<compile_context>
chip_gen: v7x
topology: tpu7x:2x2x1
jax: 0.10.0
libtpu: 0.0.40
codegen_flags: <defaults>
</compile_context>

<pallas_src>
import functools

import numpy as np
import jax
import jax.numpy as jnp
from jax.experimental import pallas as pl
from jax.experimental.pallas import tpu as pltpu


_SMALL_K = 8              # contractions at/below this bypass the MXU
_TM_CAP = 1024            # max row tile (HBM-roofline sweet spot per review)
_VMEM_BUDGET = 24 << 20   # per-step VMEM budget (v7x / v5e safe)


def _round_up(v, m):
    return ((v + m - 1) // m) * m


# ---------------------------------------------------------------------------
# Kernels: fused  sin(x @ w + b)  for one row tile (omega_0 pre-folded in w, b)
# ---------------------------------------------------------------------------
def _sine_linear_mxu_kernel(x_ref, w_ref, b_ref, o_ref):
    acc = jnp.dot(x_ref[...], w_ref[...], preferred_element_type=jnp.float32)
    o_ref[...] = jnp.sin(acc + b_ref[...]).astype(o_ref.dtype)


def _sine_linear_vpu_kernel(x_ref, w_ref, b_ref, o_ref, *, k):
    # Tiny-K path (first SIREN layer, K = 2-3 coords): a (tm, K<=8) operand
    # wastes MXU contraction rows and pads to 128 lanes, so do a broadcast-FMA
    # over K on the VPU instead.
    x = x_ref[...]
    w = w_ref[...]
    acc = jnp.zeros((x.shape[0], w.shape[1]), jnp.float32) + b_ref[...]
    for kk in range(k):                       # static, tiny trip count
        acc = acc + x[:, kk:kk + 1] * w[kk:kk + 1, :]
    o_ref[...] = jnp.sin(acc).astype(o_ref.dtype)


def _single_buffered_spec(block_shape, index_map):
    # Constant index_map -> block is DMA'd once; double-buffering only wastes
    # VMEM.  Fall back silently if this jax version lacks pipeline_mode.
    try:
        return pl.BlockSpec(block_shape, index_map, pipeline_mode=pl.Buffered(1))
    except Exception:
        return pl.BlockSpec(block_shape, index_map)


def _pick_tm(M, K, N, tm_cap, vmem_budget):
    """Row tile: biggest multiple of 8 that fits the VMEM budget, preferring a
    divisor of M (no wrapper-side pad copy) and a single step for tiny M."""
    Kp = _round_up(K, 128)
    Np = _round_up(N, 128)
    # Conservative footprint: double-buffered x / out tiles + (at worst
    # double-buffered) weight and bias blocks, all with lane padding.
    fixed = 2 * (_round_up(K, 8) * Np + 8 * Np) * 4
    per_row = 2 * (Kp + Np) * 4
    fit = max(8, (vmem_budget - fixed) // per_row)
    cap = max(8, (min(int(tm_cap), int(fit)) // 8) * 8)

    if M <= cap:
        return M, False                       # single grid step, no padding
    t = cap
    while t >= max(8, cap // 2):              # prefer a divisor of M
        if M % t == 0:
            return t, False
        t -= 8
    return cap, True                          # rare fallback: pad the rows


# ---------------------------------------------------------------------------
# Forward wrapper
# ---------------------------------------------------------------------------
def sine_layer(x, w_kn, b_1n, *, tm_cap=_TM_CAP, vmem_budget_bytes=_VMEM_BUDGET):
    """SIREN SineLayer forward.

    x:     (..., in_features)           float32
    w_kn:  (in_features, out_features)  float32, pre-transposed, omega_0 folded
    b_1n:  (1, out_features)            float32, omega_0 folded
    Returns sin(x @ w_kn + b_1n) == sin(omega_0 * (x @ W.T + b)).
    """
    *lead, K = x.shape
    Kw, N = w_kn.shape
    assert Kw == K, (Kw, K)
    M = int(np.prod(lead)) if lead else 1

    x2 = x.reshape(M, K).astype(jnp.float32)
    w2 = w_kn.astype(jnp.float32)
    b2 = b_1n.reshape(1, N).astype(jnp.float32)

    tm, needs_pad = _pick_tm(M, K, N, tm_cap, vmem_budget_bytes)
    if needs_pad:
        Mp = pl.cdiv(M, tm) * tm
        x2 = jnp.pad(x2, ((0, Mp - M), (0, 0)))
    else:
        Mp = M
    grid_m = Mp // tm

    if K <= _SMALL_K:
        kernel = functools.partial(_sine_linear_vpu_kernel, k=K)
    else:
        kernel = _sine_linear_mxu_kernel

    # Explicit scoped-VMEM limit sized to the actual footprint (+ slack);
    # v5e's 16 MiB scoped default would otherwise reject the larger tiles.
    Kp = _round_up(K, 128)
    Np = _round_up(N, 128)
    footprint = (2 * tm * (Kp + Np) + 2 * (_round_up(K, 8) * Np + 8 * Np)) * 4
    vmem_limit = int(min(footprint + (4 << 20), 56 << 20))

    # NOTE: if out_features is genuinely < 128, pad it to 128 at init for
    # lane-dense stores; typical SIREN hidden widths (>=256) are already dense.
    out = pl.pallas_call(
        kernel,
        out_shape=jax.ShapeDtypeStruct((Mp, N), jnp.float32),
        grid=(grid_m,),
        in_specs=[
            pl.BlockSpec((tm, K), lambda i: (i, 0)),           # activation row tile
            _single_buffered_spec((K, N), lambda i: (0, 0)),   # weights, VMEM-resident
            _single_buffered_spec((1, N), lambda i: (0, 0)),   # bias, VMEM-resident
        ],
        out_specs=pl.BlockSpec((tm, N), lambda i: (i, 0)),     # full-width output block
        compiler_params=pltpu.CompilerParams(
            dimension_semantics=("parallel",),
            vmem_limit_bytes=vmem_limit,
        ),
    )(x2, w2, b2)

    if needs_pad:
        out = out[:M]
    return out.reshape(*lead, N)


# ---------------------------------------------------------------------------
# Parameter init matching SineLayer.init_weights (+ nn.Linear default bias)
# ---------------------------------------------------------------------------
def init_sine_layer(key, in_features, out_features, *, is_first=False,
                    omega_0=30.0, bias=True):
    kw, kb = jax.random.split(key)
    if is_first:
        bound_w = 1.0 / in_features
    else:
        bound_w = float(np.sqrt(6.0 / in_features)) / omega_0
    weight = jax.random.uniform(kw, (out_features, in_features), jnp.float32,
                                -bound_w, bound_w)
    if bias:
        bound_b = 1.0 / float(np.sqrt(in_features))
        b = jax.random.uniform(kb, (out_features,), jnp.float32,
                               -bound_b, bound_b)
    else:
        b = None
    return weight, b


def prepare_params(weight, bias, omega_0):
    """One-time prep (outside the per-step path): fold omega_0 into the params
    and pre-transpose to (K, N) so each forward emits no transpose/scale ops."""
    w_kn = (jnp.asarray(weight, jnp.float32) * float(omega_0)).T
    n = weight.shape[0]
    if bias is None:
        b_1n = jnp.zeros((1, n), jnp.float32)
    else:
        b_1n = (jnp.asarray(bias, jnp.float32) * float(omega_0)).reshape(1, n)
    return w_kn, b_1n


# ---------------------------------------------------------------------------
# Example run + reference checks
# ---------------------------------------------------------------------------
if __name__ == "__main__":
    key = jax.random.PRNGKey(0)
    k1, k2, k3, k4 = jax.random.split(key, 4)
    OMEGA = 30.0

    # 1) Hidden-layer style shape (MXU path, single grid step for tiny M).
    B, S, IN, OUT = 2, 256, 32, 64
    weight, bias = init_sine_layer(k1, IN, OUT, is_first=False, omega_0=OMEGA)
    w_kn, b_1n = prepare_params(weight, bias, OMEGA)
    x = jax.random.normal(k2, (B, S, IN), jnp.float32)

    fwd = jax.jit(sine_layer)
    out = jax.block_until_ready(fwd(x, w_kn, b_1n))
    ref = jnp.sin(OMEGA * (x @ weight.T + bias))
    assert out.shape == (B, S, OUT), out.shape
    assert bool(jnp.all(jnp.isfinite(out)))
    assert bool(jnp.allclose(out, ref, atol=2e-4, rtol=2e-4))

    # 2) First-layer style shape (K=2 coordinates -> VPU broadcast-FMA path).
    IN0 = 2
    weight0, bias0 = init_sine_layer(k3, IN0, OUT, is_first=True, omega_0=OMEGA)
    w0_kn, b0_1n = prepare_params(weight0, bias0, OMEGA)
    coords = jax.random.uniform(k4, (B, S, IN0), jnp.float32, -1.0, 1.0)
    out0 = jax.block_until_ready(jax.jit(sine_layer)(coords, w0_kn, b0_1n))
    ref0 = jnp.sin(OMEGA * (coords @ weight0.T + bias0))
    assert out0.shape == (B, S, OUT), out0.shape
    assert bool(jnp.allclose(out0, ref0, atol=2e-4, rtol=2e-4))

    # 3) Multi-step grid (forced small tile) to exercise the pipelined path.
    fwd_small_tile = jax.jit(functools.partial(sine_layer, tm_cap=128))
    out_mt = jax.block_until_ready(fwd_small_tile(x, w_kn, b_1n))
    assert bool(jnp.allclose(out_mt, ref, atol=2e-4, rtol=2e-4))

    print("KERNEL_OK")
</pallas_src>

<mosaic_0001>
module attributes {stable_mosaic.version = 11 : i64} {
  func.func @_sine_linear_mxu_kernel(%arg0: i32, %arg1: memref<512x32xf32, #tpu.memory_space<vmem>>, %arg2: memref<32x64xf32, #tpu.memory_space<vmem>>, %arg3: memref<1x64xf32, #tpu.memory_space<vmem>>, %arg4: memref<512x64xf32, #tpu.memory_space<vmem>>) attributes {dimension_semantics = [#tpu.dimension_semantics<parallel>], iteration_bounds = array<i64: 1>, scalar_prefetch = 0 : i64, scratch_operands = 0 : i64, tpu.core_type = #tpu.core_type<tc>, window_params = [{transform_indices = @transform_0, window_bounds = array<i64: 512, 32>}, {pipeline_mode = #tpu.pipeline_mode<synchronous>, transform_indices = @transform_1, window_bounds = array<i64: 32, 64>}, {pipeline_mode = #tpu.pipeline_mode<synchronous>, transform_indices = @transform_2, window_bounds = array<i64: 1, 64>}, {transform_indices = @transform_3, window_bounds = array<i64: 512, 64>}]} {
    %c0 = arith.constant 0 : index
    %c0_0 = arith.constant 0 : index
    %0 = vector.load %arg1[%c0, %c0_0] : memref<512x32xf32, #tpu.memory_space<vmem>>, vector<512x32xf32>
    %c0_1 = arith.constant 0 : index
    %c0_2 = arith.constant 0 : index
    %1 = vector.load %arg2[%c0_1, %c0_2] : memref<32x64xf32, #tpu.memory_space<vmem>>, vector<32x64xf32>
    %cst = arith.constant dense<0.000000e+00> : vector<512x64xf32>
    %2 = tpu.matmul %0, %1, %cst {dimension_numbers = #tpu.dot_dimension_numbers<[1], [0], [0], [1], [0, 0, 1, 1], [], []>} : vector<512x32xf32>, vector<32x64xf32>, vector<512x64xf32> -> vector<512x64xf32>
    %c0_3 = arith.constant 0 : index
    %c0_4 = arith.constant 0 : index
    %3 = vector.load %arg3[%c0_3, %c0_4] : memref<1x64xf32, #tpu.memory_space<vmem>>, vector<1x64xf32>
    %4 = vector.broadcast %3 : vector<1x64xf32> to vector<512x64xf32>
    %5 = arith.addf %2, %4 : vector<512x64xf32>
    %6 = math.sin %5 : vector<512x64xf32>
    %c0_5 = arith.constant 0 : index
    %c0_6 = arith.constant 0 : index
    %7 = vector.load %arg4[%c0_5, %c0_6] : memref<512x64xf32, #tpu.memory_space<vmem>>, vector<512x64xf32>
    tpu.vector_store %arg4[%c0_5, %c0_6], %6 {strides = array<i32>} : memref<512x64xf32, #tpu.memory_space<vmem>>, vector<512x64xf32>,
    return
  }
  func.func @transform_0(%arg0: i32) -> (i32, i32) {
    %c0_i32 = arith.constant 0 : i32
    %c0_i32_0 = arith.constant 0 : i32
    return %arg0, %c0_i32 : i32, i32
  }
  func.func @transform_1(%arg0: i32) -> (i32, i32) {
    %c0_i32 = arith.constant 0 : i32
    %c0_i32_0 = arith.constant 0 : i32
    %c0_i32_1 = arith.constant 0 : i32
    return %c0_i32, %c0_i32_0 : i32, i32
  }
  func.func @transform_2(%arg0: i32) -> (i32, i32) {
    %c0_i32 = arith.constant 0 : i32
    %c0_i32_0 = arith.constant 0 : i32
    %c0_i32_1 = arith.constant 0 : i32
    return %c0_i32, %c0_i32_0 : i32, i32
  }
  func.func @transform_3(%arg0: i32) -> (i32, i32) {
    %c0_i32 = arith.constant 0 : i32
    %c0_i32_0 = arith.constant 0 : i32
    return %arg0, %c0_i32 : i32, i32
  }
}

</mosaic_0001>

<bundles_post_ra>
// kernel: sine_layer.1
= control target key start
LH: loop header
LB: loop body
LE: loop exit
PB: predicated region body
PF: predicated region fallthrough
CT: control target
= control target key end

     0   :  { %vm89_vm0 = vcmask 261120   ;;  %s14268_s1 = inlined_call_operand.vmem [shape: f32[32,64], index: 1, kind: input, shape index: {}]   ;;  %s14269_s0 = inlined_call_operand.vmem [shape: f32[512,32], index: 0, kind: input, shape index: {}]   ;;  %s14270_s2 = inlined_call_operand.vmem [shape: f32[1,64], index: 2, kind: input, shape index: {}]   ;;  %s14271_s3 = inlined_call_operand.vmem [shape: f32[512,64], index: 3, kind: output, shape index: {}]  }
   0x1   :  { %v78_v0 = vld [vmem:[%s14268_s1] sm:$0xff]  ;;  %v79_v1 = vld [vmem:[%s14268_s1 + $0x8] sm:$0xff]  ;;  %v80_v2 = vld [vmem:[%s14268_s1 + $0x10] sm:$0xff] }
   0x2   :  { %v7885_v3 = vpack.c.bf16 %v79_v1, %v78_v0  ;;  %v81_v4 = vld [vmem:[%s14268_s1 + $0x18] sm:$0xff]  ;;  %v14_v5 = vld [vmem:[%s14269_s0] sm:$0xff]  ;;  %v15_v8 = vld [vmem:[%s14269_s0 + $0x8] sm:$0xff] }
   0x3   :  { %v46_v6 = vld [vmem:[%s14269_s0 + $0x100] sm:$0xff]  ;;  %v7889_v7 = vpack.c.bf16 %v81_v4, %v80_v2  ;;  %7789 = vmatprep.mubr.msk.f32.mxu0 %vm89_vm0, %v14_v5  ;;  %v47_v9 = vld [vmem:[%s14269_s0 + $0x108] sm:$0xff]  ;;  %v16_v10 = vld [vmem:[%s14269_s0 + $0x10] sm:$0xff] }
   0x4   :  { %7837 = vmatprep.mubr.msk.f32.mxu1 %vm89_vm0, %v46_v6  ;;  %7886 = vmatprep.subr.bf16.mxu0 %v7885_v3  ;;  %v48_v11 = vld [vmem:[%s14269_s0 + $0x110] sm:$0xff]  ;;  %v17_v12 = vld [vmem:[%s14269_s0 + $0x18] sm:$0xff]  ;;  %v18_v14 = vld [vmem:[%s14269_s0 + $0x20] sm:$0xff] }
   0x5   :  { %7893 = vmatprep.subr.bf16.mxu1 %v7885_v3  ;;  %7888 = vmatpush3.bf16.msra.mxu0 %v7885_v3  ;;  %v49_v13 = vld [vmem:[%s14269_s0 + $0x118] sm:$0xff]  ;;  %v50_v15 = vld [vmem:[%s14269_s0 + $0x120] sm:$0xff]  ;;  %v19_v16 = vld [vmem:[%s14269_s0 + $0x28] sm:$0xff] }
   0x6   :  { %7895 = vmatpush3.bf16.msra.mxu1 %v7885_v3  ;;  %7890 = vmatprep.subr.bf16.mxu0 %v7889_v7  ;;  %v51_v17 = vld [vmem:[%s14269_s0 + $0x128] sm:$0xff]  ;;  %v20_v18 = vld [vmem:[%s14269_s0 + $0x30] sm:$0xff]  ;;  %v21_v20 = vld [vmem:[%s14269_s0 + $0x38] sm:$0xff] }
   0x7   :  { %7894 = vmatprep.subr.bf16.mxu1 %v7889_v7  ;;  %v52_v19 = vld [vmem:[%s14269_s0 + $0x130] sm:$0xff]  ;;  %v53_v21 = vld [vmem:[%s14269_s0 + $0x138] sm:$0xff]  ;;  %v22_v22 = vld [vmem:[%s14269_s0 + $0x40] sm:$0xff] }
   0x8   :  { %v54_v23 = vld [vmem:[%s14269_s0 + $0x140] sm:$0xff]  ;;  %v23_v24 = vld [vmem:[%s14269_s0 + $0x48] sm:$0xff]  ;;  %v24_v26 = vld [vmem:[%s14269_s0 + $0x50] sm:$0xff] }
   0x9   :  { %7892 = vmatpush3.bf16.msra.mxu0 %v7889_v7  ;;  %v55_v25 = vld [vmem:[%s14269_s0 + $0x148] sm:$0xff]  ;;  %v56_v27 = vld [vmem:[%s14269_s0 + $0x150] sm:$0xff]  ;;  %v25_v28 = vld [vmem:[%s14269_s0 + $0x58] sm:$0xff] }
   0xa   :  { %7896 = vmatpush3.bf16.msra.mxu1 %v7889_v7  ;;  %v57_v29 = vld [vmem:[%s14269_s0 + $0x158] sm:$0xff]  ;;  %v26_v30 = vld [vmem:[%s14269_s0 + $0x60] sm:$0xff]  ;;  %v27_v32 = vld [vmem:[%s14269_s0 + $0x68] sm:$0xff] }
   0xb   :  { %v58_v31 = vld [vmem:[%s14269_s0 + $0x160] sm:$0xff]  ;;  %v59_v33 = vld [vmem:[%s14269_s0 + $0x168] sm:$0xff]  ;;  %v28_v34 = vld [vmem:[%s14269_s0 + $0x70] sm:$0xff] }
   0xc   :  { %7790 = vmatmul.mubr.msk.f32.vlgmr.msra.gmra.mrb[0].mxu0 %vm89_vm0, %v15_v8  ;;  %v60_v35 = vld [vmem:[%s14269_s0 + $0x170] sm:$0xff]  ;;  %v29_v36 = vld [vmem:[%s14269_s0 + $0x78] sm:$0xff]  ;;  %v30_v38 = vld [vmem:[%s14269_s0 + $0x80] sm:$0xff] }
   0xd   :  { %7838 = vmatmul.mubr.msk.f32.vlgmr.msra.gmra.mrb[0].mxu1 %vm89_vm0, %v47_v9  ;;  %7792 = vmatprep.mubr.msk.f32.mxu0 %vm89_vm0, %v16_v10  ;;  %v61_v37 = vld [vmem:[%s14269_s0 + $0x178] sm:$0xff]  ;;  %v62_v39 = vld [vmem:[%s14269_s0 + $0x180] sm:$0xff]  ;;  %v31_v40 = vld [vmem:[%s14269_s0 + $0x88] sm:$0xff] }
   0xe   :  { %7840 = vmatprep.mubr.msk.f32.mxu1 %vm89_vm0, %v48_v11  ;;  %v63_v41 = vld [vmem:[%s14269_s0 + $0x188] sm:$0xff]  ;;  %v32_v42 = vld [vmem:[%s14269_s0 + $0x90] sm:$0xff]  ;;  %v33_v44 = vld [vmem:[%s14269_s0 + $0x98] sm:$0xff] }
   0xf   :  { %v64_v43 = vld [vmem:[%s14269_s0 + $0x190] sm:$0xff]  ;;  %v65_v45 = vld [vmem:[%s14269_s0 + $0x198] sm:$0xff]  ;;  %v34_v46 = vld [vmem:[%s14269_s0 + $0xa0] sm:$0xff] }
  0x10   :  { %7793 = vmatmul.mubr.msk.f32.gmra.mrb[2].mxu0 %vm89_vm0, %v17_v12  ;;  %v66_v47 = vld [vmem:[%s14269_s0 + $0x1a0] sm:$0xff]  ;;  %v35_v48 = vld [vmem:[%s14269_s0 + $0xa8] sm:$0xff]  ;;  %v36_v50 = vld [vmem:[%s14269_s0 + $0xb0] sm:$0xff] }
  0x11   :  { %7841 = vmatmul.mubr.msk.f32.gmra.mrb[2].mxu1 %vm89_vm0, %v49_v13  ;;  %7795 = vmatprep.mubr.msk.f32.mxu0 %vm89_vm0, %v18_v14  ;;  %v67_v49 = vld [vmem:[%s14269_s0 + $0x1a8] sm:$0xff]  ;;  %v68_v51 = vld [vmem:[%s14269_s0 + $0x1b0] sm:$0xff]  ;;  %v37_v52 = vld [vmem:[%s14269_s0 + $0xb8] sm:$0xff] }
  0x12   :  { %7843 = vmatprep.mubr.msk.f32.mxu1 %vm89_vm0, %v50_v15  ;;  %v69_v53 = vld [vmem:[%s14269_s0 + $0x1b8] sm:$0xff]  ;;  %v38_v54 = vld [vmem:[%s14269_s0 + $0xc0] sm:$0xff]  ;;  %v39_v56 = vld [vmem:[%s14269_s0 + $0xc8] sm:$0xff] }
  0x13   :  { %v70_v55 = vld [vmem:[%s14269_s0 + $0x1c0] sm:$0xff]  ;;  %v71_v57 = vld [vmem:[%s14269_s0 + $0x1c8] sm:$0xff]  ;;  %v40_v58 = vld [vmem:[%s14269_s0 + $0xd0] sm:$0xff] }
  0x14   :  { %7796 = vmatmul.mubr.msk.f32.gmra.mrb[4].mxu0 %vm89_vm0, %v19_v16  ;;  %v72_v59 = vld [vmem:[%s14269_s0 + $0x1d0] sm:$0xff]  ;;  %v41_v60 = vld [vmem:[%s14269_s0 + $0xd8] sm:$0xff]  ;;  %v42_v62 = vld [vmem:[%s14269_s0 + $0xe0] sm:$0xff] }
  0x15   :  { %7844 = vmatmul.mubr.msk.f32.gmra.mrb[4].mxu1 %vm89_vm0, %v51_v17  ;;  %7798 = vmatprep.mubr.msk.f32.mxu0 %vm89_vm0, %v20_v18  ;;  %v73_v61 = vld [vmem:[%s14269_s0 + $0x1d8] sm:$0xff]  ;;  %v74_v63 = vld [vmem:[%s14269_s0 + $0x1e0] sm:$0xff]  ;;  %v43_v0 = vld [vmem:[%s14269_s0 + $0xe8] sm:$0xff] }
  0x16   :  { %7846 = vmatprep.mubr.msk.f32.mxu1 %vm89_vm0, %v52_v19  ;;  %v75_v1 = vld [vmem:[%s14269_s0 + $0x1e8] sm:$0xff]  ;;  %v44_v2 = vld [vmem:[%s14269_s0 + $0xf0] sm:$0xff]  ;;  %v45_v4 = vld [vmem:[%s14269_s0 + $0xf8] sm:$0xff] }
  0x17   :  { %v76_v3 = vld [vmem:[%s14269_s0 + $0x1f0] sm:$0xff]  ;;  %v77_v5 = vld [vmem:[%s14269_s0 + $0x1f8] sm:$0xff]  ;;  %v8722_v6 = vld [vmem:[%s14270_s2] ss:$0 sm:$0xff] }
  0x18   :  { %7799 = vmatmul.mubr.msk.f32.gmra.mrb[6].mxu0 %vm89_vm0, %v21_v20 }
  0x19   :  { %7847 = vmatmul.mubr.msk.f32.gmra.mrb[6].mxu1 %vm89_vm0, %v53_v21  ;;  %7801 = vmatprep.mubr.msk.f32.mxu0 %vm89_vm0, %v22_v22 }
  0x1a   :  { %7849 = vmatprep.mubr.msk.f32.mxu1 %vm89_vm0, %v54_v23 }
  0x1c   :  { %7802 = vmatmul.mubr.msk.f32.gmra.mrb[8].mxu0 %vm89_vm0, %v23_v24 }
  0x1d   :  { %7850 = vmatmul.mubr.msk.f32.gmra.mrb[8].mxu1 %vm89_vm0, %v55_v25  ;;  %7804 = vmatprep.mubr.msk.f32.mxu0 %vm89_vm0, %v24_v26 }
  0x1e   :  { %7852 = vmatprep.mubr.msk.f32.mxu1 %vm89_vm0, %v56_v27 }
  0x20   :  { %7805 = vmatmul.mubr.msk.f32.gmra.mrb[10].mxu0 %vm89_vm0, %v25_v28 }
  0x21   :  { %7853 = vmatmul.mubr.msk.f32.gmra.mrb[10].mxu1 %vm89_vm0, %v57_v29  ;;  %7807 = vmatprep.mubr.msk.f32.mxu0 %vm89_vm0, %v26_v30 }
  0x22   :  { %7855 = vmatprep.mubr.msk.f32.mxu1 %vm89_vm0, %v58_v31 }
  0x24   :  { %7808 = vmatmul.mubr.msk.f32.gmra.mrb[12].mxu0 %vm89_vm0, %v27_v32 }
  0x25   :  { %7856 = vmatmul.mubr.msk.f32.gmra.mrb[12].mxu1 %vm89_vm0, %v59_v33  ;;  %7810 = vmatprep.mubr.msk.f32.mxu0 %vm89_vm0, %v28_v34 }
  0x26   :  { %7858 = vmatprep.mubr.msk.f32.mxu1 %vm89_vm0, %v60_v35 }
  0x28   :  { %7811 = vmatmul.mubr.msk.f32.gmra.mrb[14].mxu0 %vm89_vm0, %v29_v36 }
  0x29   :  { %7859 = vmatmul.mubr.msk.f32.gmra.mrb[14].mxu1 %vm89_vm0, %v61_v37  ;;  %7813 = vmatprep.mubr.msk.f32.mxu0 %vm89_vm0, %v30_v38 }
  0x2a   :  { %7861 = vmatprep.mubr.msk.f32.mxu1 %vm89_vm0, %v62_v39 }
  0x2c   :  { %7814 = vmatmul.mubr.msk.f32.gmra.mrb[16].mxu0 %vm89_vm0, %v31_v40 }
  0x2d   :  { %7862 = vmatmul.mubr.msk.f32.gmra.mrb[16].mxu1 %vm89_vm0, %v63_v41  ;;  %7816 = vmatprep.mubr.msk.f32.mxu0 %vm89_vm0, %v32_v42 }
  0x2e   :  { %7864 = vmatprep.mubr.msk.f32.mxu1 %vm89_vm0, %v64_v43 }
  0x30   :  { %7817 = vmatmul.mubr.msk.f32.gmra.mrb[18].mxu0 %vm89_vm0, %v33_v44 }
  0x31   :  { %7865 = vmatmul.mubr.msk.f32.gmra.mrb[18].mxu1 %vm89_vm0, %v65_v45  ;;  %7819 = vmatprep.mubr.msk.f32.mxu0 %vm89_vm0, %v34_v46 }
  0x32   :  { %7867 = vmatprep.mubr.msk.f32.mxu1 %vm89_vm0, %v66_v47  ;;  %v8425_v47 = vmov 683565275  }
  0x34   :  { %7820 = vmatmul.mubr.msk.f32.gmra.mrb[20].mxu0 %vm89_vm0, %v35_v48 }
  0x35   :  { %7868 = vmatmul.mubr.msk.f32.gmra.mrb[20].mxu1 %vm89_vm0, %v67_v49  ;;  %7822 = vmatprep.mubr.msk.f32.mxu0 %vm89_vm0, %v36_v50 }
  0x36   :  { %7870 = vmatprep.mubr.msk.f32.mxu1 %vm89_vm0, %v68_v51  ;;  %v8426_v51 = vmov 2475754826  }
  0x38   :  { %7823 = vmatmul.mubr.msk.f32.gmra.mrb[22].mxu0 %vm89_vm0, %v37_v52 }
  0x39   :  { %7871 = vmatmul.mubr.msk.f32.gmra.mrb[22].mxu1 %vm89_vm0, %v69_v53  ;;  %7825 = vmatprep.mubr.msk.f32.mxu0 %vm89_vm0, %v38_v54  ;;  %v8427_v53 = vmov 2131351028  }
  0x3a   :  { %7873 = vmatprep.mubr.msk.f32.mxu1 %vm89_vm0, %v70_v55  ;;  %v8428_v55 = vmov 2102212464  }
  0x3c   :  { %7826 = vmatmul.mubr.msk.f32.gmra.mrb[24].mxu0 %vm89_vm0, %v39_v56 }
  0x3d   :  { %7874 = vmatmul.mubr.msk.f32.gmra.mrb[24].mxu1 %vm89_vm0, %v71_v57  ;;  %7828 = vmatprep.mubr.msk.f32.mxu0 %vm89_vm0, %v40_v58  ;;  %v8429_v57 = vmov 920167782  }
  0x3e   :  { %7876 = vmatprep.mubr.msk.f32.mxu1 %vm89_vm0, %v72_v59 }
  0x40   :  { %7829 = vmatmul.mubr.msk.f32.gmra.mrb[26].mxu0 %vm89_vm0, %v41_v60 }
  0x41   :  { %7877 = vmatmul.mubr.msk.f32.gmra.mrb[26].mxu1 %vm89_vm0, %v73_v61  ;;  %7831 = vmatprep.mubr.msk.f32.mxu0 %vm89_vm0, %v42_v62 }
  0x42   :  { %7879 = vmatprep.mubr.msk.f32.mxu1 %vm89_vm0, %v74_v63 }
  0x44   :  { %7832 = vmatmul.mubr.msk.f32.gmra.mrb[28].mxu0 %vm89_vm0, %v43_v0  ;;  %v8430_v0 = vmov 1326507024  }
  0x45   :  { %7880 = vmatmul.mubr.msk.f32.gmra.mrb[28].mxu1 %vm89_vm0, %v75_v1  ;;  %7834 = vmatprep.mubr.msk.f32.mxu0 %vm89_vm0, %v44_v2 }
  0x46   :  { %7882 = vmatprep.mubr.msk.f32.mxu1 %vm89_vm0, %v76_v3 }
  0x48   :  { %7835 = vmatmul.mubr.msk.f32.gmra.mrb[30].mxu0 %vm89_vm0, %v45_v4 }
  0x49   :  { %7883 = vmatmul.mubr.msk.f32.gmra.mrb[30].mxu1 %vm89_vm0, %v77_v5 }
  0xdf   :  { %v7791_v7 = vpop.f32.mrb[0].mxu0 }
  0xe0   :  { %v7839_v8 = vpop.f32.mrb[0].mxu1  ;;  %v8725_v9 = vadd.f32 %v7791_v7, %v8722_v6  ;;  %v348_v11 = vpop.f32.mrb[1].mxu0 }
  0xe1   :  { %v8728_v10 = vadd.f32 %v7839_v8, %v8722_v6  ;;  %v508_v12 = vpop.f32.mrb[1].mxu1  ;;  %v8731_v13 = vadd.f32 %v8722_v6, %v348_v11 }
  0xe2   :  { %v771_v14 = vand.u32 2147483647, %v8725_v9  ;;  %v774_v15 = vand.u32 2139095040, %v8725_v9  ;;  %v8749_v31 = vadd.f32 %v8722_v6, %v508_v12  ;;  %vm773_vm14 = vcmp.lt.s32.totalorder %v8725_v9, 0 }
  0xe3   :  { %v4099_v16 = vand.u32 2147483647, %v8728_v10  ;;  %v4102_v17 = vand.u32 2139095040, %v8728_v10  ;;  %v8737_v18 = vpop.f32.mrb[2].mxu0  ;;  %v670_v24 = vand.u32 2139095040, %v8731_v13 }
  0xe4   :  { %v8739_v19 = vpop.f32.mrb[2].mxu1  ;;  %v775_v20 = vshrl.u32 %v774_v15, 23  ;;  %v778_v21 = vand.u32 8388607, %v771_v14  ;;  %v8746_v26 = vpop.f32.mrb[3].mxu0  ;;  %v3998_v45 = vand.u32 2139095040, %v8749_v31 }
  0xe5   :  { %v4103_v22 = vshrl.u32 %v4102_v17, 23  ;;  %v4106_v23 = vand.u32 8388607, %v4099_v16  ;;  %v671_v28 = vshrl.u32 %v670_v24, 23  ;;  %v667_v34 = vand.u32 2147483647, %v8731_v13 }
  0xe6   :  { %v7461_v25 = vadd.s32 4294967169, %v775_v20  ;;  %v779_v29 = vor.u32 8388608, %v778_v21  ;;  %v8752_v36 = vpop.f32.mrb[3].mxu1  ;;  %vm8852_vm15 = vcmp.le.f32.partialorder %v771_v14, 0.7853982 }
  0xe7   :  { %v7589_v27 = vadd.s32 4294967169, %v4103_v22  ;;  %v4107_v32 = vor.u32 8388608, %v4106_v23  ;;  %v7457_v35 = vadd.s32 4294967169, %v671_v28  ;;  %v8760_v43 = vand.u32 8388607, %v667_v34 }
  0xe8   :  { %v781_v30 = vadd.s32 1, %v7461_v25  ;;  %v8754_v40 = vshll.u32 %v779_v29, 8 }
  0xe9   :  { %v4109_v33 = vadd.s32 1, %v7589_v27  ;;  %v8756_v42 = vshll.u32 %v4107_v32, 8  ;;  %v8762_v44 = vadd.s32 1, %v7457_v35 }
  0xea   :  { %vm782_vm1 = vcmp.gt.s32.totalorder %v781_v30, 0 }
  0xeb   :  { %v783_v37 = vsel %vm782_vm1, %v781_v30, 0  ;;  %vm4110_vm2 = vcmp.gt.s32.totalorder %v4109_v33, 0  ;;  %vm678_vm7 = vcmp.gt.s32.totalorder %v8762_v44, 0 }
  0xec   :  { %v784_v38 = vshrl.u32 %v783_v37, 5  ;;  %v785_v39 = vand.u32 31, %v783_v37  ;;  %v4111_v41 = vsel %vm4110_vm2, %v4109_v33, 0 }
  0xed   :  { %v8766_v49 = vshrl.u32 %v4111_v41, 5  ;;  %v4113_v50 = vand.u32 31, %v4111_v41 }
  0xee   :  { %v786_v46 = vsub.s32 32, %v785_v39  ;;  %v788_v48 = vshll.u32 %v8425_v47, %v785_v39  ;;  %v791_v52 = vshll.u32 %v8426_v51, %v785_v39  ;;  %v794_v54 = vshll.u32 %v8427_v53, %v785_v39 }
  0xef   :  { %v797_v56 = vshll.u32 %v8428_v55, %v785_v39  ;;  %v800_v58 = vshll.u32 %v8429_v57, %v785_v39  ;;  %vm803_vm3 = vcmp.lt.s32.totalorder %v784_v38, 1  ;;  %vm804_vm4 = vcmp.lt.s32.totalorder %v784_v38, 2 }
  0xf0   :  { %v789_v59 = vshrl.u32 %v8426_v51, %v786_v46  ;;  %v792_v60 = vshrl.u32 %v8427_v53, %v786_v46  ;;  %v795_v61 = vshrl.u32 %v8428_v55, %v786_v46  ;;  %v787_v62 = vshrl.u32 %v8425_v47, %v786_v46 }
  0xf1   :  { %v798_v63 = vshrl.u32 %v8429_v57, %v786_v46  ;;  %v801_v1 = vshrl.u32 %v8430_v0, %v786_v46  ;;  %v4114_v5 = vsub.s32 32, %v4113_v50  ;;  %vm805_vm5 = vcmp.lt.s32.totalorder %v784_v38, 3 }
  0xf2   :  { %v790_v2 = vor.u32 %v789_v59, %v788_v48  ;;  %v793_v3 = vor.u32 %v792_v60, %v791_v52  ;;  %v796_v4 = vor.u32 %v795_v61, %v794_v54  ;;  %vm806_vm6 = vcmp.lt.s32.totalorder %v784_v38, 4 }
  0xf3   :  { %v799_v7 = vor.u32 %v798_v63, %v797_v56  ;;  %v802_v8 = vor.u32 %v801_v1, %v800_v58  ;;  %v4116_v23 = vshll.u32 %v8425_v47, %v4113_v50  ;;  %v4117_v27 = vshrl.u32 %v8426_v51, %v4114_v5 }
  0xf4   :  { %v807_v11 = vsel %vm803_vm3, %v787_v62, %v790_v2  ;;  %v808_v12 = vsel %vm806_vm6, %v796_v4, 2102212464  ;;  %v811_v15 = vsel %vm803_vm3, %v790_v2, %v793_v3  ;;  %v815_v17 = vsel %vm803_vm3, %v793_v3, %v796_v4 }
  0xf5   :  { %v809_v20 = vsel %vm805_vm5, %v793_v3, %v808_v12  ;;  %v812_v21 = vsel %vm806_vm6, %v799_v7, 920167782  ;;  %v816_v22 = vsel %vm806_vm6, %v802_v8, 1326507024  ;;  %v4119_v28 = vshll.u32 %v8426_v51, %v4113_v50 }
  0xf6   :  { %v813_v24 = vsel %vm805_vm5, %v796_v4, %v812_v21  ;;  %v817_v25 = vsel %vm805_vm5, %v799_v7, %v816_v22  ;;  %v810_v29 = vsel %vm804_vm4, %v807_v11, %v809_v20  ;;  %v4120_v33 = vshrl.u32 %v8427_v53, %v4114_v5 }
  0xf7   :  { %v814_v30 = vsel %vm804_vm4, %v811_v15, %v813_v24  ;;  %v818_v32 = vsel %vm804_vm4, %v815_v17, %v817_v25  ;;  %v4118_v46 = vor.u32 %v4117_v27, %v4116_v23  ;;  %v4122_v52 = vshll.u32 %v8427_v53, %v4113_v50 }
  0xf8   :  { %v8790_v35 = vmul.u32.u64.low %v8754_v40, %v818_v32  ;;  %v8791_v37 = vmul.u32.u64.high %v8754_v40, %v818_v32, %v8790_v35  ;;  %v8794_v39 = vmul.u32.u64.low %v8754_v40, %v814_v30  ;;  %v8795_v41 = vmul.u32.u64.high %v8754_v40, %v814_v30, %v8794_v39 }
  0xf9   :  { %v4121_v48 = vor.u32 %v4120_v33, %v4119_v28  ;;  %v4123_v54 = vshrl.u32 %v8428_v55, %v4114_v5  ;;  %v4115_v56 = vshrl.u32 %v8425_v47, %v4114_v5  ;;  %v4125_v38 = vshll.u32 %v8428_v55, %v4113_v50 }
  0xfa   :  { %v4126_v58 = vshrl.u32 %v8429_v57, %v4114_v5  ;;  %v4129_v59 = vshrl.u32 %v8430_v0, %v4114_v5  ;;  %v826_v60 = vmul.u32 %v8754_v40, %v810_v29  ;;  %v4128_v62 = vshll.u32 %v8429_v57, %v4113_v50 }
  0xfb   :  { %v4124_v61 = vor.u32 %v4123_v54, %v4122_v52  ;;  %vm4131_vm8 = vcmp.lt.s32.totalorder %v8766_v49, 1  ;;  %vm828_vm9 = vc.u32 %v8791_v37, %v8794_v39  ;;  %v829_v63 = vadd.s32 1, %v8795_v41  ;;  %v8835_v52 = vpop.f32.mrb[4].mxu0 }
  0xfc   :  { %v4127_v1 = vor.u32 %v4126_v58, %v4125_v38  ;;  %vm4132_vm10 = vcmp.lt.s32.totalorder %v8766_v49, 2  ;;  %v4130_v2 = vor.u32 %v4129_v59, %v4128_v62  ;;  %vm4133_vm11 = vcmp.lt.s32.totalorder %v8766_v49, 3 }
  0xfd   :  { %vm4134_vm12 = vcmp.lt.s32.totalorder %v8766_v49, 4  ;;  %v4139_v3 = vsel %vm4131_vm8, %v4118_v46, %v4121_v48  ;;  %v830_v40 = vsel %vm828_vm9, %v829_v63, %v8795_v41  ;;  %v4143_v50 = vsel %vm4131_vm8, %v4121_v48, %v4124_v61 }
  0xfe   :  { %v4136_v4 = vsel %vm4134_vm12, %v4124_v61, 2102212464  ;;  %v4140_v5 = vsel %vm4134_vm12, %v4127_v1, 920167782  ;;  %v831_v7 = vadd.s32 %v830_v40, %v826_v60  ;;  %v4135_v8 = vsel %vm4131_vm8, %v4115_v56, %v4118_v46 }
  0xff   :  { %v4141_v11 = vsel %vm4133_vm11, %v4124_v61, %v4140_v5  ;;  %v4144_v12 = vsel %vm4134_vm12, %v4130_v2, 1326507024  ;;  %v4137_v15 = vsel %vm4133_vm11, %v4121_v48, %v4136_v4  ;;  %v679_v21 = vsel %vm678_vm7, %v8762_v44, 0 }
 0x100   :  { %v4142_v17 = vsel %vm4132_vm10, %v4139_v3, %v4141_v11  ;;  %v4145_v20 = vsel %vm4133_vm11, %v4127_v1, %v4144_v12  ;;  %v832_v22 = vadd.s32 536870912, %v831_v7  ;;  %v3995_v29 = vand.u32 2147483647, %v8749_v31 }
 0x101   :  { %v4146_v23 = vsel %vm4132_vm10, %v4143_v50, %v4145_v20  ;;  %v8820_v24 = vmul.u32.u64.low %v8756_v42, %v4142_v17  ;;  %v8821_v25 = vmul.u32.u64.high %v8756_v42, %v4142_v17, %v8820_v24  ;;  %v4138_v32 = vsel %vm4132_vm10, %v4135_v8, %v4137_v15 }
 0x102   :  { %v8825_v27 = vmul.u32.u64.low %v8756_v42, %v4146_v23  ;;  %v8826_v28 = vmul.u32.u64.high %v8756_v42, %v4146_v23, %v8825_v27  ;;  %v833_v30 = vshrl.u32 %v832_v22, 30  ;;  %v675_v44 = vor.u32 8388608, %v8760_v43 }
 0x103   :  { %v681_v33 = vand.u32 31, %v679_v21  ;;  %v4157_v41 = vadd.s32 1, %v8821_v25  ;;  %v3999_v48 = vshrl.u32 %v3998_v45, 23  ;;  %v4154_v54 = vmul.u32 %v8756_v42, %v4138_v32 }
 0x104   :  { %v834_v35 = vshll.u32 %v833_v30, 30  ;;  %vm4156_vm13 = vc.u32 %v8826_v28, %v8820_v24  ;;  %v8842_v49 = vand.u32 8388607, %v3995_v29  ;;  %v8848_v38 = vshll.u32 %v675_v44, 8 }
 0x105   :  { %v682_v46 = vsub.s32 32, %v681_v33  ;;  %v4158_v56 = vsel %vm4156_vm13, %v4157_v41, %v8821_v25  ;;  %v827_v42 = vadd.s32 %v8794_v39, %v8791_v37  ;;  %v8857_v59 = vshrl.u32 %v679_v21, 5 }
 0x106   :  { %v8845_v43 = vsub.s32 %v831_v7, %v834_v35  ;;  %v4159_v58 = vadd.s32 %v4158_v56, %v4154_v54  ;;  %v7585_v1 = vadd.s32 4294967169, %v3999_v48  ;;  %v857_v2 = vsub.s32 4, %v833_v30 }
 0x107   :  { %v685_v60 = vshrl.u32 %v8426_v51, %v682_v46  ;;  %v688_v62 = vshrl.u32 %v8427_v53, %v682_v46  ;;  %v691_v63 = vshrl.u32 %v8428_v55, %v682_v46  ;;  %v684_v14 = vshll.u32 %v8425_v47, %v681_v33 }
 0x108   :  { %v837_v61 = vsub.s32 0, %v8845_v43  ;;  %v4160_v3 = vadd.s32 536870912, %v4159_v58  ;;  %v4003_v40 = vor.u32 8388608, %v8842_v49  ;;  %v687_v39 = vshll.u32 %v8426_v51, %v681_v33 }
 0x109   :  { %v690_v4 = vshll.u32 %v8427_v53, %v681_v33  ;;  %v694_v5 = vshrl.u32 %v8429_v57, %v682_v46  ;;  %v686_v7 = vor.u32 %v685_v60, %v684_v14  ;;  %v693_v8 = vshll.u32 %v8428_v55, %v681_v33 }
 0x10a   :  { %v7462_v37 = vmin.u32 %v837_v61, %v8845_v43  ;;  %v4161_v50 = vshrl.u32 %v4160_v3, 30  ;;  %v697_v11 = vshrl.u32 %v8430_v0, %v682_v46  ;;  %v689_v15 = vor.u32 %v688_v62, %v687_v39 }
 0x10b   :  { %v692_v17 = vor.u32 %v691_v63, %v690_v4  ;;  %v696_v20 = vshll.u32 %v8429_v57, %v681_v33  ;;  %v858_v21 = vsel %vm773_vm14, %v857_v2, %v833_v30  ;;  %v695_v23 = vor.u32 %v694_v5, %v693_v8 }
 0x10c   :  { %v839_v12 = vclz %v7462_v37  ;;  %v4162_v22 = vshll.u32 %v4161_v50, 30  ;;  %vm699_vm0 = vcmp.lt.s32.totalorder %v8857_v59, 1  ;;  %vm700_vm1 = vcmp.lt.s32.totalorder %v8857_v59, 2 }
 0x10d   :  { %v698_v27 = vor.u32 %v697_v11, %v696_v20  ;;  %vm702_vm2 = vcmp.lt.s32.totalorder %v8857_v59, 4  ;;  %vm4101_vm3 = vcmp.lt.s32.totalorder %v8728_v10, 0  ;;  %v683_v44 = vshrl.u32 %v8425_v47, %v682_v46 }
 0x10e   :  { %v7463_v25 = vadd.s32 4294967294, %v839_v12  ;;  %v8878_v32 = vsub.s32 %v4159_v58, %v4162_v22  ;;  %vm701_vm4 = vcmp.lt.s32.totalorder %v8857_v59, 3  ;;  %v708_v30 = vsel %vm702_vm2, %v695_v23, 920167782 }
 0x10f   :  { %v860_v33 = vsel %vm8852_vm15, 0, %v858_v21  ;;  %v707_v35 = vsel %vm699_vm0, %v686_v7, %v689_v15  ;;  %v709_v41 = vsel %vm701_vm4, %v692_v17, %v708_v30  ;;  %v4185_v56 = vsub.s32 4, %v4161_v50 }
 0x110   :  { %vm7464_vm5 = vcmp.lt.s32.totalorder %v7463_v25, 0  ;;  %v4165_v54 = vsub.s32 0, %v8878_v32  ;;  %v711_v46 = vsel %vm699_vm0, %v689_v15, %v692_v17  ;;  %vm8895_vm6 = vcmp.le.f32.partialorder %v4099_v16, 0.7853982 }
 0x111   :  { %v842_v48 = vsel %vm7464_vm5, 0, %v7463_v25  ;;  %v704_v62 = vsel %vm702_vm2, %v692_v17, 2102212464  ;;  %v712_v63 = vsel %vm702_vm2, %v698_v27, 1326507024  ;;  %v710_v14 = vsel %vm700_vm1, %v707_v35, %v709_v41  ;;  %v8915_v17 = vpop.f32.mrb[4].mxu1 }
 0x112   :  { %v843_v58 = vsub.s32 32, %v842_v48  ;;  %v847_v60 = vsub.s32 4294967266, %v842_v48  ;;  %v844_v2 = vshll.u32 %v8845_v43, %v842_v48  ;;  %v7590_v3 = vmin.u32 %v4165_v54, %v8878_v32 }
 0x113   :  { %v713_v37 = vsel %vm701_vm4, %v695_v23, %v712_v63  ;;  %v4005_v5 = vadd.s32 1, %v7585_v1  ;;  %v864_v8 = vadd.s32 3, %v860_v33  ;;  %v703_v12 = vsel %vm699_vm0, %v683_v44, %v686_v7 }
 0x114   :  { %v845_v16 = vshrl.u32 %v827_v42, %v843_v58  ;;  %v848_v39 = vadd.s32 127, %v847_v60  ;;  %v714_v4 = vsel %vm700_vm1, %v711_v46, %v713_v37  ;;  %v4167_v11 = vclz %v7590_v3 }
 0x115   :  { %v705_v43 = vsel %vm701_vm4, %v689_v15, %v704_v62  ;;  %v8918_v22 = vmul.u32.u64.low %v8848_v38, %v714_v4  ;;  %v8919_v42 = vmul.u32.u64.high %v8848_v38, %v714_v4, %v8918_v22  ;;  %vm4006_vm7 = vcmp.gt.s32.totalorder %v4005_v5, 0 }
 0x116   :  { %v846_v20 = vor.u32 %v845_v16, %v844_v2  ;;  %v849_v21 = vshll.u32 %v848_v39, 23  ;;  %v7591_v23 = vadd.s32 4294967294, %v4167_v11  ;;  %v4155_v7 = vadd.s32 %v8820_v24, %v8826_v28 }
 0x117   :  { %v8922_v25 = vmul.u32.u64.low %v8848_v38, %v710_v14  ;;  %v8923_v1 = vmul.u32.u64.high %v8848_v38, %v710_v14, %v8922_v25  ;;  %v4186_v15 = vsel %vm4101_vm3, %v4185_v56, %v4161_v50  ;;  %v4007_v44 = vsel %vm4006_vm7, %v4005_v5, 0 }
 0x118   :  { %v850_v27 = vor.u32 4788187, %v849_v21  ;;  %v8930_v30 = vand.u32 3, %v864_v8  ;;  %vm7592_vm8 = vcmp.lt.s32.totalorder %v7591_v23, 0  ;;  %v706_v33 = vsel %vm700_vm1, %v703_v12, %v705_v43 }
 0x119   :  { %v4009_v35 = vand.u32 31, %v4007_v44  ;;  %v853_v48 = vcvt.s32.f32 %v846_v20  ;;  %v4170_v54 = vsel %vm7592_vm8, 0, %v7591_v23  ;;  %vm724_vm9 = vc.u32 %v8919_v42, %v8922_v25 }
 0x11a   :  { %v851_v41 = vand.u32 2147483647, %v850_v27  ;;  %v4171_v46 = vsub.s32 32, %v4170_v54  ;;  %v4175_v58 = vsub.s32 4294967266, %v4170_v54  ;;  %v4188_v24 = vsel %vm8895_vm6, 0, %v4186_v15 }
 0x11b   :  { %v725_v28 = vadd.s32 1, %v8923_v1  ;;  %v722_v56 = vmul.u32 %v8848_v38, %v706_v33  ;;  %v8940_v60 = vshrl.u32 %v4007_v44, 5  ;;  %v4010_v59 = vsub.s32 32, %v4009_v35 }
 0x11c   :  { %v854_v50 = vmul.f32 %v853_v48, %v851_v41  ;;  %v4172_v62 = vshll.u32 %v8878_v32, %v4170_v54  ;;  %v4173_v63 = vshrl.u32 %v4155_v7, %v4171_v46  ;;  %v4176_v2 = vadd.s32 127, %v4175_v58 }
 0x11d   :  { %v726_v3 = vsel %vm724_vm9, %v725_v28, %v8923_v1  ;;  %v4012_v16 = vshll.u32 %v8425_v47, %v4009_v35  ;;  %v4013_v39 = vshrl.u32 %v8426_v51, %v4010_v59  ;;  %v4015_v8 = vshll.u32 %v8426_v51, %v4009_v35 }
 0x11e   :  { %v855_v14 = vxor.u32 2147483648, %v854_v50  ;;  %v727_v37 = vadd.s32 %v726_v3, %v722_v56  ;;  %v4174_v4 = vor.u32 %v4173_v63, %v4172_v62  ;;  %v4177_v5 = vshll.u32 %v4176_v2, 23 }
 0x11f   :  { %v4016_v38 = vshrl.u32 %v8427_v53, %v4010_v59  ;;  %v4018_v12 = vshll.u32 %v8427_v53, %v4009_v35  ;;  %v4019_v43 = vshrl.u32 %v8428_v55, %v4010_v59  ;;  %v4014_v22 = vor.u32 %v4013_v39, %v4012_v16 }
 0x120   :  { %v856_v11 = vsel %vm773_vm14, %v855_v14, %v854_v50  ;;  %v728_v32 = vadd.s32 536870912, %v727_v37  ;;  %v4178_v21 = vor.u32 4788187, %v4177_v5  ;;  %v4021_v23 = vshll.u32 %v8428_v55, %v4009_v35 }
 0x121   :  { %v859_v20 = vsel %vm8852_vm15, %v8725_v9, %v856_v11  ;;  %v4181_v1 = vcvt.s32.f32 %v4174_v4  ;;  %v4022_v7 = vshrl.u32 %v8429_v57, %v4010_v59  ;;  %v4017_v44 = vor.u32 %v4016_v38, %v4015_v8 }
 0x122   :  { %8159 = vcosq.f32 %v859_v20  ;;  %v8956_v27 = vshrl.u32 %v728_v32, 30  ;;  %v4179_v15 = vand.u32 2147483647, %v4178_v21  ;;  %v4025_v33 = vshrl.u32 %v8430_v0, %v4010_v59 }
 0x123   :  { %8161 = vsinq.f32 %v859_v20  ;;  %v4023_v48 = vor.u32 %v4022_v7, %v4021_v23  ;;  %v4020_v54 = vor.u32 %v4019_v43, %v4018_v12  ;;  %v4024_v46 = vshll.u32 %v8429_v57, %v4009_v35 }
 0x124   :  { %v730_v41 = vshll.u32 %v8956_v27, 30  ;;  %v4182_v45 = vmul.f32 %v4181_v1, %v4179_v15  ;;  %v4192_v58 = vadd.s32 3, %v4188_v24  ;;  %vm4027_vm10 = vcmp.lt.s32.totalorder %v8940_v60, 1 }
 0x125   :  { %v8967_v50 = vshll.u32 %v4003_v40, 8  ;;  %vm867_vm11 = vcmp.eq.s32.totalorder %v8930_v30, 0  ;;  %v4026_v62 = vor.u32 %v4025_v33, %v4024_v46  ;;  %vm4030_vm12 = vcmp.lt.s32.totalorder %v8940_v60, 4 }
 0x126   :  { %v8962_v28 = vsub.s32 %v727_v37, %v730_v41  ;;  %v4183_v56 = vxor.u32 2147483648, %v4182_v45  ;;  %v4035_v63 = vsel %vm4027_vm10, %v4014_v22, %v4017_v44  ;;  %vm866_vm13 = vcmp.lt.s32.totalorder %v8930_v30, 2 }
 0x127   :  { %vm7323_vm14 = vcmask 523264   ;;  %v4011_v24 = vshrl.u32 %v8425_v47, %v4010_v59  ;;  %vm4029_vm15 = vcmp.lt.s32.totalorder %v8940_v60, 3  ;;  %v4036_v49 = vsel %vm4030_vm12, %v4023_v48, 920167782 }
 0x128   :  { %v733_v35 = vsub.s32 0, %v8962_v28  ;;  %vm863_vm0 = vweird.f32 %v8725_v9  ;;  %v4184_v40 = vsel %vm4101_vm3, %v4183_v56, %v4182_v45  ;;  %vm669_vm1 = vcmp.lt.s32.totalorder %v8731_v13, 0 }
 0x129   :  { %vm4028_vm2 = vcmp.lt.s32.totalorder %v8940_v60, 2  ;;  %v4032_v2 = vsel %vm4030_vm12, %v4020_v54, 2102212464  ;;  %v4037_v59 = vsel %vm4029_vm15, %v4020_v54, %v4036_v49  ;;  %v4187_v3 = vsel %vm8895_vm6, %v8728_v10, %v4184_v40 }
 0x12a   :  { %v7458_v14 = vmin.u32 %v733_v35, %v8962_v28  ;;  %v4038_v37 = vsel %vm4028_vm2, %v4035_v63, %v4037_v59  ;;  %v4039_v16 = vsel %vm4027_vm10, %v4017_v44, %v4020_v54  ;;  %8163 = vcosq.f32 %v4187_v3 }
 0x12b   :  { %v4040_v39 = vsel %vm4030_vm12, %v4026_v62, 1326507024  ;;  %v8999_v4 = vmul.u32.u64.low %v8967_v50, %v4038_v37  ;;  %v9000_v5 = vmul.u32.u64.high %v8967_v50, %v4038_v37, %v8999_v4  ;;  %vm870_vm3 = vcmp.eq.s32.totalorder %v8930_v30, 2 }
 0x12c   :  { %v8160_v8 = vpop.eup %8159  ;;  %8165 = vsinq.f32 %v4187_v3  ;;  %v735_v61 = vclz %v7458_v14  ;;  %v753_v38 = vsub.s32 4, %v8956_v27  ;;  %v4031_v12 = vsel %vm4027_vm10, %v4011_v24, %v4014_v22 }
 0x12d   :  { %v8162_v11 = vpop.eup %8161  ;;  %v871_v32 = vxor.u32 2147483648, %v8160_v8  ;;  %v4033_v43 = vsel %vm4029_vm15, %v4017_v44, %v4032_v2  ;;  %v4041_v20 = vsel %vm4029_vm15, %v4023_v48, %v4040_v39  ;;  %v9015_v7 = vadd.f32 %v8737_v18, %v8722_v6 }
 0x12e   :  { %v868_v21 = vxor.u32 2147483648, %v8162_v11  ;;  %v7459_v23 = vadd.s32 4294967294, %v735_v61  ;;  %v4042_v1 = vsel %vm4028_vm2, %v4039_v16, %v4041_v20  ;;  %v4193_v33 = vand.u32 3, %v4192_v58 }
 0x12f   :  { %v872_v15 = vsel %vm870_vm3, %v871_v32, %v8162_v11  ;;  %v9018_v41 = vmul.u32.u64.low %v8967_v50, %v4042_v1  ;;  %v9019_v22 = vmul.u32.u64.high %v8967_v50, %v4042_v1, %v9018_v41  ;;  %v4034_v48 = vsel %vm4028_vm2, %v4031_v12, %v4033_v43 }
 0x130   :  { %v869_v44 = vsel %vm867_vm11, %v8160_v8, %v868_v21  ;;  %vm7460_vm4 = vcmp.lt.s32.totalorder %v7459_v23, 0  ;;  %v4053_v45 = vadd.s32 1, %v9000_v5  ;;  %v723_v18 = vadd.s32 %v8922_v25, %v8919_v42 }
 0x131   :  { %v873_v54 = vsel %vm866_vm13, %v869_v44, %v872_v15  ;;  %v738_v46 = vsel %vm7460_vm4, 0, %v7459_v23  ;;  %v982_v58 = vand.u32 2139095040, %v9015_v7  ;;  %vm4191_vm5 = vweird.f32 %v8728_v10 }
 0x132   :  { %v874_v56 = vsel %vm863_vm0, nan, %v873_v54  ;;  %v739_v62 = vsub.s32 32, %v738_v46  ;;  %v743_v63 = vsub.s32 4294967266, %v738_v46  ;;  %v754_v60 = vsel %vm669_vm1, %v753_v38, %v8956_v27  ;;  %v9047_v27 = vpop.f32.mrb[5].mxu0 }
 0x133   :  { %7325 = vst.msk [vmem:[%s14271_s3 + $0x8] sm:$0xff] %vm7323_vm14, %v874_v56  ;;  %v4050_v42 = vmul.u32 %v8967_v50, %v4034_v48  ;;  %vm4052_vm6 = vc.u32 %v9019_v22, %v8999_v4  ;;  %v979_v9 = vand.u32 2147483647, %v9015_v7  ;;  %v983_v25 = vshrl.u32 %v982_v58, 23 }
 0x134   :  { %v740_v30 = vshll.u32 %v8962_v28, %v738_v46  ;;  %v741_v35 = vshrl.u32 %v723_v18, %v739_v62  ;;  %v744_v24 = vadd.s32 127, %v743_v63  ;;  %v4054_v49 = vsel %vm4052_vm6, %v4053_v45, %v9000_v5  ;;  %v8164_v40 = vpop.eup %8163 }
 0x135   :  { %vm4198_vm7 = vcmp.eq.s32.totalorder %v4193_v33, 2  ;;  %vm9051_vm8 = vcmp.le.f32.partialorder %v667_v34, 0.7853982  ;;  %v4055_v2 = vadd.s32 %v4054_v49, %v4050_v42  ;;  %v7469_v59 = vadd.s32 4294967169, %v983_v25 }
 0x136   :  { %v8166_v3 = vpop.eup %8165  ;;  %v4199_v14 = vxor.u32 2147483648, %v8164_v40  ;;  %v742_v37 = vor.u32 %v741_v35, %v740_v30  ;;  %v745_v28 = vshll.u32 %v744_v24, 23  ;;  %v756_v16 = vsel %vm9051_vm8, 0, %v754_v60 }
 0x137   :  { %v4196_v39 = vxor.u32 2147483648, %v8166_v3  ;;  %v4056_v5 = vadd.s32 536870912, %v4055_v2  ;;  %v986_v8 = vand.u32 8388607, %v979_v9  ;;  %v989_v61 = vadd.s32 1, %v7469_v59 }
 0x138   :  { %vm4194_vm9 = vcmp.lt.s32.totalorder %v4193_v33, 2  ;;  %vm4195_vm10 = vcmp.eq.s32.totalorder %v4193_v33, 0  ;;  %v4200_v34 = vsel %vm4198_vm7, %v4199_v14, %v8166_v3  ;;  %v746_v38 = vor.u32 4788187, %v745_v28 }
 0x139   :  { %v4197_v11 = vsel %vm4195_vm10, %v8164_v40, %v4196_v39  ;;  %v760_v32 = vadd.s32 3, %v756_v16  ;;  %v9059_v12 = vshrl.u32 %v4056_v5, 30  ;;  %vm990_vm11 = vcmp.gt.s32.totalorder %v989_v61, 0 }
 0x13a   :  { %v4201_v43 = vsel %vm4194_vm9, %v4197_v11, %v4200_v34  ;;  %v747_v20 = vand.u32 2147483647, %v746_v38  ;;  %v749_v21 = vcvt.s32.f32 %v742_v37  ;;  %v991_v23 = vsel %vm990_vm11, %v989_v61, 0  ;;  %v9117_v34 = vpop.f32.mrb[5].mxu1 }
 0x13b   :  { %v4202_v1 = vsel %vm4191_vm5, nan, %v4201_v43  ;;  %v4058_v15 = vshll.u32 %v9059_v12, 30  ;;  %v987_v41 = vor.u32 8388608, %v986_v8  ;;  %v993_v44 = vand.u32 31, %v991_v23 }
 0x13c   :  { %7357 = vst.msk [vmem:[%s14271_s3 + $0x108] sm:$0xff] %vm7323_vm14, %v4202_v1  ;;  %v750_v33 = vmul.f32 %v749_v21, %v747_v20  ;;  %v9068_v48 = vand.u32 3, %v760_v32  ;;  %v4051_v18 = vadd.s32 %v8999_v4, %v9019_v22  ;;  %v9076_v46 = vadd.f32 %v8739_v19, %v8722_v6 }
 0x13d   :  { %v9070_v45 = vsub.s32 %v4055_v2, %v4058_v15  ;;  %v994_v10 = vsub.s32 32, %v993_v44  ;;  %v9079_v56 = vshrl.u32 %v991_v23, 5  ;;  %v9081_v62 = vshll.u32 %v987_v41, 8 }
 0x13e   :  { %v751_v54 = vxor.u32 2147483648, %v750_v33  ;;  %v9085_v63 = vadd.f32 %v8722_v6, %v8746_v26  ;;  %v996_v4 = vshll.u32 %v8425_v47, %v993_v44  ;;  %v999_v30 = vshll.u32 %v8426_v51, %v993_v44 }
 0x13f   :  { %v4061_v58 = vsub.s32 0, %v9070_v45  ;;  %v997_v22 = vshrl.u32 %v8426_v51, %v994_v10  ;;  %v1000_v19 = vshrl.u32 %v8427_v53, %v994_v10  ;;  %v1003_v6 = vshrl.u32 %v8428_v55, %v994_v10 }
 0x140   :  { %v752_v60 = vsel %vm669_vm1, %v751_v54, %v750_v33  ;;  %v4081_v26 = vsub.s32 4, %v9059_v12  ;;  %v1002_v35 = vshll.u32 %v8427_v53, %v993_v44  ;;  %v4310_v24 = vand.u32 2139095040, %v9076_v46 }
 0x141   :  { %v755_v42 = vsel %vm9051_vm8, %v8731_v13, %v752_v60  ;;  %v7586_v25 = vmin.u32 %v4061_v58, %v9070_v45  ;;  %v998_v40 = vor.u32 %v997_v22, %v996_v4  ;;  %v1001_v2 = vor.u32 %v1000_v19, %v999_v30 }
 0x142   :  { %8167 = vcosq.f32 %v755_v42  ;;  %v1004_v59 = vor.u32 %v1003_v6, %v1002_v35  ;;  %v1005_v50 = vshll.u32 %v8428_v55, %v993_v44  ;;  %v1006_v3 = vshrl.u32 %v8429_v57, %v994_v10 }
 0x143   :  { %8169 = vsinq.f32 %v755_v42  ;;  %v4063_v49 = vclz %v7586_v25  ;;  %vm1011_vm12 = vcmp.lt.s32.totalorder %v9079_v56, 1  ;;  %v1008_v37 = vshll.u32 %v8429_v57, %v993_v44 }
 0x144   :  { %v1009_v28 = vshrl.u32 %v8430_v0, %v994_v10  ;;  %vm1012_vm13 = vcmp.lt.s32.totalorder %v9079_v56, 2  ;;  %vm766_vm15 = vcmp.eq.s32.totalorder %v9068_v48, 2  ;;  %v995_v16 = vshrl.u32 %v8425_v47, %v994_v10 }
 0x145   :  { %v7587_v14 = vadd.s32 4294967294, %v4063_v49  ;;  %v1007_v39 = vor.u32 %v1006_v3, %v1005_v50  ;;  %vm1013_vm0 = vcmp.lt.s32.totalorder %v9079_v56, 3  ;;  %vm1014_vm1 = vcmp.lt.s32.totalorder %v9079_v56, 4 }
 0x146   :  { %vm763_vm2 = vcmp.eq.s32.totalorder %v9068_v48, 0  ;;  %vm3997_vm3 = vcmp.lt.s32.totalorder %v8749_v31, 0  ;;  %v1010_v5 = vor.u32 %v1009_v28, %v1008_v37  ;;  %v1016_v8 = vsel %vm1014_vm1, %v1004_v59, 2102212464 }
 0x147   :  { %vm7588_vm4 = vcmp.lt.s32.totalorder %v7587_v14, 0  ;;  %v1019_v61 = vsel %vm1011_vm12, %v998_v40, %v1001_v2  ;;  %vm762_vm5 = vcmp.lt.s32.totalorder %v9068_v48, 2  ;;  %v1015_v11 = vsel %vm1011_vm12, %v995_v16, %v998_v40 }
 0x148   :  { %v4066_v38 = vsel %vm7588_vm4, 0, %v7587_v14  ;;  %v1020_v32 = vsel %vm1014_vm1, %v1007_v39, 920167782  ;;  %v4311_v43 = vshrl.u32 %v4310_v24, 23  ;;  %vm759_vm6 = vweird.f32 %v8731_v13 }
 0x149   :  { %v4067_v20 = vsub.s32 32, %v4066_v38  ;;  %v4071_v21 = vsub.s32 4294967266, %v4066_v38  ;;  %v1021_v23 = vsel %vm1013_vm0, %v1004_v59, %v1020_v32  ;;  %v1023_v1 = vsel %vm1011_vm12, %v1001_v2, %v1004_v59 }
 0x14a   :  { %vm9131_vm7 = vcmp.le.f32.partialorder %v3995_v29, 0.7853982  ;;  %v1017_v41 = vsel %vm1013_vm0, %v1001_v2, %v1016_v8  ;;  %v1022_v33 = vsel %vm1012_vm13, %v1019_v61, %v1021_v23  ;;  %v1024_v44 = vsel %vm1014_vm1, %v1010_v5, 1326507024 }
 0x14b   :  { %v7597_v54 = vadd.s32 4294967169, %v4311_v43  ;;  %v4068_v10 = vshll.u32 %v9070_v45, %v4066_v38  ;;  %v4069_v58 = vshrl.u32 %v4051_v18, %v4067_v20  ;;  %v4072_v60 = vadd.s32 127, %v4071_v21 }
 0x14c   :  { %v1025_v29 = vsel %vm1013_vm0, %v1007_v39, %v1024_v44  ;;  %v8168_v4 = vpop.eup %8167  ;;  %v9147_v19 = vmul.u32.u64.low %v9081_v62, %v1022_v33  ;;  %v9148_v42 = vmul.u32.u64.high %v9081_v62, %v1022_v33, %v9147_v19  ;;  %v4307_v45 = vand.u32 2147483647, %v9076_v46 }
 0x14d   :  { %v1026_v22 = vsel %vm1012_vm13, %v1023_v1, %v1025_v29  ;;  %v4317_v25 = vadd.s32 1, %v7597_v54  ;;  %v8170_v30 = vpop.eup %8169  ;;  %v767_v6 = vxor.u32 2147483648, %v8168_v4  ;;  %v4070_v35 = vor.u32 %v4069_v58, %v4068_v10 }
 0x14e   :  { %v4073_v24 = vshll.u32 %v4072_v60, 23  ;;  %v764_v18 = vxor.u32 2147483648, %v8170_v30  ;;  %v9153_v49 = vmul.u32.u64.low %v9081_v62, %v1026_v22  ;;  %v9154_v40 = vmul.u32.u64.high %v9081_v62, %v1026_v22, %v9153_v49 }
 0x14f   :  { %vm4318_vm8 = vcmp.gt.s32.totalorder %v4317_v25, 0  ;;  %v768_v2 = vsel %vm766_vm15, %v767_v6, %v8170_v30  ;;  %v1018_v50 = vsel %vm1012_vm13, %v1015_v11, %v1017_v41  ;;  %v4082_v37 = vsel %vm3997_vm3, %v4081_v26, %v9059_v12 }
 0x150   :  { %v4074_v59 = vor.u32 4788187, %v4073_v24  ;;  %v4319_v3 = vsel %vm4318_vm8, %v4317_v25, 0  ;;  %v765_v14 = vsel %vm763_vm2, %v8168_v4, %v764_v18  ;;  %v1037_v28 = vadd.s32 1, %v9148_v42 }
 0x151   :  { %v4321_v16 = vand.u32 31, %v4319_v3  ;;  %v769_v39 = vsel %vm762_vm5, %v765_v14, %v768_v2  ;;  %v4077_v8 = vcvt.s32.f32 %v4070_v35  ;;  %v4314_v56 = vand.u32 8388607, %v4307_v45 }
 0x152   :  { %v4075_v5 = vand.u32 2147483647, %v4074_v59  ;;  %v770_v61 = vsel %vm759_vm6, nan, %v769_v39  ;;  %v1034_v38 = vmul.u32 %v9081_v62, %v1018_v50  ;;  %vm1036_vm9 = vc.u32 %v9154_v40, %v9147_v19 }
 0x153   :  { %v4322_v12 = vsub.s32 32, %v4321_v16  ;;  %7324 = vst.msk [vmem:[%s14271_s3] sm:$0xff] %vm7323_vm14, %v770_v61  ;;  %v4084_v26 = vsel %vm9131_vm7, 0, %v4082_v37  ;;  %v1038_v11 = vsel %vm1036_vm9, %v1037_v28, %v9148_v42  ;;  %v4320_v32 = vshrl.u32 %v4319_v3, 5 }
 0x154   :  { %v4078_v48 = vmul.f32 %v4077_v8, %v4075_v5  ;;  %v1039_v13 = vadd.s32 %v1038_v11, %v1034_v38  ;;  %v4324_v43 = vshll.u32 %v8425_v47, %v4321_v16  ;;  %v4327_v23 = vshll.u32 %v8426_v51, %v4321_v16 }
 0x155   :  { %v4325_v62 = vshrl.u32 %v8426_v51, %v4322_v12  ;;  %v4328_v20 = vshrl.u32 %v8427_v53, %v4322_v12  ;;  %v4330_v1 = vshll.u32 %v8427_v53, %v4321_v16  ;;  %v4331_v41 = vshrl.u32 %v8428_v55, %v4322_v12 }
 0x156   :  { %v4079_v21 = vxor.u32 2147483648, %v4078_v48  ;;  %v1040_v33 = vadd.s32 536870912, %v1039_v13  ;;  %v4333_v54 = vshll.u32 %v8428_v55, %v4321_v16  ;;  %v4334_v10 = vshrl.u32 %v8429_v57, %v4322_v12 }
 0x157   :  { %v4326_v44 = vor.u32 %v4325_v62, %v4324_v43  ;;  %v4329_v60 = vor.u32 %v4328_v20, %v4327_v23  ;;  %v4332_v29 = vor.u32 %v4331_v41, %v4330_v1  ;;  %v4337_v4 = vshrl.u32 %v8430_v0, %v4322_v12 }
 0x158   :  { %v4080_v58 = vsel %vm3997_vm3, %v4079_v21, %v4078_v48  ;;  %v1041_v42 = vshrl.u32 %v1040_v33, 30  ;;  %v4335_v25 = vor.u32 %v4334_v10, %v4333_v54  ;;  %v4336_v30 = vshll.u32 %v8429_v57, %v4321_v16 }
 0x159   :  { %v4083_v22 = vsel %vm9131_vm7, %v8749_v31, %v4080_v58  ;;  %v4088_v6 = vadd.s32 3, %v4084_v26  ;;  %v4315_v35 = vor.u32 8388608, %v4314_v56  ;;  %vm4339_vm10 = vcmp.lt.s32.totalorder %v4320_v32, 1 }
 0x15a   :  { %8171 = vcosq.f32 %v4083_v22  ;;  %v1042_v24 = vshll.u32 %v1041_v42, 30  ;;  %v4338_v18 = vor.u32 %v4337_v4, %v4336_v30  ;;  %vm4342_vm11 = vcmp.lt.s32.totalorder %v4320_v32, 4 }
 0x15b   :  { %8173 = vsinq.f32 %v4083_v22  ;;  %v4323_v49 = vshrl.u32 %v8425_v47, %v4322_v12  ;;  %vm4341_vm12 = vcmp.lt.s32.totalorder %v4320_v32, 3  ;;  %v4347_v2 = vsel %vm4339_vm10, %v4326_v44, %v4329_v60 }
 0x15c   :  { %v4348_v15 = vsel %vm4342_vm11, %v4335_v25, 920167782  ;;  %v9202_v59 = vsub.s32 %v1039_v13, %v1042_v24  ;;  %vm4340_vm13 = vcmp.lt.s32.totalorder %v4320_v32, 2  ;;  %v4344_v50 = vsel %vm4342_vm11, %v4332_v29, 2102212464 }
 0x15d   :  { %v4349_v3 = vsel %vm4341_vm12, %v4332_v29, %v4348_v15  ;;  %v1065_v14 = vsub.s32 4, %v1041_v42  ;;  %v4351_v28 = vsel %vm4339_vm10, %v4329_v60, %v4332_v29  ;;  %v4355_v16 = vshll.u32 %v4315_v35, 8 }
 0x15e   :  { %v4350_v37 = vsel %vm4340_vm13, %v4347_v2, %v4349_v3  ;;  %v4089_v39 = vand.u32 3, %v4088_v6  ;;  %v1045_v5 = vsub.s32 0, %v9202_v59  ;;  %v4343_v8 = vsel %vm4339_vm10, %v4323_v49, %v4326_v44 }
 0x15f   :  { %v4352_v56 = vsel %vm4342_vm11, %v4338_v18, 1326507024  ;;  %v4345_v61 = vsel %vm4341_vm12, %v4329_v60, %v4344_v50  ;;  %v9213_v12 = vmul.u32.u64.low %v4355_v16, %v4350_v37  ;;  %v9214_v48 = vmul.u32.u64.high %v4355_v16, %v4350_v37, %v9213_v12  ;;  %v9247_v37 = vpop.f32.mrb[6].mxu0 }
 0x160   :  { %v4353_v38 = vsel %vm4341_vm12, %v4335_v25, %v4352_v56  ;;  %vm4087_vm15 = vweird.f32 %v8749_v31  ;;  %vm981_vm0 = vcmp.lt.s32.totalorder %v9015_v7, 0  ;;  %v7470_v26 = vmin.u32 %v1045_v5, %v9202_v59 }
 0x161   :  { %v4354_v11 = vsel %vm4340_vm13, %v4351_v28, %v4353_v38  ;;  %v1066_v13 = vsel %vm981_vm0, %v1065_v14, %v1041_v42  ;;  %v878_v20 = vand.u32 2139095040, %v9085_v63  ;;  %vm9228_vm1 = vcmp.le.f32.partialorder %v979_v9, 0.7853982 }
 0x162   :  { %v9222_v43 = vmul.u32.u64.low %v4355_v16, %v4354_v11  ;;  %v9223_v62 = vmul.u32.u64.high %v4355_v16, %v4354_v11, %v9222_v43  ;;  %v1047_v23 = vclz %v7470_v26  ;;  %v4346_v1 = vsel %vm4340_vm13, %v4343_v8, %v4345_v61 }
 0x163   :  { %v875_v41 = vand.u32 2147483647, %v9085_v63  ;;  %vm4090_vm2 = vcmp.lt.s32.totalorder %v4089_v39, 2  ;;  %vm4091_vm3 = vcmp.eq.s32.totalorder %v4089_v39, 0  ;;  %v4365_v44 = vadd.s32 1, %v9214_v48 }
 0x164   :  { %v8172_v33 = vpop.eup %8171  ;;  %v879_v54 = vshrl.u32 %v878_v20, 23  ;;  %vm4094_vm4 = vcmp.eq.s32.totalorder %v4089_v39, 2  ;;  %v7471_v60 = vadd.s32 4294967294, %v1047_v23  ;;  %v1068_v9 = vsel %vm9228_vm1, 0, %v1066_v13 }
 0x165   :  { %v8174_v10 = vpop.eup %8173  ;;  %v4095_v58 = vxor.u32 2147483648, %v8172_v33  ;;  %v4362_v4 = vmul.u32 %v4355_v16, %v4346_v1  ;;  %vm4364_vm5 = vc.u32 %v9223_v62, %v9213_v12  ;;  %v882_v25 = vand.u32 8388607, %v875_v41 }
 0x166   :  { %v4092_v29 = vxor.u32 2147483648, %v8174_v10  ;;  %v7465_v32 = vadd.s32 4294967169, %v879_v54  ;;  %vm7472_vm6 = vcmp.lt.s32.totalorder %v7471_v60, 0  ;;  %v4366_v42 = vsel %vm4364_vm5, %v4365_v44, %v9214_v48 }
 0x167   :  { %v4096_v22 = vsel %vm4094_vm4, %v4095_v58, %v8174_v10  ;;  %v1050_v6 = vsel %vm7472_vm6, 0, %v7471_v60  ;;  %v4367_v35 = vadd.s32 %v4366_v42, %v4362_v4  ;;  %v1035_v49 = vadd.s32 %v9147_v19, %v9154_v40 }
 0x168   :  { %v4093_v30 = vsel %vm4091_vm3, %v8172_v33, %v4092_v29  ;;  %v885_v24 = vadd.s32 1, %v7465_v32  ;;  %v1051_v2 = vsub.s32 32, %v1050_v6  ;;  %v1055_v15 = vsub.s32 4294967266, %v1050_v6 }
 0x169   :  { %v4097_v18 = vsel %vm4090_vm2, %v4093_v30, %v4096_v22  ;;  %v1072_v3 = vadd.s32 3, %v1068_v9  ;;  %v4368_v14 = vadd.s32 536870912, %v4367_v35  ;;  %v1052_v28 = vshll.u32 %v9202_v59, %v1050_v6  ;;  %v9261_v59 = vld [vmem:[%s14270_s2] ss:$0 sm:$0xff] }
 0x16a   :  { %v4098_v50 = vsel %vm4087_vm15, nan, %v4097_v18  ;;  %vm886_vm7 = vcmp.gt.s32.totalorder %v885_v24, 0  ;;  %v1053_v16 = vshrl.u32 %v1035_v49, %v1051_v2  ;;  %v1056_v39 = vadd.s32 127, %v1055_v15 }
 0x16b   :  { %7356 = vst.msk [vmem:[%s14271_s3 + $0x100] sm:$0xff] %vm7323_vm14, %v4098_v50  ;;  %v887_v19 = vsel %vm886_vm7, %v885_v24, 0  ;;  %v4369_v40 = vshrl.u32 %v4368_v14, 30  ;;  %v883_v5 = vor.u32 8388608, %v882_v25  ;;  %v9254_v61 = vand.u32 3, %v1072_v3 }
 0x16c   :  { %v889_v8 = vand.u32 31, %v887_v19  ;;  %v1054_v31 = vor.u32 %v1053_v16, %v1052_v28  ;;  %v1057_v56 = vshll.u32 %v1056_v39, 23  ;;  %vm4309_vm8 = vcmp.lt.s32.totalorder %v9076_v46, 0 }
 0x16d   :  { %v4370_v38 = vshll.u32 %v4369_v40, 30  ;;  %v4363_v11 = vadd.s32 %v9213_v12, %v9223_v62  ;;  %v9265_v13 = vadd.f32 %v9261_v59, %v8752_v36  ;;  %v9269_v43 = vadd.f32 %v9261_v59, %v8835_v52 }
 0x16e   :  { %v890_v48 = vsub.s32 32, %v889_v8  ;;  %v1058_v26 = vor.u32 4788187, %v1057_v56  ;;  %v888_v23 = vshrl.u32 %v887_v19, 5  ;;  %v9274_v33 = vshll.u32 %v883_v5, 8 }
 0x16f   :  { %v9271_v20 = vsub.s32 %v4367_v35, %v4370_v38  ;;  %v1061_v62 = vcvt.s32.f32 %v1054_v31  ;;  %v4393_v10 = vsub.s32 4, %v4369_v40  ;;  %v892_v58 = vshll.u32 %v8425_v47, %v889_v8 }
 0x170   :  { %v893_v1 = vshrl.u32 %v8426_v51, %v890_v48  ;;  %v1059_v12 = vand.u32 2147483647, %v1058_v26  ;;  %v896_v44 = vshrl.u32 %v8427_v53, %v890_v48  ;;  %v899_v54 = vshrl.u32 %v8428_v55, %v890_v48 }
 0x171   :  { %v4373_v36 = vsub.s32 0, %v9271_v20  ;;  %v895_v52 = vshll.u32 %v8426_v51, %v889_v8  ;;  %v898_v9 = vshll.u32 %v8427_v53, %v889_v8  ;;  %v901_v29 = vshll.u32 %v8428_v55, %v889_v8 }
 0x172   :  { %v1062_v60 = vmul.f32 %v1061_v62, %v1059_v12  ;;  %v902_v4 = vshrl.u32 %v8429_v57, %v890_v48  ;;  %v894_v22 = vor.u32 %v893_v1, %v892_v58  ;;  %v905_v25 = vshrl.u32 %v8430_v0, %v890_v48 }
 0x173   :  { %v7598_v32 = vmin.u32 %v4373_v36, %v9271_v20  ;;  %v897_v42 = vor.u32 %v896_v44, %v895_v52  ;;  %v900_v6 = vor.u32 %v899_v54, %v898_v9  ;;  %v904_v24 = vshll.u32 %v8429_v57, %v889_v8  ;;  %v9299_v8 = vpop.f32.mrb[6].mxu1 }
 0x174   :  { %v1063_v30 = vxor.u32 2147483648, %v1062_v60  ;;  %v903_v35 = vor.u32 %v902_v4, %v901_v29  ;;  %v4394_v49 = vsel %vm4309_vm8, %v4393_v10, %v4369_v40  ;;  %v891_v2 = vshrl.u32 %v8425_v47, %v890_v48 }
 0x175   :  { %v4375_v18 = vclz %v7598_v32  ;;  %v4206_v15 = vand.u32 2139095040, %v9265_v13  ;;  %v906_v3 = vor.u32 %v905_v25, %v904_v24  ;;  %vm907_vm9 = vcmp.lt.s32.totalorder %v888_v23, 1 }
 0x176   :  { %v1064_v50 = vsel %vm981_vm0, %v1063_v30, %v1062_v60  ;;  %vm908_vm10 = vcmp.lt.s32.totalorder %v888_v23, 2  ;;  %vm909_vm11 = vcmp.lt.s32.totalorder %v888_v23, 3  ;;  %vm910_vm12 = vcmp.lt.s32.totalorder %v888_v23, 4 }
 0x177   :  { %v1067_v14 = vsel %vm9228_vm1, %v9015_v7, %v1064_v50  ;;  %v7599_v28 = vadd.s32 4294967294, %v4375_v18  ;;  %v912_v16 = vsel %vm910_vm12, %v900_v6, 2102212464  ;;  %v915_v39 = vsel %vm907_vm9, %v894_v22, %v897_v42 }
 0x178   :  { %8175 = vcosq.f32 %v1067_v14  ;;  %v916_v19 = vsel %vm910_vm12, %v903_v35, 920167782  ;;  %v911_v40 = vsel %vm907_vm9, %v891_v2, %v894_v22  ;;  %v919_v56 = vsel %vm907_vm9, %v897_v42, %v900_v6 }
 0x179   :  { %8177 = vsinq.f32 %v1067_v14  ;;  %vm7600_vm13 = vcmp.lt.s32.totalorder %v7599_v28, 0  ;;  %v917_v5 = vsel %vm909_vm11, %v900_v6, %v916_v19  ;;  %v920_v38 = vsel %vm910_vm12, %v906_v3, 1326507024 }
 0x17a   :  { %v4378_v31 = vsel %vm7600_vm13, 0, %v7599_v28  ;;  %v918_v21 = vsel %vm908_vm10, %v915_v39, %v917_v5  ;;  %v913_v1 = vsel %vm909_vm11, %v897_v42, %v912_v16  ;;  %v921_v12 = vsel %vm909_vm11, %v903_v35, %v920_v38 }
 0x17b   :  { %v4379_v48 = vsub.s32 32, %v4378_v31  ;;  %v4383_v26 = vsub.s32 4294967266, %v4378_v31  ;;  %v4380_v62 = vshll.u32 %v9271_v20, %v4378_v31  ;;  %v922_v44 = vsel %vm908_vm10, %v919_v56, %v921_v12 }
 0x17c   :  { %v9308_v54 = vmul.u32.u64.low %v9274_v33, %v918_v21  ;;  %v9309_v36 = vmul.u32.u64.high %v9274_v33, %v918_v21, %v9308_v54  ;;  %v9313_v52 = vmul.u32.u64.low %v9274_v33, %v922_v44  ;;  %v9314_v60 = vmul.u32.u64.high %v9274_v33, %v922_v44, %v9313_v52 }
 0x17d   :  { %v4381_v10 = vshrl.u32 %v4363_v11, %v4379_v48  ;;  %v4384_v58 = vadd.s32 127, %v4383_v26  ;;  %vm9318_vm15 = vcmp.le.f32.partialorder %v4307_v45, 0.7853982  ;;  %v914_v20 = vsel %vm908_vm10, %v911_v40, %v913_v1 }
 0x17e   :  { %v4207_v29 = vshrl.u32 %v4206_v15, 23  ;;  %v4396_v22 = vsel %vm9318_vm15, 0, %v4394_v49  ;;  %v933_v11 = vadd.s32 1, %v9309_v36  ;;  %v4203_v42 = vand.u32 2147483647, %v9265_v13 }
 0x17f   :  { %v4382_v4 = vor.u32 %v4381_v10, %v4380_v62  ;;  %v4385_v32 = vshll.u32 %v4384_v58, 23  ;;  %v1190_v30 = vand.u32 2139095040, %v9269_v43  ;;  %vm1075_vm0 = vcmp.eq.s32.totalorder %v9254_v61, 0 }
 0x180   :  { %v7593_v25 = vadd.s32 4294967169, %v4207_v29  ;;  %v930_v6 = vmul.u32 %v9274_v33, %v914_v20  ;;  %vm932_vm1 = vc.u32 %v9314_v60, %v9308_v54  ;;  %vm1078_vm2 = vcmp.eq.s32.totalorder %v9254_v61, 2 }
 0x181   :  { %v4386_v45 = vor.u32 4788187, %v4385_v32  ;;  %v4400_v35 = vadd.s32 3, %v4396_v22  ;;  %v934_v24 = vsel %vm932_vm1, %v933_v11, %v9309_v36  ;;  %v4389_v50 = vcvt.s32.f32 %v4382_v4 }
 0x182   :  { %v8176_v23 = vpop.eup %8175  ;;  %v4213_v18 = vadd.s32 1, %v7593_v25  ;;  %v935_v3 = vadd.s32 %v934_v24, %v930_v6  ;;  %v4210_v28 = vand.u32 8388607, %v4203_v42  ;;  %v1191_v33 = vshrl.u32 %v1190_v30, 23 }
 0x183   :  { %v8178_v49 = vpop.eup %8177  ;;  %v1079_v2 = vxor.u32 2147483648, %v8176_v23  ;;  %v4387_v15 = vand.u32 2147483647, %v4386_v45  ;;  %vm1071_vm4 = vweird.f32 %v9015_v7  ;;  %vm1074_vm5 = vcmp.lt.s32.totalorder %v9254_v61, 2 }
 0x184   :  { %v1076_v14 = vxor.u32 2147483648, %v8178_v49  ;;  %vm4214_vm3 = vcmp.gt.s32.totalorder %v4213_v18, 0  ;;  %v936_v19 = vadd.s32 536870912, %v935_v3  ;;  %v9340_v38 = vand.u32 3, %v4400_v35 }
 0x185   :  { %v1080_v16 = vsel %vm1078_vm2, %v1079_v2, %v8178_v49  ;;  %v4390_v39 = vmul.f32 %v4389_v50, %v4387_v15  ;;  %v4215_v40 = vsel %vm4214_vm3, %v4213_v18, 0  ;;  %v4211_v1 = vor.u32 8388608, %v4210_v28 }
 0x186   :  { %v1077_v5 = vsel %vm1075_vm0, %v8176_v23, %v1076_v14  ;;  %v4217_v31 = vand.u32 31, %v4215_v40  ;;  %v9342_v48 = vshrl.u32 %v936_v19, 30  ;;  %v1187_v62 = vand.u32 2147483647, %v9269_v43 }
 0x187   :  { %v1081_v21 = vsel %vm1074_vm5, %v1077_v5, %v1080_v16  ;;  %v4391_v56 = vxor.u32 2147483648, %v4390_v39  ;;  %v7477_v36 = vadd.s32 4294967169, %v1191_v33  ;;  %v931_v22 = vadd.s32 %v9308_v54, %v9314_v60 }
 0x188   :  { %v1082_v26 = vsel %vm1071_vm4, nan, %v1081_v21  ;;  %v4218_v12 = vsub.s32 32, %v4217_v31  ;;  %v938_v61 = vshll.u32 %v9342_v48, 30  ;;  %v4220_v44 = vshll.u32 %v8425_v47, %v4217_v31 }
 0x189   :  { %7327 = vst.msk [vmem:[%s14271_s3 + $0x18] sm:$0xff] %vm7323_vm14, %v1082_v26  ;;  %v4392_v7 = vsel %vm4309_vm8, %v4391_v56, %v4390_v39  ;;  %v4223_v52 = vshll.u32 %v8426_v51, %v4217_v31  ;;  %v4226_v4 = vshll.u32 %v8427_v53, %v4217_v31  ;;  %v4216_v11 = vshrl.u32 %v4215_v40, 5 }
 0x18a   :  { %v4395_v10 = vsel %vm9318_vm15, %v9076_v46, %v4392_v7  ;;  %v4221_v58 = vshrl.u32 %v8426_v51, %v4218_v12  ;;  %v4224_v20 = vshrl.u32 %v8427_v53, %v4218_v12  ;;  %v9359_v29 = vsub.s32 %v935_v3, %v938_v61 }
 0x18b   :  { %8179 = vcosq.f32 %v4395_v10  ;;  %v4227_v32 = vshrl.u32 %v8428_v55, %v4218_v12  ;;  %v9365_v9 = vshll.u32 %v4211_v1, 8  ;;  %v4229_v23 = vshll.u32 %v8428_v55, %v4217_v31 }
 0x18c   :  { %8181 = vsinq.f32 %v4395_v10  ;;  %v941_v25 = vsub.s32 0, %v9359_v29  ;;  %v4222_v30 = vor.u32 %v4221_v58, %v4220_v44  ;;  %v4225_v45 = vor.u32 %v4224_v20, %v4223_v52  ;;  %v9395_v20 = vpop.f32.mrb[7].mxu0 }
 0x18d   :  { %v4228_v6 = vor.u32 %v4227_v32, %v4226_v4  ;;  %v4230_v35 = vshrl.u32 %v8429_v57, %v4218_v12  ;;  %v4232_v24 = vshll.u32 %v8429_v57, %v4217_v31  ;;  %v4233_v18 = vshrl.u32 %v8430_v0, %v4218_v12 }
 0x18e   :  { %vm4406_vm6 = vcmp.eq.s32.totalorder %v9340_v38, 2  ;;  %v7466_v54 = vmin.u32 %v941_v25, %v9359_v29  ;;  %v961_v60 = vsub.s32 4, %v9342_v48  ;;  %v9377_v49 = vand.u32 8388607, %v1187_v62 }
 0x18f   :  { %v1197_v2 = vadd.s32 1, %v7477_v36  ;;  %vm4403_vm7 = vcmp.eq.s32.totalorder %v9340_v38, 0  ;;  %v4219_v15 = vshrl.u32 %v8425_v47, %v4218_v12  ;;  %v4231_v50 = vor.u32 %v4230_v35, %v4229_v23 }
 0x190   :  { %v4234_v3 = vor.u32 %v4233_v18, %v4232_v24  ;;  %vm4235_vm8 = vcmp.lt.s32.totalorder %v4216_v11, 1  ;;  %vm4402_vm9 = vcmp.lt.s32.totalorder %v9340_v38, 2  ;;  %vm877_vm10 = vcmp.lt.s32.totalorder %v9085_v63, 0 }
 0x191   :  { %v943_v14 = vclz %v7466_v54  ;;  %vm4236_vm11 = vcmp.lt.s32.totalorder %v4216_v11, 2  ;;  %vm4237_vm12 = vcmp.lt.s32.totalorder %v4216_v11, 3  ;;  %vm4238_vm13 = vcmp.lt.s32.totalorder %v4216_v11, 4 }
 0x192   :  { %vm4399_vm15 = vweird.f32 %v9076_v46  ;;  %v4240_v28 = vsel %vm4238_vm13, %v4228_v6, 2102212464  ;;  %v4243_v33 = vsel %vm4235_vm8, %v4222_v30, %v4225_v45  ;;  %v4244_v16 = vsel %vm4238_vm13, %v4231_v50, 920167782 }
 0x193   :  { %v4247_v39 = vsel %vm4235_vm8, %v4225_v45, %v4228_v6  ;;  %v7467_v19 = vadd.s32 4294967294, %v943_v14  ;;  %v4239_v40 = vsel %vm4235_vm8, %v4219_v15, %v4222_v30  ;;  %v4245_v5 = vsel %vm4237_vm12, %v4228_v6, %v4244_v16 }
 0x194   :  { %v4248_v31 = vsel %vm4238_vm13, %v4234_v3, 1326507024  ;;  %v4241_v21 = vsel %vm4237_vm12, %v4225_v45, %v4240_v28  ;;  %v4246_v56 = vsel %vm4236_vm11, %v4243_v33, %v4245_v5  ;;  %vm1198_vm0 = vcmp.gt.s32.totalorder %v1197_v2, 0 }
 0x195   :  { %v4249_v26 = vsel %vm4237_vm12, %v4231_v50, %v4248_v31  ;;  %v8180_v1 = vpop.eup %8179  ;;  %vm7468_vm1 = vcmp.lt.s32.totalorder %v7467_v19, 0  ;;  %v9387_v7 = vmul.u32.u64.low %v9365_v9, %v4246_v56  ;;  %v9388_v61 = vmul.u32.u64.high %v9365_v9, %v4246_v56, %v9387_v7 }
 0x196   :  { %v4250_v12 = vsel %vm4236_vm11, %v4247_v39, %v4249_v26  ;;  %v8182_v44 = vpop.eup %8181  ;;  %v4407_v36 = vxor.u32 2147483648, %v8180_v1  ;;  %v946_v10 = vsel %vm7468_vm1, 0, %v7467_v19  ;;  %v4242_v30 = vsel %vm4236_vm11, %v4239_v40, %v4241_v21 }
 0x197   :  { %v9392_v58 = vmul.u32.u64.low %v9365_v9, %v4250_v12  ;;  %v9393_v52 = vmul.u32.u64.high %v9365_v9, %v4250_v12, %v9392_v58  ;;  %v4404_v4 = vxor.u32 2147483648, %v8182_v44  ;;  %v947_v32 = vsub.s32 32, %v946_v10 }
 0x198   :  { %v951_v25 = vsub.s32 4294967266, %v946_v10  ;;  %v4408_v45 = vsel %vm4406_vm6, %v4407_v36, %v8182_v44  ;;  %v948_v6 = vshll.u32 %v9359_v29, %v946_v10  ;;  %v1195_v23 = vor.u32 8388608, %v9377_v49 }
 0x199   :  { %v1199_v35 = vsel %vm1198_vm0, %v1197_v2, 0  ;;  %v4405_v24 = vsel %vm4403_vm7, %v8180_v1, %v4404_v4  ;;  %v949_v18 = vshrl.u32 %v931_v22, %v947_v32  ;;  %v4261_v15 = vadd.s32 1, %v9388_v61 }
 0x19a   :  { %v952_v54 = vadd.s32 127, %v951_v25  ;;  %v4409_v11 = vsel %vm4402_vm9, %v4405_v24, %v4408_v45  ;;  %v962_v50 = vsel %vm877_vm10, %v961_v60, %v9342_v48  ;;  %v4258_v29 = vmul.u32 %v9365_v9, %v4242_v30 }
 0x19b   :  { %vm4260_vm2 = vc.u32 %v9393_v52, %v9387_v7  ;;  %v4410_v49 = vsel %vm4399_vm15, nan, %v4409_v11  ;;  %v950_v2 = vor.u32 %v949_v18, %v948_v6  ;;  %vm9423_vm3 = vcmp.le.f32.partialorder %v875_v41, 0.7853982 }
 0x19c   :  { %v953_v22 = vshll.u32 %v952_v54, 23  ;;  %v4262_v3 = vsel %vm4260_vm2, %v4261_v15, %v9388_v61  ;;  %7359 = vst.msk [vmem:[%s14271_s3 + $0x118] sm:$0xff] %vm7323_vm14, %v4410_v49  ;;  %v1201_v9 = vand.u32 31, %v1199_v35  ;;  %v964_v46 = vsel %vm9423_vm3, 0, %v962_v50 }
 0x19d   :  { %v4263_v48 = vadd.s32 %v4262_v3, %v4258_v29  ;;  %v9429_v14 = vshll.u32 %v1195_v23, 8  ;;  %v957_v28 = vcvt.s32.f32 %v950_v2  ;;  %v9431_v16 = vshrl.u32 %v1199_v35, 5 }
 0x19e   :  { %v954_v60 = vor.u32 4788187, %v953_v22  ;;  %v1202_v39 = vsub.s32 32, %v1201_v9  ;;  %v1204_v40 = vshll.u32 %v8425_v47, %v1201_v9  ;;  %v1207_v41 = vshll.u32 %v8426_v51, %v1201_v9 }
 0x19f   :  { %v4264_v33 = vadd.s32 536870912, %v4263_v48  ;;  %v1210_v5 = vshll.u32 %v8427_v53, %v1201_v9  ;;  %v1213_v26 = vshll.u32 %v8428_v55, %v1201_v9  ;;  %v968_v36 = vadd.s32 3, %v964_v46 }
 0x1a0   :  { %v955_v19 = vand.u32 2147483647, %v954_v60  ;;  %v1205_v21 = vshrl.u32 %v8426_v51, %v1202_v39  ;;  %v1208_v56 = vshrl.u32 %v8427_v53, %v1202_v39  ;;  %v1211_v12 = vshrl.u32 %v8428_v55, %v1202_v39 }
 0x1a1   :  { %v4265_v31 = vshrl.u32 %v4264_v33, 30  ;;  %v1214_v61 = vshrl.u32 %v8429_v57, %v1202_v39  ;;  %v1217_v44 = vshrl.u32 %v8430_v0, %v1202_v39  ;;  %v1216_v45 = vshll.u32 %v8429_v57, %v1201_v9 }
 0x1a2   :  { %v958_v1 = vmul.f32 %v957_v28, %v955_v19  ;;  %v1206_v58 = vor.u32 %v1205_v21, %v1204_v40  ;;  %v1209_v4 = vor.u32 %v1208_v56, %v1207_v41  ;;  %v1212_v25 = vor.u32 %v1211_v12, %v1210_v5  ;;  %v9480_v28 = vpop.f32.mrb[7].mxu1 }
 0x1a3   :  { %v4266_v10 = vshll.u32 %v4265_v31, 30  ;;  %v1215_v30 = vor.u32 %v1214_v61, %v1213_v26  ;;  %vm1219_vm4 = vcmp.lt.s32.totalorder %v9431_v16, 1  ;;  %vm1222_vm5 = vcmp.lt.s32.totalorder %v9431_v16, 4 }
 0x1a4   :  { %v959_v32 = vxor.u32 2147483648, %v958_v1  ;;  %v9449_v23 = vadd.f32 %v9261_v59, %v8915_v17  ;;  %v1218_v24 = vor.u32 %v1217_v44, %v1216_v45  ;;  %v1227_v18 = vsel %vm1219_vm4, %v1206_v58, %v1209_v4 }
 0x1a5   :  { %v9443_v6 = vsub.s32 %v4263_v48, %v4266_v10  ;;  %v1228_v54 = vsel %vm1222_vm5, %v1215_v30, 920167782  ;;  %vm1220_vm6 = vcmp.lt.s32.totalorder %v9431_v16, 2  ;;  %vm1221_vm7 = vcmp.lt.s32.totalorder %v9431_v16, 3 }
 0x1a6   :  { %v960_v35 = vsel %vm877_vm10, %v959_v32, %v958_v1  ;;  %v4289_v17 = vsub.s32 4, %v4265_v31  ;;  %v1203_v50 = vshrl.u32 %v8425_v47, %v1202_v39  ;;  %v1229_v29 = vsel %vm1221_vm7, %v1212_v25, %v1228_v54 }
 0x1a7   :  { %v963_v15 = vsel %vm9423_vm3, %v9085_v63, %v960_v35  ;;  %v4269_v11 = vsub.s32 0, %v9443_v6  ;;  %v1224_v2 = vsel %vm1222_vm5, %v1212_v25, 2102212464  ;;  %v1230_v22 = vsel %vm1220_vm6, %v1227_v18, %v1229_v29 }
 0x1a8   :  { %8183 = vcosq.f32 %v963_v15  ;;  %v1231_v3 = vsel %vm1219_vm4, %v1209_v4, %v1212_v25  ;;  %v1232_v38 = vsel %vm1222_vm5, %v1218_v24, 1326507024  ;;  %v969_v60 = vand.u32 3, %v968_v36 }
 0x1a9   :  { %8185 = vsinq.f32 %v963_v15  ;;  %v7594_v49 = vmin.u32 %v4269_v11, %v9443_v6  ;;  %v9476_v48 = vmul.u32.u64.low %v9429_v14, %v1230_v22  ;;  %v9477_v9 = vmul.u32.u64.high %v9429_v14, %v1230_v22, %v9476_v48 }
 0x1aa   :  { %v1223_v33 = vsel %vm1219_vm4, %v1203_v50, %v1206_v58  ;;  %v1225_v39 = vsel %vm1221_vm7, %v1209_v4, %v1224_v2  ;;  %v1233_v19 = vsel %vm1221_vm7, %v1215_v30, %v1232_v38  ;;  %v4518_v40 = vand.u32 2139095040, %v9449_v23 }
 0x1ab   :  { %v4271_v46 = vclz %v7594_v49  ;;  %vm9491_vm8 = vcmp.le.f32.partialorder %v4203_v42, 0.7853982  ;;  %vm4205_vm9 = vcmp.lt.s32.totalorder %v9265_v13, 0  ;;  %v1234_v21 = vsel %vm1220_vm6, %v1231_v3, %v1233_v19 }
 0x1ac   :  { %v4290_v56 = vsel %vm4205_vm9, %v4289_v17, %v4265_v31  ;;  %v9501_v26 = vmul.u32.u64.low %v9429_v14, %v1234_v21  ;;  %v9502_v1 = vmul.u32.u64.high %v9429_v14, %v1234_v21, %v9501_v26  ;;  %v4515_v12 = vand.u32 2147483647, %v9449_v23 }
 0x1ad   :  { %v7595_v5 = vadd.s32 4294967294, %v4271_v46  ;;  %vm967_vm10 = vweird.f32 %v9085_v63  ;;  %v1226_v42 = vsel %vm1220_vm6, %v1223_v33, %v1225_v39  ;;  %v1245_v61 = vadd.s32 1, %v9477_v9 }
 0x1ae   :  { %v4519_v44 = vshrl.u32 %v4518_v40, 23  ;;  %vm970_vm12 = vcmp.lt.s32.totalorder %v969_v60, 2  ;;  %vm974_vm13 = vcmp.eq.s32.totalorder %v969_v60, 2  ;;  %v4259_v31 = vadd.s32 %v9387_v7, %v9393_v52 }
 0x1af   :  { %vm7596_vm11 = vcmp.lt.s32.totalorder %v7595_v5, 0  ;;  %v4292_v4 = vsel %vm9491_vm8, 0, %v4290_v56  ;;  %v1242_v16 = vmul.u32 %v9429_v14, %v1226_v42  ;;  %vm1244_vm15 = vc.u32 %v9502_v1, %v9476_v48 }
 0x1b0   :  { %v4274_v36 = vsel %vm7596_vm11, 0, %v7595_v5  ;;  %v7605_v32 = vadd.s32 4294967169, %v4519_v44  ;;  %v4522_v45 = vand.u32 8388607, %v4515_v12  ;;  %v1246_v18 = vsel %vm1244_vm15, %v1245_v61, %v9477_v9 }
 0x1b1   :  { %v4275_v10 = vsub.s32 32, %v4274_v36  ;;  %v4279_v58 = vsub.s32 4294967266, %v4274_v36  ;;  %v4276_v30 = vshll.u32 %v9443_v6, %v4274_v36  ;;  %v1247_v15 = vadd.s32 %v1246_v18, %v1242_v16 }
 0x1b2   :  { %v8184_v25 = vpop.eup %8183  ;;  %v4525_v11 = vadd.s32 1, %v7605_v32  ;;  %v9522_v6 = vadd.f32 %v9261_v59, %v9047_v27  ;;  %vm971_vm0 = vcmp.eq.s32.totalorder %v969_v60, 0  ;;  %v4296_v49 = vadd.s32 3, %v4292_v4 }
 0x1b3   :  { %v8186_v35 = vpop.eup %8185  ;;  %v975_v7 = vxor.u32 2147483648, %v8184_v25  ;;  %v4277_v52 = vshrl.u32 %v4259_v31, %v4275_v10  ;;  %v4280_v24 = vadd.s32 127, %v4279_v58  ;;  %v1248_v2 = vadd.s32 536870912, %v1247_v15 }
 0x1b4   :  { %v972_v54 = vxor.u32 2147483648, %v8186_v35  ;;  %vm4526_vm1 = vcmp.gt.s32.totalorder %v4525_v11, 0  ;;  %v4523_v38 = vor.u32 8388608, %v4522_v45  ;;  %v1086_v39 = vand.u32 2139095040, %v9522_v6 }
 0x1b5   :  { %v976_v14 = vsel %vm974_vm13, %v975_v7, %v8186_v35  ;;  %v4278_v17 = vor.u32 %v4277_v52, %v4276_v30  ;;  %v4281_v50 = vshll.u32 %v4280_v24, 23  ;;  %v4527_v9 = vsel %vm4526_vm1, %v4525_v11, 0 }
 0x1b6   :  { %v973_v29 = vsel %vm971_vm0, %v8184_v25, %v972_v54  ;;  %v1249_v33 = vshrl.u32 %v1248_v2, 30  ;;  %v4529_v27 = vand.u32 31, %v4527_v9  ;;  %vm1189_vm2 = vcmp.lt.s32.totalorder %v9269_v43, 0 }
 0x1b7   :  { %v977_v22 = vsel %vm970_vm12, %v973_v29, %v976_v14  ;;  %v4282_v3 = vor.u32 4788187, %v4281_v50  ;;  %v4285_v40 = vcvt.s32.f32 %v4278_v17  ;;  %v9534_v60 = vand.u32 3, %v4296_v49 }
 0x1b8   :  { %v978_v46 = vsel %vm967_vm10, nan, %v977_v22  ;;  %vm9538_vm3 = vcmp.le.f32.partialorder %v1187_v62, 0.7853982  ;;  %v1250_v5 = vshll.u32 %v1249_v33, 30  ;;  %v4530_v21 = vsub.s32 32, %v4529_v27 }
 0x1b9   :  { %7326 = vst.msk [vmem:[%s14271_s3 + $0x10] sm:$0xff] %vm7323_vm14, %v978_v46  ;;  %v4283_v19 = vand.u32 2147483647, %v4282_v3  ;;  %v1083_v56 = vand.u32 2147483647, %v9522_v6  ;;  %v1243_v42 = vadd.s32 %v9476_v48, %v9502_v1  ;;  %v1273_v61 = vsub.s32 4, %v1249_v33 }
 0x1ba   :  { %v9545_v44 = vshll.u32 %v4523_v38, 8  ;;  %v9547_v31 = vsub.s32 %v1247_v15, %v1250_v5  ;;  %v9549_v36 = vshrl.u32 %v4527_v9, 5  ;;  %v4533_v62 = vshrl.u32 %v8426_v51, %v4530_v21 }
 0x1bb   :  { %v4286_v26 = vmul.f32 %v4285_v40, %v4283_v19  ;;  %v1087_v10 = vshrl.u32 %v1086_v39, 23  ;;  %v4532_v4 = vshll.u32 %v8425_v47, %v4529_v27  ;;  %v4536_v32 = vshrl.u32 %v8427_v53, %v4530_v21 }
 0x1bc   :  { %v4539_v25 = vshrl.u32 %v8428_v55, %v4530_v21  ;;  %v1253_v30 = vsub.s32 0, %v9547_v31  ;;  %v4535_v48 = vshll.u32 %v8426_v51, %v4529_v27  ;;  %v4538_v1 = vshll.u32 %v8427_v53, %v4529_v27 }
 0x1bd   :  { %v4287_v58 = vxor.u32 2147483648, %v4286_v26  ;;  %v4542_v16 = vshrl.u32 %v8429_v57, %v4530_v21  ;;  %v1274_v35 = vsel %vm1189_vm2, %v1273_v61, %v1249_v33  ;;  %v4534_v7 = vor.u32 %v4533_v62, %v4532_v4 }
 0x1be   :  { %v4541_v52 = vshll.u32 %v8428_v55, %v4529_v27  ;;  %v7478_v18 = vmin.u32 %v1253_v30, %v9547_v31  ;;  %v4537_v54 = vor.u32 %v4536_v32, %v4535_v48  ;;  %v4540_v15 = vor.u32 %v4539_v25, %v4538_v1 }
 0x1bf   :  { %v4288_v45 = vsel %vm4205_vm9, %v4287_v58, %v4286_v26  ;;  %v4544_v14 = vshll.u32 %v8429_v57, %v4529_v27  ;;  %v4545_v17 = vshrl.u32 %v8430_v0, %v4530_v21  ;;  %v7473_v29 = vadd.s32 4294967169, %v1087_v10 }
 0x1c0   :  { %v4291_v24 = vsel %vm9491_vm8, %v9265_v13, %v4288_v45  ;;  %v4543_v11 = vor.u32 %v4542_v16, %v4541_v52  ;;  %v1255_v50 = vclz %v7478_v18  ;;  %v9572_v49 = vand.u32 8388607, %v1083_v56  ;;  %v9603_v45 = vpop.f32.mrb[8].mxu0 }
 0x1c1   :  { %8187 = vcosq.f32 %v4291_v24  ;;  %v1276_v41 = vsel %vm9538_vm3, 0, %v1274_v35  ;;  %v4531_v2 = vshrl.u32 %v8425_v47, %v4530_v21  ;;  %v4546_v22 = vor.u32 %v4545_v17, %v4544_v14 }
 0x1c2   :  { %8189 = vsinq.f32 %v4291_v24  ;;  %vm4547_vm4 = vcmp.lt.s32.totalorder %v9549_v36, 1  ;;  %v7479_v3 = vadd.s32 4294967294, %v1255_v50  ;;  %vm4549_vm5 = vcmp.lt.s32.totalorder %v9549_v36, 3 }
 0x1c3   :  { %vm4550_vm6 = vcmp.lt.s32.totalorder %v9549_v36, 4  ;;  %v4555_v38 = vsel %vm4547_vm4, %v4534_v7, %v4537_v54  ;;  %v4559_v33 = vsel %vm4547_vm4, %v4537_v54, %v4540_v15  ;;  %vm4548_vm8 = vcmp.lt.s32.totalorder %v9549_v36, 2 }
 0x1c4   :  { %v4552_v9 = vsel %vm4550_vm6, %v4540_v15, 2102212464  ;;  %v4556_v46 = vsel %vm4550_vm6, %v4543_v11, 920167782  ;;  %v4560_v27 = vsel %vm4550_vm6, %v4546_v22, 1326507024  ;;  %v4551_v5 = vsel %vm4547_vm4, %v4531_v2, %v4534_v7 }
 0x1c5   :  { %vm7480_vm7 = vcmp.lt.s32.totalorder %v7479_v3, 0  ;;  %v4557_v39 = vsel %vm4549_vm5, %v4540_v15, %v4556_v46  ;;  %v4561_v19 = vsel %vm4549_vm5, %v4543_v11, %v4560_v27  ;;  %vm4298_vm9 = vcmp.lt.s32.totalorder %v9534_v60, 2 }
 0x1c6   :  { %v1258_v40 = vsel %vm7480_vm7, 0, %v7479_v3  ;;  %v4558_v21 = vsel %vm4548_vm8, %v4555_v38, %v4557_v39  ;;  %v4562_v26 = vsel %vm4548_vm8, %v4559_v33, %v4561_v19  ;;  %vm4295_vm10 = vweird.f32 %v9265_v13 }
 0x1c7   :  { %v1259_v61 = vsub.s32 32, %v1258_v40  ;;  %v1263_v62 = vsub.s32 4294967266, %v1258_v40  ;;  %v4553_v10 = vsel %vm4549_vm5, %v4537_v54, %v4552_v9  ;;  %v1093_v58 = vadd.s32 1, %v7473_v29 }
 0x1c8   :  { %v9594_v4 = vmul.u32.u64.low %v9545_v44, %v4562_v26  ;;  %v9595_v32 = vmul.u32.u64.high %v9545_v44, %v4562_v26, %v9594_v4  ;;  %v9598_v25 = vmul.u32.u64.low %v9545_v44, %v4558_v21  ;;  %v9599_v30 = vmul.u32.u64.high %v9545_v44, %v4558_v21, %v9598_v25 }
 0x1c9   :  { %v1260_v48 = vshll.u32 %v9547_v31, %v1258_v40  ;;  %v1261_v1 = vshrl.u32 %v1243_v42, %v1259_v61  ;;  %v1264_v16 = vadd.s32 127, %v1263_v62  ;;  %vm1094_vm11 = vcmp.gt.s32.totalorder %v1093_v58, 0 }
 0x1ca   :  { %vm4299_vm12 = vcmp.eq.s32.totalorder %v9534_v60, 0  ;;  %vm4302_vm13 = vcmp.eq.s32.totalorder %v9534_v60, 2  ;;  %v4554_v7 = vsel %vm4548_vm8, %v4551_v5, %v4553_v10  ;;  %v1095_v52 = vsel %vm1094_vm11, %v1093_v58, 0 }
 0x1cb   :  { %v8188_v35 = vpop.eup %8187  ;;  %v1262_v54 = vor.u32 %v1261_v1, %v1260_v48  ;;  %v1265_v15 = vshll.u32 %v1264_v16, 23  ;;  %v1091_v31 = vor.u32 8388608, %v9572_v49  ;;  %v1280_v11 = vadd.s32 3, %v1276_v41 }
 0x1cc   :  { %v8190_v24 = vpop.eup %8189  ;;  %v4303_v18 = vxor.u32 2147483648, %v8188_v35  ;;  %vm4572_vm15 = vc.u32 %v9595_v32, %v9598_v25  ;;  %v4573_v14 = vadd.s32 1, %v9599_v30  ;;  %v4570_v29 = vmul.u32 %v9545_v44, %v4554_v7 }
 0x1cd   :  { %v4300_v42 = vxor.u32 2147483648, %v8190_v24  ;;  %v1266_v50 = vor.u32 4788187, %v1265_v15  ;;  %v1097_v36 = vand.u32 31, %v1095_v52  ;;  %v1269_v22 = vcvt.s32.f32 %v1262_v54 }
 0x1ce   :  { %v4304_v17 = vsel %vm4302_vm13, %v4303_v18, %v8190_v24  ;;  %v4574_v3 = vsel %vm4572_vm15, %v4573_v14, %v9599_v30  ;;  %v9619_v49 = vadd.f32 %v9261_v59, %v9117_v34  ;;  %v9625_v33 = vand.u32 3, %v1280_v11 }
 0x1cf   :  { %v4301_v2 = vsel %vm4299_vm12, %v8188_v35, %v4300_v42  ;;  %v1267_v38 = vand.u32 2147483647, %v1266_v50  ;;  %v4575_v9 = vadd.s32 %v4574_v3, %v4570_v29  ;;  %v1098_v46 = vsub.s32 32, %v1097_v36 }
 0x1d0   :  { %v4305_v41 = vsel %vm4298_vm9, %v4301_v2, %v4304_v17  ;;  %v1096_v27 = vshrl.u32 %v1095_v52, 5  ;;  %v1100_v39 = vshll.u32 %v8425_v47, %v1097_v36  ;;  %v1103_v40 = vshll.u32 %v8426_v51, %v1097_v36 }
 0x1d1   :  { %v4306_v44 = vsel %vm4295_vm10, nan, %v4305_v41  ;;  %v1270_v34 = vmul.f32 %v1269_v22, %v1267_v38  ;;  %v4576_v19 = vadd.s32 536870912, %v4575_v9  ;;  %v1101_v60 = vshrl.u32 %v8426_v51, %v1098_v46 }
 0x1d2   :  { %7358 = vst.msk [vmem:[%s14271_s3 + $0x110] sm:$0xff] %vm7323_vm14, %v4306_v44  ;;  %v1104_v5 = vshrl.u32 %v8427_v53, %v1098_v46  ;;  %v1106_v13 = vshll.u32 %v8427_v53, %v1097_v36  ;;  %v1107_v21 = vshrl.u32 %v8428_v55, %v1098_v46  ;;  %v1110_v26 = vshrl.u32 %v8429_v57, %v1098_v46 }
 0x1d3   :  { %v1271_v61 = vxor.u32 2147483648, %v1270_v34  ;;  %v4577_v62 = vshrl.u32 %v4576_v19, 30  ;;  %v1102_v10 = vor.u32 %v1101_v60, %v1100_v39  ;;  %v1109_v58 = vshll.u32 %v8428_v55, %v1097_v36 }
 0x1d4   :  { %v1105_v4 = vor.u32 %v1104_v5, %v1103_v40  ;;  %v1108_v30 = vor.u32 %v1107_v21, %v1106_v13  ;;  %v1112_v48 = vshll.u32 %v8429_v57, %v1097_v36  ;;  %v1113_v1 = vshrl.u32 %v8430_v0, %v1098_v46 }
 0x1d5   :  { %v1272_v16 = vsel %vm1189_vm2, %v1271_v61, %v1270_v34  ;;  %v4578_v35 = vshll.u32 %v4577_v62, 30  ;;  %v1111_v7 = vor.u32 %v1110_v26, %v1109_v58  ;;  %v9643_v52 = vshll.u32 %v1091_v31, 8 }
 0x1d6   :  { %v1275_v24 = vsel %vm9538_vm3, %v9269_v43, %v1272_v16  ;;  %v1114_v18 = vor.u32 %v1113_v1, %v1112_v48  ;;  %vm1115_vm0 = vcmp.lt.s32.totalorder %v1096_v27, 1  ;;  %v4414_v54 = vand.u32 2139095040, %v9619_v49 }
 0x1d7   :  { %8191 = vcosq.f32 %v1275_v24  ;;  %v9649_v15 = vsub.s32 %v4575_v9, %v4578_v35  ;;  %vm1116_vm1 = vcmp.lt.s32.totalorder %v1096_v27, 2  ;;  %vm1118_vm4 = vcmp.lt.s32.totalorder %v1096_v27, 4 }
 0x1d8   :  { %8193 = vsinq.f32 %v1275_v24  ;;  %v1099_v42 = vshrl.u32 %v8425_v47, %v1098_v46  ;;  %v1120_v11 = vsel %vm1118_vm4, %v1108_v30, 2102212464  ;;  %v1123_v31 = vsel %vm1115_vm0, %v1102_v10, %v1105_v4 }
 0x1d9   :  { %v4581_v14 = vsub.s32 0, %v9649_v15  ;;  %v4601_v17 = vsub.s32 4, %v4577_v62  ;;  %vm1117_vm2 = vcmp.lt.s32.totalorder %v1096_v27, 3  ;;  %v1124_v63 = vsel %vm1118_vm4, %v1111_v7, 920167782  ;;  %v9683_v27 = vpop.f32.mrb[8].mxu1 }
 0x1da   :  { %v1119_v50 = vsel %vm1115_vm0, %v1099_v42, %v1102_v10  ;;  %v1125_v29 = vsel %vm1117_vm2, %v1108_v30, %v1124_v63  ;;  %v1127_v36 = vsel %vm1115_vm0, %v1105_v4, %v1108_v30  ;;  %v1128_v2 = vsel %vm1118_vm4, %v1114_v18, 1326507024 }
 0x1db   :  { %v7606_v22 = vmin.u32 %v4581_v14, %v9649_v15  ;;  %v1121_v3 = vsel %vm1117_vm2, %v1105_v4, %v1120_v11  ;;  %v1126_v41 = vsel %vm1116_vm1, %v1123_v31, %v1125_v29  ;;  %v1129_v38 = vsel %vm1117_vm2, %v1111_v7, %v1128_v2 }
 0x1dc   :  { %vm4517_vm3 = vcmp.lt.s32.totalorder %v9449_v23, 0  ;;  %v1130_v9 = vsel %vm1116_vm1, %v1127_v36, %v1129_v38  ;;  %v9661_v46 = vmul.u32.u64.low %v9643_v52, %v1126_v41  ;;  %v9662_v44 = vmul.u32.u64.high %v9643_v52, %v1126_v41, %v9661_v46 }
 0x1dd   :  { %v4583_v39 = vclz %v7606_v22  ;;  %v4602_v34 = vsel %vm4517_vm3, %v4601_v17, %v4577_v62  ;;  %v4411_v19 = vand.u32 2147483647, %v9619_v49  ;;  %v1122_v60 = vsel %vm1116_vm1, %v1119_v50, %v1121_v3 }
 0x1de   :  { %v9669_v40 = vmul.u32.u64.low %v9643_v52, %v1130_v9  ;;  %v9670_v5 = vmul.u32.u64.high %v9643_v52, %v1130_v9, %v9669_v40  ;;  %v4415_v13 = vshrl.u32 %v4414_v54, 23  ;;  %vm1282_vm5 = vcmp.lt.s32.totalorder %v9625_v33, 2 }
 0x1df   :  { %vm9675_vm6 = vcmp.le.f32.partialorder %v4515_v12, 0.7853982  ;;  %v7607_v26 = vadd.s32 4294967294, %v4583_v39  ;;  %v9681_v61 = vadd.f32 %v9261_v59, %v9247_v37  ;;  %vm1283_vm7 = vcmp.eq.s32.totalorder %v9625_v33, 0 }
 0x1e0   :  { %vm1286_vm8 = vcmp.eq.s32.totalorder %v9625_v33, 2  ;;  %v1141_v62 = vadd.s32 1, %v9662_v44  ;;  %v7601_v10 = vadd.s32 4294967169, %v4415_v13  ;;  %v4571_v12 = vadd.s32 %v9598_v25, %v9595_v32 }
 0x1e1   :  { %v8192_v58 = vpop.eup %8191  ;;  %vm7608_vm9 = vcmp.lt.s32.totalorder %v7607_v26, 0  ;;  %v4604_v4 = vsel %vm9675_vm6, 0, %v4602_v34  ;;  %v1138_v37 = vmul.u32 %v9643_v52, %v1122_v60  ;;  %vm1140_vm10 = vc.u32 %v9670_v5, %v9661_v46 }
 0x1e2   :  { %v8194_v59 = vpop.eup %8193  ;;  %v1287_v30 = vxor.u32 2147483648, %v8192_v58  ;;  %v4586_v48 = vsel %vm7608_vm9, 0, %v7607_v26  ;;  %v4418_v1 = vand.u32 8388607, %v4411_v19  ;;  %v1398_v24 = vand.u32 2139095040, %v9681_v61 }
 0x1e3   :  { %v1284_v16 = vxor.u32 2147483648, %v8194_v59  ;;  %v4587_v35 = vsub.s32 32, %v4586_v48  ;;  %v4591_v7 = vsub.s32 4294967266, %v4586_v48  ;;  %v4588_v25 = vshll.u32 %v9649_v15, %v4586_v48 }
 0x1e4   :  { %v1288_v32 = vsel %vm1286_vm8, %v1287_v30, %v8194_v59  ;;  %v1142_v52 = vsel %vm1140_vm10, %v1141_v62, %v9662_v44  ;;  %v4421_v18 = vadd.s32 1, %v7601_v10  ;;  %vm1279_vm11 = vweird.f32 %v9269_v43 }
 0x1e5   :  { %v1285_v54 = vsel %vm1283_vm7, %v8192_v58, %v1284_v16  ;;  %v4589_v42 = vshrl.u32 %v4571_v12, %v4587_v35  ;;  %v4592_v11 = vadd.s32 127, %v4591_v7  ;;  %v1143_v31 = vadd.s32 %v1142_v52, %v1138_v37 }
 0x1e6   :  { %v1289_v14 = vsel %vm1282_vm5, %v1285_v54, %v1288_v32  ;;  %v4608_v17 = vadd.s32 3, %v4604_v4  ;;  %vm4422_vm12 = vcmp.gt.s32.totalorder %v4421_v18, 0  ;;  %v4419_v36 = vor.u32 8388608, %v4418_v1 }
 0x1e7   :  { %v1290_v63 = vsel %vm1279_vm11, nan, %v1289_v14  ;;  %v4590_v50 = vor.u32 %v4589_v42, %v4588_v25  ;;  %v4593_v29 = vshll.u32 %v4592_v11, 23  ;;  %v1144_v15 = vadd.s32 536870912, %v1143_v31 }
 0x1e8   :  { %7329 = vst.msk [vmem:[%s14271_s3 + $0x28] sm:$0xff] %vm7323_vm14, %v1290_v63  ;;  %v4423_v2 = vsel %vm4422_vm12, %v4421_v18, 0  ;;  %v1399_v41 = vshrl.u32 %v1398_v24, 23  ;;  %v9710_v9 = vand.u32 3, %v4608_v17  ;;  %vm1085_vm13 = vcmp.lt.s32.totalorder %v9522_v6, 0 }
 0x1e9   :  { %v4594_v22 = vor.u32 4788187, %v4593_v29  ;;  %v1145_v3 = vshrl.u32 %v1144_v15, 30  ;;  %v4425_v43 = vand.u32 31, %v4423_v2  ;;  %v4597_v33 = vcvt.s32.f32 %v4590_v50 }
 0x1ea   :  { %v9714_v39 = vadd.s32 %v9661_v46, %v9670_v5  ;;  %v9716_v60 = vshll.u32 %v4419_v36, 8  ;;  %v1395_v40 = vand.u32 2147483647, %v9681_v61  ;;  %v9721_v62 = vshrl.u32 %v4423_v2, 5 }
 0x1eb   :  { %v4595_v38 = vand.u32 2147483647, %v4594_v22  ;;  %v1146_v44 = vshll.u32 %v1145_v3, 30  ;;  %v4426_v34 = vsub.s32 32, %v4425_v43  ;;  %v7485_v10 = vadd.s32 4294967169, %v1399_v41 }
 0x1ec   :  { %v1169_v58 = vsub.s32 4, %v1145_v3  ;;  %v4428_v12 = vshll.u32 %v8425_v47, %v4425_v43  ;;  %vm9728_vm15 = vcmp.le.f32.partialorder %v1083_v56, 0.7853982  ;;  %v4431_v30 = vshll.u32 %v8426_v51, %v4425_v43 }
 0x1ed   :  { %v4598_v13 = vmul.f32 %v4597_v33, %v4595_v38  ;;  %v9719_v26 = vsub.s32 %v1143_v31, %v1146_v44  ;;  %v4429_v4 = vshrl.u32 %v8426_v51, %v4426_v34  ;;  %v4432_v37 = vshrl.u32 %v8427_v53, %v4426_v34  ;;  %v9768_v44 = vpop.f32.mrb[9].mxu0 }
 0x1ee   :  { %v4435_v48 = vshrl.u32 %v8428_v55, %v4426_v34  ;;  %v4434_v16 = vshll.u32 %v8427_v53, %v4425_v43  ;;  %v4437_v35 = vshll.u32 %v8428_v55, %v4425_v43  ;;  %v4438_v7 = vshrl.u32 %v8429_v57, %v4426_v34 }
 0x1ef   :  { %v4599_v46 = vxor.u32 2147483648, %v4598_v13  ;;  %v1149_v59 = vsub.s32 0, %v9719_v26  ;;  %v4430_v1 = vor.u32 %v4429_v4, %v4428_v12  ;;  %v4433_v32 = vor.u32 %v4432_v37, %v4431_v30 }
 0x1f0   :  { %v4440_v25 = vshll.u32 %v8429_v57, %v4425_v43  ;;  %v4436_v18 = vor.u32 %v4435_v48, %v4434_v16  ;;  %v4439_v54 = vor.u32 %v4438_v7, %v4437_v35  ;;  %v4441_v42 = vshrl.u32 %v8430_v0, %v4426_v34 }
 0x1f1   :  { %v4600_v24 = vsel %vm4517_vm3, %v4599_v46, %v4598_v13  ;;  %v7474_v56 = vmin.u32 %v1149_v59, %v9719_v26  ;;  %vm4443_vm0 = vcmp.lt.s32.totalorder %v9721_v62, 1  ;;  %v1405_v31 = vadd.s32 1, %v7485_v10 }
 0x1f2   :  { %v4603_v52 = vsel %vm9675_vm6, %v9449_v23, %v4600_v24  ;;  %v1170_v14 = vsel %vm1085_vm13, %v1169_v58, %v1145_v3  ;;  %v4427_v17 = vshrl.u32 %v8425_v47, %v4426_v34  ;;  %v4442_v63 = vor.u32 %v4441_v42, %v4440_v25 }
 0x1f3   :  { %8195 = vcosq.f32 %v4603_v52  ;;  %v1151_v11 = vclz %v7474_v56  ;;  %vm4445_vm1 = vcmp.lt.s32.totalorder %v9721_v62, 3  ;;  %vm4446_vm4 = vcmp.lt.s32.totalorder %v9721_v62, 4 }
 0x1f4   :  { %8197 = vsinq.f32 %v4603_v52  ;;  %v4451_v21 = vsel %vm4443_vm0, %v4430_v1, %v4433_v32  ;;  %v4448_v29 = vsel %vm4446_vm4, %v4436_v18, 2102212464  ;;  %v4452_v15 = vsel %vm4446_vm4, %v4439_v54, 920167782 }
 0x1f5   :  { %v7475_v50 = vadd.s32 4294967294, %v1151_v11  ;;  %v4455_v36 = vsel %vm4443_vm0, %v4433_v32, %v4436_v18  ;;  %v4456_v2 = vsel %vm4446_vm4, %v4442_v63, 1326507024  ;;  %vm4444_vm3 = vcmp.lt.s32.totalorder %v9721_v62, 2  ;;  %v9798_v62 = vld [vmem:[%s14270_s2] ss:$0 sm:$0xff] }
 0x1f6   :  { %v4453_v22 = vsel %vm4445_vm1, %v4436_v18, %v4452_v15  ;;  %v4457_v3 = vsel %vm4445_vm1, %v4439_v54, %v4456_v2  ;;  %vm4611_vm5 = vcmp.eq.s32.totalorder %v9710_v9, 0  ;;  %v1172_v43 = vsel %vm9728_vm15, 0, %v1170_v14 }
 0x1f7   :  { %vm7476_vm2 = vcmp.lt.s32.totalorder %v7475_v50, 0  ;;  %v4454_v38 = vsel %vm4444_vm3, %v4451_v21, %v4453_v22  ;;  %v4458_v33 = vsel %vm4444_vm3, %v4455_v36, %v4457_v3  ;;  %vm4610_vm6 = vcmp.lt.s32.totalorder %v9710_v9, 2 }
 0x1f8   :  { %v1154_v41 = vsel %vm7476_vm2, 0, %v7475_v50  ;;  %v4447_v10 = vsel %vm4443_vm0, %v4427_v17, %v4430_v1  ;;  %v4449_v58 = vsel %vm4445_vm1, %v4433_v32, %v4448_v29  ;;  %vm4607_vm7 = vweird.f32 %v9449_v23 }
 0x1f9   :  { %v1155_v34 = vsub.s32 32, %v1154_v41  ;;  %v1159_v13 = vsub.s32 4294967266, %v1154_v41  ;;  %v9777_v12 = vmul.u32.u64.low %v9716_v60, %v4458_v33  ;;  %v9778_v4 = vmul.u32.u64.high %v9716_v60, %v4458_v33, %v9777_v12 }
 0x1fa   :  { %v9781_v37 = vmul.u32.u64.low %v9716_v60, %v4454_v38  ;;  %v9782_v46 = vmul.u32.u64.high %v9716_v60, %v4454_v38, %v9781_v37  ;;  %v1156_v59 = vshll.u32 %v9719_v26, %v1154_v41  ;;  %vm1406_vm8 = vcmp.gt.s32.totalorder %v1405_v31, 0 }
 0x1fb   :  { %v1157_v30 = vshrl.u32 %v9714_v39, %v1155_v34  ;;  %v1160_v48 = vadd.s32 127, %v1159_v13  ;;  %v1176_v1 = vadd.s32 3, %v1172_v43  ;;  %v4450_v16 = vsel %vm4444_vm3, %v4447_v10, %v4449_v58 }
 0x1fc   :  { %v1402_v35 = vand.u32 8388607, %v1395_v40  ;;  %v1407_v7 = vsel %vm1406_vm8, %v1405_v31, 0  ;;  %vm4614_vm9 = vcmp.eq.s32.totalorder %v9710_v9, 2  ;;  %vm4468_vm10 = vc.u32 %v9778_v4, %v9781_v37 }
 0x1fd   :  { %v8196_v24 = vpop.eup %8195  ;;  %v1158_v56 = vor.u32 %v1157_v30, %v1156_v59  ;;  %v1161_v32 = vshll.u32 %v1160_v48, 23  ;;  %v1409_v25 = vand.u32 31, %v1407_v7  ;;  %v4469_v39 = vadd.s32 1, %v9782_v46 }
 0x1fe   :  { %v8198_v52 = vpop.eup %8197  ;;  %v4615_v26 = vxor.u32 2147483648, %v8196_v24  ;;  %v9802_v18 = vadd.f32 %v9798_v62, %v9299_v8  ;;  %v4466_v11 = vmul.u32 %v9716_v60, %v4450_v16  ;;  %v9805_v17 = vand.u32 3, %v1176_v1 }
 0x1ff   :  { %v4612_v54 = vxor.u32 2147483648, %v8198_v52  ;;  %v1162_v42 = vor.u32 4788187, %v1161_v32  ;;  %v1410_v31 = vsub.s32 32, %v1409_v25  ;;  %v4470_v63 = vsel %vm4468_vm10, %v4469_v39, %v9782_v46 }
 0x200   :  { %v4616_v14 = vsel %vm4614_vm9, %v4615_v26, %v8198_v52  ;;  %v1403_v50 = vor.u32 8388608, %v1402_v35  ;;  %v1165_v15 = vcvt.s32.f32 %v1158_v56  ;;  %v4471_v36 = vadd.s32 %v4470_v63, %v4466_v11 }
 0x201   :  { %v4613_v21 = vsel %vm4611_vm5, %v8196_v24, %v4612_v54  ;;  %v1163_v29 = vand.u32 2147483647, %v1162_v42  ;;  %v1412_v2 = vshll.u32 %v8425_v47, %v1409_v25  ;;  %v1413_v60 = vshrl.u32 %v8426_v51, %v1410_v31 }
 0x202   :  { %v4617_v8 = vsel %vm4610_vm6, %v4613_v21, %v4616_v14  ;;  %v1416_v22 = vshrl.u32 %v8427_v53, %v1410_v31  ;;  %v4472_v43 = vadd.s32 536870912, %v4471_v36  ;;  %v1419_v38 = vshrl.u32 %v8428_v55, %v1410_v31 }
 0x203   :  { %v4618_v3 = vsel %vm4607_vm7, nan, %v4617_v8  ;;  %v1166_v41 = vmul.f32 %v1165_v15, %v1163_v29  ;;  %v1408_v9 = vshrl.u32 %v1407_v7, 5  ;;  %v1415_v33 = vshll.u32 %v8426_v51, %v1409_v25 }
 0x204   :  { %7361 = vst.msk [vmem:[%s14271_s3 + $0x128] sm:$0xff] %vm7323_vm14, %v4618_v3  ;;  %v1418_v34 = vshll.u32 %v8427_v53, %v1409_v25  ;;  %v1422_v13 = vshrl.u32 %v8429_v57, %v1410_v31  ;;  %v4473_v58 = vshrl.u32 %v4472_v43, 30  ;;  %v1414_v23 = vor.u32 %v1413_v60, %v1412_v2 }
 0x205   :  { %v1167_v10 = vxor.u32 2147483648, %v1166_v41  ;;  %v1421_v12 = vshll.u32 %v8428_v55, %v1409_v25  ;;  %v1417_v46 = vor.u32 %v1416_v22, %v1415_v33  ;;  %v1424_v30 = vshll.u32 %v8429_v57, %v1409_v25  ;;  %v9847_v22 = vpop.f32.mrb[9].mxu1 }
 0x206   :  { %v1420_v59 = vor.u32 %v1419_v38, %v1418_v34  ;;  %v1425_v48 = vshrl.u32 %v8430_v0, %v1410_v31  ;;  %v4474_v16 = vshll.u32 %v4473_v58, 30  ;;  %v9830_v7 = vshll.u32 %v1403_v50, 8 }
 0x207   :  { %v1168_v1 = vsel %vm1085_vm13, %v1167_v10, %v1166_v41  ;;  %v1423_v35 = vor.u32 %v1422_v13, %v1421_v12  ;;  %v1411_v56 = vshrl.u32 %v8425_v47, %v1410_v31  ;;  %v4726_v52 = vand.u32 2139095040, %v9802_v18 }
 0x208   :  { %v1171_v24 = vsel %vm9728_vm15, %v9522_v6, %v1168_v1  ;;  %v1426_v32 = vor.u32 %v1425_v48, %v1424_v30  ;;  %v9837_v25 = vsub.s32 %v4471_v36, %v4474_v16  ;;  %vm1427_vm11 = vcmp.lt.s32.totalorder %v1408_v9, 1 }
 0x209   :  { %8199 = vcosq.f32 %v1171_v24  ;;  %vm1430_vm12 = vcmp.lt.s32.totalorder %v1408_v9, 4  ;;  %vm1428_vm13 = vcmp.lt.s32.totalorder %v1408_v9, 2  ;;  %v1435_v39 = vsel %vm1427_vm11, %v1414_v23, %v1417_v46 }
 0x20a   :  { %8201 = vsinq.f32 %v1171_v24  ;;  %v1432_v26 = vsel %vm1430_vm12, %v1420_v59, 2102212464  ;;  %v4477_v54 = vsub.s32 0, %v9837_v25  ;;  %v4497_v42 = vsub.s32 4, %v4473_v58 }
 0x20b   :  { %vm1429_vm0 = vcmp.lt.s32.totalorder %v1408_v9, 3  ;;  %v1436_v5 = vsel %vm1430_vm12, %v1423_v35, 920167782  ;;  %v1431_v11 = vsel %vm1427_vm11, %v1411_v56, %v1414_v23  ;;  %v1439_v31 = vsel %vm1427_vm11, %v1417_v46, %v1420_v59 }
 0x20c   :  { %v1437_v14 = vsel %vm1429_vm0, %v1420_v59, %v1436_v5  ;;  %v1440_v63 = vsel %vm1430_vm12, %v1426_v32, 1326507024  ;;  %v7602_v50 = vmin.u32 %v4477_v54, %v9837_v25  ;;  %v1433_v21 = vsel %vm1429_vm0, %v1417_v46, %v1432_v26 }
 0x20d   :  { %v1438_v29 = vsel %vm1428_vm13, %v1435_v39, %v1437_v14  ;;  %v1441_v15 = vsel %vm1429_vm0, %v1423_v35, %v1440_v63  ;;  %v4727_v60 = vshrl.u32 %v4726_v52, 23  ;;  %vm9851_vm15 = vcmp.le.f32.partialorder %v4411_v19, 0.7853982 }
 0x20e   :  { %v1442_v36 = vsel %vm1428_vm13, %v1439_v31, %v1441_v15  ;;  %v9844_v8 = vmul.u32.u64.low %v9830_v7, %v1438_v29  ;;  %v9845_v2 = vmul.u32.u64.high %v9830_v7, %v1438_v29, %v9844_v8  ;;  %vm4413_vm1 = vcmp.lt.s32.totalorder %v9619_v49, 0 }
 0x20f   :  { %v4479_v41 = vclz %v7602_v50  ;;  %vm1175_vm4 = vweird.f32 %v9522_v6  ;;  %v4498_v43 = vsel %vm4413_vm1, %v4497_v42, %v4473_v58  ;;  %v7613_v34 = vadd.s32 4294967169, %v4727_v60 }
 0x210   :  { %v9860_v38 = vmul.u32.u64.low %v9830_v7, %v1442_v36  ;;  %v9861_v33 = vmul.u32.u64.high %v9830_v7, %v1442_v36, %v9860_v38  ;;  %v1434_v10 = vsel %vm1428_vm13, %v1431_v11, %v1433_v21  ;;  %v4723_v19 = vand.u32 2147483647, %v9802_v18 }
 0x211   :  { %v7603_v13 = vadd.s32 4294967294, %v4479_v41  ;;  %v9867_v23 = vadd.f32 %v9798_v62, %v9395_v20  ;;  %vm1178_vm2 = vcmp.lt.s32.totalorder %v9805_v17, 2  ;;  %vm1179_vm3 = vcmp.eq.s32.totalorder %v9805_v17, 0 }
 0x212   :  { %v1453_v58 = vadd.s32 1, %v9845_v2  ;;  %v4733_v12 = vadd.s32 1, %v7613_v34  ;;  %vm1182_vm5 = vcmp.eq.s32.totalorder %v9805_v17, 2  ;;  %v4467_v9 = vadd.s32 %v9781_v37, %v9778_v4 }
 0x213   :  { %v8200_v46 = vpop.eup %8199  ;;  %vm7604_vm6 = vcmp.lt.s32.totalorder %v7603_v13, 0  ;;  %v4500_v59 = vsel %vm9851_vm15, 0, %v4498_v43  ;;  %v1450_v1 = vmul.u32 %v9830_v7, %v1434_v10  ;;  %vm1452_vm7 = vc.u32 %v9861_v33, %v9844_v8 }
 0x214   :  { %v8202_v30 = vpop.eup %8201  ;;  %v1183_v20 = vxor.u32 2147483648, %v8200_v46  ;;  %v4482_v48 = vsel %vm7604_vm6, 0, %v7603_v13  ;;  %v4730_v56 = vand.u32 8388607, %v4723_v19  ;;  %v1454_v37 = vsel %vm1452_vm7, %v1453_v58, %v9845_v2 }
 0x215   :  { %v1180_v16 = vxor.u32 2147483648, %v8202_v30  ;;  %v4483_v35 = vsub.s32 32, %v4482_v48  ;;  %v4487_v24 = vsub.s32 4294967266, %v4482_v48  ;;  %v4484_v4 = vshll.u32 %v9837_v25, %v4482_v48 }
 0x216   :  { %v1184_v32 = vsel %vm1182_vm5, %v1183_v20, %v8202_v30  ;;  %vm4734_vm8 = vcmp.gt.s32.totalorder %v4733_v12, 0  ;;  %v1455_v7 = vadd.s32 %v1454_v37, %v1450_v1  ;;  %v4504_v42 = vadd.s32 3, %v4500_v59 }
 0x217   :  { %v1181_v52 = vsel %vm1179_vm3, %v8200_v46, %v1180_v16  ;;  %v4485_v26 = vshrl.u32 %v4467_v9, %v4483_v35  ;;  %v4488_v39 = vadd.s32 127, %v4487_v24  ;;  %v4735_v5 = vsel %vm4734_vm8, %v4733_v12, 0 }
 0x218   :  { %v1185_v54 = vsel %vm1178_vm2, %v1181_v52, %v1184_v32  ;;  %v1291_v11 = vand.u32 2147483647, %v9867_v23  ;;  %v1456_v63 = vadd.s32 536870912, %v1455_v7  ;;  %v4731_v50 = vor.u32 8388608, %v4730_v56 }
 0x219   :  { %v1186_v14 = vsel %vm1175_vm4, nan, %v1185_v54  ;;  %v4486_v25 = vor.u32 %v4485_v26, %v4484_v4  ;;  %v4489_v31 = vshll.u32 %v4488_v39, 23  ;;  %v4737_v21 = vand.u32 31, %v4735_v5 }
 0x21a   :  { %7328 = vst.msk [vmem:[%s14271_s3 + $0x20] sm:$0xff] %vm7323_vm14, %v1186_v14  ;;  %v9894_v17 = vshrl.u32 %v1456_v63, 30  ;;  %v9896_v15 = vand.u32 3, %v4504_v42  ;;  %v1294_v2 = vand.u32 2139095040, %v9867_v23  ;;  %v9901_v6 = vand.u32 8388607, %v1291_v11 }
 0x21b   :  { %v4490_v29 = vor.u32 4788187, %v4489_v31  ;;  %v4738_v36 = vsub.s32 32, %v4737_v21  ;;  %v4493_v41 = vcvt.s32.f32 %v4486_v25  ;;  %v9904_v43 = vadd.s32 %v9844_v8, %v9861_v33 }
 0x21c   :  { %v1458_v38 = vshll.u32 %v9894_v17, 30  ;;  %v9910_v58 = vshll.u32 %v4731_v50, 8  ;;  %v4740_v9 = vshll.u32 %v8425_v47, %v4737_v21  ;;  %v4736_v30 = vshrl.u32 %v4735_v5, 5 }
 0x21d   :  { %v4491_v60 = vand.u32 2147483647, %v4490_v29  ;;  %v4741_v34 = vshrl.u32 %v8426_v51, %v4738_v36  ;;  %v4744_v13 = vshrl.u32 %v8427_v53, %v4738_v36  ;;  %v4747_v10 = vshrl.u32 %v8428_v55, %v4738_v36 }
 0x21e   :  { %v9912_v46 = vsub.s32 %v1455_v7, %v1458_v38  ;;  %v4750_v59 = vshrl.u32 %v8429_v57, %v4738_v36  ;;  %v4743_v8 = vshll.u32 %v8426_v51, %v4737_v21  ;;  %v4746_v33 = vshll.u32 %v8427_v53, %v4737_v21 }
 0x21f   :  { %v4494_v12 = vmul.f32 %v4493_v41, %v4491_v60  ;;  %v1295_v20 = vshrl.u32 %v1294_v2, 23  ;;  %v4742_v16 = vor.u32 %v4741_v34, %v4740_v9  ;;  %v4749_v35 = vshll.u32 %v8428_v55, %v4737_v21 }
 0x220   :  { %v1461_v1 = vsub.s32 0, %v9912_v46  ;;  %v4745_v24 = vor.u32 %v4744_v13, %v4743_v8  ;;  %v4748_v56 = vor.u32 %v4747_v10, %v4746_v33  ;;  %v4752_v32 = vshll.u32 %v8429_v57, %v4737_v21 }
 0x221   :  { %v4495_v48 = vxor.u32 2147483648, %v4494_v12  ;;  %v4753_v4 = vshrl.u32 %v8430_v0, %v4738_v36  ;;  %v4751_v26 = vor.u32 %v4750_v59, %v4749_v35  ;;  %v1299_v39 = vor.u32 8388608, %v9901_v6 }
 0x222   :  { %v7486_v52 = vmin.u32 %v1461_v1, %v9912_v46  ;;  %v4739_v54 = vshrl.u32 %v8425_v47, %v4738_v36  ;;  %v7481_v5 = vadd.s32 4294967169, %v1295_v20  ;;  %vm4755_vm9 = vcmp.lt.s32.totalorder %v4736_v30, 1  ;;  %v9945_v1 = vpop.f32.mrb[10].mxu0 }
 0x223   :  { %v4496_v37 = vsel %vm4413_vm1, %v4495_v48, %v4494_v12  ;;  %v4754_v42 = vor.u32 %v4753_v4, %v4752_v32  ;;  %vm4758_vm10 = vcmp.lt.s32.totalorder %v4736_v30, 4  ;;  %vm1397_vm11 = vcmp.lt.s32.totalorder %v9681_v61, 0 }
 0x224   :  { %v4499_v7 = vsel %vm9851_vm15, %v9619_v49, %v4496_v37  ;;  %v1463_v14 = vclz %v7486_v52  ;;  %vm4756_vm12 = vcmp.lt.s32.totalorder %v4736_v30, 2  ;;  %v4760_v25 = vsel %vm4758_vm10, %v4748_v56, 2102212464 }
 0x225   :  { %8203 = vcosq.f32 %v4499_v7  ;;  %v4763_v31 = vsel %vm4755_vm9, %v4742_v16, %v4745_v24  ;;  %vm4757_vm13 = vcmp.lt.s32.totalorder %v4736_v30, 3  ;;  %v4764_v50 = vsel %vm4758_vm10, %v4751_v26, 920167782 }
 0x226   :  { %8205 = vsinq.f32 %v4499_v7  ;;  %v7487_v63 = vadd.s32 4294967294, %v1463_v14  ;;  %v4767_v21 = vsel %vm4755_vm9, %v4745_v24, %v4748_v56  ;;  %v4759_v3 = vsel %vm4755_vm9, %v4739_v54, %v4742_v16 }
 0x227   :  { %v4765_v29 = vsel %vm4757_vm13, %v4748_v56, %v4764_v50  ;;  %v4768_v2 = vsel %vm4758_vm10, %v4754_v42, 1326507024  ;;  %v1301_v36 = vadd.s32 1, %v7481_v5  ;;  %v4761_v6 = vsel %vm4757_vm13, %v4745_v24, %v4760_v25 }
 0x228   :  { %vm7488_vm0 = vcmp.lt.s32.totalorder %v7487_v63, 0  ;;  %v4766_v60 = vsel %vm4756_vm12, %v4763_v31, %v4765_v29  ;;  %v4769_v41 = vsel %vm4757_vm13, %v4751_v26, %v4768_v2  ;;  %v1481_v59 = vsub.s32 4, %v9894_v17 }
 0x229   :  { %v1466_v38 = vsel %vm7488_vm0, 0, %v7487_v63  ;;  %v4770_v34 = vsel %vm4756_vm12, %v4767_v21, %v4769_v41  ;;  %v9934_v13 = vmul.u32.u64.low %v9910_v58, %v4766_v60  ;;  %v9935_v10 = vmul.u32.u64.high %v9910_v58, %v4766_v60, %v9934_v13 }
 0x22a   :  { %v1467_v12 = vsub.s32 32, %v1466_v38  ;;  %v1471_v9 = vsub.s32 4294967266, %v1466_v38  ;;  %vm1302_vm15 = vcmp.gt.s32.totalorder %v1301_v36, 0  ;;  %vm4503_vm1 = vweird.f32 %v9619_v49 }
 0x22b   :  { %v4762_v8 = vsel %vm4756_vm12, %v4759_v3, %v4761_v6  ;;  %v9942_v33 = vmul.u32.u64.low %v9910_v58, %v4770_v34  ;;  %v9943_v20 = vmul.u32.u64.high %v9910_v58, %v4770_v34, %v9942_v33  ;;  %v1303_v48 = vsel %vm1302_vm15, %v1301_v36, 0 }
 0x22c   :  { %v1468_v16 = vshll.u32 %v9912_v46, %v1466_v38  ;;  %v1469_v35 = vshrl.u32 %v9904_v43, %v1467_v12  ;;  %v1472_v24 = vadd.s32 127, %v1471_v9  ;;  %v1305_v56 = vand.u32 31, %v1303_v48 }
 0x22d   :  { %vm4506_vm4 = vcmp.lt.s32.totalorder %v9896_v15, 2  ;;  %vm4507_vm2 = vcmp.eq.s32.totalorder %v9896_v15, 0  ;;  %vm9953_vm3 = vcmp.le.f32.partialorder %v1395_v40, 0.7853982  ;;  %v4781_v32 = vadd.s32 1, %v9935_v10 }
 0x22e   :  { %vm4510_vm5 = vcmp.eq.s32.totalorder %v9896_v15, 2  ;;  %v1470_v46 = vor.u32 %v1469_v35, %v1468_v16  ;;  %v1473_v37 = vshll.u32 %v1472_v24, 23  ;;  %v1482_v43 = vsel %vm1397_vm11, %v1481_v59, %v9894_v17 }
 0x22f   :  { %v8204_v4 = vpop.eup %8203  ;;  %v4778_v7 = vmul.u32 %v9910_v58, %v4762_v8  ;;  %vm4780_vm6 = vc.u32 %v9943_v20, %v9934_v13  ;;  %v1306_v40 = vsub.s32 32, %v1305_v56  ;;  %v9966_v14 = vshll.u32 %v1299_v39, 8 }
 0x230   :  { %v8206_v52 = vpop.eup %8205  ;;  %v4511_v26 = vxor.u32 2147483648, %v8204_v4  ;;  %v1474_v42 = vor.u32 4788187, %v1473_v37  ;;  %v4782_v5 = vsel %vm4780_vm6, %v4781_v32, %v9935_v10  ;;  %v1484_v31 = vsel %vm9953_vm3, 0, %v1482_v43 }
 0x231   :  { %v4508_v54 = vxor.u32 2147483648, %v8206_v52  ;;  %v4783_v63 = vadd.s32 %v4782_v5, %v4778_v7  ;;  %v9972_v17 = vadd.f32 %v9798_v62, %v9480_v28  ;;  %v1477_v21 = vcvt.s32.f32 %v1470_v46 }
 0x232   :  { %v4512_v25 = vsel %vm4510_vm5, %v4511_v26, %v8206_v52  ;;  %v1475_v50 = vand.u32 2147483647, %v1474_v42  ;;  %v9976_v3 = vshrl.u32 %v1303_v48, 5  ;;  %v1309_v2 = vshrl.u32 %v8426_v51, %v1306_v40 }
 0x233   :  { %v4509_v58 = vsel %vm4507_vm2, %v8204_v4, %v4508_v54  ;;  %v4784_v29 = vadd.s32 536870912, %v4783_v63  ;;  %v1312_v36 = vshrl.u32 %v8427_v53, %v1306_v40  ;;  %v1308_v60 = vshll.u32 %v8425_v47, %v1305_v56 }
 0x234   :  { %v4513_v39 = vsel %vm4506_vm4, %v4509_v58, %v4512_v25  ;;  %v1478_v28 = vmul.f32 %v1477_v21, %v1475_v50  ;;  %v1315_v41 = vshrl.u32 %v8428_v55, %v1306_v40  ;;  %v1311_v38 = vshll.u32 %v8426_v51, %v1305_v56 }
 0x235   :  { %v4514_v6 = vsel %vm4503_vm1, nan, %v4513_v39  ;;  %v4785_v15 = vshrl.u32 %v4784_v29, 30  ;;  %v1314_v34 = vshll.u32 %v8427_v53, %v1305_v56  ;;  %v1318_v10 = vshrl.u32 %v8429_v57, %v1306_v40 }
 0x236   :  { %7360 = vst.msk [vmem:[%s14271_s3 + $0x120] sm:$0xff] %vm7323_vm14, %v4514_v6  ;;  %v1479_v12 = vxor.u32 2147483648, %v1478_v28  ;;  %v1317_v49 = vshll.u32 %v8428_v55, %v1305_v56  ;;  %v1320_v9 = vshll.u32 %v8429_v57, %v1305_v56  ;;  %v1321_v59 = vshrl.u32 %v8430_v0, %v1306_v40 }
 0x237   :  { %v1488_v8 = vadd.s32 3, %v1484_v31  ;;  %v4786_v33 = vshll.u32 %v4785_v15, 30  ;;  %v1310_v48 = vor.u32 %v1309_v2, %v1308_v60  ;;  %v1313_v16 = vor.u32 %v1312_v36, %v1311_v38 }
 0x238   :  { %v1480_v35 = vsel %vm1397_vm11, %v1479_v12, %v1478_v28  ;;  %v1316_v24 = vor.u32 %v1315_v41, %v1314_v34  ;;  %v1319_v32 = vor.u32 %v1318_v10, %v1317_v49  ;;  %v1322_v4 = vor.u32 %v1321_v59, %v1320_v9 }
 0x239   :  { %v1483_v46 = vsel %vm9953_vm3, %v9681_v61, %v1480_v35  ;;  %v10001_v37 = vsub.s32 %v4783_v63, %v4786_v33  ;;  %v1307_v56 = vshrl.u32 %v8425_v47, %v1306_v40  ;;  %v4622_v43 = vand.u32 2139095040, %v9972_v17 }
 0x23a   :  { %8207 = vcosq.f32 %v1483_v46  ;;  %vm1323_vm7 = vcmp.lt.s32.totalorder %v9976_v3, 1  ;;  %vm1324_vm8 = vcmp.lt.s32.totalorder %v9976_v3, 2  ;;  %vm1325_vm9 = vcmp.lt.s32.totalorder %v9976_v3, 3 }
 0x23b   :  { %8209 = vsinq.f32 %v1483_v46  ;;  %v4789_v52 = vsub.s32 0, %v10001_v37  ;;  %vm1326_vm10 = vcmp.lt.s32.totalorder %v9976_v3, 4  ;;  %v1331_v30 = vsel %vm1323_vm7, %v1310_v48, %v1313_v16 }
 0x23c   :  { %v1328_v26 = vsel %vm1326_vm10, %v1316_v24, 2102212464  ;;  %v1332_v7 = vsel %vm1326_vm10, %v1319_v32, 920167782  ;;  %v1335_v40 = vsel %vm1323_vm7, %v1313_v16, %v1316_v24  ;;  %v1336_v54 = vsel %vm1326_vm10, %v1322_v4, 1326507024 }
 0x23d   :  { %v7614_v42 = vmin.u32 %v4789_v52, %v10001_v37  ;;  %v4809_v5 = vsub.s32 4, %v4785_v15  ;;  %v1333_v25 = vsel %vm1325_vm9, %v1316_v24, %v1332_v7  ;;  %v1337_v31 = vsel %vm1325_vm9, %v1319_v32, %v1336_v54 }
 0x23e   :  { %v1489_v63 = vand.u32 3, %v1488_v8  ;;  %v1334_v58 = vsel %vm1324_vm8, %v1331_v30, %v1333_v25  ;;  %v1338_v50 = vsel %vm1324_vm8, %v1335_v40, %v1337_v31  ;;  %v4623_v21 = vshrl.u32 %v4622_v43, 23 }
 0x23f   :  { %vm4725_vm11 = vcmp.lt.s32.totalorder %v9802_v18, 0  ;;  %v4791_v39 = vclz %v7614_v42  ;;  %v1327_v29 = vsel %vm1323_vm7, %v1307_v56, %v1310_v48  ;;  %v1329_v2 = vsel %vm1325_vm9, %v1313_v16, %v1328_v26 }
 0x240   :  { %v10029_v36 = vmul.u32.u64.low %v9966_v14, %v1338_v50  ;;  %v10030_v6 = vmul.u32.u64.high %v9966_v14, %v1338_v50, %v10029_v36  ;;  %v10033_v28 = vmul.u32.u64.low %v9966_v14, %v1334_v58  ;;  %v10034_v60 = vmul.u32.u64.high %v9966_v14, %v1334_v58, %v10033_v28 }
 0x241   :  { %vm1487_vm12 = vweird.f32 %v9681_v61  ;;  %vm10040_vm13 = vcmp.le.f32.partialorder %v4723_v19, 0.7853982  ;;  %v7615_v38 = vadd.s32 4294967294, %v4791_v39  ;;  %v4810_v34 = vsel %vm4725_vm11, %v4809_v5, %v4785_v15 }
 0x242   :  { %v7609_v10 = vadd.s32 4294967169, %v4623_v21  ;;  %vm1490_vm0 = vcmp.lt.s32.totalorder %v1489_v63, 2  ;;  %vm1491_vm15 = vcmp.eq.s32.totalorder %v1489_v63, 0  ;;  %vm1494_vm1 = vcmp.eq.s32.totalorder %v1489_v63, 2 }
 0x243   :  { %v1330_v12 = vsel %vm1324_vm8, %v1327_v29, %v1329_v2  ;;  %v4779_v49 = vadd.s32 %v9934_v13, %v9943_v20  ;;  %vm7616_vm4 = vcmp.lt.s32.totalorder %v7615_v38, 0  ;;  %v4619_v19 = vand.u32 2147483647, %v9972_v17 }
 0x244   :  { %v4629_v9 = vadd.s32 1, %v7609_v10  ;;  %v8208_v59 = vpop.eup %8207  ;;  %v4794_v8 = vsel %vm7616_vm4, 0, %v7615_v38  ;;  %v4812_v33 = vsel %vm10040_vm13, 0, %v4810_v34  ;;  %vm1348_vm2 = vc.u32 %v10030_v6, %v10033_v28  ;;  %v10082_v38 = vpop.f32.mrb[10].mxu1 }
 0x245   :  { %v1349_v15 = vadd.s32 1, %v10034_v60  ;;  %v8210_v48 = vpop.eup %8209  ;;  %v1495_v3 = vxor.u32 2147483648, %v8208_v59  ;;  %v4795_v16 = vsub.s32 32, %v4794_v8  ;;  %v4799_v35 = vsub.s32 4294967266, %v4794_v8 }
 0x246   :  { %v1346_v13 = vmul.u32 %v9966_v14, %v1330_v12  ;;  %v1492_v20 = vxor.u32 2147483648, %v8210_v48  ;;  %v4796_v24 = vshll.u32 %v10001_v37, %v4794_v8  ;;  %vm4630_vm3 = vcmp.gt.s32.totalorder %v4629_v9, 0 }
 0x247   :  { %v1350_v32 = vsel %vm1348_vm2, %v1349_v15, %v10034_v60  ;;  %v1496_v4 = vsel %vm1494_vm1, %v1495_v3, %v8210_v48  ;;  %v4797_v46 = vshrl.u32 %v4779_v49, %v4795_v16  ;;  %v4800_v56 = vadd.s32 127, %v4799_v35 }
 0x248   :  { %v1351_v43 = vadd.s32 %v1350_v32, %v1346_v13  ;;  %v1493_v52 = vsel %vm1491_vm15, %v8208_v59, %v1492_v20  ;;  %v4816_v30 = vadd.s32 3, %v4812_v33  ;;  %v4626_v26 = vand.u32 8388607, %v4619_v19 }
 0x249   :  { %v4631_v7 = vsel %vm4630_vm3, %v4629_v9, 0  ;;  %v1497_v14 = vsel %vm1490_vm0, %v1493_v52, %v1496_v4  ;;  %v4798_v40 = vor.u32 %v4797_v46, %v4796_v24  ;;  %v4801_v54 = vshll.u32 %v4800_v56, 23 }
 0x24a   :  { %v1352_v37 = vadd.s32 536870912, %v1351_v43  ;;  %v1498_v42 = vsel %vm1487_vm12, nan, %v1497_v14  ;;  %v4633_v5 = vand.u32 31, %v4631_v7  ;;  %v4627_v58 = vor.u32 8388608, %v4626_v26 }
 0x24b   :  { %7331 = vst.msk [vmem:[%s14271_s3 + $0x38] sm:$0xff] %vm7323_vm14, %v1498_v42  ;;  %v4802_v25 = vor.u32 4788187, %v4801_v54  ;;  %v4805_v63 = vcvt.s32.f32 %v4798_v40  ;;  %v10072_v39 = vand.u32 3, %v4816_v30  ;;  %v10080_v60 = vadd.f32 %v9798_v62, %v9603_v45 }
 0x24c   :  { %v10070_v31 = vshrl.u32 %v1352_v37, 30  ;;  %v4634_v50 = vsub.s32 32, %v4633_v5  ;;  %v4636_v12 = vshll.u32 %v8425_v47, %v4633_v5  ;;  %v4632_v9 = vshrl.u32 %v4631_v7, 5 }
 0x24d   :  { %v4803_v21 = vand.u32 2147483647, %v4802_v25  ;;  %v4639_v59 = vshll.u32 %v8426_v51, %v4633_v5  ;;  %v4642_v8 = vshll.u32 %v8427_v53, %v4633_v5  ;;  %v10090_v33 = vshll.u32 %v4627_v58, 8 }
 0x24e   :  { %v1354_v29 = vshll.u32 %v10070_v31, 30  ;;  %v4637_v61 = vshrl.u32 %v8426_v51, %v4634_v50  ;;  %v4640_v2 = vshrl.u32 %v8427_v53, %v4634_v50  ;;  %v4643_v36 = vshrl.u32 %v8428_v55, %v4634_v50 }
 0x24f   :  { %v4806_v34 = vmul.f32 %v4805_v63, %v4803_v21  ;;  %v4646_v49 = vshrl.u32 %v8429_v57, %v4634_v50  ;;  %v4645_v3 = vshll.u32 %v8428_v55, %v4633_v5  ;;  %v4648_v13 = vshll.u32 %v8429_v57, %v4633_v5 }
 0x250   :  { %v10084_v10 = vsub.s32 %v1351_v43, %v1354_v29  ;;  %v4638_v48 = vor.u32 %v4637_v61, %v4636_v12  ;;  %v4641_v16 = vor.u32 %v4640_v2, %v4639_v59  ;;  %v4644_v35 = vor.u32 %v4643_v36, %v4642_v8 }
 0x251   :  { %v4807_v15 = vxor.u32 2147483648, %v4806_v34  ;;  %v4649_v20 = vshrl.u32 %v8430_v0, %v4634_v50  ;;  %vm1293_vm5 = vcmp.lt.s32.totalorder %v9867_v23, 0  ;;  %v4647_v4 = vor.u32 %v4646_v49, %v4645_v3 }
 0x252   :  { %v1357_v45 = vsub.s32 0, %v10084_v10  ;;  %v1606_v46 = vand.u32 2139095040, %v10080_v60  ;;  %v1377_v43 = vsub.s32 4, %v10070_v31  ;;  %v4635_v52 = vshrl.u32 %v8425_v47, %v4634_v50 }
 0x253   :  { %v4808_v24 = vsel %vm4725_vm11, %v4807_v15, %v4806_v34  ;;  %v4650_v30 = vor.u32 %v4649_v20, %v4648_v13  ;;  %vm4651_vm6 = vcmp.lt.s32.totalorder %v4632_v9, 1  ;;  %vm4654_vm7 = vcmp.lt.s32.totalorder %v4632_v9, 4 }
 0x254   :  { %v7482_v32 = vmin.u32 %v1357_v45, %v10084_v10  ;;  %v4811_v56 = vsel %vm10040_vm13, %v9802_v18, %v4808_v24  ;;  %vm10108_vm8 = vcmp.le.f32.partialorder %v1291_v11, 0.7853982  ;;  %vm4652_vm9 = vcmp.lt.s32.totalorder %v4632_v9, 2 }
 0x255   :  { %8211 = vcosq.f32 %v4811_v56  ;;  %v4656_v14 = vsel %vm4654_vm7, %v4644_v35, 2102212464  ;;  %v4659_v41 = vsel %vm4651_vm6, %v4638_v48, %v4641_v16  ;;  %vm4653_vm10 = vcmp.lt.s32.totalorder %v4632_v9, 3 }
 0x256   :  { %v1359_v26 = vclz %v7482_v32  ;;  %8213 = vsinq.f32 %v4811_v56  ;;  %v4660_v54 = vsel %vm4654_vm7, %v4647_v4, 920167782  ;;  %v4663_v37 = vsel %vm4651_vm6, %v4641_v16, %v4644_v35 }
 0x257   :  { %v4655_v42 = vsel %vm4651_vm6, %v4635_v52, %v4638_v48  ;;  %v4661_v5 = vsel %vm4653_vm10, %v4644_v35, %v4660_v54  ;;  %v4664_v25 = vsel %vm4654_vm7, %v4650_v30, 1326507024  ;;  %v1607_v58 = vshrl.u32 %v1606_v46, 23 }
 0x258   :  { %v7483_v40 = vadd.s32 4294967294, %v1359_v26  ;;  %v4657_v50 = vsel %vm4653_vm10, %v4641_v16, %v4656_v14  ;;  %v4662_v21 = vsel %vm4652_vm9, %v4659_v41, %v4661_v5  ;;  %v4665_v63 = vsel %vm4653_vm10, %v4647_v4, %v4664_v25 }
 0x259   :  { %vm4819_vm12 = vcmp.eq.s32.totalorder %v10072_v39, 0  ;;  %v4666_v29 = vsel %vm4652_vm9, %v4663_v37, %v4665_v63  ;;  %v10116_v61 = vmul.u32.u64.low %v10090_v33, %v4662_v21  ;;  %v10117_v2 = vmul.u32.u64.high %v10090_v33, %v4662_v21, %v10116_v61 }
 0x25a   :  { %vm7484_vm11 = vcmp.lt.s32.totalorder %v7483_v40, 0  ;;  %vm4818_vm13 = vcmp.lt.s32.totalorder %v10072_v39, 2  ;;  %v1347_v36 = vadd.s32 %v10033_v28, %v10030_v6  ;;  %v7493_v49 = vadd.s32 4294967169, %v1607_v58  ;;  %v10133_v28 = vpop.f32.mrb[11].mxu0 }
 0x25b   :  { %v1362_v11 = vsel %vm7484_vm11, 0, %v7483_v40  ;;  %vm4815_vm0 = vweird.f32 %v9802_v18  ;;  %v1378_v59 = vsel %vm1293_vm5, %v1377_v43, %v10070_v31  ;;  %v4658_v8 = vsel %vm4652_vm9, %v4655_v42, %v4657_v50 }
 0x25c   :  { %v1363_v34 = vsub.s32 32, %v1362_v11  ;;  %v1367_v12 = vsub.s32 4294967266, %v1362_v11  ;;  %v10129_v15 = vmul.u32.u64.low %v10090_v33, %v4666_v29  ;;  %v10130_v45 = vmul.u32.u64.high %v10090_v33, %v4666_v29, %v10129_v15 }
 0x25d   :  { %v1364_v48 = vshll.u32 %v10084_v10, %v1362_v11  ;;  %v1613_v6 = vadd.s32 1, %v7493_v49  ;;  %vm4822_vm15 = vcmp.eq.s32.totalorder %v10072_v39, 2  ;;  %v4677_v35 = vadd.s32 1, %v10117_v2 }
 0x25e   :  { %v1365_v3 = vshrl.u32 %v1347_v36, %v1363_v34  ;;  %v1368_v16 = vadd.s32 127, %v1367_v12  ;;  %v1603_v13 = vand.u32 2147483647, %v10080_v60  ;;  %v10140_v31 = vadd.f32 %v9798_v62, %v9683_v27 }
 0x25f   :  { %v8212_v9 = vpop.eup %8211  ;;  %v1380_v10 = vsel %vm10108_vm8, 0, %v1378_v59  ;;  %vm1614_vm1 = vcmp.gt.s32.totalorder %v1613_v6, 0  ;;  %v4674_v46 = vmul.u32 %v10090_v33, %v4658_v8  ;;  %vm4676_vm4 = vc.u32 %v10130_v45, %v10116_v61 }
 0x260   :  { %v1366_v20 = vor.u32 %v1365_v3, %v1364_v48  ;;  %v1369_v24 = vshll.u32 %v1368_v16, 23  ;;  %v8214_v32 = vpop.eup %8213  ;;  %v4823_v4 = vxor.u32 2147483648, %v8212_v9  ;;  %v1615_v56 = vsel %vm1614_vm1, %v1613_v6, 0 }
 0x261   :  { %v4820_v43 = vxor.u32 2147483648, %v8214_v32  ;;  %v4678_v27 = vsel %vm4676_vm4, %v4677_v35, %v10117_v2  ;;  %v10150_v30 = vadd.f32 %v9798_v62, %v9768_v44  ;;  %v1610_v41 = vand.u32 8388607, %v1603_v13 }
 0x262   :  { %v1370_v52 = vor.u32 4788187, %v1369_v24  ;;  %v4824_v26 = vsel %vm4822_vm15, %v4823_v4, %v8214_v32  ;;  %v4679_v14 = vadd.s32 %v4678_v27, %v4674_v46  ;;  %v1617_v33 = vand.u32 31, %v1615_v56 }
 0x263   :  { %v4821_v40 = vsel %vm4819_vm12, %v8212_v9, %v4820_v43  ;;  %v1373_v37 = vcvt.s32.f32 %v1366_v20  ;;  %v1384_v42 = vadd.s32 3, %v1380_v10  ;;  %v4934_v62 = vand.u32 2139095040, %v10140_v31 }
 0x264   :  { %v1371_v54 = vand.u32 2147483647, %v1370_v52  ;;  %v4825_v5 = vsel %vm4818_vm13, %v4821_v40, %v4824_v26  ;;  %v4680_v25 = vadd.s32 536870912, %v4679_v14  ;;  %v1618_v44 = vsub.s32 32, %v1617_v33 }
 0x265   :  { %v4826_v58 = vsel %vm4815_vm0, nan, %v4825_v5  ;;  %v1620_v21 = vshll.u32 %v8425_v47, %v1617_v33  ;;  %v1623_v63 = vshll.u32 %v8426_v51, %v1617_v33  ;;  %v1626_v2 = vshll.u32 %v8427_v53, %v1617_v33 }
 0x266   :  { %v1374_v50 = vmul.f32 %v1373_v37, %v1371_v54  ;;  %7363 = vst.msk [vmem:[%s14271_s3 + $0x138] sm:$0xff] %vm7323_vm14, %v4826_v58  ;;  %v4681_v11 = vshrl.u32 %v4680_v25, 30  ;;  %v1621_v39 = vshrl.u32 %v8426_v51, %v1618_v44  ;;  %v1624_v29 = vshrl.u32 %v8427_v53, %v1618_v44  ;;  %v10198_v37 = vpop.f32.mrb[11].mxu1 }
 0x267   :  { %v1627_v18 = vshrl.u32 %v8428_v55, %v1618_v44  ;;  %v1629_v34 = vshll.u32 %v8428_v55, %v1617_v33  ;;  %v1630_v12 = vshrl.u32 %v8429_v57, %v1618_v44  ;;  %v10175_v49 = vand.u32 3, %v1384_v42 }
 0x268   :  { %v1375_v36 = vxor.u32 2147483648, %v1374_v50  ;;  %vm4621_vm2 = vcmp.lt.s32.totalorder %v9972_v17, 0  ;;  %v4682_v59 = vshll.u32 %v4681_v11, 30  ;;  %v1616_v8 = vshrl.u32 %v1615_v56, 5 }
 0x269   :  { %v1622_v15 = vor.u32 %v1621_v39, %v1620_v21  ;;  %v1625_v3 = vor.u32 %v1624_v29, %v1623_v63  ;;  %v1628_v16 = vor.u32 %v1627_v18, %v1626_v2  ;;  %v1631_v6 = vor.u32 %v1630_v12, %v1629_v34 }
 0x26a   :  { %v1376_v48 = vsel %vm1293_vm5, %v1375_v36, %v1374_v50  ;;  %v10183_v9 = vsub.s32 %v4679_v14, %v4682_v59  ;;  %v1632_v20 = vshll.u32 %v8429_v57, %v1617_v33  ;;  %v1633_v24 = vshrl.u32 %v8430_v0, %v1618_v44 }
 0x26b   :  { %v1379_v35 = vsel %vm10108_vm8, %v9867_v23, %v1376_v48  ;;  %v1611_v10 = vor.u32 8388608, %v1610_v41  ;;  %v4931_v32 = vand.u32 2147483647, %v10140_v31  ;;  %v4935_v4 = vshrl.u32 %v4934_v62, 23 }
 0x26c   :  { %8215 = vcosq.f32 %v1379_v35  ;;  %vm10190_vm3 = vcmp.le.f32.partialorder %v4619_v19, 0.7853982  ;;  %v4685_v7 = vsub.s32 0, %v10183_v9  ;;  %v1619_v56 = vshrl.u32 %v8425_v47, %v1618_v44 }
 0x26d   :  { %8217 = vsinq.f32 %v1379_v35  ;;  %v1634_v43 = vor.u32 %v1633_v24, %v1632_v20  ;;  %v4705_v52 = vsub.s32 4, %v4681_v11  ;;  %vm1635_vm5 = vcmp.lt.s32.totalorder %v1616_v8, 1 }
 0x26e   :  { %vm1637_vm6 = vcmp.lt.s32.totalorder %v1616_v8, 3  ;;  %vm1638_vm7 = vcmp.lt.s32.totalorder %v1616_v8, 4  ;;  %v7610_v27 = vmin.u32 %v4685_v7, %v10183_v9  ;;  %v1643_v14 = vsel %vm1635_vm5, %v1622_v15, %v1625_v3 }
 0x26f   :  { %v1640_v26 = vsel %vm1638_vm7, %v1628_v16, 2102212464  ;;  %v1644_v41 = vsel %vm1638_vm7, %v1631_v6, 920167782  ;;  %v1647_v19 = vsel %vm1635_vm5, %v1625_v3, %v1628_v16  ;;  %v1648_v40 = vsel %vm1638_vm7, %v1634_v43, 1326507024 }
 0x270   :  { %v1645_v33 = vsel %vm1637_vm6, %v1628_v16, %v1644_v41  ;;  %v1651_v54 = vshll.u32 %v1611_v10, 8  ;;  %v4687_v42 = vclz %v7610_v27  ;;  %vm1636_vm8 = vcmp.lt.s32.totalorder %v1616_v8, 2 }
 0x271   :  { %v1639_v5 = vsel %vm1635_vm5, %v1619_v56, %v1622_v15  ;;  %v1641_v25 = vsel %vm1637_vm6, %v1625_v3, %v1640_v26  ;;  %v4706_v44 = vsel %vm4621_vm2, %v4705_v52, %v4681_v11  ;;  %v1646_v62 = vsel %vm1636_vm8, %v1643_v14, %v1645_v33 }
 0x272   :  { %v1649_v58 = vsel %vm1637_vm6, %v1631_v6, %v1648_v40  ;;  %v7621_v50 = vadd.s32 4294967169, %v4935_v4  ;;  %vm1383_vm9 = vweird.f32 %v9867_v23  ;;  %v7611_v21 = vadd.s32 4294967294, %v4687_v42 }
 0x273   :  { %v1650_v63 = vsel %vm1636_vm8, %v1647_v19, %v1649_v58  ;;  %v10205_v39 = vmul.u32.u64.low %v1651_v54, %v1646_v62  ;;  %v10206_v29 = vmul.u32.u64.high %v1651_v54, %v1646_v62, %v10205_v39  ;;  %vm1386_vm10 = vcmp.lt.s32.totalorder %v10175_v49, 2 }
 0x274   :  { %v1642_v2 = vsel %vm1636_vm8, %v1639_v5, %v1641_v25  ;;  %v10210_v36 = vmul.u32.u64.low %v1651_v54, %v1650_v63  ;;  %v10211_v18 = vmul.u32.u64.high %v1651_v54, %v1650_v63, %v10210_v36  ;;  %vm1387_vm11 = vcmp.eq.s32.totalorder %v10175_v49, 0 }
 0x275   :  { %vm1390_vm12 = vcmp.eq.s32.totalorder %v10175_v49, 2  ;;  %vm7612_vm13 = vcmp.lt.s32.totalorder %v7611_v21, 0  ;;  %v4941_v11 = vadd.s32 1, %v7621_v50  ;;  %v4675_v12 = vadd.s32 %v10116_v61, %v10130_v45 }
 0x276   :  { %v8216_v34 = vpop.eup %8215  ;;  %v4690_v59 = vsel %vm7612_vm13, 0, %v7611_v21  ;;  %v4708_v8 = vsel %vm10190_vm3, 0, %v4706_v44  ;;  %v4938_v15 = vand.u32 8388607, %v4931_v32  ;;  %v1658_v35 = vmul.u32 %v1651_v54, %v1642_v2 }
 0x277   :  { %v8218_v48 = vpop.eup %8217  ;;  %v1391_v3 = vxor.u32 2147483648, %v8216_v34  ;;  %v4691_v16 = vsub.s32 32, %v4690_v59  ;;  %v4695_v6 = vsub.s32 4294967266, %v4690_v59  ;;  %v4692_v24 = vshll.u32 %v10183_v9, %v4690_v59 }
 0x278   :  { %v1388_v20 = vxor.u32 2147483648, %v8218_v48  ;;  %vm1660_vm0 = vc.u32 %v10211_v18, %v10205_v39  ;;  %v1661_v61 = vadd.s32 1, %v10206_v29  ;;  %vm4942_vm15 = vcmp.gt.s32.totalorder %v4941_v11, 0 }
 0x279   :  { %v1392_v45 = vsel %vm1390_vm12, %v1391_v3, %v8218_v48  ;;  %v4693_v10 = vshrl.u32 %v4675_v12, %v4691_v16  ;;  %v4696_v4 = vadd.s32 127, %v4695_v6  ;;  %v4712_v56 = vadd.s32 3, %v4708_v8 }
 0x27a   :  { %v1389_v7 = vsel %vm1387_vm11, %v8216_v34, %v1388_v20  ;;  %v1662_v43 = vsel %vm1660_vm0, %v1661_v61, %v10206_v29  ;;  %v4943_v52 = vsel %vm4942_vm15, %v4941_v11, 0  ;;  %v4939_v42 = vor.u32 8388608, %v4938_v15 }
 0x27b   :  { %v1393_v9 = vsel %vm1386_vm10, %v1389_v7, %v1392_v45  ;;  %v4694_v27 = vor.u32 %v4693_v10, %v4692_v24  ;;  %v4697_v26 = vshll.u32 %v4696_v4, 23  ;;  %v1663_v14 = vadd.s32 %v1662_v43, %v1658_v35 }
 0x27c   :  { %v1394_v41 = vsel %vm1383_vm9, nan, %v1393_v9  ;;  %v4945_v33 = vand.u32 31, %v4943_v52  ;;  %v10238_v54 = vand.u32 3, %v4712_v56  ;;  %v1502_v62 = vand.u32 2139095040, %v10150_v30 }
 0x27d   :  { %7330 = vst.msk [vmem:[%s14271_s3 + $0x30] sm:$0xff] %vm7323_vm14, %v1394_v41  ;;  %v4698_v19 = vor.u32 4788187, %v4697_v26  ;;  %v1664_v40 = vadd.s32 536870912, %v1663_v14  ;;  %v4701_v25 = vcvt.s32.f32 %v4694_v27  ;;  %v4944_v23 = vshrl.u32 %v4943_v52, 5 }
 0x27e   :  { %v4946_v5 = vsub.s32 32, %v4945_v33  ;;  %v4954_v2 = vshll.u32 %v8427_v53, %v4945_v33  ;;  %v4948_v11 = vshll.u32 %v8425_v47, %v4945_v33  ;;  %v4951_v34 = vshll.u32 %v8426_v51, %v4945_v33 }
 0x27f   :  { %v4699_v49 = vand.u32 2147483647, %v4698_v19  ;;  %v10240_v44 = vshrl.u32 %v1664_v40, 30  ;;  %v4957_v12 = vshll.u32 %v8428_v55, %v4945_v33  ;;  %v1499_v3 = vand.u32 2147483647, %v10150_v30 }
 0x280   :  { %v4949_v58 = vshrl.u32 %v8426_v51, %v4946_v5  ;;  %v4952_v50 = vshrl.u32 %v8427_v53, %v4946_v5  ;;  %v4955_v21 = vshrl.u32 %v8428_v55, %v4946_v5  ;;  %v4958_v36 = vshrl.u32 %v8429_v57, %v4946_v5 }
 0x281   :  { %v4702_v63 = vmul.f32 %v4701_v25, %v4699_v49  ;;  %v1666_v29 = vshll.u32 %v10240_v44, 30  ;;  %v4961_v59 = vshrl.u32 %v8430_v0, %v4946_v5  ;;  %v4960_v20 = vshll.u32 %v8429_v57, %v4945_v33 }
 0x282   :  { %v4956_v48 = vor.u32 %v4955_v21, %v4954_v2  ;;  %v4950_v16 = vor.u32 %v4949_v58, %v4948_v11  ;;  %v4953_v6 = vor.u32 %v4952_v50, %v4951_v34  ;;  %v4959_v35 = vor.u32 %v4958_v36, %v4957_v12 }
 0x283   :  { %v4703_v8 = vxor.u32 2147483648, %v4702_v63  ;;  %v10253_v15 = vsub.s32 %v1663_v14, %v1666_v29  ;;  %v10260_v45 = vshll.u32 %v4939_v42, 8  ;;  %v1503_v10 = vshrl.u32 %v1502_v62, 23 }
 0x284   :  { %v4947_v7 = vshrl.u32 %v8425_v47, %v4946_v5  ;;  %v4962_v56 = vor.u32 %v4961_v59, %v4960_v20  ;;  %vm4966_vm1 = vcmp.lt.s32.totalorder %v4944_v23, 4  ;;  %vm4963_vm4 = vcmp.lt.s32.totalorder %v4944_v23, 1 }
 0x285   :  { %v4704_v24 = vsel %vm4621_vm2, %v4703_v8, %v4702_v63  ;;  %v1669_v61 = vsub.s32 0, %v10253_v15  ;;  %v4968_v52 = vsel %vm4966_vm1, %v4956_v48, 2102212464  ;;  %vm4965_vm2 = vcmp.lt.s32.totalorder %v4944_v23, 3 }
 0x286   :  { %v4707_v4 = vsel %vm10190_vm3, %v9972_v17, %v4704_v24  ;;  %v4971_v9 = vsel %vm4963_vm4, %v4950_v16, %v4953_v6  ;;  %v4972_v27 = vsel %vm4966_vm1, %v4959_v35, 920167782  ;;  %vm10271_vm5 = vcmp.le.f32.partialorder %v1603_v13, 0.7853982 }
 0x287   :  { %8219 = vcosq.f32 %v4707_v4  ;;  %v7494_v43 = vmin.u32 %v1669_v61, %v10253_v15  ;;  %v4967_v14 = vsel %vm4963_vm4, %v4947_v7, %v4950_v16  ;;  %v4969_v41 = vsel %vm4965_vm2, %v4953_v6, %v4968_v52 }
 0x288   :  { %8221 = vsinq.f32 %v4707_v4  ;;  %v4975_v33 = vsel %vm4963_vm4, %v4953_v6, %v4956_v48  ;;  %vm4964_vm3 = vcmp.lt.s32.totalorder %v4944_v23, 2  ;;  %v4973_v19 = vsel %vm4965_vm2, %v4956_v48, %v4972_v27 }
 0x289   :  { %v1671_v26 = vclz %v7494_v43  ;;  %v4976_v40 = vsel %vm4966_vm1, %v4962_v56, 1326507024  ;;  %v7489_v42 = vadd.s32 4294967169, %v1503_v10  ;;  %v1689_v49 = vsub.s32 4, %v10240_v44  ;;  %v10304_v10 = vpop.f32.mrb[12].mxu0 }
 0x28a   :  { %v4974_v25 = vsel %vm4964_vm3, %v4971_v9, %v4973_v19  ;;  %v4977_v62 = vsel %vm4965_vm2, %v4959_v35, %v4976_v40  ;;  %v4970_v58 = vsel %vm4964_vm3, %v4967_v14, %v4969_v41  ;;  %vm4711_vm7 = vweird.f32 %v9972_v17  ;;  %v10312_v9 = vld [vmem:[%s14270_s2] ss:$0 sm:$0xff] }
 0x28b   :  { %v7495_v5 = vadd.s32 4294967294, %v1671_v26  ;;  %v4978_v50 = vsel %vm4964_vm3, %v4975_v33, %v4977_v62  ;;  %v10278_v13 = vmul.u32.u64.low %v10260_v45, %v4974_v25  ;;  %v10279_v21 = vmul.u32.u64.high %v10260_v45, %v4974_v25, %v10278_v13 }
 0x28c   :  { %v10283_v63 = vmul.u32.u64.low %v10260_v45, %v4978_v50  ;;  %v10284_v29 = vmul.u32.u64.high %v10260_v45, %v4978_v50, %v10283_v63  ;;  %v1509_v23 = vadd.s32 1, %v7489_v42  ;;  %vm4718_vm8 = vcmp.eq.s32.totalorder %v10238_v54, 2 }
 0x28d   :  { %vm7496_vm6 = vcmp.lt.s32.totalorder %v7495_v5, 0  ;;  %vm1605_vm9 = vcmp.lt.s32.totalorder %v10080_v60, 0  ;;  %v1659_v2 = vadd.s32 %v10205_v39, %v10211_v18  ;;  %v4986_v59 = vmul.u32 %v10260_v45, %v4970_v58 }
 0x28e   :  { %v1674_v36 = vsel %vm7496_vm6, 0, %v7495_v5  ;;  %v1690_v12 = vsel %vm1605_vm9, %v1689_v49, %v10240_v44  ;;  %vm1510_vm10 = vcmp.gt.s32.totalorder %v1509_v23, 0  ;;  %v4989_v8 = vadd.s32 1, %v10279_v21 }
 0x28f   :  { %v1675_v11 = vsub.s32 32, %v1674_v36  ;;  %v1679_v34 = vsub.s32 4294967266, %v1674_v36  ;;  %v1506_v48 = vand.u32 8388607, %v1499_v3  ;;  %v1511_v16 = vsel %vm1510_vm10, %v1509_v23, 0 }
 0x290   :  { %v1676_v35 = vshll.u32 %v10253_v15, %v1674_v36  ;;  %vm4988_vm11 = vc.u32 %v10284_v29, %v10278_v13  ;;  %v1692_v44 = vsel %vm10271_vm5, 0, %v1690_v12  ;;  %v1513_v45 = vand.u32 31, %v1511_v16 }
 0x291   :  { %v8220_v6 = vpop.eup %8219  ;;  %v1677_v39 = vshrl.u32 %v1659_v2, %v1675_v11  ;;  %v1680_v18 = vadd.s32 127, %v1679_v34  ;;  %v4990_v61 = vsel %vm4988_vm11, %v4989_v8, %v10279_v21  ;;  %vm4715_vm12 = vcmp.eq.s32.totalorder %v10238_v54, 0 }
 0x292   :  { %v8222_v20 = vpop.eup %8221  ;;  %v4719_v24 = vxor.u32 2147483648, %v8220_v6  ;;  %v4991_v43 = vadd.s32 %v4990_v61, %v4986_v59  ;;  %v1514_v52 = vsub.s32 32, %v1513_v45  ;;  %v10316_v27 = vadd.f32 %v10312_v9, %v9847_v22 }
 0x293   :  { %v4716_v4 = vxor.u32 2147483648, %v8222_v20  ;;  %v1678_v7 = vor.u32 %v1677_v39, %v1676_v35  ;;  %v1681_v56 = vshll.u32 %v1680_v18, 23  ;;  %vm4714_vm13 = vcmp.lt.s32.totalorder %v10238_v54, 2 }
 0x294   :  { %v4720_v15 = vsel %vm4718_vm8, %v4719_v24, %v8222_v20  ;;  %v4992_v41 = vadd.s32 536870912, %v4991_v43  ;;  %v1696_v19 = vadd.s32 3, %v1692_v44  ;;  %v1507_v40 = vor.u32 8388608, %v1506_v48 }
 0x295   :  { %v4717_v26 = vsel %vm4715_vm12, %v8220_v6, %v4716_v4  ;;  %v1682_v14 = vor.u32 4788187, %v1681_v56  ;;  %v10321_v42 = vadd.f32 %v10312_v9, %v9945_v1  ;;  %v1685_v25 = vcvt.s32.f32 %v1678_v7 }
 0x296   :  { %v4721_v33 = vsel %vm4714_vm13, %v4717_v26, %v4720_v15  ;;  %v4993_v62 = vshrl.u32 %v4992_v41, 30  ;;  %v1512_v22 = vshrl.u32 %v1511_v16, 5  ;;  %v1517_v54 = vshrl.u32 %v8426_v51, %v1514_v52 }
 0x297   :  { %v4722_v5 = vsel %vm4711_vm7, nan, %v4721_v33  ;;  %v1683_v49 = vand.u32 2147483647, %v1682_v14  ;;  %v1520_v58 = vshrl.u32 %v8427_v53, %v1514_v52  ;;  %v1523_v50 = vshrl.u32 %v8428_v55, %v1514_v52 }
 0x298   :  { %7362 = vst.msk [vmem:[%s14271_s3 + $0x130] sm:$0xff] %vm7323_vm14, %v4722_v5  ;;  %v4994_v21 = vshll.u32 %v4993_v62, 30  ;;  %v1522_v17 = vshll.u32 %v8427_v53, %v1513_v45  ;;  %v1526_v63 = vshrl.u32 %v8429_v57, %v1514_v52  ;;  %vm4933_vm0 = vcmp.lt.s32.totalorder %v10140_v31, 0 }
 0x299   :  { %v1686_v1 = vmul.f32 %v1685_v25, %v1683_v49  ;;  %v1516_v23 = vshll.u32 %v8425_v47, %v1513_v45  ;;  %v1519_v2 = vshll.u32 %v8426_v51, %v1513_v45  ;;  %v1525_v36 = vshll.u32 %v8428_v55, %v1513_v45 }
 0x29a   :  { %v1529_v11 = vshrl.u32 %v8430_v0, %v1514_v52  ;;  %v10339_v12 = vand.u32 3, %v1696_v19  ;;  %v10341_v59 = vsub.s32 %v4991_v43, %v4994_v21  ;;  %v1524_v8 = vor.u32 %v1523_v50, %v1522_v17  ;;  %v10362_v19 = vpop.f32.mrb[12].mxu1 }
 0x29b   :  { %v1687_v34 = vxor.u32 2147483648, %v1686_v1  ;;  %v1518_v48 = vor.u32 %v1517_v54, %v1516_v23  ;;  %v1521_v16 = vor.u32 %v1520_v58, %v1519_v2  ;;  %v1527_v6 = vor.u32 %v1526_v63, %v1525_v36 }
 0x29c   :  { %v1528_v35 = vshll.u32 %v8429_v57, %v1513_v45  ;;  %v4997_v18 = vsub.s32 0, %v10341_v59  ;;  %v1515_v20 = vshrl.u32 %v8425_v47, %v1514_v52  ;;  %v1547_v24 = vshll.u32 %v1507_v40, 8 }
 0x29d   :  { %v1688_v39 = vsel %vm1605_vm9, %v1687_v34, %v1686_v1  ;;  %v5017_v61 = vsub.s32 4, %v4993_v62  ;;  %vm1534_vm15 = vcmp.lt.s32.totalorder %v1512_v22, 4  ;;  %vm10353_vm1 = vcmp.le.f32.partialorder %v4931_v32, 0.7853982 }
 0x29e   :  { %v1691_v44 = vsel %vm10271_vm5, %v10080_v60, %v1688_v39  ;;  %v1530_v4 = vor.u32 %v1529_v11, %v1528_v35  ;;  %v7622_v7 = vmin.u32 %v4997_v18, %v10341_v59  ;;  %vm1531_vm4 = vcmp.lt.s32.totalorder %v1512_v22, 1 }
 0x29f   :  { %8223 = vcosq.f32 %v1691_v44  ;;  %v1536_v56 = vsel %vm1534_vm15, %v1524_v8, 2102212464  ;;  %vm1532_vm2 = vcmp.lt.s32.totalorder %v1512_v22, 2  ;;  %v1539_v43 = vsel %vm1531_vm4, %v1518_v48, %v1521_v16 }
 0x2a0   :  { %8225 = vsinq.f32 %v1691_v44  ;;  %v1540_v46 = vsel %vm1534_vm15, %v1527_v6, 920167782  ;;  %v4999_v15 = vclz %v7622_v7  ;;  %vm1533_vm5 = vcmp.lt.s32.totalorder %v1512_v22, 3 }
 0x2a1   :  { %v1535_v52 = vsel %vm1531_vm4, %v1515_v20, %v1518_v48  ;;  %v1543_v26 = vsel %vm1531_vm4, %v1521_v16, %v1524_v8  ;;  %v1537_v14 = vsel %vm1533_vm5, %v1521_v16, %v1536_v56  ;;  %v1541_v41 = vsel %vm1533_vm5, %v1524_v8, %v1540_v46 }
 0x2a2   :  { %v1544_v32 = vsel %vm1534_vm15, %v1530_v4, 1326507024  ;;  %v4830_v33 = vand.u32 2139095040, %v10316_v27  ;;  %v7623_v40 = vadd.s32 4294967294, %v4999_v15  ;;  %v5018_v5 = vsel %vm4933_vm0, %v5017_v61, %v4993_v62 }
 0x2a3   :  { %v1542_v49 = vsel %vm1532_vm2, %v1539_v43, %v1541_v41  ;;  %v1545_v25 = vsel %vm1533_vm5, %v1527_v6, %v1544_v32  ;;  %v1538_v21 = vsel %vm1532_vm2, %v1535_v52, %v1537_v14  ;;  %vm1698_vm6 = vcmp.lt.s32.totalorder %v10339_v12, 2 }
 0x2a4   :  { %v1546_v54 = vsel %vm1532_vm2, %v1543_v26, %v1545_v25  ;;  %v10368_v58 = vmul.u32.u64.low %v1547_v24, %v1542_v49  ;;  %v10369_v50 = vmul.u32.u64.high %v1547_v24, %v1542_v49, %v10368_v58  ;;  %v4831_v1 = vshrl.u32 %v4830_v33, 23 }
 0x2a5   :  { %vm7624_vm3 = vcmp.lt.s32.totalorder %v7623_v40, 0  ;;  %v10373_v17 = vmul.u32.u64.low %v1547_v24, %v1546_v54  ;;  %v10374_v63 = vmul.u32.u64.high %v1547_v24, %v1546_v54, %v10373_v17  ;;  %vm1699_vm7 = vcmp.eq.s32.totalorder %v10339_v12, 0 }
 0x2a6   :  { %v5002_v62 = vsel %vm7624_vm3, 0, %v7623_v40  ;;  %v7617_v23 = vadd.s32 4294967169, %v4831_v1  ;;  %v4987_v2 = vadd.s32 %v10278_v13, %v10284_v29  ;;  %v4827_v34 = vand.u32 2147483647, %v10316_v27 }
 0x2a7   :  { %v5003_v36 = vsub.s32 32, %v5002_v62  ;;  %v5007_v11 = vsub.s32 4294967266, %v5002_v62  ;;  %v5020_v22 = vsel %vm10353_vm1, 0, %v5018_v5  ;;  %v1554_v8 = vmul.u32 %v1547_v24, %v1538_v21 }
 0x2a8   :  { %v1557_v48 = vadd.s32 1, %v10369_v50  ;;  %v4837_v16 = vadd.s32 1, %v7617_v23  ;;  %v5004_v35 = vshll.u32 %v10341_v59, %v5002_v62  ;;  %vm1556_vm8 = vc.u32 %v10374_v63, %v10368_v58 }
 0x2a9   :  { %v8224_v6 = vpop.eup %8223  ;;  %v5005_v39 = vshrl.u32 %v4987_v2, %v5003_v36  ;;  %v5008_v18 = vadd.s32 127, %v5007_v11  ;;  %vm1702_vm9 = vcmp.eq.s32.totalorder %v10339_v12, 2  ;;  %v5024_v56 = vadd.s32 3, %v5020_v22 }
 0x2aa   :  { %v8226_v13 = vpop.eup %8225  ;;  %v1703_v29 = vxor.u32 2147483648, %v8224_v6  ;;  %v1558_v20 = vsel %vm1556_vm8, %v1557_v48, %v10369_v50  ;;  %vm4838_vm10 = vcmp.gt.s32.totalorder %v4837_v16, 0  ;;  %v4834_v59 = vand.u32 8388607, %v4827_v34 }
 0x2ab   :  { %v1700_v44 = vxor.u32 2147483648, %v8226_v13  ;;  %v5006_v24 = vor.u32 %v5005_v39, %v5004_v35  ;;  %v5009_v61 = vshll.u32 %v5008_v18, 23  ;;  %v1559_v4 = vadd.s32 %v1558_v20, %v1554_v8 }
 0x2ac   :  { %v1704_v7 = vsel %vm1702_vm9, %v1703_v29, %v8226_v13  ;;  %v4839_v43 = vsel %vm4838_vm10, %v4837_v16, 0  ;;  %v1814_v26 = vand.u32 2139095040, %v10321_v42  ;;  %vm1695_vm11 = vweird.f32 %v10080_v60 }
 0x2ad   :  { %v1701_v46 = vsel %vm1699_vm7, %v8224_v6, %v1700_v44  ;;  %v5010_v15 = vor.u32 4788187, %v5009_v61  ;;  %v1560_v52 = vadd.s32 536870912, %v1559_v4  ;;  %v4841_v41 = vand.u32 31, %v4839_v43 }
 0x2ae   :  { %v1705_v14 = vsel %vm1698_vm6, %v1701_v46, %v1704_v7  ;;  %v5013_v40 = vcvt.s32.f32 %v5006_v24  ;;  %v10403_v49 = vand.u32 3, %v5024_v56  ;;  %v4835_v25 = vor.u32 8388608, %v4834_v59 }
 0x2af   :  { %v1706_v32 = vsel %vm1695_vm11, nan, %v1705_v14  ;;  %v5011_v33 = vand.u32 2147483647, %v5010_v15  ;;  %v10397_v5 = vshrl.u32 %v1560_v52, 30  ;;  %v4842_v54 = vsub.s32 32, %v4841_v41 }
 0x2b0   :  { %7333 = vst.msk [vmem:[%s14271_s3 + $0x48] sm:$0xff] %vm7323_vm14, %v1706_v32  ;;  %v1811_v60 = vand.u32 2147483647, %v10321_v42  ;;  %v4844_v1 = vshll.u32 %v8425_v47, %v4841_v41  ;;  %v1815_v21 = vshrl.u32 %v1814_v26, 23  ;;  %v4847_v62 = vshll.u32 %v8426_v51, %v4841_v41 }
 0x2b1   :  { %v5014_v50 = vmul.f32 %v5013_v40, %v5011_v33  ;;  %v1562_v12 = vshll.u32 %v10397_v5, 30  ;;  %v4845_v17 = vshrl.u32 %v8426_v51, %v4842_v54  ;;  %v4848_v23 = vshrl.u32 %v8427_v53, %v4842_v54 }
 0x2b2   :  { %v4851_v2 = vshrl.u32 %v8428_v55, %v4842_v54  ;;  %v4850_v22 = vshll.u32 %v8427_v53, %v4841_v41  ;;  %v4854_v8 = vshrl.u32 %v8429_v57, %v4842_v54  ;;  %v4840_v48 = vshrl.u32 %v4839_v43, 5 }
 0x2b3   :  { %v5015_v36 = vxor.u32 2147483648, %v5014_v50  ;;  %v10412_v11 = vsub.s32 %v1559_v4, %v1562_v12  ;;  %v4846_v16 = vor.u32 %v4845_v17, %v4844_v1  ;;  %v4853_v6 = vshll.u32 %v8428_v55, %v4841_v41 }
 0x2b4   :  { %v10417_v35 = vshll.u32 %v4835_v25, 8  ;;  %v4849_v13 = vor.u32 %v4848_v23, %v4847_v62  ;;  %v4852_v29 = vor.u32 %v4851_v2, %v4850_v22  ;;  %vm1501_vm12 = vcmp.lt.s32.totalorder %v10150_v30, 0  ;;  %v10458_v22 = vpop.f32.mrb[13].mxu0 }
 0x2b5   :  { %v5016_v39 = vsel %vm4933_vm0, %v5015_v36, %v5014_v50  ;;  %v1565_v18 = vsub.s32 0, %v10412_v11  ;;  %v4855_v44 = vor.u32 %v4854_v8, %v4853_v6  ;;  %v4856_v24 = vshll.u32 %v8429_v57, %v4841_v41 }
 0x2b6   :  { %v5019_v20 = vsel %vm10353_vm1, %v10140_v31, %v5016_v39  ;;  %v4857_v61 = vshrl.u32 %v8430_v0, %v4842_v54  ;;  %v1555_v4 = vadd.s32 %v10368_v58, %v10374_v63  ;;  %v7501_v56 = vadd.s32 4294967169, %v1815_v21 }
 0x2b7   :  { %8227 = vcosq.f32 %v5019_v20  ;;  %v7490_v7 = vmin.u32 %v1565_v18, %v10412_v11  ;;  %v1585_v59 = vsub.s32 4, %v10397_v5  ;;  %v4843_v45 = vshrl.u32 %v8425_v47, %v4842_v54 }
 0x2b8   :  { %8229 = vsinq.f32 %v5019_v20  ;;  %v4858_v43 = vor.u32 %v4857_v61, %v4856_v24  ;;  %vm10435_vm13 = vcmp.le.f32.partialorder %v1499_v3, 0.7853982  ;;  %vm4859_vm0 = vcmp.lt.s32.totalorder %v4840_v48, 1 }
 0x2b9   :  { %v1567_v15 = vclz %v7490_v7  ;;  %vm4860_vm15 = vcmp.lt.s32.totalorder %v4840_v48, 2  ;;  %vm4862_vm1 = vcmp.lt.s32.totalorder %v4840_v48, 4  ;;  %vm4861_vm4 = vcmp.lt.s32.totalorder %v4840_v48, 3 }
 0x2ba   :  { %v4864_v58 = vsel %vm4862_vm1, %v4852_v29, 2102212464  ;;  %v4867_v63 = vsel %vm4859_vm0, %v4846_v16, %v4849_v13  ;;  %v4868_v52 = vsel %vm4862_vm1, %v4855_v44, 920167782  ;;  %vm5030_vm2 = vcmp.eq.s32.totalorder %v10403_v49, 2 }
 0x2bb   :  { %v7491_v26 = vadd.s32 4294967294, %v1567_v15  ;;  %v4863_v14 = vsel %vm4859_vm0, %v4843_v45, %v4846_v16  ;;  %v4869_v41 = vsel %vm4861_vm4, %v4852_v29, %v4868_v52  ;;  %v4871_v32 = vsel %vm4859_vm0, %v4849_v13, %v4852_v29 }
 0x2bc   :  { %vm5027_vm5 = vcmp.eq.s32.totalorder %v10403_v49, 0  ;;  %v4865_v3 = vsel %vm4861_vm4, %v4849_v13, %v4864_v58  ;;  %v4870_v33 = vsel %vm4860_vm15, %v4867_v63, %v4869_v41  ;;  %v4872_v40 = vsel %vm4862_vm1, %v4858_v43, 1326507024 }
 0x2bd   :  { %v1821_v25 = vadd.s32 1, %v7501_v56  ;;  %vm5026_vm3 = vcmp.lt.s32.totalorder %v10403_v49, 2  ;;  %vm7492_vm6 = vcmp.lt.s32.totalorder %v7491_v26, 0  ;;  %v4873_v54 = vsel %vm4861_vm4, %v4855_v44, %v4872_v40 }
 0x2be   :  { %v10447_v50 = vmul.u32.u64.low %v10417_v35, %v4870_v33  ;;  %v10448_v12 = vmul.u32.u64.high %v10417_v35, %v4870_v33, %v10447_v50  ;;  %vm5023_vm7 = vweird.f32 %v10140_v31  ;;  %v1570_v1 = vsel %vm7492_vm6, 0, %v7491_v26 }
 0x2bf   :  { %v4874_v21 = vsel %vm4860_vm15, %v4871_v32, %v4873_v54  ;;  %v1818_v17 = vand.u32 8388607, %v1811_v60  ;;  %vm1822_vm8 = vcmp.gt.s32.totalorder %v1821_v25, 0  ;;  %v1571_v62 = vsub.s32 32, %v1570_v1 }
 0x2c0   :  { %v1575_v23 = vsub.s32 4294967266, %v1570_v1  ;;  %v1586_v2 = vsel %vm1501_vm12, %v1585_v59, %v10397_v5  ;;  %v1823_v36 = vsel %vm1822_vm8, %v1821_v25, 0  ;;  %v4866_v8 = vsel %vm4860_vm15, %v4863_v14, %v4865_v3 }
 0x2c1   :  { %v10462_v16 = vmul.u32.u64.low %v10417_v35, %v4874_v21  ;;  %v10463_v6 = vmul.u32.u64.high %v10417_v35, %v4874_v21, %v10462_v16  ;;  %v1825_v39 = vand.u32 31, %v1823_v36  ;;  %v8228_v18 = vpop.eup %8227  ;;  %v1572_v13 = vshll.u32 %v10412_v11, %v1570_v1 }
 0x2c2   :  { %v1573_v29 = vshrl.u32 %v1555_v4, %v1571_v62  ;;  %v1576_v20 = vadd.s32 127, %v1575_v23  ;;  %v4885_v44 = vadd.s32 1, %v10448_v12  ;;  %v8230_v24 = vpop.eup %8229  ;;  %v5031_v61 = vxor.u32 2147483648, %v8228_v18 }
 0x2c3   :  { %v1588_v5 = vsel %vm10435_vm13, 0, %v1586_v2  ;;  %v1819_v7 = vor.u32 8388608, %v1818_v17  ;;  %v1826_v48 = vsub.s32 32, %v1825_v39  ;;  %v5028_v56 = vxor.u32 2147483648, %v8230_v24 }
 0x2c4   :  { %v1574_v59 = vor.u32 %v1573_v29, %v1572_v13  ;;  %v1577_v45 = vshll.u32 %v1576_v20, 23  ;;  %v4882_v43 = vmul.u32 %v10417_v35, %v4866_v8  ;;  %v5032_v15 = vsel %vm5030_vm2, %v5031_v61, %v8230_v24 }
 0x2c5   :  { %vm4884_vm9 = vc.u32 %v10463_v6, %v10447_v50  ;;  %v10474_v11 = vshrl.u32 %v1823_v36, 5  ;;  %v1828_v4 = vshll.u32 %v8425_v47, %v1825_v39  ;;  %v5029_v58 = vsel %vm5027_vm5, %v8228_v18, %v5028_v56 }
 0x2c6   :  { %v1578_v63 = vor.u32 4788187, %v1577_v45  ;;  %v4886_v52 = vsel %vm4884_vm9, %v4885_v44, %v10448_v12  ;;  %v1831_v26 = vshll.u32 %v8426_v51, %v1825_v39  ;;  %v5033_v35 = vsel %vm5026_vm3, %v5029_v58, %v5032_v15 }
 0x2c7   :  { %v4887_v14 = vadd.s32 %v4886_v52, %v4882_v43  ;;  %v1829_v41 = vshrl.u32 %v8426_v51, %v1826_v48  ;;  %v1832_v32 = vshrl.u32 %v8427_v53, %v1826_v48  ;;  %v5034_v3 = vsel %vm5023_vm7, nan, %v5033_v35 }
 0x2c8   :  { %v1579_v33 = vand.u32 2147483647, %v1578_v63  ;;  %v1581_v40 = vcvt.s32.f32 %v1574_v59  ;;  %v1835_v25 = vshrl.u32 %v8428_v55, %v1826_v48  ;;  %7365 = vst.msk [vmem:[%s14271_s3 + $0x148] sm:$0xff] %vm7323_vm14, %v5034_v3  ;;  %v1834_v49 = vshll.u32 %v8427_v53, %v1825_v39  ;;  %v10544_v3 = vpop.f32.mrb[13].mxu1 }
 0x2c9   :  { %v4888_v54 = vadd.s32 536870912, %v4887_v14  ;;  %v1837_v12 = vshll.u32 %v8428_v55, %v1825_v39  ;;  %v1838_v1 = vshrl.u32 %v8429_v57, %v1826_v48  ;;  %v1830_v17 = vor.u32 %v1829_v41, %v1828_v4 }
 0x2ca   :  { %v1582_v21 = vmul.f32 %v1581_v40, %v1579_v33  ;;  %v1833_v31 = vor.u32 %v1832_v32, %v1831_v26  ;;  %v1841_v62 = vshrl.u32 %v8430_v0, %v1826_v48  ;;  %v1592_v8 = vadd.s32 3, %v1588_v5 }
 0x2cb   :  { %v4889_v23 = vshrl.u32 %v4888_v54, 30  ;;  %v1839_v2 = vor.u32 %v1838_v1, %v1837_v12  ;;  %v1836_v16 = vor.u32 %v1835_v25, %v1834_v49  ;;  %v1840_v18 = vshll.u32 %v8429_v57, %v1825_v39 }
 0x2cc   :  { %v1583_v36 = vxor.u32 2147483648, %v1582_v21  ;;  %vm1843_vm10 = vcmp.lt.s32.totalorder %v10474_v11, 1  ;;  %vm1846_vm11 = vcmp.lt.s32.totalorder %v10474_v11, 4  ;;  %v10499_v29 = vshll.u32 %v1819_v7, 8 }
 0x2cd   :  { %v4890_v13 = vshll.u32 %v4889_v23, 30  ;;  %v1842_v44 = vor.u32 %v1841_v62, %v1840_v18  ;;  %v1851_v24 = vsel %vm1843_vm10, %v1830_v17, %v1833_v31  ;;  %v1852_v61 = vsel %vm1846_vm11, %v1839_v2, 920167782 }
 0x2ce   :  { %v1584_v20 = vsel %vm1501_vm12, %v1583_v36, %v1582_v21  ;;  %v1827_v56 = vshrl.u32 %v8425_v47, %v1826_v48  ;;  %vm1845_vm0 = vcmp.lt.s32.totalorder %v10474_v11, 3  ;;  %vm1844_vm12 = vcmp.lt.s32.totalorder %v10474_v11, 2 }
 0x2cf   :  { %v1587_v39 = vsel %vm10435_vm13, %v10150_v30, %v1584_v20  ;;  %v10510_v5 = vsub.s32 %v4887_v14, %v4890_v13  ;;  %v1848_v7 = vsel %vm1846_vm11, %v1836_v16, 2102212464  ;;  %v1853_v59 = vsel %vm1845_vm0, %v1836_v16, %v1852_v61 }
 0x2d0   :  { %8231 = vcosq.f32 %v1587_v39  ;;  %v1854_v46 = vsel %vm1844_vm12, %v1851_v24, %v1853_v59  ;;  %v1855_v48 = vsel %vm1843_vm10, %v1833_v31, %v1836_v16  ;;  %v4913_v43 = vsub.s32 4, %v4889_v23 }
 0x2d1   :  { %8233 = vsinq.f32 %v1587_v39  ;;  %v4893_v45 = vsub.s32 0, %v10510_v5  ;;  %v1856_v15 = vsel %vm1846_vm11, %v1842_v44, 1326507024  ;;  %v1593_v63 = vand.u32 3, %v1592_v8 }
 0x2d2   :  { %v10527_v4 = vmul.u32.u64.low %v10499_v29, %v1854_v46  ;;  %v10528_v58 = vmul.u32.u64.high %v10499_v29, %v1854_v46, %v10527_v4  ;;  %v1857_v26 = vsel %vm1845_vm0, %v1839_v2, %v1856_v15  ;;  %v1847_v35 = vsel %vm1843_vm10, %v1827_v56, %v1830_v17 }
 0x2d3   :  { %v7618_v52 = vmin.u32 %v4893_v45, %v10510_v5  ;;  %v1849_v14 = vsel %vm1845_vm0, %v1833_v31, %v1848_v7  ;;  %v1858_v41 = vsel %vm1844_vm12, %v1855_v48, %v1857_v26  ;;  %v10542_v32 = vadd.f32 %v10312_v9, %v10082_v38 }
 0x2d4   :  { %vm4829_vm13 = vcmp.lt.s32.totalorder %v10316_v27, 0  ;;  %v10550_v25 = vmul.u32.u64.low %v10499_v29, %v1858_v41  ;;  %v10551_v54 = vmul.u32.u64.high %v10499_v29, %v1858_v41, %v10550_v25  ;;  %vm1591_vm15 = vweird.f32 %v10150_v30 }
 0x2d5   :  { %v4895_v33 = vclz %v7618_v52  ;;  %v4914_v40 = vsel %vm4829_vm13, %v4913_v43, %v4889_v23  ;;  %v1850_v12 = vsel %vm1844_vm12, %v1847_v35, %v1849_v14  ;;  %v5142_v38 = vand.u32 2139095040, %v10542_v32 }
 0x2d6   :  { %v10559_v1 = vadd.f32 %v10312_v9, %v10133_v28  ;;  %vm1595_vm1 = vcmp.eq.s32.totalorder %v1593_v63, 0  ;;  %vm1598_vm4 = vcmp.eq.s32.totalorder %v1593_v63, 2  ;;  %vm10563_vm2 = vcmp.le.f32.partialorder %v4827_v34, 0.7853982 }
 0x2d7   :  { %v7619_v49 = vadd.s32 4294967294, %v4895_v33  ;;  %v1869_v17 = vadd.s32 1, %v10528_v58  ;;  %v4883_v11 = vadd.s32 %v10447_v50, %v10463_v6  ;;  %v4916_v31 = vsel %vm10563_vm2, 0, %v4914_v40 }
 0x2d8   :  { %v5143_v62 = vshrl.u32 %v5142_v38, 23  ;;  %v1866_v2 = vmul.u32 %v10499_v29, %v1850_v12  ;;  %vm1868_vm3 = vc.u32 %v10551_v54, %v10527_v4  ;;  %v5139_v34 = vand.u32 2147483647, %v10542_v32 }
 0x2d9   :  { %vm7620_vm5 = vcmp.lt.s32.totalorder %v7619_v49, 0  ;;  %v1710_v50 = vand.u32 2139095040, %v10559_v1  ;;  %v1870_v20 = vsel %vm1868_vm3, %v1869_v17, %v10528_v58  ;;  %vm1594_vm6 = vcmp.lt.s32.totalorder %v1593_v63, 2 }
 0x2da   :  { %v8232_v28 = vpop.eup %8231  ;;  %v4898_v23 = vsel %vm7620_vm5, 0, %v7619_v49  ;;  %v7629_v44 = vadd.s32 4294967169, %v5143_v62  ;;  %v1871_v39 = vadd.s32 %v1870_v20, %v1866_v2  ;;  %v4920_v7 = vadd.s32 3, %v4916_v31 }
 0x2db   :  { %v8234_v36 = vpop.eup %8233  ;;  %v1599_v8 = vxor.u32 2147483648, %v8232_v28  ;;  %v4899_v16 = vsub.s32 32, %v4898_v23  ;;  %v4903_v18 = vsub.s32 4294967266, %v4898_v23  ;;  %v4900_v13 = vshll.u32 %v10510_v5, %v4898_v23 }
 0x2dc   :  { %v1596_v6 = vxor.u32 2147483648, %v8234_v36  ;;  %v5149_v59 = vadd.s32 1, %v7629_v44  ;;  %v1872_v43 = vadd.s32 536870912, %v1871_v39  ;;  %v5146_v15 = vand.u32 8388607, %v5139_v34 }
 0x2dd   :  { %v1600_v24 = vsel %vm1598_vm4, %v1599_v8, %v8234_v36  ;;  %v4901_v29 = vshrl.u32 %v4883_v11, %v4899_v16  ;;  %v4904_v61 = vadd.s32 127, %v4903_v18  ;;  %v1711_v26 = vshrl.u32 %v1710_v50, 23 }
 0x2de   :  { %v1597_v56 = vsel %vm1595_vm1, %v8232_v28, %v1596_v6  ;;  %vm5150_vm7 = vcmp.gt.s32.totalorder %v5149_v59, 0  ;;  %v1873_v63 = vshrl.u32 %v1872_v43, 30  ;;  %v10589_v35 = vand.u32 3, %v4920_v7 }
 0x2df   :  { %v1601_v45 = vsel %vm1594_vm6, %v1597_v56, %v1600_v24  ;;  %v4902_v46 = vor.u32 %v4901_v29, %v4900_v13  ;;  %v4905_v48 = vshll.u32 %v4904_v61, 23  ;;  %v5151_v52 = vsel %vm5150_vm7, %v5149_v59, 0 }
 0x2e0   :  { %v1602_v5 = vsel %vm1591_vm15, nan, %v1601_v45  ;;  %v5153_v14 = vand.u32 31, %v5151_v52  ;;  %vm1813_vm8 = vcmp.lt.s32.totalorder %v10321_v42, 0  ;;  %v1874_v30 = vshll.u32 %v1873_v63, 30 }
 0x2e1   :  { %7332 = vst.msk [vmem:[%s14271_s3 + $0x40] sm:$0xff] %vm7323_vm14, %v1602_v5  ;;  %v4906_v58 = vor.u32 4788187, %v4905_v48  ;;  %v4909_v33 = vcvt.s32.f32 %v4902_v46  ;;  %v10594_v40 = vadd.f32 %v10312_v9, %v10198_v37  ;;  %v1867_v25 = vadd.s32 %v10527_v4, %v10551_v54 }
 0x2e2   :  { %v5147_v49 = vor.u32 8388608, %v5146_v15  ;;  %v5154_v12 = vsub.s32 32, %v5153_v14  ;;  %v1707_v38 = vand.u32 2147483647, %v10559_v1  ;;  %v10599_v11 = vsub.s32 %v1871_v39, %v1874_v30 }
 0x2e3   :  { %v4907_v41 = vand.u32 2147483647, %v4906_v58  ;;  %v10601_v31 = vshrl.u32 %v5151_v52, 5  ;;  %v7497_v62 = vadd.s32 4294967169, %v1711_v26  ;;  %v1897_v28 = vsub.s32 4, %v1873_v63 }
 0x2e4   :  { %v5156_v23 = vshll.u32 %v8425_v47, %v5153_v14  ;;  %v5157_v2 = vshrl.u32 %v8426_v51, %v5154_v12  ;;  %v5160_v37 = vshrl.u32 %v8427_v53, %v5154_v12  ;;  %v1877_v4 = vsub.s32 0, %v10599_v11 }
 0x2e5   :  { %v4910_v17 = vmul.f32 %v4909_v33, %v4907_v41  ;;  %v5159_v54 = vshll.u32 %v8426_v51, %v5153_v14  ;;  %v5163_v8 = vshrl.u32 %v8428_v55, %v5154_v12  ;;  %v5162_v18 = vshll.u32 %v8427_v53, %v5153_v14 }
 0x2e6   :  { %v5158_v16 = vor.u32 %v5157_v2, %v5156_v23  ;;  %v5165_v50 = vshll.u32 %v8428_v55, %v5153_v14  ;;  %v5166_v6 = vshrl.u32 %v8429_v57, %v5154_v12  ;;  %v7502_v20 = vmin.u32 %v1877_v4, %v10599_v11 }
 0x2e7   :  { %v4911_v36 = vxor.u32 2147483648, %v4910_v17  ;;  %v5161_v44 = vor.u32 %v5160_v37, %v5159_v54  ;;  %v5168_v24 = vshll.u32 %v8429_v57, %v5153_v14  ;;  %v5164_v61 = vor.u32 %v5163_v8, %v5162_v18  ;;  %v10657_v8 = vpop.f32.mrb[14].mxu0 }
 0x2e8   :  { %v5167_v39 = vor.u32 %v5166_v6, %v5165_v50  ;;  %v5169_v56 = vshrl.u32 %v8430_v0, %v5154_v12  ;;  %v1879_v7 = vclz %v7502_v20  ;;  %v10620_v59 = vshll.u32 %v5147_v49, 8 }
 0x2e9   :  { %v4912_v13 = vsel %vm4829_vm13, %v4911_v36, %v4910_v17  ;;  %v1717_v45 = vadd.s32 1, %v7497_v62  ;;  %vm10624_vm9 = vcmp.le.f32.partialorder %v1811_v60, 0.7853982  ;;  %v1898_v21 = vsel %vm1813_vm8, %v1897_v28, %v1873_v63 }
 0x2ea   :  { %v4915_v29 = vsel %vm10563_vm2, %v10316_v27, %v4912_v13  ;;  %v5155_v48 = vshrl.u32 %v8425_v47, %v5154_v12  ;;  %v5170_v43 = vor.u32 %v5169_v56, %v5168_v24  ;;  %v7503_v5 = vadd.s32 4294967294, %v1879_v7 }
 0x2eb   :  { %8235 = vcosq.f32 %v4915_v29  ;;  %vm5171_vm10 = vcmp.lt.s32.totalorder %v10601_v31, 1  ;;  %vm5173_vm11 = vcmp.lt.s32.totalorder %v10601_v31, 3  ;;  %vm5174_vm0 = vcmp.lt.s32.totalorder %v10601_v31, 4 }
 0x2ec   :  { %8237 = vsinq.f32 %v4915_v29  ;;  %v5176_v15 = vsel %vm5174_vm0, %v5164_v61, 2102212464  ;;  %v5179_v58 = vsel %vm5171_vm10, %v5158_v16, %v5161_v44  ;;  %v5180_v52 = vsel %vm5174_vm0, %v5167_v39, 920167782 }
 0x2ed   :  { %v5183_v60 = vsel %vm5171_vm10, %v5161_v44, %v5164_v61  ;;  %vm7504_vm12 = vcmp.lt.s32.totalorder %v7503_v5, 0  ;;  %vm5172_vm13 = vcmp.lt.s32.totalorder %v10601_v31, 2  ;;  %v5181_v63 = vsel %vm5173_vm11, %v5164_v61, %v5180_v52 }
 0x2ee   :  { %v5184_v26 = vsel %vm5174_vm0, %v5170_v43, 1326507024  ;;  %v1882_v14 = vsel %vm7504_vm12, 0, %v7503_v5  ;;  %v5175_v41 = vsel %vm5171_vm10, %v5155_v48, %v5158_v16  ;;  %v5182_v33 = vsel %vm5172_vm13, %v5179_v58, %v5181_v63 }
 0x2ef   :  { %v5185_v30 = vsel %vm5173_vm11, %v5167_v39, %v5184_v26  ;;  %vm4922_vm15 = vcmp.lt.s32.totalorder %v10589_v35, 2  ;;  %v1883_v49 = vsub.s32 32, %v1882_v14  ;;  %v1887_v12 = vsub.s32 4294967266, %v1882_v14 }
 0x2f0   :  { %v5177_v17 = vsel %vm5173_vm11, %v5161_v44, %v5176_v15  ;;  %v5186_v62 = vsel %vm5172_vm13, %v5183_v60, %v5185_v30  ;;  %vm4919_vm1 = vweird.f32 %v10316_v27  ;;  %v1884_v36 = vshll.u32 %v10599_v11, %v1882_v14 }
 0x2f1   :  { %v10648_v28 = vmul.u32.u64.low %v10620_v59, %v5186_v62  ;;  %v10649_v23 = vmul.u32.u64.high %v10620_v59, %v5186_v62, %v10648_v28  ;;  %v10652_v2 = vmul.u32.u64.low %v10620_v59, %v5182_v33  ;;  %v10653_v37 = vmul.u32.u64.high %v10620_v59, %v5182_v33, %v10652_v2 }
 0x2f2   :  { %v1885_v4 = vshrl.u32 %v1867_v25, %v1883_v49  ;;  %v1888_v54 = vadd.s32 127, %v1887_v12  ;;  %vm1718_vm4 = vcmp.gt.s32.totalorder %v1717_v45, 0  ;;  %vm4923_vm2 = vcmp.eq.s32.totalorder %v10589_v35, 0 }
 0x2f3   :  { %v5178_v16 = vsel %vm5172_vm13, %v5175_v41, %v5177_v17  ;;  %v1714_v18 = vand.u32 8388607, %v1707_v38  ;;  %v1719_v50 = vsel %vm1718_vm4, %v1717_v45, 0  ;;  %v1900_v11 = vsel %vm10624_vm9, 0, %v1898_v21 }
 0x2f4   :  { %v1886_v13 = vor.u32 %v1885_v4, %v1884_v36  ;;  %v1889_v20 = vshll.u32 %v1888_v54, 23  ;;  %v1721_v25 = vand.u32 31, %v1719_v50  ;;  %vm4926_vm5 = vcmp.eq.s32.totalorder %v10589_v35, 2 }
 0x2f5   :  { %v8236_v6 = vpop.eup %8235  ;;  %vm5196_vm3 = vc.u32 %v10649_v23, %v10652_v2  ;;  %v5197_v31 = vadd.s32 1, %v10653_v37  ;;  %v5194_v39 = vmul.u32 %v10620_v59, %v5178_v16  ;;  %v1904_v45 = vadd.s32 3, %v1900_v11 }
 0x2f6   :  { %v8238_v44 = vpop.eup %8237  ;;  %v4927_v24 = vxor.u32 2147483648, %v8236_v6  ;;  %v1890_v61 = vor.u32 4788187, %v1889_v20  ;;  %v1722_v56 = vsub.s32 32, %v1721_v25  ;;  %v1715_v21 = vor.u32 8388608, %v1714_v18 }
 0x2f7   :  { %v4924_v29 = vxor.u32 2147483648, %v8238_v44  ;;  %v5198_v48 = vsel %vm5196_vm3, %v5197_v31, %v10653_v37  ;;  %v1893_v15 = vcvt.s32.f32 %v1886_v13  ;;  %v1724_v60 = vshll.u32 %v8425_v47, %v1721_v25 }
 0x2f8   :  { %v4928_v7 = vsel %vm4926_vm5, %v4927_v24, %v8238_v44  ;;  %v1891_v5 = vand.u32 2147483647, %v1890_v61  ;;  %v5199_v58 = vadd.s32 %v5198_v48, %v5194_v39  ;;  %v1725_v63 = vshrl.u32 %v8426_v51, %v1722_v56 }
 0x2f9   :  { %v4925_v43 = vsel %vm4923_vm2, %v8236_v6, %v4924_v29  ;;  %v1728_v59 = vshrl.u32 %v8427_v53, %v1722_v56  ;;  %v1731_v33 = vshrl.u32 %v8428_v55, %v1722_v56  ;;  %v1720_v35 = vshrl.u32 %v1719_v50, 5 }
 0x2fa   :  { %v4929_v52 = vsel %vm4922_vm15, %v4925_v43, %v4928_v7  ;;  %v1894_v14 = vmul.f32 %v1893_v15, %v1891_v5  ;;  %v5200_v41 = vadd.s32 536870912, %v5199_v58  ;;  %v1727_v30 = vshll.u32 %v8426_v51, %v1721_v25 }
 0x2fb   :  { %v4930_v26 = vsel %vm4919_vm1, nan, %v4929_v52  ;;  %v1730_v49 = vshll.u32 %v8427_v53, %v1721_v25  ;;  %v1734_v12 = vshrl.u32 %v8429_v57, %v1722_v56  ;;  %v1726_v27 = vor.u32 %v1725_v63, %v1724_v60 }
 0x2fc   :  { %7364 = vst.msk [vmem:[%s14271_s3 + $0x140] sm:$0xff] %vm7323_vm14, %v4930_v26  ;;  %v1895_v17 = vxor.u32 2147483648, %v1894_v14  ;;  %v5201_v62 = vshrl.u32 %v5200_v41, 30  ;;  %v1733_v28 = vshll.u32 %v8428_v55, %v1721_v25  ;;  %vm5141_vm6 = vcmp.lt.s32.totalorder %v10542_v32, 0 }
 0x2fd   :  { %v1729_v37 = vor.u32 %v1728_v59, %v1727_v30  ;;  %v1732_v36 = vor.u32 %v1731_v33, %v1730_v49  ;;  %v1736_v4 = vshll.u32 %v8429_v57, %v1721_v25  ;;  %v1737_v54 = vshrl.u32 %v8430_v0, %v1722_v56 }
 0x2fe   :  { %v1896_v16 = vsel %vm1813_vm8, %v1895_v17, %v1894_v14  ;;  %v10695_v18 = vand.u32 3, %v1904_v45  ;;  %v5202_v50 = vshll.u32 %v5201_v62, 30  ;;  %v1735_v6 = vor.u32 %v1734_v12, %v1733_v28 }
 0x2ff   :  { %v1899_v13 = vsel %vm10624_vm9, %v10321_v42, %v1896_v16  ;;  %v1723_v20 = vshrl.u32 %v8425_v47, %v1722_v56  ;;  %v1738_v11 = vor.u32 %v1737_v54, %v1736_v4  ;;  %v10701_v44 = vshll.u32 %v1715_v21, 8 }
 0x300   :  { %8239 = vcosq.f32 %v1899_v13  ;;  %v10703_v25 = vsub.s32 %v5199_v58, %v5202_v50  ;;  %vm1739_vm7 = vcmp.lt.s32.totalorder %v1720_v35, 1  ;;  %vm1742_vm10 = vcmp.lt.s32.totalorder %v1720_v35, 4 }
 0x301   :  { %8241 = vsinq.f32 %v1899_v13  ;;  %vm1740_vm8 = vcmp.lt.s32.totalorder %v1720_v35, 2  ;;  %v1744_v24 = vsel %vm1742_vm10, %v1732_v36, 2102212464  ;;  %v1747_v31 = vsel %vm1739_vm7, %v1726_v27, %v1729_v37 }
 0x302   :  { %v5205_v29 = vsub.s32 0, %v10703_v25  ;;  %v5225_v61 = vsub.s32 4, %v5201_v62  ;;  %vm1741_vm11 = vcmp.lt.s32.totalorder %v1720_v35, 3  ;;  %v1748_v46 = vsel %vm1742_vm10, %v1735_v6, 920167782  ;;  %v10733_v35 = vpop.f32.mrb[14].mxu1 }
 0x303   :  { %v1743_v39 = vsel %vm1739_vm7, %v1723_v20, %v1726_v27  ;;  %v1749_v7 = vsel %vm1741_vm11, %v1732_v36, %v1748_v46  ;;  %v1751_v56 = vsel %vm1739_vm7, %v1729_v37, %v1732_v36  ;;  %v1752_v45 = vsel %vm1742_vm10, %v1738_v11, 1326507024 }
 0x304   :  { %v7630_v48 = vmin.u32 %v5205_v29, %v10703_v25  ;;  %v1745_v21 = vsel %vm1741_vm11, %v1729_v37, %v1744_v24  ;;  %v1750_v43 = vsel %vm1740_vm8, %v1747_v31, %v1749_v7  ;;  %v1753_v5 = vsel %vm1741_vm11, %v1735_v6, %v1752_v45 }
 0x305   :  { %v1754_v15 = vsel %vm1740_vm8, %v1751_v56, %v1753_v5  ;;  %v10710_v58 = vmul.u32.u64.low %v10701_v44, %v1750_v43  ;;  %v10711_v52 = vmul.u32.u64.high %v10701_v44, %v1750_v43, %v10710_v58  ;;  %v5038_v60 = vand.u32 2139095040, %v10594_v40 }
 0x306   :  { %v5207_v63 = vclz %v7630_v48  ;;  %v5226_v59 = vsel %vm5141_vm6, %v5225_v61, %v5201_v62  ;;  %v5035_v26 = vand.u32 2147483647, %v10594_v40  ;;  %v1746_v14 = vsel %vm1740_vm8, %v1743_v39, %v1745_v21 }
 0x307   :  { %v10719_v41 = vmul.u32.u64.low %v10701_v44, %v1754_v15  ;;  %v10720_v33 = vmul.u32.u64.high %v10701_v44, %v1754_v15, %v10719_v41  ;;  %v5039_v30 = vshrl.u32 %v5038_v60, 23  ;;  %vm1906_vm9 = vcmp.lt.s32.totalorder %v10695_v18, 2 }
 0x308   :  { %vm10725_vm0 = vcmp.le.f32.partialorder %v5139_v34, 0.7853982  ;;  %v7631_v12 = vadd.s32 4294967294, %v5207_v63  ;;  %v10731_v17 = vadd.f32 %v10312_v9, %v10304_v10  ;;  %vm1907_vm12 = vcmp.eq.s32.totalorder %v10695_v18, 0 }
 0x309   :  { %vm1910_vm13 = vcmp.eq.s32.totalorder %v10695_v18, 2  ;;  %v1765_v62 = vadd.s32 1, %v10711_v52  ;;  %v7625_v27 = vadd.s32 4294967169, %v5039_v30  ;;  %v5195_v34 = vadd.s32 %v10652_v2, %v10649_v23 }
 0x30a   :  { %v8240_v28 = vpop.eup %8239  ;;  %vm7632_vm15 = vcmp.lt.s32.totalorder %v7631_v12, 0  ;;  %v5228_v37 = vsel %vm10725_vm0, 0, %v5226_v59  ;;  %v1762_v10 = vmul.u32 %v10701_v44, %v1746_v14  ;;  %vm1764_vm1 = vc.u32 %v10720_v33, %v10710_v58 }
 0x30b   :  { %v8242_v9 = vpop.eup %8241  ;;  %v1911_v36 = vxor.u32 2147483648, %v8240_v28  ;;  %v5210_v4 = vsel %vm7632_vm15, 0, %v7631_v12  ;;  %v5042_v54 = vand.u32 8388607, %v5035_v26  ;;  %v2022_v13 = vand.u32 2139095040, %v10731_v17 }
 0x30c   :  { %v1908_v16 = vxor.u32 2147483648, %v8242_v9  ;;  %v5211_v50 = vsub.s32 32, %v5210_v4  ;;  %v5215_v6 = vsub.s32 4294967266, %v5210_v4  ;;  %v5212_v2 = vshll.u32 %v10703_v25, %v5210_v4 }
 0x30d   :  { %v1912_v23 = vsel %vm1910_vm13, %v1911_v36, %v8242_v9  ;;  %v1766_v20 = vsel %vm1764_vm1, %v1765_v62, %v10711_v52  ;;  %v5045_v11 = vadd.s32 1, %v7625_v27  ;;  %vm1903_vm4 = vweird.f32 %v10321_v42 }
 0x30e   :  { %v1909_v44 = vsel %vm1907_vm12, %v8240_v28, %v1908_v16  ;;  %v5213_v24 = vshrl.u32 %v5195_v34, %v5211_v50  ;;  %v5216_v31 = vadd.s32 127, %v5215_v6  ;;  %v1767_v29 = vadd.s32 %v1766_v20, %v1762_v10 }
 0x30f   :  { %v1913_v61 = vsel %vm1906_vm9, %v1909_v44, %v1912_v23  ;;  %v5232_v46 = vadd.s32 3, %v5228_v37  ;;  %vm5046_vm2 = vcmp.gt.s32.totalorder %v5045_v11, 0  ;;  %v5043_v45 = vor.u32 8388608, %v5042_v54 }
 0x310   :  { %v1914_v39 = vsel %vm1903_vm4, nan, %v1913_v61  ;;  %v5214_v7 = vor.u32 %v5213_v24, %v5212_v2  ;;  %v5217_v56 = vshll.u32 %v5216_v31, 23  ;;  %v1768_v25 = vadd.s32 536870912, %v1767_v29 }
 0x311   :  { %7335 = vst.msk [vmem:[%s14271_s3 + $0x58] sm:$0xff] %vm7323_vm14, %v1914_v39  ;;  %v5047_v48 = vsel %vm5046_vm2, %v5045_v11, 0  ;;  %v2023_v5 = vshrl.u32 %v2022_v13, 23  ;;  %v10760_v52 = vand.u32 3, %v5232_v46  ;;  %vm1709_vm5 = vcmp.lt.s32.totalorder %v10559_v1, 0 }
 0x312   :  { %v5218_v21 = vor.u32 4788187, %v5217_v56  ;;  %v1769_v43 = vshrl.u32 %v1768_v25, 30  ;;  %v5049_v42 = vand.u32 31, %v5047_v48  ;;  %v5221_v18 = vcvt.s32.f32 %v5214_v7 }
 0x313   :  { %v10764_v63 = vadd.s32 %v10710_v58, %v10720_v33  ;;  %v10766_v14 = vshll.u32 %v5043_v45, 8  ;;  %v2019_v41 = vand.u32 2147483647, %v10731_v17  ;;  %v10771_v62 = vshrl.u32 %v5047_v48, 5 }
 0x314   :  { %v5219_v15 = vand.u32 2147483647, %v5218_v21  ;;  %v1770_v60 = vshll.u32 %v1769_v43, 30  ;;  %v5050_v59 = vsub.s32 32, %v5049_v42  ;;  %v7509_v27 = vadd.s32 4294967169, %v2023_v5 }
 0x315   :  { %v1793_v28 = vsub.s32 4, %v1769_v43  ;;  %v5052_v34 = vshll.u32 %v8425_v47, %v5049_v42  ;;  %vm10778_vm3 = vcmp.le.f32.partialorder %v1707_v38, 0.7853982  ;;  %v5055_v36 = vshll.u32 %v8426_v51, %v5049_v42 }
 0x316   :  { %v5222_v30 = vmul.f32 %v5221_v18, %v5219_v15  ;;  %v10769_v12 = vsub.s32 %v1767_v29, %v1770_v60  ;;  %v5053_v37 = vshrl.u32 %v8426_v51, %v5050_v59  ;;  %v5056_v10 = vshrl.u32 %v8427_v53, %v5050_v59  ;;  %v10818_v60 = vpop.f32.mrb[15].mxu0 }
 0x317   :  { %v5059_v4 = vshrl.u32 %v8428_v55, %v5050_v59  ;;  %v5058_v16 = vshll.u32 %v8427_v53, %v5049_v42  ;;  %v5061_v50 = vshll.u32 %v8428_v55, %v5049_v42  ;;  %v5062_v6 = vshrl.u32 %v8429_v57, %v5050_v59 }
 0x318   :  { %v5223_v58 = vxor.u32 2147483648, %v5222_v30  ;;  %v1773_v9 = vsub.s32 0, %v10769_v12  ;;  %v5054_v54 = vor.u32 %v5053_v37, %v5052_v34  ;;  %v5057_v23 = vor.u32 %v5056_v10, %v5055_v36 }
 0x319   :  { %v5064_v2 = vshll.u32 %v8429_v57, %v5049_v42  ;;  %v5060_v11 = vor.u32 %v5059_v4, %v5058_v16  ;;  %v5063_v44 = vor.u32 %v5062_v6, %v5061_v50  ;;  %v5065_v24 = vshrl.u32 %v8430_v0, %v5050_v59 }
 0x31a   :  { %v5224_v13 = vsel %vm5141_vm6, %v5223_v58, %v5222_v30  ;;  %v7498_v38 = vmin.u32 %v1773_v9, %v10769_v12  ;;  %vm5067_vm7 = vcmp.lt.s32.totalorder %v10771_v62, 1  ;;  %v2029_v29 = vadd.s32 1, %v7509_v27 }
 0x31b   :  { %v5227_v20 = vsel %vm10725_vm0, %v10542_v32, %v5224_v13  ;;  %v1794_v61 = vsel %vm1709_vm5, %v1793_v28, %v1769_v43  ;;  %v5051_v46 = vshrl.u32 %v8425_v47, %v5050_v59  ;;  %v5066_v39 = vor.u32 %v5065_v24, %v5064_v2 }
 0x31c   :  { %8243 = vcosq.f32 %v5227_v20  ;;  %v1775_v31 = vclz %v7498_v38  ;;  %vm5069_vm6 = vcmp.lt.s32.totalorder %v10771_v62, 3  ;;  %vm5070_vm10 = vcmp.lt.s32.totalorder %v10771_v62, 4 }
 0x31d   :  { %8245 = vsinq.f32 %v5227_v20  ;;  %v5075_v49 = vsel %vm5067_vm7, %v5054_v54, %v5057_v23  ;;  %v5072_v56 = vsel %vm5070_vm10, %v5060_v11, 2102212464  ;;  %v5076_v25 = vsel %vm5070_vm10, %v5063_v44, 920167782 }
 0x31e   :  { %v7499_v7 = vadd.s32 4294967294, %v1775_v31  ;;  %v5079_v45 = vsel %vm5067_vm7, %v5057_v23, %v5060_v11  ;;  %v5080_v48 = vsel %vm5070_vm10, %v5066_v39, 1326507024  ;;  %vm5068_vm11 = vcmp.lt.s32.totalorder %v10771_v62, 2  ;;  %v10848_v62 = vld [vmem:[%s14270_s2] ss:$0 sm:$0xff] }
 0x31f   :  { %v5077_v21 = vsel %vm5069_vm6, %v5060_v11, %v5076_v25  ;;  %v5081_v43 = vsel %vm5069_vm6, %v5063_v44, %v5080_v48  ;;  %vm5235_vm9 = vcmp.eq.s32.totalorder %v10760_v52, 0  ;;  %v1796_v42 = vsel %vm10778_vm3, 0, %v1794_v61 }
 0x320   :  { %vm7500_vm8 = vcmp.lt.s32.totalorder %v7499_v7, 0  ;;  %v5078_v15 = vsel %vm5068_vm11, %v5075_v49, %v5077_v21  ;;  %v5082_v18 = vsel %vm5068_vm11, %v5079_v45, %v5081_v43  ;;  %vm5234_vm0 = vcmp.lt.s32.totalorder %v10760_v52, 2 }
 0x321   :  { %v1778_v5 = vsel %vm7500_vm8, 0, %v7499_v7  ;;  %v5071_v27 = vsel %vm5067_vm7, %v5051_v46, %v5054_v54  ;;  %v5073_v28 = vsel %vm5069_vm6, %v5057_v23, %v5072_v56  ;;  %vm5231_vm12 = vweird.f32 %v10542_v32 }
 0x322   :  { %v1779_v59 = vsub.s32 32, %v1778_v5  ;;  %v1783_v30 = vsub.s32 4294967266, %v1778_v5  ;;  %v10827_v34 = vmul.u32.u64.low %v10766_v14, %v5082_v18  ;;  %v10828_v37 = vmul.u32.u64.high %v10766_v14, %v5082_v18, %v10827_v34 }
 0x323   :  { %v10831_v10 = vmul.u32.u64.low %v10766_v14, %v5078_v15  ;;  %v10832_v58 = vmul.u32.u64.high %v10766_v14, %v5078_v15, %v10831_v10  ;;  %v1780_v9 = vshll.u32 %v10769_v12, %v1778_v5  ;;  %vm2030_vm13 = vcmp.gt.s32.totalorder %v2029_v29, 0 }
 0x324   :  { %v1781_v36 = vshrl.u32 %v10764_v63, %v1779_v59  ;;  %v1784_v4 = vadd.s32 127, %v1783_v30  ;;  %v1800_v54 = vadd.s32 3, %v1796_v42  ;;  %v5074_v16 = vsel %vm5068_vm11, %v5071_v27, %v5073_v28 }
 0x325   :  { %v2026_v50 = vand.u32 8388607, %v2019_v41  ;;  %v2031_v6 = vsel %vm2030_vm13, %v2029_v29, 0  ;;  %vm5238_vm15 = vcmp.eq.s32.totalorder %v10760_v52, 2  ;;  %vm5092_vm1 = vc.u32 %v10828_v37, %v10831_v10 }
 0x326   :  { %v8244_v13 = vpop.eup %8243  ;;  %v1782_v38 = vor.u32 %v1781_v36, %v1780_v9  ;;  %v1785_v23 = vshll.u32 %v1784_v4, 23  ;;  %v2033_v2 = vand.u32 31, %v2031_v6  ;;  %v5093_v63 = vadd.s32 1, %v10832_v58 }
 0x327   :  { %v8246_v20 = vpop.eup %8245  ;;  %v5239_v12 = vxor.u32 2147483648, %v8244_v13  ;;  %v10852_v11 = vadd.f32 %v10848_v62, %v10362_v19  ;;  %v5090_v31 = vmul.u32 %v10766_v14, %v5074_v16  ;;  %v10855_v46 = vand.u32 3, %v1800_v54 }
 0x328   :  { %v5236_v44 = vxor.u32 2147483648, %v8246_v20  ;;  %v1786_v24 = vor.u32 4788187, %v1785_v23  ;;  %v2034_v29 = vsub.s32 32, %v2033_v2  ;;  %v5094_v39 = vsel %vm5092_vm1, %v5093_v63, %v10832_v58 }
 0x329   :  { %v5240_v61 = vsel %vm5238_vm15, %v5239_v12, %v8246_v20  ;;  %v2027_v7 = vor.u32 8388608, %v2026_v50  ;;  %v1789_v25 = vcvt.s32.f32 %v1782_v38  ;;  %v5095_v45 = vadd.s32 %v5094_v39, %v5090_v31 }
 0x32a   :  { %v5237_v49 = vsel %vm5235_vm9, %v8244_v13, %v5236_v44  ;;  %v1787_v56 = vand.u32 2147483647, %v1786_v24  ;;  %v2036_v48 = vshll.u32 %v8425_v47, %v2033_v2  ;;  %v2037_v14 = vshrl.u32 %v8426_v51, %v2034_v29 }
 0x32b   :  { %v5241_v19 = vsel %vm5234_vm0, %v5237_v49, %v5240_v61  ;;  %v2040_v21 = vshrl.u32 %v8427_v53, %v2034_v29  ;;  %v5096_v42 = vadd.s32 536870912, %v5095_v45  ;;  %v2043_v15 = vshrl.u32 %v8428_v55, %v2034_v29 }
 0x32c   :  { %v5242_v43 = vsel %vm5231_vm12, nan, %v5241_v19  ;;  %v1790_v5 = vmul.f32 %v1789_v25, %v1787_v56  ;;  %v2032_v52 = vshrl.u32 %v2031_v6, 5  ;;  %v2039_v18 = vshll.u32 %v8426_v51, %v2033_v2 }
 0x32d   :  { %7367 = vst.msk [vmem:[%s14271_s3 + $0x158] sm:$0xff] %vm7323_vm14, %v5242_v43  ;;  %v2042_v59 = vshll.u32 %v8427_v53, %v2033_v2  ;;  %v2046_v30 = vshrl.u32 %v8429_v57, %v2034_v29  ;;  %v5097_v28 = vshrl.u32 %v5096_v42, 30  ;;  %v2038_v32 = vor.u32 %v2037_v14, %v2036_v48 }
 0x32e   :  { %v1791_v27 = vxor.u32 2147483648, %v1790_v5  ;;  %v2045_v34 = vshll.u32 %v8428_v55, %v2033_v2  ;;  %v2041_v58 = vor.u32 %v2040_v21, %v2039_v18  ;;  %v2048_v36 = vshll.u32 %v8429_v57, %v2033_v2  ;;  %v10897_v21 = vpop.f32.mrb[15].mxu1 }
 0x32f   :  { %v2044_v9 = vor.u32 %v2043_v15, %v2042_v59  ;;  %v2049_v4 = vshrl.u32 %v8430_v0, %v2034_v29  ;;  %v5098_v16 = vshll.u32 %v5097_v28, 30  ;;  %v10880_v6 = vshll.u32 %v2027_v7, 8 }
 0x330   :  { %v1792_v54 = vsel %vm1709_vm5, %v1791_v27, %v1790_v5  ;;  %v2047_v50 = vor.u32 %v2046_v30, %v2045_v34  ;;  %v2035_v38 = vshrl.u32 %v8425_v47, %v2034_v29  ;;  %v5350_v20 = vand.u32 2139095040, %v10852_v11 }
 0x331   :  { %v1795_v13 = vsel %vm10778_vm3, %v10559_v1, %v1792_v54  ;;  %v2050_v23 = vor.u32 %v2049_v4, %v2048_v36  ;;  %v10887_v2 = vsub.s32 %v5095_v45, %v5098_v16  ;;  %vm2051_vm4 = vcmp.lt.s32.totalorder %v2032_v52, 1 }
 0x332   :  { %8247 = vcosq.f32 %v1795_v13  ;;  %vm2054_vm2 = vcmp.lt.s32.totalorder %v2032_v52, 4  ;;  %vm2052_vm5 = vcmp.lt.s32.totalorder %v2032_v52, 2  ;;  %v2059_v63 = vsel %vm2051_vm4, %v2038_v32, %v2041_v58 }
 0x333   :  { %8249 = vsinq.f32 %v1795_v13  ;;  %v2056_v12 = vsel %vm2054_vm2, %v2044_v9, 2102212464  ;;  %v5101_v44 = vsub.s32 0, %v10887_v2  ;;  %v5121_v24 = vsub.s32 4, %v5097_v28 }
 0x334   :  { %vm2053_vm7 = vcmp.lt.s32.totalorder %v2032_v52, 3  ;;  %v2060_v33 = vsel %vm2054_vm2, %v2047_v50, 920167782  ;;  %v2055_v31 = vsel %vm2051_vm4, %v2035_v38, %v2038_v32  ;;  %v2063_v29 = vsel %vm2051_vm4, %v2041_v58, %v2044_v9 }
 0x335   :  { %v2061_v61 = vsel %vm2053_vm7, %v2044_v9, %v2060_v33  ;;  %v2064_v39 = vsel %vm2054_vm2, %v2050_v23, 1326507024  ;;  %v7626_v7 = vmin.u32 %v5101_v44, %v10887_v2  ;;  %v2057_v49 = vsel %vm2053_vm7, %v2041_v58, %v2056_v12 }
 0x336   :  { %v2062_v56 = vsel %vm2052_vm5, %v2059_v63, %v2061_v61  ;;  %v2065_v25 = vsel %vm2053_vm7, %v2047_v50, %v2064_v39  ;;  %v5351_v14 = vshrl.u32 %v5350_v20, 23  ;;  %vm10901_vm3 = vcmp.le.f32.partialorder %v5035_v26, 0.7853982 }
 0x337   :  { %v2066_v45 = vsel %vm2052_vm5, %v2063_v29, %v2065_v25  ;;  %v10894_v19 = vmul.u32.u64.low %v10880_v6, %v2062_v56  ;;  %v10895_v48 = vmul.u32.u64.high %v10880_v6, %v2062_v56, %v10894_v19  ;;  %vm5037_vm6 = vcmp.lt.s32.totalorder %v10594_v40, 0 }
 0x338   :  { %v5103_v5 = vclz %v7626_v7  ;;  %vm1799_vm10 = vweird.f32 %v10559_v1  ;;  %v5122_v42 = vsel %vm5037_vm6, %v5121_v24, %v5097_v28  ;;  %v7637_v59 = vadd.s32 4294967169, %v5351_v14 }
 0x339   :  { %v10910_v15 = vmul.u32.u64.low %v10880_v6, %v2066_v45  ;;  %v10911_v18 = vmul.u32.u64.high %v10880_v6, %v2066_v45, %v10910_v15  ;;  %v2058_v27 = vsel %vm2052_vm5, %v2055_v31, %v2057_v49  ;;  %v5347_v26 = vand.u32 2147483647, %v10852_v11 }
 0x33a   :  { %v7627_v30 = vadd.s32 4294967294, %v5103_v5  ;;  %v10917_v32 = vadd.f32 %v10848_v62, %v10458_v22  ;;  %vm1802_vm8 = vcmp.lt.s32.totalorder %v10855_v46, 2  ;;  %vm1803_vm11 = vcmp.eq.s32.totalorder %v10855_v46, 0 }
 0x33b   :  { %v2077_v28 = vadd.s32 1, %v10895_v48  ;;  %v5357_v34 = vadd.s32 1, %v7637_v59  ;;  %vm1806_vm9 = vcmp.eq.s32.totalorder %v10855_v46, 2  ;;  %v5091_v52 = vadd.s32 %v10831_v10, %v10828_v37 }
 0x33c   :  { %v8248_v58 = vpop.eup %8247  ;;  %vm7628_vm0 = vcmp.lt.s32.totalorder %v7627_v30, 0  ;;  %v5124_v9 = vsel %vm10901_vm3, 0, %v5122_v42  ;;  %v2074_v54 = vmul.u32 %v10880_v6, %v2058_v27  ;;  %vm2076_vm12 = vc.u32 %v10911_v18, %v10894_v19 }
 0x33d   :  { %v8250_v36 = vpop.eup %8249  ;;  %v1807_v22 = vxor.u32 2147483648, %v8248_v58  ;;  %v5106_v4 = vsel %vm7628_vm0, 0, %v7627_v30  ;;  %v5354_v38 = vand.u32 8388607, %v5347_v26  ;;  %v2078_v10 = vsel %vm2076_vm12, %v2077_v28, %v10895_v48 }
 0x33e   :  { %v1804_v16 = vxor.u32 2147483648, %v8250_v36  ;;  %v5107_v50 = vsub.s32 32, %v5106_v4  ;;  %v5111_v13 = vsub.s32 4294967266, %v5106_v4  ;;  %v5108_v37 = vshll.u32 %v10887_v2, %v5106_v4 }
 0x33f   :  { %v1808_v23 = vsel %vm1806_vm9, %v1807_v22, %v8250_v36  ;;  %vm5358_vm13 = vcmp.gt.s32.totalorder %v5357_v34, 0  ;;  %v2079_v6 = vadd.s32 %v2078_v10, %v2074_v54  ;;  %v5128_v24 = vadd.s32 3, %v5124_v9 }
 0x340   :  { %v1805_v20 = vsel %vm1803_vm11, %v8248_v58, %v1804_v16  ;;  %v5109_v12 = vshrl.u32 %v5091_v52, %v5107_v50  ;;  %v5112_v63 = vadd.s32 127, %v5111_v13  ;;  %v5359_v33 = vsel %vm5358_vm13, %v5357_v34, 0 }
 0x341   :  { %v1809_v44 = vsel %vm1802_vm8, %v1805_v20, %v1808_v23  ;;  %v1915_v31 = vand.u32 2147483647, %v10917_v32  ;;  %v2080_v39 = vadd.s32 536870912, %v2079_v6  ;;  %v5355_v7 = vor.u32 8388608, %v5354_v38 }
 0x342   :  { %v1810_v61 = vsel %vm1799_vm10, nan, %v1809_v44  ;;  %v5110_v2 = vor.u32 %v5109_v12, %v5108_v37  ;;  %v5113_v29 = vshll.u32 %v5112_v63, 23  ;;  %v5361_v49 = vand.u32 31, %v5359_v33 }
 0x343   :  { %7334 = vst.msk [vmem:[%s14271_s3 + $0x50] sm:$0xff] %vm7323_vm14, %v1810_v61  ;;  %v10944_v46 = vshrl.u32 %v2080_v39, 30  ;;  %v10946_v25 = vand.u32 3, %v5128_v24  ;;  %v1918_v48 = vand.u32 2139095040, %v10917_v32  ;;  %v10951_v1 = vand.u32 8388607, %v1915_v31 }
 0x344   :  { %v5114_v56 = vor.u32 4788187, %v5113_v29  ;;  %v5362_v45 = vsub.s32 32, %v5361_v49  ;;  %v5117_v5 = vcvt.s32.f32 %v5110_v2  ;;  %v10954_v42 = vadd.s32 %v10894_v19, %v10911_v18 }
 0x345   :  { %v2082_v15 = vshll.u32 %v10944_v46, 30  ;;  %v10960_v28 = vshll.u32 %v5355_v7, 8  ;;  %v5364_v52 = vshll.u32 %v8425_v47, %v5361_v49  ;;  %v5360_v36 = vshrl.u32 %v5359_v33, 5 }
 0x346   :  { %v5115_v14 = vand.u32 2147483647, %v5114_v56  ;;  %v5365_v59 = vshrl.u32 %v8426_v51, %v5362_v45  ;;  %v5368_v30 = vshrl.u32 %v8427_v53, %v5362_v45  ;;  %v5371_v27 = vshrl.u32 %v8428_v55, %v5362_v45 }
 0x347   :  { %v10962_v58 = vsub.s32 %v2079_v6, %v2082_v15  ;;  %v5374_v9 = vshrl.u32 %v8429_v57, %v5362_v45  ;;  %v5367_v19 = vshll.u32 %v8426_v51, %v5361_v49  ;;  %v5370_v18 = vshll.u32 %v8427_v53, %v5361_v49 }
 0x348   :  { %v5118_v34 = vmul.f32 %v5117_v5, %v5115_v14  ;;  %v1919_v22 = vshrl.u32 %v1918_v48, 23  ;;  %v5366_v16 = vor.u32 %v5365_v59, %v5364_v52  ;;  %v5373_v50 = vshll.u32 %v8428_v55, %v5361_v49 }
 0x349   :  { %v2085_v54 = vsub.s32 0, %v10962_v58  ;;  %v5369_v13 = vor.u32 %v5368_v30, %v5367_v19  ;;  %v5372_v38 = vor.u32 %v5371_v27, %v5370_v18  ;;  %v5376_v23 = vshll.u32 %v8429_v57, %v5361_v49 }
 0x34a   :  { %v5119_v4 = vxor.u32 2147483648, %v5118_v34  ;;  %v5377_v37 = vshrl.u32 %v8430_v0, %v5362_v45  ;;  %v5375_v12 = vor.u32 %v5374_v9, %v5373_v50  ;;  %v1923_v63 = vor.u32 8388608, %v10951_v1 }
 0x34b   :  { %v7510_v20 = vmin.u32 %v2085_v54, %v10962_v58  ;;  %v5363_v44 = vshrl.u32 %v8425_v47, %v5362_v45  ;;  %v7505_v33 = vadd.s32 4294967169, %v1919_v22  ;;  %vm5379_vm15 = vcmp.lt.s32.totalorder %v5360_v36, 1  ;;  %v10995_v54 = vpop.f32.mrb[16].mxu0 }
 0x34c   :  { %v5120_v10 = vsel %vm5037_vm6, %v5119_v4, %v5118_v34  ;;  %v5378_v24 = vor.u32 %v5377_v37, %v5376_v23  ;;  %vm5382_vm1 = vcmp.lt.s32.totalorder %v5360_v36, 4  ;;  %vm2021_vm4 = vcmp.lt.s32.totalorder %v10731_v17, 0 }
 0x34d   :  { %v5123_v6 = vsel %vm10901_vm3, %v10594_v40, %v5120_v10  ;;  %v2087_v61 = vclz %v7510_v20  ;;  %vm5380_vm2 = vcmp.lt.s32.totalorder %v5360_v36, 2  ;;  %v5384_v2 = vsel %vm5382_vm1, %v5372_v38, 2102212464 }
 0x34e   :  { %8251 = vcosq.f32 %v5123_v6  ;;  %v5387_v29 = vsel %vm5379_vm15, %v5366_v16, %v5369_v13  ;;  %vm5381_vm5 = vcmp.lt.s32.totalorder %v5360_v36, 3  ;;  %v5388_v7 = vsel %vm5382_vm1, %v5375_v12, 920167782 }
 0x34f   :  { %8253 = vsinq.f32 %v5123_v6  ;;  %v7511_v39 = vadd.s32 4294967294, %v2087_v61  ;;  %v5391_v49 = vsel %vm5379_vm15, %v5369_v13, %v5372_v38  ;;  %v5383_v43 = vsel %vm5379_vm15, %v5363_v44, %v5366_v16 }
 0x350   :  { %v5389_v56 = vsel %vm5381_vm5, %v5372_v38, %v5388_v7  ;;  %v5392_v48 = vsel %vm5382_vm1, %v5378_v24, 1326507024  ;;  %v1925_v45 = vadd.s32 1, %v7505_v33  ;;  %v5385_v1 = vsel %vm5381_vm5, %v5369_v13, %v5384_v2 }
 0x351   :  { %vm7512_vm7 = vcmp.lt.s32.totalorder %v7511_v39, 0  ;;  %v5390_v14 = vsel %vm5380_vm2, %v5387_v29, %v5389_v56  ;;  %v5393_v5 = vsel %vm5381_vm5, %v5375_v12, %v5392_v48  ;;  %v2105_v9 = vsub.s32 4, %v10944_v46 }
 0x352   :  { %v2090_v15 = vsel %vm7512_vm7, 0, %v7511_v39  ;;  %v5394_v59 = vsel %vm5380_vm2, %v5391_v49, %v5393_v5  ;;  %v10984_v30 = vmul.u32.u64.low %v10960_v28, %v5390_v14  ;;  %v10985_v27 = vmul.u32.u64.high %v10960_v28, %v5390_v14, %v10984_v30 }
 0x353   :  { %v2091_v34 = vsub.s32 32, %v2090_v15  ;;  %v2095_v52 = vsub.s32 4294967266, %v2090_v15  ;;  %vm1926_vm3 = vcmp.gt.s32.totalorder %v1925_v45, 0  ;;  %vm5127_vm6 = vweird.f32 %v10594_v40 }
 0x354   :  { %v5386_v19 = vsel %vm5380_vm2, %v5383_v43, %v5385_v1  ;;  %v10992_v18 = vmul.u32.u64.low %v10960_v28, %v5394_v59  ;;  %v10993_v22 = vmul.u32.u64.high %v10960_v28, %v5394_v59, %v10992_v18  ;;  %v1927_v4 = vsel %vm1926_vm3, %v1925_v45, 0 }
 0x355   :  { %v2092_v16 = vshll.u32 %v10962_v58, %v2090_v15  ;;  %v2093_v50 = vshrl.u32 %v10954_v42, %v2091_v34  ;;  %v2096_v13 = vadd.s32 127, %v2095_v52  ;;  %v1929_v38 = vand.u32 31, %v1927_v4 }
 0x356   :  { %vm5130_vm10 = vcmp.lt.s32.totalorder %v10946_v25, 2  ;;  %vm5131_vm8 = vcmp.eq.s32.totalorder %v10946_v25, 0  ;;  %vm11003_vm11 = vcmp.le.f32.partialorder %v2019_v41, 0.7853982  ;;  %v5405_v23 = vadd.s32 1, %v10985_v27 }
 0x357   :  { %vm5134_vm9 = vcmp.eq.s32.totalorder %v10946_v25, 2  ;;  %v2094_v58 = vor.u32 %v2093_v50, %v2092_v16  ;;  %v2097_v10 = vshll.u32 %v2096_v13, 23  ;;  %v2106_v42 = vsel %vm2021_vm4, %v2105_v9, %v10944_v46 }
 0x358   :  { %v8252_v37 = vpop.eup %8251  ;;  %v5402_v6 = vmul.u32 %v10960_v28, %v5386_v19  ;;  %vm5404_vm0 = vc.u32 %v10993_v22, %v10984_v30  ;;  %v1930_v41 = vsub.s32 32, %v1929_v38  ;;  %v11016_v61 = vshll.u32 %v1923_v63, 8 }
 0x359   :  { %v8254_v20 = vpop.eup %8253  ;;  %v5135_v12 = vxor.u32 2147483648, %v8252_v37  ;;  %v2098_v24 = vor.u32 4788187, %v2097_v10  ;;  %v5406_v33 = vsel %vm5404_vm0, %v5405_v23, %v10985_v27  ;;  %v2108_v29 = vsel %vm11003_vm11, 0, %v2106_v42 }
 0x35a   :  { %v5132_v44 = vxor.u32 2147483648, %v8254_v20  ;;  %v5407_v39 = vadd.s32 %v5406_v33, %v5402_v6  ;;  %v11022_v46 = vadd.f32 %v10848_v62, %v10544_v3  ;;  %v2101_v49 = vcvt.s32.f32 %v2094_v58 }
 0x35b   :  { %v5136_v2 = vsel %vm5134_vm9, %v5135_v12, %v8254_v20  ;;  %v2099_v7 = vand.u32 2147483647, %v2098_v24  ;;  %v11026_v43 = vshrl.u32 %v1927_v4, 5  ;;  %v1933_v48 = vshrl.u32 %v8426_v51, %v1930_v41 }
 0x35c   :  { %v5133_v28 = vsel %vm5131_vm8, %v8252_v37, %v5132_v44  ;;  %v5408_v56 = vadd.s32 536870912, %v5407_v39  ;;  %v1936_v45 = vshrl.u32 %v8427_v53, %v1930_v41  ;;  %v1932_v14 = vshll.u32 %v8425_v47, %v1929_v38 }
 0x35d   :  { %v5137_v63 = vsel %vm5130_vm10, %v5133_v28, %v5136_v2  ;;  %v2102_v3 = vmul.f32 %v2101_v49, %v2099_v7  ;;  %v1939_v5 = vshrl.u32 %v8428_v55, %v1930_v41  ;;  %v1935_v15 = vshll.u32 %v8426_v51, %v1929_v38 }
 0x35e   :  { %v5138_v1 = vsel %vm5127_vm6, nan, %v5137_v63  ;;  %v5409_v25 = vshrl.u32 %v5408_v56, 30  ;;  %v1938_v59 = vshll.u32 %v8427_v53, %v1929_v38  ;;  %v1942_v27 = vshrl.u32 %v8429_v57, %v1930_v41 }
 0x35f   :  { %7366 = vst.msk [vmem:[%s14271_s3 + $0x150] sm:$0xff] %vm7323_vm14, %v5138_v1  ;;  %v2103_v34 = vxor.u32 2147483648, %v2102_v3  ;;  %v1941_v40 = vshll.u32 %v8428_v55, %v1929_v38  ;;  %v1944_v52 = vshll.u32 %v8429_v57, %v1929_v38  ;;  %v1945_v9 = vshrl.u32 %v8430_v0, %v1930_v41 }
 0x360   :  { %v2112_v19 = vadd.s32 3, %v2108_v29  ;;  %v5410_v18 = vshll.u32 %v5409_v25, 30  ;;  %v1934_v4 = vor.u32 %v1933_v48, %v1932_v14  ;;  %v1937_v16 = vor.u32 %v1936_v45, %v1935_v15 }
 0x361   :  { %v2104_v50 = vsel %vm2021_vm4, %v2103_v34, %v2102_v3  ;;  %v1940_v13 = vor.u32 %v1939_v5, %v1938_v59  ;;  %v1943_v23 = vor.u32 %v1942_v27, %v1941_v40  ;;  %v1946_v37 = vor.u32 %v1945_v9, %v1944_v52 }
 0x362   :  { %v2107_v58 = vsel %vm11003_vm11, %v10731_v17, %v2104_v50  ;;  %v11051_v10 = vsub.s32 %v5407_v39, %v5410_v18  ;;  %v1931_v38 = vshrl.u32 %v8425_v47, %v1930_v41  ;;  %v5246_v42 = vand.u32 2139095040, %v11022_v46 }
 0x363   :  { %8255 = vcosq.f32 %v2107_v58  ;;  %vm1947_vm12 = vcmp.lt.s32.totalorder %v11026_v43, 1  ;;  %vm1948_vm13 = vcmp.lt.s32.totalorder %v11026_v43, 2  ;;  %vm1949_vm15 = vcmp.lt.s32.totalorder %v11026_v43, 3 }
 0x364   :  { %8257 = vsinq.f32 %v2107_v58  ;;  %v5413_v20 = vsub.s32 0, %v11051_v10  ;;  %vm1950_vm1 = vcmp.lt.s32.totalorder %v11026_v43, 4  ;;  %v1955_v36 = vsel %vm1947_vm12, %v1934_v4, %v1937_v16 }
 0x365   :  { %v1952_v12 = vsel %vm1950_vm1, %v1940_v13, 2102212464  ;;  %v1956_v6 = vsel %vm1950_vm1, %v1943_v23, 920167782  ;;  %v1959_v41 = vsel %vm1947_vm12, %v1937_v16, %v1940_v13  ;;  %v1960_v44 = vsel %vm1950_vm1, %v1946_v37, 1326507024 }
 0x366   :  { %v7638_v24 = vmin.u32 %v5413_v20, %v11051_v10  ;;  %v5433_v33 = vsub.s32 4, %v5409_v25  ;;  %v1957_v2 = vsel %vm1949_vm15, %v1940_v13, %v1956_v6  ;;  %v1961_v29 = vsel %vm1949_vm15, %v1943_v23, %v1960_v44 }
 0x367   :  { %v2113_v39 = vand.u32 3, %v2112_v19  ;;  %v1958_v28 = vsel %vm1948_vm13, %v1955_v36, %v1957_v2  ;;  %v1962_v7 = vsel %vm1948_vm13, %v1959_v41, %v1961_v29  ;;  %v5247_v49 = vshrl.u32 %v5246_v42, 23 }
 0x368   :  { %vm5349_vm4 = vcmp.lt.s32.totalorder %v10852_v11, 0  ;;  %v5415_v63 = vclz %v7638_v24  ;;  %v1951_v56 = vsel %vm1947_vm12, %v1931_v38, %v1934_v4  ;;  %v1953_v48 = vsel %vm1949_vm15, %v1937_v16, %v1952_v12 }
 0x369   :  { %v11079_v45 = vmul.u32.u64.low %v11016_v61, %v1962_v7  ;;  %v11080_v1 = vmul.u32.u64.high %v11016_v61, %v1962_v7, %v11079_v45  ;;  %v11083_v3 = vmul.u32.u64.low %v11016_v61, %v1958_v28  ;;  %v11084_v14 = vmul.u32.u64.high %v11016_v61, %v1958_v28, %v11083_v3 }
 0x36a   :  { %vm2111_vm2 = vweird.f32 %v10731_v17  ;;  %vm11090_vm5 = vcmp.le.f32.partialorder %v5347_v26, 0.7853982  ;;  %v7639_v15 = vadd.s32 4294967294, %v5415_v63  ;;  %v5434_v59 = vsel %vm5349_vm4, %v5433_v33, %v5409_v25 }
 0x36b   :  { %v7633_v27 = vadd.s32 4294967169, %v5247_v49  ;;  %vm2114_vm7 = vcmp.lt.s32.totalorder %v2113_v39, 2  ;;  %vm2115_vm3 = vcmp.eq.s32.totalorder %v2113_v39, 0  ;;  %vm2118_vm6 = vcmp.eq.s32.totalorder %v2113_v39, 2 }
 0x36c   :  { %v1954_v34 = vsel %vm1948_vm13, %v1951_v56, %v1953_v48  ;;  %v5403_v40 = vadd.s32 %v10984_v30, %v10993_v22  ;;  %vm7640_vm10 = vcmp.lt.s32.totalorder %v7639_v15, 0  ;;  %v5243_v26 = vand.u32 2147483647, %v11022_v46 }
 0x36d   :  { %v5253_v52 = vadd.s32 1, %v7633_v27  ;;  %v8256_v9 = vpop.eup %8255  ;;  %v5418_v19 = vsel %vm7640_vm10, 0, %v7639_v15  ;;  %v5436_v18 = vsel %vm11090_vm5, 0, %v5434_v59  ;;  %vm1972_vm8 = vc.u32 %v11080_v1, %v11083_v3  ;;  %v11132_v15 = vpop.f32.mrb[16].mxu1 }
 0x36e   :  { %v1973_v25 = vadd.s32 1, %v11084_v14  ;;  %v8258_v4 = vpop.eup %8257  ;;  %v2119_v43 = vxor.u32 2147483648, %v8256_v9  ;;  %v5419_v16 = vsub.s32 32, %v5418_v19  ;;  %v5423_v50 = vsub.s32 4294967266, %v5418_v19 }
 0x36f   :  { %v1970_v30 = vmul.u32 %v11016_v61, %v1954_v34  ;;  %v2116_v22 = vxor.u32 2147483648, %v8258_v4  ;;  %v5420_v13 = vshll.u32 %v11051_v10, %v5418_v19  ;;  %vm5254_vm11 = vcmp.gt.s32.totalorder %v5253_v52, 0 }
 0x370   :  { %v1974_v23 = vsel %vm1972_vm8, %v1973_v25, %v11084_v14  ;;  %v2120_v37 = vsel %vm2118_vm6, %v2119_v43, %v8258_v4  ;;  %v5421_v58 = vshrl.u32 %v5403_v40, %v5419_v16  ;;  %v5424_v38 = vadd.s32 127, %v5423_v50 }
 0x371   :  { %v1975_v42 = vadd.s32 %v1974_v23, %v1970_v30  ;;  %v2117_v20 = vsel %vm2115_vm3, %v8256_v9, %v2116_v22  ;;  %v5440_v36 = vadd.s32 3, %v5436_v18  ;;  %v5250_v12 = vand.u32 8388607, %v5243_v26 }
 0x372   :  { %v5255_v6 = vsel %vm5254_vm11, %v5253_v52, 0  ;;  %v2121_v61 = vsel %vm2114_vm7, %v2117_v20, %v2120_v37  ;;  %v5422_v41 = vor.u32 %v5421_v58, %v5420_v13  ;;  %v5425_v44 = vshll.u32 %v5424_v38, 23 }
 0x373   :  { %v1976_v10 = vadd.s32 536870912, %v1975_v42  ;;  %v2122_v24 = vsel %vm2111_vm2, nan, %v2121_v61  ;;  %v5257_v33 = vand.u32 31, %v5255_v6  ;;  %v5251_v28 = vor.u32 8388608, %v5250_v12 }
 0x374   :  { %7337 = vst.msk [vmem:[%s14271_s3 + $0x68] sm:$0xff] %vm7323_vm14, %v2122_v24  ;;  %v5426_v2 = vor.u32 4788187, %v5425_v44  ;;  %v5429_v39 = vcvt.s32.f32 %v5422_v41  ;;  %v11122_v63 = vand.u32 3, %v5440_v36  ;;  %v11130_v14 = vadd.f32 %v10848_v62, %v10657_v8 }
 0x375   :  { %v11120_v29 = vshrl.u32 %v1976_v10, 30  ;;  %v5258_v7 = vsub.s32 32, %v5257_v33  ;;  %v5260_v34 = vshll.u32 %v8425_v47, %v5257_v33  ;;  %v5256_v52 = vshrl.u32 %v5255_v6, 5 }
 0x376   :  { %v5427_v49 = vand.u32 2147483647, %v5426_v2  ;;  %v5263_v9 = vshll.u32 %v8426_v51, %v5257_v33  ;;  %v5266_v19 = vshll.u32 %v8427_v53, %v5257_v33  ;;  %v11140_v18 = vshll.u32 %v5251_v28, 8 }
 0x377   :  { %v1978_v56 = vshll.u32 %v11120_v29, 30  ;;  %v5261_v17 = vshrl.u32 %v8426_v51, %v5258_v7  ;;  %v5264_v48 = vshrl.u32 %v8427_v53, %v5258_v7  ;;  %v5267_v45 = vshrl.u32 %v8428_v55, %v5258_v7 }
 0x378   :  { %v5430_v59 = vmul.f32 %v5429_v39, %v5427_v49  ;;  %v5270_v40 = vshrl.u32 %v8429_v57, %v5258_v7  ;;  %v5269_v43 = vshll.u32 %v8428_v55, %v5257_v33  ;;  %v5272_v30 = vshll.u32 %v8429_v57, %v5257_v33 }
 0x379   :  { %v11134_v27 = vsub.s32 %v1975_v42, %v1978_v56  ;;  %v5262_v4 = vor.u32 %v5261_v17, %v5260_v34  ;;  %v5265_v16 = vor.u32 %v5264_v48, %v5263_v9  ;;  %v5268_v50 = vor.u32 %v5267_v45, %v5266_v19 }
 0x37a   :  { %v5431_v25 = vxor.u32 2147483648, %v5430_v59  ;;  %v5273_v22 = vshrl.u32 %v8430_v0, %v5258_v7  ;;  %vm1917_vm9 = vcmp.lt.s32.totalorder %v10917_v32, 0  ;;  %v5271_v37 = vor.u32 %v5270_v40, %v5269_v43 }
 0x37b   :  { %v1981_v8 = vsub.s32 0, %v11134_v27  ;;  %v2230_v58 = vand.u32 2139095040, %v11130_v14  ;;  %v2001_v42 = vsub.s32 4, %v11120_v29  ;;  %v5259_v20 = vshrl.u32 %v8425_v47, %v5258_v7 }
 0x37c   :  { %v5432_v13 = vsel %vm5349_vm4, %v5431_v25, %v5430_v59  ;;  %v5274_v36 = vor.u32 %v5273_v22, %v5272_v30  ;;  %vm5275_vm0 = vcmp.lt.s32.totalorder %v5256_v52, 1  ;;  %vm5278_vm12 = vcmp.lt.s32.totalorder %v5256_v52, 4 }
 0x37d   :  { %v7506_v23 = vmin.u32 %v1981_v8, %v11134_v27  ;;  %v5435_v38 = vsel %vm11090_vm5, %v10852_v11, %v5432_v13  ;;  %vm11158_vm13 = vcmp.le.f32.partialorder %v1915_v31, 0.7853982  ;;  %vm5276_vm15 = vcmp.lt.s32.totalorder %v5256_v52, 2 }
 0x37e   :  { %8259 = vcosq.f32 %v5435_v38  ;;  %v5280_v61 = vsel %vm5278_vm12, %v5268_v50, 2102212464  ;;  %v5283_v5 = vsel %vm5275_vm0, %v5262_v4, %v5265_v16  ;;  %vm5277_vm1 = vcmp.lt.s32.totalorder %v5256_v52, 3 }
 0x37f   :  { %v1983_v12 = vclz %v7506_v23  ;;  %8261 = vsinq.f32 %v5435_v38  ;;  %v5284_v44 = vsel %vm5278_vm12, %v5271_v37, 920167782  ;;  %v5287_v10 = vsel %vm5275_vm0, %v5265_v16, %v5268_v50 }
 0x380   :  { %v5279_v24 = vsel %vm5275_vm0, %v5259_v20, %v5262_v4  ;;  %v5285_v33 = vsel %vm5277_vm1, %v5268_v50, %v5284_v44  ;;  %v5288_v2 = vsel %vm5278_vm12, %v5274_v36, 1326507024  ;;  %v2231_v28 = vshrl.u32 %v2230_v58, 23 }
 0x381   :  { %v7507_v41 = vadd.s32 4294967294, %v1983_v12  ;;  %v5281_v7 = vsel %vm5277_vm1, %v5265_v16, %v5280_v61  ;;  %v5286_v49 = vsel %vm5276_vm15, %v5283_v5, %v5285_v33  ;;  %v5289_v39 = vsel %vm5277_vm1, %v5271_v37, %v5288_v2 }
 0x382   :  { %vm5443_vm2 = vcmp.eq.s32.totalorder %v11122_v63, 0  ;;  %v5290_v56 = vsel %vm5276_vm15, %v5287_v10, %v5289_v39  ;;  %v11166_v17 = vmul.u32.u64.low %v11140_v18, %v5286_v49  ;;  %v11167_v48 = vmul.u32.u64.high %v11140_v18, %v5286_v49, %v11166_v17 }
 0x383   :  { %vm7508_vm4 = vcmp.lt.s32.totalorder %v7507_v41, 0  ;;  %vm5442_vm5 = vcmp.lt.s32.totalorder %v11122_v63, 2  ;;  %v1971_v45 = vadd.s32 %v11083_v3, %v11080_v1  ;;  %v7517_v40 = vadd.s32 4294967169, %v2231_v28  ;;  %v11183_v3 = vpop.f32.mrb[17].mxu0 }
 0x384   :  { %v1986_v31 = vsel %vm7508_vm4, 0, %v7507_v41  ;;  %vm5439_vm7 = vweird.f32 %v10852_v11  ;;  %v2002_v9 = vsel %vm1917_vm9, %v2001_v42, %v11120_v29  ;;  %v5282_v19 = vsel %vm5276_vm15, %v5279_v24, %v5281_v7 }
 0x385   :  { %v1987_v59 = vsub.s32 32, %v1986_v31  ;;  %v1991_v34 = vsub.s32 4294967266, %v1986_v31  ;;  %v11179_v25 = vmul.u32.u64.low %v11140_v18, %v5290_v56  ;;  %v11180_v8 = vmul.u32.u64.high %v11140_v18, %v5290_v56, %v11179_v25 }
 0x386   :  { %v1988_v4 = vshll.u32 %v11134_v27, %v1986_v31  ;;  %v2237_v1 = vadd.s32 1, %v7517_v40  ;;  %vm5446_vm3 = vcmp.eq.s32.totalorder %v11122_v63, 2  ;;  %v5301_v50 = vadd.s32 1, %v11167_v48 }
 0x387   :  { %v1989_v43 = vshrl.u32 %v1971_v45, %v1987_v59  ;;  %v1992_v16 = vadd.s32 127, %v1991_v34  ;;  %v2227_v30 = vand.u32 2147483647, %v11130_v14  ;;  %v11190_v29 = vadd.f32 %v10848_v62, %v10733_v35 }
 0x388   :  { %v8260_v52 = vpop.eup %8259  ;;  %v2004_v27 = vsel %vm11158_vm13, 0, %v2002_v9  ;;  %vm2238_vm6 = vcmp.gt.s32.totalorder %v2237_v1, 0  ;;  %v5298_v58 = vmul.u32 %v11140_v18, %v5282_v19  ;;  %vm5300_vm10 = vc.u32 %v11180_v8, %v11166_v17 }
 0x389   :  { %v1990_v22 = vor.u32 %v1989_v43, %v1988_v4  ;;  %v1993_v13 = vshll.u32 %v1992_v16, 23  ;;  %v8262_v23 = vpop.eup %8261  ;;  %v5447_v37 = vxor.u32 2147483648, %v8260_v52  ;;  %v2239_v38 = vsel %vm2238_vm6, %v2237_v1, 0 }
 0x38a   :  { %v5444_v42 = vxor.u32 2147483648, %v8262_v23  ;;  %v5302_v35 = vsel %vm5300_vm10, %v5301_v50, %v11167_v48  ;;  %v11200_v36 = vadd.f32 %v10848_v62, %v10818_v60  ;;  %v2234_v5 = vand.u32 8388607, %v2227_v30 }
 0x38b   :  { %v1994_v20 = vor.u32 4788187, %v1993_v13  ;;  %v5448_v12 = vsel %vm5446_vm3, %v5447_v37, %v8262_v23  ;;  %v5303_v61 = vadd.s32 %v5302_v35, %v5298_v58  ;;  %v2241_v18 = vand.u32 31, %v2239_v38 }
 0x38c   :  { %v5445_v41 = vsel %vm5443_vm2, %v8260_v52, %v5444_v42  ;;  %v1997_v10 = vcvt.s32.f32 %v1990_v22  ;;  %v2008_v24 = vadd.s32 3, %v2004_v27  ;;  %v5558_v62 = vand.u32 2139095040, %v11190_v29 }
 0x38d   :  { %v1995_v44 = vand.u32 2147483647, %v1994_v20  ;;  %v5449_v33 = vsel %vm5442_vm5, %v5445_v41, %v5448_v12  ;;  %v5304_v2 = vadd.s32 536870912, %v5303_v61  ;;  %v2242_v60 = vsub.s32 32, %v2241_v18 }
 0x38e   :  { %v5450_v28 = vsel %vm5439_vm7, nan, %v5449_v33  ;;  %v2244_v49 = vshll.u32 %v8425_v47, %v2241_v18  ;;  %v2247_v39 = vshll.u32 %v8426_v51, %v2241_v18  ;;  %v2250_v48 = vshll.u32 %v8427_v53, %v2241_v18 }
 0x38f   :  { %v1998_v7 = vmul.f32 %v1997_v10, %v1995_v44  ;;  %7369 = vst.msk [vmem:[%s14271_s3 + $0x168] sm:$0xff] %vm7323_vm14, %v5450_v28  ;;  %v5305_v31 = vshrl.u32 %v5304_v2, 30  ;;  %v2245_v63 = vshrl.u32 %v8426_v51, %v2242_v60  ;;  %v2248_v56 = vshrl.u32 %v8427_v53, %v2242_v60  ;;  %v11248_v10 = vpop.f32.mrb[17].mxu1 }
 0x390   :  { %v2251_v11 = vshrl.u32 %v8428_v55, %v2242_v60  ;;  %v2253_v59 = vshll.u32 %v8428_v55, %v2241_v18  ;;  %v2254_v34 = vshrl.u32 %v8429_v57, %v2242_v60  ;;  %v11225_v40 = vand.u32 3, %v2008_v24 }
 0x391   :  { %v1999_v45 = vxor.u32 2147483648, %v1998_v7  ;;  %vm5245_vm8 = vcmp.lt.s32.totalorder %v11022_v46, 0  ;;  %v5306_v9 = vshll.u32 %v5305_v31, 30  ;;  %v2240_v19 = vshrl.u32 %v2239_v38, 5 }
 0x392   :  { %v2246_v25 = vor.u32 %v2245_v63, %v2244_v49  ;;  %v2249_v43 = vor.u32 %v2248_v56, %v2247_v39  ;;  %v2252_v16 = vor.u32 %v2251_v11, %v2250_v48  ;;  %v2255_v1 = vor.u32 %v2254_v34, %v2253_v59 }
 0x393   :  { %v2000_v4 = vsel %vm1917_vm9, %v1999_v45, %v1998_v7  ;;  %v11233_v52 = vsub.s32 %v5303_v61, %v5306_v9  ;;  %v2256_v22 = vshll.u32 %v8429_v57, %v2241_v18  ;;  %v2257_v13 = vshrl.u32 %v8430_v0, %v2242_v60 }
 0x394   :  { %v2003_v50 = vsel %vm11158_vm13, %v10917_v32, %v2000_v4  ;;  %v2235_v27 = vor.u32 8388608, %v2234_v5  ;;  %v5555_v23 = vand.u32 2147483647, %v11190_v29  ;;  %v5559_v37 = vshrl.u32 %v5558_v62, 23 }
 0x395   :  { %8263 = vcosq.f32 %v2003_v50  ;;  %vm11240_vm11 = vcmp.le.f32.partialorder %v5243_v26, 0.7853982  ;;  %v5309_v6 = vsub.s32 0, %v11233_v52  ;;  %v2243_v38 = vshrl.u32 %v8425_v47, %v2242_v60 }
 0x396   :  { %8265 = vsinq.f32 %v2003_v50  ;;  %v2258_v42 = vor.u32 %v2257_v13, %v2256_v22  ;;  %v5329_v20 = vsub.s32 4, %v5305_v31  ;;  %vm2259_vm9 = vcmp.lt.s32.totalorder %v2240_v19, 1 }
 0x397   :  { %vm2261_vm0 = vcmp.lt.s32.totalorder %v2240_v19, 3  ;;  %vm2262_vm12 = vcmp.lt.s32.totalorder %v2240_v19, 4  ;;  %v7634_v35 = vmin.u32 %v5309_v6, %v11233_v52  ;;  %v2267_v61 = vsel %vm2259_vm9, %v2246_v25, %v2249_v43 }
 0x398   :  { %v2264_v12 = vsel %vm2262_vm12, %v2252_v16, 2102212464  ;;  %v2268_v5 = vsel %vm2262_vm12, %v2255_v1, 920167782  ;;  %v2271_v26 = vsel %vm2259_vm9, %v2249_v43, %v2252_v16  ;;  %v2272_v41 = vsel %vm2262_vm12, %v2258_v42, 1326507024 }
 0x399   :  { %v2269_v18 = vsel %vm2261_vm0, %v2252_v16, %v2268_v5  ;;  %v2275_v44 = vshll.u32 %v2235_v27, 8  ;;  %v5311_v24 = vclz %v7634_v35  ;;  %vm2260_vm13 = vcmp.lt.s32.totalorder %v2240_v19, 2 }
 0x39a   :  { %v2263_v33 = vsel %vm2259_vm9, %v2243_v38, %v2246_v25  ;;  %v2265_v2 = vsel %vm2261_vm0, %v2249_v43, %v2264_v12  ;;  %v5330_v60 = vsel %vm5245_vm8, %v5329_v20, %v5305_v31  ;;  %v2270_v62 = vsel %vm2260_vm13, %v2267_v61, %v2269_v18 }
 0x39b   :  { %v2273_v28 = vsel %vm2261_vm0, %v2255_v1, %v2272_v41  ;;  %v7645_v7 = vadd.s32 4294967169, %v5559_v37  ;;  %vm2007_vm15 = vweird.f32 %v10917_v32  ;;  %v7635_v49 = vadd.s32 4294967294, %v5311_v24 }
 0x39c   :  { %v2274_v39 = vsel %vm2260_vm13, %v2271_v26, %v2273_v28  ;;  %v11255_v63 = vmul.u32.u64.low %v2275_v44, %v2270_v62  ;;  %v11256_v56 = vmul.u32.u64.high %v2275_v44, %v2270_v62, %v11255_v63  ;;  %vm2010_vm1 = vcmp.lt.s32.totalorder %v11225_v40, 2 }
 0x39d   :  { %v2266_v48 = vsel %vm2260_vm13, %v2263_v33, %v2265_v2  ;;  %v11260_v45 = vmul.u32.u64.low %v2275_v44, %v2274_v39  ;;  %v11261_v11 = vmul.u32.u64.high %v2275_v44, %v2274_v39, %v11260_v45  ;;  %vm2011_vm4 = vcmp.eq.s32.totalorder %v11225_v40, 0 }
 0x39e   :  { %vm2014_vm2 = vcmp.eq.s32.totalorder %v11225_v40, 2  ;;  %vm7636_vm5 = vcmp.lt.s32.totalorder %v7635_v49, 0  ;;  %v5565_v31 = vadd.s32 1, %v7645_v7  ;;  %v5299_v34 = vadd.s32 %v11166_v17, %v11180_v8 }
 0x39f   :  { %v8264_v59 = vpop.eup %8263  ;;  %v5314_v9 = vsel %vm7636_vm5, 0, %v7635_v49  ;;  %v5332_v19 = vsel %vm11240_vm11, 0, %v5330_v60  ;;  %v5562_v25 = vand.u32 8388607, %v5555_v23  ;;  %v2282_v50 = vmul.u32 %v2275_v44, %v2266_v48 }
 0x3a0   :  { %v8266_v4 = vpop.eup %8265  ;;  %v2015_v43 = vxor.u32 2147483648, %v8264_v59  ;;  %v5315_v16 = vsub.s32 32, %v5314_v9  ;;  %v5319_v1 = vsub.s32 4294967266, %v5314_v9  ;;  %v5316_v13 = vshll.u32 %v11233_v52, %v5314_v9 }
 0x3a1   :  { %v2012_v22 = vxor.u32 2147483648, %v8266_v4  ;;  %vm2284_vm7 = vc.u32 %v11261_v11, %v11255_v63  ;;  %v2285_v17 = vadd.s32 1, %v11256_v56  ;;  %vm5566_vm3 = vcmp.gt.s32.totalorder %v5565_v31, 0 }
 0x3a2   :  { %v2016_v8 = vsel %vm2014_vm2, %v2015_v43, %v8266_v4  ;;  %v5317_v27 = vshrl.u32 %v5299_v34, %v5315_v16  ;;  %v5320_v37 = vadd.s32 127, %v5319_v1  ;;  %v5336_v38 = vadd.s32 3, %v5332_v19 }
 0x3a3   :  { %v2013_v6 = vsel %vm2011_vm4, %v8264_v59, %v2012_v22  ;;  %v2286_v42 = vsel %vm2284_vm7, %v2285_v17, %v11256_v56  ;;  %v5567_v20 = vsel %vm5566_vm3, %v5565_v31, 0  ;;  %v5563_v24 = vor.u32 8388608, %v5562_v25 }
 0x3a4   :  { %v2017_v52 = vsel %vm2010_vm1, %v2013_v6, %v2016_v8  ;;  %v5318_v35 = vor.u32 %v5317_v27, %v5316_v13  ;;  %v5321_v12 = vshll.u32 %v5320_v37, 23  ;;  %v2287_v61 = vadd.s32 %v2286_v42, %v2282_v50 }
 0x3a5   :  { %v2018_v5 = vsel %vm2007_vm15, nan, %v2017_v52  ;;  %v5569_v18 = vand.u32 31, %v5567_v20  ;;  %v11288_v44 = vand.u32 3, %v5336_v38  ;;  %v2126_v62 = vand.u32 2139095040, %v11200_v36 }
 0x3a6   :  { %7336 = vst.msk [vmem:[%s14271_s3 + $0x60] sm:$0xff] %vm7323_vm14, %v2018_v5  ;;  %v5322_v26 = vor.u32 4788187, %v5321_v12  ;;  %v2288_v41 = vadd.s32 536870912, %v2287_v61  ;;  %v5325_v2 = vcvt.s32.f32 %v5318_v35  ;;  %v5568_v32 = vshrl.u32 %v5567_v20, 5 }
 0x3a7   :  { %v5570_v33 = vsub.s32 32, %v5569_v18  ;;  %v5578_v48 = vshll.u32 %v8427_v53, %v5569_v18  ;;  %v5572_v31 = vshll.u32 %v8425_v47, %v5569_v18  ;;  %v5575_v59 = vshll.u32 %v8426_v51, %v5569_v18 }
 0x3a8   :  { %v5323_v40 = vand.u32 2147483647, %v5322_v26  ;;  %v11290_v60 = vshrl.u32 %v2288_v41, 30  ;;  %v5581_v34 = vshll.u32 %v8428_v55, %v5569_v18  ;;  %v2123_v43 = vand.u32 2147483647, %v11200_v36 }
 0x3a9   :  { %v5573_v28 = vshrl.u32 %v8426_v51, %v5570_v33  ;;  %v5576_v7 = vshrl.u32 %v8427_v53, %v5570_v33  ;;  %v5579_v49 = vshrl.u32 %v8428_v55, %v5570_v33  ;;  %v5582_v45 = vshrl.u32 %v8429_v57, %v5570_v33 }
 0x3aa   :  { %v5326_v39 = vmul.f32 %v5325_v2, %v5323_v40  ;;  %v2290_v56 = vshll.u32 %v11290_v60, 30  ;;  %v5585_v9 = vshrl.u32 %v8430_v0, %v5570_v33  ;;  %v5584_v22 = vshll.u32 %v8429_v57, %v5569_v18 }
 0x3ab   :  { %v5580_v4 = vor.u32 %v5579_v49, %v5578_v48  ;;  %v5574_v16 = vor.u32 %v5573_v28, %v5572_v31  ;;  %v5577_v1 = vor.u32 %v5576_v7, %v5575_v59  ;;  %v5583_v50 = vor.u32 %v5582_v45, %v5581_v34 }
 0x3ac   :  { %v5327_v19 = vxor.u32 2147483648, %v5326_v39  ;;  %v11303_v25 = vsub.s32 %v2287_v61, %v2290_v56  ;;  %v11310_v8 = vshll.u32 %v5563_v24, 8  ;;  %v2127_v27 = vshrl.u32 %v2126_v62, 23 }
 0x3ad   :  { %v5571_v6 = vshrl.u32 %v8425_v47, %v5570_v33  ;;  %v5586_v38 = vor.u32 %v5585_v9, %v5584_v22  ;;  %vm5590_vm6 = vcmp.lt.s32.totalorder %v5568_v32, 4  ;;  %vm5587_vm10 = vcmp.lt.s32.totalorder %v5568_v32, 1 }
 0x3ae   :  { %v5328_v13 = vsel %vm5245_vm8, %v5327_v19, %v5326_v39  ;;  %v2293_v17 = vsub.s32 0, %v11303_v25  ;;  %v5592_v20 = vsel %vm5590_vm6, %v5580_v4, 2102212464  ;;  %vm5589_vm8 = vcmp.lt.s32.totalorder %v5568_v32, 3 }
 0x3af   :  { %v5331_v37 = vsel %vm11240_vm11, %v11022_v46, %v5328_v13  ;;  %v5595_v52 = vsel %vm5587_vm10, %v5574_v16, %v5577_v1  ;;  %v5596_v35 = vsel %vm5590_vm6, %v5583_v50, 920167782  ;;  %vm11321_vm9 = vcmp.le.f32.partialorder %v2227_v30, 0.7853982 }
 0x3b0   :  { %8267 = vcosq.f32 %v5331_v37  ;;  %v7518_v42 = vmin.u32 %v2293_v17, %v11303_v25  ;;  %v5591_v61 = vsel %vm5587_vm10, %v5571_v6, %v5574_v16  ;;  %v5593_v5 = vsel %vm5589_vm8, %v5577_v1, %v5592_v20 }
 0x3b1   :  { %8269 = vsinq.f32 %v5331_v37  ;;  %v5599_v18 = vsel %vm5587_vm10, %v5577_v1, %v5580_v4  ;;  %vm5588_vm11 = vcmp.lt.s32.totalorder %v5568_v32, 2  ;;  %v5597_v26 = vsel %vm5589_vm8, %v5580_v4, %v5596_v35 }
 0x3b2   :  { %v2295_v12 = vclz %v7518_v42  ;;  %v5600_v41 = vsel %vm5590_vm6, %v5586_v38, 1326507024  ;;  %v7513_v24 = vadd.s32 4294967169, %v2127_v27  ;;  %v2313_v40 = vsub.s32 4, %v11290_v60  ;;  %v11354_v27 = vpop.f32.mrb[18].mxu0 }
 0x3b3   :  { %v5598_v2 = vsel %vm5588_vm11, %v5595_v52, %v5597_v26  ;;  %v5601_v62 = vsel %vm5589_vm8, %v5583_v50, %v5600_v41  ;;  %v5594_v28 = vsel %vm5588_vm11, %v5591_v61, %v5593_v5  ;;  %vm5335_vm12 = vweird.f32 %v11022_v46  ;;  %v11362_v52 = vld [vmem:[%s14270_s2] ss:$0 sm:$0xff] }
 0x3b4   :  { %v7519_v33 = vadd.s32 4294967294, %v2295_v12  ;;  %v5602_v7 = vsel %vm5588_vm11, %v5599_v18, %v5601_v62  ;;  %v11328_v30 = vmul.u32.u64.low %v11310_v8, %v5598_v2  ;;  %v11329_v49 = vmul.u32.u64.high %v11310_v8, %v5598_v2, %v11328_v30 }
 0x3b5   :  { %v11333_v39 = vmul.u32.u64.low %v11310_v8, %v5602_v7  ;;  %v11334_v56 = vmul.u32.u64.high %v11310_v8, %v5602_v7, %v11333_v39  ;;  %v2133_v32 = vadd.s32 1, %v7513_v24  ;;  %vm5342_vm13 = vcmp.eq.s32.totalorder %v11288_v44, 2 }
 0x3b6   :  { %vm7520_vm0 = vcmp.lt.s32.totalorder %v7519_v33, 0  ;;  %vm2229_vm15 = vcmp.lt.s32.totalorder %v11130_v14, 0  ;;  %v2283_v48 = vadd.s32 %v11255_v63, %v11261_v11  ;;  %v5610_v9 = vmul.u32 %v11310_v8, %v5594_v28 }
 0x3b7   :  { %v2298_v45 = vsel %vm7520_vm0, 0, %v7519_v33  ;;  %v2314_v34 = vsel %vm2229_vm15, %v2313_v40, %v11290_v60  ;;  %vm2134_vm1 = vcmp.gt.s32.totalorder %v2133_v32, 0  ;;  %v5613_v19 = vadd.s32 1, %v11329_v49 }
 0x3b8   :  { %v2299_v31 = vsub.s32 32, %v2298_v45  ;;  %v2303_v59 = vsub.s32 4294967266, %v2298_v45  ;;  %v2130_v4 = vand.u32 8388607, %v2123_v43  ;;  %v2135_v16 = vsel %vm2134_vm1, %v2133_v32, 0 }
 0x3b9   :  { %v2300_v50 = vshll.u32 %v11303_v25, %v2298_v45  ;;  %vm5612_vm4 = vc.u32 %v11334_v56, %v11328_v30  ;;  %v2316_v60 = vsel %vm11321_vm9, 0, %v2314_v34  ;;  %v2137_v8 = vand.u32 31, %v2135_v16 }
 0x3ba   :  { %v8268_v1 = vpop.eup %8267  ;;  %v2301_v63 = vshrl.u32 %v2283_v48, %v2299_v31  ;;  %v2304_v11 = vadd.s32 127, %v2303_v59  ;;  %v5614_v17 = vsel %vm5612_vm4, %v5613_v19, %v11329_v49  ;;  %vm5339_vm2 = vcmp.eq.s32.totalorder %v11288_v44, 0 }
 0x3bb   :  { %v8270_v22 = vpop.eup %8269  ;;  %v5343_v13 = vxor.u32 2147483648, %v8268_v1  ;;  %v5615_v42 = vadd.s32 %v5614_v17, %v5610_v9  ;;  %v2138_v20 = vsub.s32 32, %v2137_v8  ;;  %v11366_v35 = vadd.f32 %v11362_v52, %v10897_v21 }
 0x3bc   :  { %v5340_v37 = vxor.u32 2147483648, %v8270_v22  ;;  %v2302_v6 = vor.u32 %v2301_v63, %v2300_v50  ;;  %v2305_v38 = vshll.u32 %v2304_v11, 23  ;;  %vm5338_vm5 = vcmp.lt.s32.totalorder %v11288_v44, 2 }
 0x3bd   :  { %v5344_v25 = vsel %vm5342_vm13, %v5343_v13, %v8270_v22  ;;  %v5616_v5 = vadd.s32 536870912, %v5615_v42  ;;  %v2320_v26 = vadd.s32 3, %v2316_v60  ;;  %v2131_v41 = vor.u32 8388608, %v2130_v4 }
 0x3be   :  { %v5341_v12 = vsel %vm5339_vm2, %v8268_v1, %v5340_v37  ;;  %v2306_v61 = vor.u32 4788187, %v2305_v38  ;;  %v11371_v24 = vadd.f32 %v11362_v52, %v10995_v54  ;;  %v2309_v2 = vcvt.s32.f32 %v2302_v6 }
 0x3bf   :  { %v5345_v18 = vsel %vm5338_vm5, %v5341_v12, %v5344_v25  ;;  %v5617_v62 = vshrl.u32 %v5616_v5, 30  ;;  %v2136_v21 = vshrl.u32 %v2135_v16, 5  ;;  %v2141_v44 = vshrl.u32 %v8426_v51, %v2138_v20 }
 0x3c0   :  { %v5346_v33 = vsel %vm5335_vm12, nan, %v5345_v18  ;;  %v2307_v40 = vand.u32 2147483647, %v2306_v61  ;;  %v2144_v28 = vshrl.u32 %v8427_v53, %v2138_v20  ;;  %v2147_v7 = vshrl.u32 %v8428_v55, %v2138_v20 }
 0x3c1   :  { %7368 = vst.msk [vmem:[%s14271_s3 + $0x160] sm:$0xff] %vm7323_vm14, %v5346_v33  ;;  %v5618_v49 = vshll.u32 %v5617_v62, 30  ;;  %v2146_v46 = vshll.u32 %v8427_v53, %v2137_v8  ;;  %v2150_v39 = vshrl.u32 %v8429_v57, %v2138_v20  ;;  %vm5557_vm7 = vcmp.lt.s32.totalorder %v11190_v29, 0 }
 0x3c2   :  { %v2310_v54 = vmul.f32 %v2309_v2, %v2307_v40  ;;  %v2140_v32 = vshll.u32 %v8425_v47, %v2137_v8  ;;  %v2143_v48 = vshll.u32 %v8426_v51, %v2137_v8  ;;  %v2149_v45 = vshll.u32 %v8428_v55, %v2137_v8 }
 0x3c3   :  { %v2153_v31 = vshrl.u32 %v8430_v0, %v2138_v20  ;;  %v11389_v34 = vand.u32 3, %v2320_v26  ;;  %v11391_v9 = vsub.s32 %v5615_v42, %v5618_v49  ;;  %v2148_v19 = vor.u32 %v2147_v7, %v2146_v46  ;;  %v11412_v26 = vpop.f32.mrb[18].mxu1 }
 0x3c4   :  { %v2311_v59 = vxor.u32 2147483648, %v2310_v54  ;;  %v2142_v4 = vor.u32 %v2141_v44, %v2140_v32  ;;  %v2145_v16 = vor.u32 %v2144_v28, %v2143_v48  ;;  %v2151_v1 = vor.u32 %v2150_v39, %v2149_v45 }
 0x3c5   :  { %v2152_v50 = vshll.u32 %v8429_v57, %v2137_v8  ;;  %v5621_v11 = vsub.s32 0, %v11391_v9  ;;  %v2139_v22 = vshrl.u32 %v8425_v47, %v2138_v20  ;;  %v2171_v13 = vshll.u32 %v2131_v41, 8 }
 0x3c6   :  { %v2312_v63 = vsel %vm2229_vm15, %v2311_v59, %v2310_v54  ;;  %v5641_v17 = vsub.s32 4, %v5617_v62  ;;  %vm2158_vm3 = vcmp.lt.s32.totalorder %v2136_v21, 4  ;;  %vm11403_vm6 = vcmp.le.f32.partialorder %v5555_v23, 0.7853982 }
 0x3c7   :  { %v2315_v60 = vsel %vm11321_vm9, %v11130_v14, %v2312_v63  ;;  %v2154_v37 = vor.u32 %v2153_v31, %v2152_v50  ;;  %v7646_v6 = vmin.u32 %v5621_v11, %v11391_v9  ;;  %vm2155_vm10 = vcmp.lt.s32.totalorder %v2136_v21, 1 }
 0x3c8   :  { %8271 = vcosq.f32 %v2315_v60  ;;  %v2160_v38 = vsel %vm2158_vm3, %v2148_v19, 2102212464  ;;  %vm2156_vm8 = vcmp.lt.s32.totalorder %v2136_v21, 2  ;;  %v2163_v42 = vsel %vm2155_vm10, %v2142_v4, %v2145_v16 }
 0x3c9   :  { %8273 = vsinq.f32 %v2315_v60  ;;  %v2164_v58 = vsel %vm2158_vm3, %v2151_v1, 920167782  ;;  %v5623_v25 = vclz %v7646_v6  ;;  %vm2157_vm9 = vcmp.lt.s32.totalorder %v2136_v21, 3 }
 0x3ca   :  { %v2159_v20 = vsel %vm2155_vm10, %v2139_v22, %v2142_v4  ;;  %v2167_v12 = vsel %vm2155_vm10, %v2145_v16, %v2148_v19  ;;  %v2161_v61 = vsel %vm2157_vm9, %v2145_v16, %v2160_v38  ;;  %v2165_v5 = vsel %vm2157_vm9, %v2148_v19, %v2164_v58 }
 0x3cb   :  { %v2168_v23 = vsel %vm2158_vm3, %v2154_v37, 1326507024  ;;  %v5454_v18 = vand.u32 2139095040, %v11366_v35  ;;  %v7647_v41 = vadd.s32 4294967294, %v5623_v25  ;;  %v5642_v33 = vsel %vm5557_vm7, %v5641_v17, %v5617_v62 }
 0x3cc   :  { %v2166_v40 = vsel %vm2156_vm8, %v2163_v42, %v2165_v5  ;;  %v2169_v2 = vsel %vm2157_vm9, %v2151_v1, %v2168_v23  ;;  %v2162_v49 = vsel %vm2156_vm8, %v2159_v20, %v2161_v61  ;;  %vm2322_vm0 = vcmp.lt.s32.totalorder %v11389_v34, 2 }
 0x3cd   :  { %v2170_v44 = vsel %vm2156_vm8, %v2167_v12, %v2169_v2  ;;  %v11418_v28 = vmul.u32.u64.low %v2171_v13, %v2166_v40  ;;  %v11419_v7 = vmul.u32.u64.high %v2171_v13, %v2166_v40, %v11418_v28  ;;  %v5455_v54 = vshrl.u32 %v5454_v18, 23 }
 0x3ce   :  { %vm7648_vm11 = vcmp.lt.s32.totalorder %v7647_v41, 0  ;;  %v11423_v46 = vmul.u32.u64.low %v2171_v13, %v2170_v44  ;;  %v11424_v39 = vmul.u32.u64.high %v2171_v13, %v2170_v44, %v11423_v46  ;;  %vm2323_vm12 = vcmp.eq.s32.totalorder %v11389_v34, 0 }
 0x3cf   :  { %v5626_v62 = vsel %vm7648_vm11, 0, %v7647_v41  ;;  %v7641_v32 = vadd.s32 4294967169, %v5455_v54  ;;  %v5611_v48 = vadd.s32 %v11328_v30, %v11334_v56  ;;  %v5451_v59 = vand.u32 2147483647, %v11366_v35 }
 0x3d0   :  { %v5627_v45 = vsub.s32 32, %v5626_v62  ;;  %v5631_v31 = vsub.s32 4294967266, %v5626_v62  ;;  %v5644_v21 = vsel %vm11403_vm6, 0, %v5642_v33  ;;  %v2178_v19 = vmul.u32 %v2171_v13, %v2162_v49 }
 0x3d1   :  { %v2181_v4 = vadd.s32 1, %v11419_v7  ;;  %v5461_v16 = vadd.s32 1, %v7641_v32  ;;  %v5628_v50 = vshll.u32 %v11391_v9, %v5626_v62  ;;  %vm2180_vm13 = vc.u32 %v11424_v39, %v11418_v28 }
 0x3d2   :  { %v8272_v1 = vpop.eup %8271  ;;  %v5629_v63 = vshrl.u32 %v5611_v48, %v5627_v45  ;;  %v5632_v11 = vadd.s32 127, %v5631_v31  ;;  %vm2326_vm15 = vcmp.eq.s32.totalorder %v11389_v34, 2  ;;  %v5648_v38 = vadd.s32 3, %v5644_v21 }
 0x3d3   :  { %v8274_v30 = vpop.eup %8273  ;;  %v2327_v56 = vxor.u32 2147483648, %v8272_v1  ;;  %v2182_v22 = vsel %vm2180_vm13, %v2181_v4, %v11419_v7  ;;  %vm5462_vm1 = vcmp.gt.s32.totalorder %v5461_v16, 0  ;;  %v5458_v9 = vand.u32 8388607, %v5451_v59 }
 0x3d4   :  { %v2324_v60 = vxor.u32 2147483648, %v8274_v30  ;;  %v5630_v13 = vor.u32 %v5629_v63, %v5628_v50  ;;  %v5633_v17 = vshll.u32 %v5632_v11, 23  ;;  %v2183_v37 = vadd.s32 %v2182_v22, %v2178_v19 }
 0x3d5   :  { %v2328_v6 = vsel %vm2326_vm15, %v2327_v56, %v8274_v30  ;;  %v5463_v42 = vsel %vm5462_vm1, %v5461_v16, 0  ;;  %v2438_v12 = vand.u32 2139095040, %v11371_v24  ;;  %vm2319_vm4 = vweird.f32 %v11130_v14 }
 0x3d6   :  { %v2325_v58 = vsel %vm2323_vm12, %v8272_v1, %v2324_v60  ;;  %v5634_v25 = vor.u32 4788187, %v5633_v17  ;;  %v2184_v20 = vadd.s32 536870912, %v2183_v37  ;;  %v5465_v5 = vand.u32 31, %v5463_v42 }
 0x3d7   :  { %v2329_v61 = vsel %vm2322_vm0, %v2325_v58, %v2328_v6  ;;  %v5637_v41 = vcvt.s32.f32 %v5630_v13  ;;  %v11453_v40 = vand.u32 3, %v5648_v38  ;;  %v5459_v2 = vor.u32 8388608, %v5458_v9 }
 0x3d8   :  { %v2330_v23 = vsel %vm2319_vm4, nan, %v2329_v61  ;;  %v5635_v18 = vand.u32 2147483647, %v5634_v25  ;;  %v11447_v33 = vshrl.u32 %v2184_v20, 30  ;;  %v5466_v44 = vsub.s32 32, %v5465_v5 }
 0x3d9   :  { %7339 = vst.msk [vmem:[%s14271_s3 + $0x78] sm:$0xff] %vm7323_vm14, %v2330_v23  ;;  %v2435_v14 = vand.u32 2147483647, %v11371_v24  ;;  %v5468_v54 = vshll.u32 %v8425_v47, %v5465_v5  ;;  %v2439_v49 = vshrl.u32 %v2438_v12, 23  ;;  %v5471_v62 = vshll.u32 %v8426_v51, %v5465_v5 }
 0x3da   :  { %v5638_v7 = vmul.f32 %v5637_v41, %v5635_v18  ;;  %v2186_v34 = vshll.u32 %v11447_v33, 30  ;;  %v5469_v46 = vshrl.u32 %v8426_v51, %v5466_v44  ;;  %v5472_v32 = vshrl.u32 %v8427_v53, %v5466_v44 }
 0x3db   :  { %v5475_v48 = vshrl.u32 %v8428_v55, %v5466_v44  ;;  %v5474_v21 = vshll.u32 %v8427_v53, %v5465_v5  ;;  %v5478_v19 = vshrl.u32 %v8429_v57, %v5466_v44  ;;  %v5464_v4 = vshrl.u32 %v5463_v42, 5 }
 0x3dc   :  { %v5639_v45 = vxor.u32 2147483648, %v5638_v7  ;;  %v11462_v31 = vsub.s32 %v2183_v37, %v2186_v34  ;;  %v5470_v16 = vor.u32 %v5469_v46, %v5468_v54  ;;  %v5477_v1 = vshll.u32 %v8428_v55, %v5465_v5 }
 0x3dd   :  { %v11467_v50 = vshll.u32 %v5459_v2, 8  ;;  %v5473_v30 = vor.u32 %v5472_v32, %v5471_v62  ;;  %v5476_v56 = vor.u32 %v5475_v48, %v5474_v21  ;;  %vm2125_vm2 = vcmp.lt.s32.totalorder %v11200_v36, 0  ;;  %v11508_v21 = vpop.f32.mrb[19].mxu0 }
 0x3de   :  { %v5640_v63 = vsel %vm5557_vm7, %v5639_v45, %v5638_v7  ;;  %v2189_v11 = vsub.s32 0, %v11462_v31  ;;  %v5479_v60 = vor.u32 %v5478_v19, %v5477_v1  ;;  %v5480_v13 = vshll.u32 %v8429_v57, %v5465_v5 }
 0x3df   :  { %v5643_v22 = vsel %vm11403_vm6, %v11190_v29, %v5640_v63  ;;  %v5481_v17 = vshrl.u32 %v8430_v0, %v5466_v44  ;;  %v2179_v37 = vadd.s32 %v11418_v28, %v11424_v39  ;;  %v7525_v38 = vadd.s32 4294967169, %v2439_v49 }
 0x3e0   :  { %8275 = vcosq.f32 %v5643_v22  ;;  %v7514_v6 = vmin.u32 %v2189_v11, %v11462_v31  ;;  %v2209_v9 = vsub.s32 4, %v11447_v33  ;;  %v5467_v8 = vshrl.u32 %v8425_v47, %v5466_v44 }
 0x3e1   :  { %8277 = vsinq.f32 %v5643_v22  ;;  %v5482_v42 = vor.u32 %v5481_v17, %v5480_v13  ;;  %vm11485_vm5 = vcmp.le.f32.partialorder %v2123_v43, 0.7853982  ;;  %vm5483_vm7 = vcmp.lt.s32.totalorder %v5464_v4, 1 }
 0x3e2   :  { %v2191_v25 = vclz %v7514_v6  ;;  %vm5484_vm3 = vcmp.lt.s32.totalorder %v5464_v4, 2  ;;  %vm5486_vm6 = vcmp.lt.s32.totalorder %v5464_v4, 4  ;;  %vm5485_vm10 = vcmp.lt.s32.totalorder %v5464_v4, 3 }
 0x3e3   :  { %v5488_v28 = vsel %vm5486_vm6, %v5476_v56, 2102212464  ;;  %v5491_v39 = vsel %vm5483_vm7, %v5470_v16, %v5473_v30  ;;  %v5492_v20 = vsel %vm5486_vm6, %v5479_v60, 920167782  ;;  %vm5654_vm8 = vcmp.eq.s32.totalorder %v11453_v40, 2 }
 0x3e4   :  { %v7515_v12 = vadd.s32 4294967294, %v2191_v25  ;;  %v5487_v61 = vsel %vm5483_vm7, %v5467_v8, %v5470_v16  ;;  %v5493_v5 = vsel %vm5485_vm10, %v5476_v56, %v5492_v20  ;;  %v5495_v23 = vsel %vm5483_vm7, %v5473_v30, %v5476_v56 }
 0x3e5   :  { %vm5651_vm9 = vcmp.eq.s32.totalorder %v11453_v40, 0  ;;  %v5489_v43 = vsel %vm5485_vm10, %v5473_v30, %v5488_v28  ;;  %v5494_v18 = vsel %vm5484_vm3, %v5491_v39, %v5493_v5  ;;  %v5496_v41 = vsel %vm5486_vm6, %v5482_v42, 1326507024 }
 0x3e6   :  { %v2445_v2 = vadd.s32 1, %v7525_v38  ;;  %vm5650_vm11 = vcmp.lt.s32.totalorder %v11453_v40, 2  ;;  %vm7516_vm0 = vcmp.lt.s32.totalorder %v7515_v12, 0  ;;  %v5497_v44 = vsel %vm5485_vm10, %v5479_v60, %v5496_v41 }
 0x3e7   :  { %v11497_v7 = vmul.u32.u64.low %v11467_v50, %v5494_v18  ;;  %v11498_v34 = vmul.u32.u64.high %v11467_v50, %v5494_v18, %v11497_v7  ;;  %vm5647_vm12 = vweird.f32 %v11190_v29  ;;  %v2194_v54 = vsel %vm7516_vm0, 0, %v7515_v12 }
 0x3e8   :  { %v5498_v49 = vsel %vm5484_vm3, %v5495_v23, %v5497_v44  ;;  %v2442_v46 = vand.u32 8388607, %v2435_v14  ;;  %vm2446_vm13 = vcmp.gt.s32.totalorder %v2445_v2, 0  ;;  %v2195_v62 = vsub.s32 32, %v2194_v54 }
 0x3e9   :  { %v2199_v32 = vsub.s32 4294967266, %v2194_v54  ;;  %v2210_v48 = vsel %vm2125_vm2, %v2209_v9, %v11447_v33  ;;  %v2447_v45 = vsel %vm2446_vm13, %v2445_v2, 0  ;;  %v5490_v19 = vsel %vm5484_vm3, %v5487_v61, %v5489_v43 }
 0x3ea   :  { %v11512_v16 = vmul.u32.u64.low %v11467_v50, %v5498_v49  ;;  %v11513_v1 = vmul.u32.u64.high %v11467_v50, %v5498_v49, %v11512_v16  ;;  %v2449_v63 = vand.u32 31, %v2447_v45  ;;  %v8276_v11 = vpop.eup %8275  ;;  %v2196_v30 = vshll.u32 %v11462_v31, %v2194_v54 }
 0x3eb   :  { %v2197_v56 = vshrl.u32 %v2179_v37, %v2195_v62  ;;  %v2200_v22 = vadd.s32 127, %v2199_v32  ;;  %v5509_v60 = vadd.s32 1, %v11498_v34  ;;  %v8278_v13 = vpop.eup %8277  ;;  %v5655_v17 = vxor.u32 2147483648, %v8276_v11 }
 0x3ec   :  { %v2212_v33 = vsel %vm11485_vm5, 0, %v2210_v48  ;;  %v2443_v6 = vor.u32 8388608, %v2442_v46  ;;  %v2450_v4 = vsub.s32 32, %v2449_v63  ;;  %v5652_v38 = vxor.u32 2147483648, %v8278_v13 }
 0x3ed   :  { %v2198_v9 = vor.u32 %v2197_v56, %v2196_v30  ;;  %v2201_v8 = vshll.u32 %v2200_v22, 23  ;;  %v5506_v42 = vmul.u32 %v11467_v50, %v5490_v19  ;;  %v5656_v25 = vsel %vm5654_vm8, %v5655_v17, %v8278_v13 }
 0x3ee   :  { %vm5508_vm15 = vc.u32 %v11513_v1, %v11497_v7  ;;  %v11524_v31 = vshrl.u32 %v2447_v45, 5  ;;  %v2452_v37 = vshll.u32 %v8425_v47, %v2449_v63  ;;  %v5653_v28 = vsel %vm5651_vm9, %v8276_v11, %v5652_v38 }
 0x3ef   :  { %v2202_v39 = vor.u32 4788187, %v2201_v8  ;;  %v5510_v20 = vsel %vm5508_vm15, %v5509_v60, %v11498_v34  ;;  %v2455_v12 = vshll.u32 %v8426_v51, %v2449_v63  ;;  %v5657_v50 = vsel %vm5650_vm11, %v5653_v28, %v5656_v25 }
 0x3f0   :  { %v5511_v61 = vadd.s32 %v5510_v20, %v5506_v42  ;;  %v2453_v5 = vshrl.u32 %v8426_v51, %v2450_v4  ;;  %v2456_v23 = vshrl.u32 %v8427_v53, %v2450_v4  ;;  %v5658_v43 = vsel %vm5647_vm12, nan, %v5657_v50 }
 0x3f1   :  { %v2203_v18 = vand.u32 2147483647, %v2202_v39  ;;  %v2205_v41 = vcvt.s32.f32 %v2198_v9  ;;  %v2459_v2 = vshrl.u32 %v8428_v55, %v2450_v4  ;;  %7371 = vst.msk [vmem:[%s14271_s3 + $0x178] sm:$0xff] %vm7323_vm14, %v5658_v43  ;;  %v2458_v40 = vshll.u32 %v8427_v53, %v2449_v63  ;;  %v11594_v43 = vpop.f32.mrb[19].mxu1 }
 0x3f2   :  { %v5512_v44 = vadd.s32 536870912, %v5511_v61  ;;  %v2461_v34 = vshll.u32 %v8428_v55, %v2449_v63  ;;  %v2462_v54 = vshrl.u32 %v8429_v57, %v2450_v4  ;;  %v2454_v46 = vor.u32 %v2453_v5, %v2452_v37 }
 0x3f3   :  { %v2206_v49 = vmul.f32 %v2205_v41, %v2203_v18  ;;  %v2457_v29 = vor.u32 %v2456_v23, %v2455_v12  ;;  %v2465_v62 = vshrl.u32 %v8430_v0, %v2450_v4  ;;  %v2216_v19 = vadd.s32 3, %v2212_v33 }
 0x3f4   :  { %v5513_v32 = vshrl.u32 %v5512_v44, 30  ;;  %v2463_v48 = vor.u32 %v2462_v54, %v2461_v34  ;;  %v2460_v16 = vor.u32 %v2459_v2, %v2458_v40  ;;  %v2464_v11 = vshll.u32 %v8429_v57, %v2449_v63 }
 0x3f5   :  { %v2207_v45 = vxor.u32 2147483648, %v2206_v49  ;;  %vm2467_vm1 = vcmp.lt.s32.totalorder %v11524_v31, 1  ;;  %vm2470_vm4 = vcmp.lt.s32.totalorder %v11524_v31, 4  ;;  %v11549_v56 = vshll.u32 %v2443_v6, 8 }
 0x3f6   :  { %v5514_v30 = vshll.u32 %v5513_v32, 30  ;;  %v2466_v60 = vor.u32 %v2465_v62, %v2464_v11  ;;  %v2475_v13 = vsel %vm2467_vm1, %v2454_v46, %v2457_v29  ;;  %v2476_v17 = vsel %vm2470_vm4, %v2463_v48, 920167782 }
 0x3f7   :  { %v2208_v22 = vsel %vm2125_vm2, %v2207_v45, %v2206_v49  ;;  %v2451_v38 = vshrl.u32 %v8425_v47, %v2450_v4  ;;  %vm2469_vm7 = vcmp.lt.s32.totalorder %v11524_v31, 3  ;;  %vm2468_vm2 = vcmp.lt.s32.totalorder %v11524_v31, 2 }
 0x3f8   :  { %v2211_v63 = vsel %vm11485_vm5, %v11200_v36, %v2208_v22  ;;  %v11560_v33 = vsub.s32 %v5511_v61, %v5514_v30  ;;  %v2472_v6 = vsel %vm2470_vm4, %v2460_v16, 2102212464  ;;  %v2477_v9 = vsel %vm2469_vm7, %v2460_v16, %v2476_v17 }
 0x3f9   :  { %8279 = vcosq.f32 %v2211_v63  ;;  %v2478_v58 = vsel %vm2468_vm2, %v2475_v13, %v2477_v9  ;;  %v2479_v4 = vsel %vm2467_vm1, %v2457_v29, %v2460_v16  ;;  %v5537_v42 = vsub.s32 4, %v5513_v32 }
 0x3fa   :  { %8281 = vsinq.f32 %v2211_v63  ;;  %v5517_v8 = vsub.s32 0, %v11560_v33  ;;  %v2480_v25 = vsel %vm2470_vm4, %v2466_v60, 1326507024  ;;  %v2217_v39 = vand.u32 3, %v2216_v19 }
 0x3fb   :  { %v11577_v37 = vmul.u32.u64.low %v11549_v56, %v2478_v58  ;;  %v11578_v28 = vmul.u32.u64.high %v11549_v56, %v2478_v58, %v11577_v37  ;;  %v2481_v12 = vsel %vm2469_vm7, %v2463_v48, %v2480_v25  ;;  %v2471_v50 = vsel %vm2467_vm1, %v2451_v38, %v2454_v46 }
 0x3fc   :  { %v7642_v20 = vmin.u32 %v5517_v8, %v11560_v33  ;;  %v2473_v61 = vsel %vm2469_vm7, %v2457_v29, %v2472_v6  ;;  %v2482_v5 = vsel %vm2468_vm2, %v2479_v4, %v2481_v12  ;;  %v11592_v23 = vadd.f32 %v11362_v52, %v11132_v15 }
 0x3fd   :  { %vm5453_vm5 = vcmp.lt.s32.totalorder %v11366_v35, 0  ;;  %v11600_v2 = vmul.u32.u64.low %v11549_v56, %v2482_v5  ;;  %v11601_v44 = vmul.u32.u64.high %v11549_v56, %v2482_v5, %v11600_v2  ;;  %vm2215_vm3 = vweird.f32 %v11200_v36 }
 0x3fe   :  { %v5519_v18 = vclz %v7642_v20  ;;  %v5538_v41 = vsel %vm5453_vm5, %v5537_v42, %v5513_v32  ;;  %v2474_v34 = vsel %vm2468_vm2, %v2471_v50, %v2473_v61  ;;  %v5766_v15 = vand.u32 2139095040, %v11592_v23 }
 0x3ff   :  { %v11609_v54 = vadd.f32 %v11362_v52, %v11183_v3  ;;  %vm2219_vm6 = vcmp.eq.s32.totalorder %v2217_v39, 0  ;;  %vm2222_vm10 = vcmp.eq.s32.totalorder %v2217_v39, 2  ;;  %vm11613_vm8 = vcmp.le.f32.partialorder %v5451_v59, 0.7853982 }
 0x400   :  { %v7643_v40 = vadd.s32 4294967294, %v5519_v18  ;;  %v2493_v46 = vadd.s32 1, %v11578_v28  ;;  %v5507_v31 = vadd.s32 %v11497_v7, %v11513_v1  ;;  %v5540_v29 = vsel %vm11613_vm8, 0, %v5538_v41 }
 0x401   :  { %v5767_v62 = vshrl.u32 %v5766_v15, 23  ;;  %v2490_v48 = vmul.u32 %v11549_v56, %v2474_v34  ;;  %vm2492_vm11 = vc.u32 %v11601_v44, %v11577_v37  ;;  %v5763_v59 = vand.u32 2147483647, %v11592_v23 }
 0x402   :  { %vm7644_vm9 = vcmp.lt.s32.totalorder %v7643_v40, 0  ;;  %v2334_v7 = vand.u32 2139095040, %v11609_v54  ;;  %v2494_v22 = vsel %vm2492_vm11, %v2493_v46, %v11578_v28  ;;  %vm2218_vm0 = vcmp.lt.s32.totalorder %v2217_v39, 2 }
 0x403   :  { %v8280_v3 = vpop.eup %8279  ;;  %v5522_v32 = vsel %vm7644_vm9, 0, %v7643_v40  ;;  %v7653_v60 = vadd.s32 4294967169, %v5767_v62  ;;  %v2495_v63 = vadd.s32 %v2494_v22, %v2490_v48  ;;  %v5544_v6 = vadd.s32 3, %v5540_v29 }
 0x404   :  { %v8282_v45 = vpop.eup %8281  ;;  %v2223_v19 = vxor.u32 2147483648, %v8280_v3  ;;  %v5523_v16 = vsub.s32 32, %v5522_v32  ;;  %v5527_v11 = vsub.s32 4294967266, %v5522_v32  ;;  %v5524_v30 = vshll.u32 %v11560_v33, %v5522_v32 }
 0x405   :  { %v2220_v1 = vxor.u32 2147483648, %v8282_v45  ;;  %v5773_v9 = vadd.s32 1, %v7653_v60  ;;  %v2496_v42 = vadd.s32 536870912, %v2495_v63  ;;  %v5770_v25 = vand.u32 8388607, %v5763_v59 }
 0x406   :  { %v2224_v13 = vsel %vm2222_vm10, %v2223_v19, %v8282_v45  ;;  %v5525_v56 = vshrl.u32 %v5507_v31, %v5523_v16  ;;  %v5528_v17 = vadd.s32 127, %v5527_v11  ;;  %v2335_v12 = vshrl.u32 %v2334_v7, 23 }
 0x407   :  { %v2221_v38 = vsel %vm2219_vm6, %v8280_v3, %v2220_v1  ;;  %vm5774_vm12 = vcmp.gt.s32.totalorder %v5773_v9, 0  ;;  %v2497_v39 = vshrl.u32 %v2496_v42, 30  ;;  %v11639_v50 = vand.u32 3, %v5544_v6 }
 0x408   :  { %v2225_v8 = vsel %vm2218_vm0, %v2221_v38, %v2224_v13  ;;  %v5526_v58 = vor.u32 %v5525_v56, %v5524_v30  ;;  %v5529_v4 = vshll.u32 %v5528_v17, 23  ;;  %v5775_v20 = vsel %vm5774_vm12, %v5773_v9, 0 }
 0x409   :  { %v2226_v33 = vsel %vm2215_vm3, nan, %v2225_v8  ;;  %v5777_v61 = vand.u32 31, %v5775_v20  ;;  %vm2437_vm13 = vcmp.lt.s32.totalorder %v11371_v24, 0  ;;  %v2498_v36 = vshll.u32 %v2497_v39, 30 }
 0x40a   :  { %7338 = vst.msk [vmem:[%s14271_s3 + $0x70] sm:$0xff] %vm7323_vm14, %v2226_v33  ;;  %v5530_v28 = vor.u32 4788187, %v5529_v4  ;;  %v5533_v18 = vcvt.s32.f32 %v5526_v58  ;;  %v11644_v41 = vadd.f32 %v11362_v52, %v11248_v10  ;;  %v2491_v2 = vadd.s32 %v11577_v37, %v11601_v44 }
 0x40b   :  { %v5771_v40 = vor.u32 8388608, %v5770_v25  ;;  %v5778_v34 = vsub.s32 32, %v5777_v61  ;;  %v2331_v15 = vand.u32 2147483647, %v11609_v54  ;;  %v11649_v31 = vsub.s32 %v2495_v63, %v2498_v36 }
 0x40c   :  { %v5531_v5 = vand.u32 2147483647, %v5530_v28  ;;  %v11651_v29 = vshrl.u32 %v5775_v20, 5  ;;  %v7521_v62 = vadd.s32 4294967169, %v2335_v12  ;;  %v2521_v3 = vsub.s32 4, %v2497_v39 }
 0x40d   :  { %v5780_v32 = vshll.u32 %v8425_v47, %v5777_v61  ;;  %v5781_v48 = vshrl.u32 %v8426_v51, %v5778_v34  ;;  %v5784_v10 = vshrl.u32 %v8427_v53, %v5778_v34  ;;  %v2501_v37 = vsub.s32 0, %v11649_v31 }
 0x40e   :  { %v5534_v46 = vmul.f32 %v5533_v18, %v5531_v5  ;;  %v5783_v44 = vshll.u32 %v8426_v51, %v5777_v61  ;;  %v5787_v19 = vshrl.u32 %v8428_v55, %v5778_v34  ;;  %v5786_v11 = vshll.u32 %v8427_v53, %v5777_v61 }
 0x40f   :  { %v5782_v16 = vor.u32 %v5781_v48, %v5780_v32  ;;  %v5789_v7 = vshll.u32 %v8428_v55, %v5777_v61  ;;  %v5790_v1 = vshrl.u32 %v8429_v57, %v5778_v34  ;;  %v7526_v22 = vmin.u32 %v2501_v37, %v11649_v31 }
 0x410   :  { %v5535_v45 = vxor.u32 2147483648, %v5534_v46  ;;  %v5785_v60 = vor.u32 %v5784_v10, %v5783_v44  ;;  %v5792_v13 = vshll.u32 %v8429_v57, %v5777_v61  ;;  %v5788_v17 = vor.u32 %v5787_v19, %v5786_v11  ;;  %v11707_v19 = vpop.f32.mrb[20].mxu0 }
 0x411   :  { %v5791_v63 = vor.u32 %v5790_v1, %v5789_v7  ;;  %v5793_v38 = vshrl.u32 %v8430_v0, %v5778_v34  ;;  %v2503_v6 = vclz %v7526_v22  ;;  %v11670_v9 = vshll.u32 %v5771_v40, 8 }
 0x412   :  { %v5536_v30 = vsel %vm5453_vm5, %v5535_v45, %v5534_v46  ;;  %v2341_v8 = vadd.s32 1, %v7521_v62  ;;  %vm11674_vm15 = vcmp.le.f32.partialorder %v2435_v14, 0.7853982  ;;  %v2522_v49 = vsel %vm2437_vm13, %v2521_v3, %v2497_v39 }
 0x413   :  { %v5539_v56 = vsel %vm11613_vm8, %v11366_v35, %v5536_v30  ;;  %v5779_v4 = vshrl.u32 %v8425_v47, %v5778_v34  ;;  %v5794_v42 = vor.u32 %v5793_v38, %v5792_v13  ;;  %v7527_v33 = vadd.s32 4294967294, %v2503_v6 }
 0x414   :  { %8283 = vcosq.f32 %v5539_v56  ;;  %vm5795_vm1 = vcmp.lt.s32.totalorder %v11651_v29, 1  ;;  %vm5797_vm4 = vcmp.lt.s32.totalorder %v11651_v29, 3  ;;  %vm5798_vm7 = vcmp.lt.s32.totalorder %v11651_v29, 4 }
 0x415   :  { %8285 = vsinq.f32 %v5539_v56  ;;  %v5800_v25 = vsel %vm5798_vm7, %v5788_v17, 2102212464  ;;  %v5803_v28 = vsel %vm5795_vm1, %v5782_v16, %v5785_v60  ;;  %v5804_v20 = vsel %vm5798_vm7, %v5791_v63, 920167782 }
 0x416   :  { %v5807_v14 = vsel %vm5795_vm1, %v5785_v60, %v5788_v17  ;;  %vm7528_vm2 = vcmp.lt.s32.totalorder %v7527_v33, 0  ;;  %vm5796_vm5 = vcmp.lt.s32.totalorder %v11651_v29, 2  ;;  %v5805_v39 = vsel %vm5797_vm4, %v5788_v17, %v5804_v20 }
 0x417   :  { %v5808_v12 = vsel %vm5798_vm7, %v5794_v42, 1326507024  ;;  %v2506_v61 = vsel %vm7528_vm2, 0, %v7527_v33  ;;  %v5799_v5 = vsel %vm5795_vm1, %v5779_v4, %v5782_v16  ;;  %v5806_v18 = vsel %vm5796_vm5, %v5803_v28, %v5805_v39 }
 0x418   :  { %v5809_v36 = vsel %vm5797_vm4, %v5791_v63, %v5808_v12  ;;  %vm5546_vm3 = vcmp.lt.s32.totalorder %v11639_v50, 2  ;;  %v2507_v40 = vsub.s32 32, %v2506_v61  ;;  %v2511_v34 = vsub.s32 4294967266, %v2506_v61 }
 0x419   :  { %v5801_v46 = vsel %vm5797_vm4, %v5785_v60, %v5800_v25  ;;  %v5810_v62 = vsel %vm5796_vm5, %v5807_v14, %v5809_v36  ;;  %vm5543_vm6 = vweird.f32 %v11366_v35  ;;  %v2508_v45 = vshll.u32 %v11649_v31, %v2506_v61 }
 0x41a   :  { %v11698_v3 = vmul.u32.u64.low %v11670_v9, %v5810_v62  ;;  %v11699_v32 = vmul.u32.u64.high %v11670_v9, %v5810_v62, %v11698_v3  ;;  %v11702_v48 = vmul.u32.u64.low %v11670_v9, %v5806_v18  ;;  %v11703_v10 = vmul.u32.u64.high %v11670_v9, %v5806_v18, %v11702_v48 }
 0x41b   :  { %v2509_v37 = vshrl.u32 %v2491_v2, %v2507_v40  ;;  %v2512_v44 = vadd.s32 127, %v2511_v34  ;;  %vm2342_vm10 = vcmp.gt.s32.totalorder %v2341_v8, 0  ;;  %vm5547_vm8 = vcmp.eq.s32.totalorder %v11639_v50, 0 }
 0x41c   :  { %v5802_v16 = vsel %vm5796_vm5, %v5799_v5, %v5801_v46  ;;  %v2338_v11 = vand.u32 8388607, %v2331_v15  ;;  %v2343_v7 = vsel %vm2342_vm10, %v2341_v8, 0  ;;  %v2524_v31 = vsel %vm11674_vm15, 0, %v2522_v49 }
 0x41d   :  { %v2510_v30 = vor.u32 %v2509_v37, %v2508_v45  ;;  %v2513_v22 = vshll.u32 %v2512_v44, 23  ;;  %v2345_v2 = vand.u32 31, %v2343_v7  ;;  %vm5550_vm9 = vcmp.eq.s32.totalorder %v11639_v50, 2 }
 0x41e   :  { %v8284_v1 = vpop.eup %8283  ;;  %vm5820_vm11 = vc.u32 %v11699_v32, %v11702_v48  ;;  %v5821_v29 = vadd.s32 1, %v11703_v10  ;;  %v5818_v63 = vmul.u32 %v11670_v9, %v5802_v16  ;;  %v2528_v8 = vadd.s32 3, %v2524_v31 }
 0x41f   :  { %v8286_v60 = vpop.eup %8285  ;;  %v5551_v13 = vxor.u32 2147483648, %v8284_v1  ;;  %v2514_v17 = vor.u32 4788187, %v2513_v22  ;;  %v2346_v38 = vsub.s32 32, %v2345_v2  ;;  %v2339_v49 = vor.u32 8388608, %v2338_v11 }
 0x420   :  { %v5548_v56 = vxor.u32 2147483648, %v8286_v60  ;;  %v5822_v4 = vsel %vm5820_vm11, %v5821_v29, %v11703_v10  ;;  %v2517_v25 = vcvt.s32.f32 %v2510_v30  ;;  %v2348_v14 = vshll.u32 %v8425_v47, %v2345_v2 }
 0x421   :  { %v5552_v6 = vsel %vm5550_vm9, %v5551_v13, %v8286_v60  ;;  %v2515_v33 = vand.u32 2147483647, %v2514_v17  ;;  %v5823_v28 = vadd.s32 %v5822_v4, %v5818_v63  ;;  %v2349_v39 = vshrl.u32 %v8426_v51, %v2346_v38 }
 0x422   :  { %v5549_v42 = vsel %vm5547_vm8, %v8284_v1, %v5548_v56  ;;  %v2352_v9 = vshrl.u32 %v8427_v53, %v2346_v38  ;;  %v2355_v18 = vshrl.u32 %v8428_v55, %v2346_v38  ;;  %v2344_v50 = vshrl.u32 %v2343_v7, 5 }
 0x423   :  { %v5553_v20 = vsel %vm5546_vm3, %v5549_v42, %v5552_v6  ;;  %v2518_v61 = vmul.f32 %v2517_v25, %v2515_v33  ;;  %v5824_v5 = vadd.s32 536870912, %v5823_v28  ;;  %v2351_v36 = vshll.u32 %v8426_v51, %v2345_v2 }
 0x424   :  { %v5554_v12 = vsel %vm5543_vm6, nan, %v5553_v20  ;;  %v2354_v40 = vshll.u32 %v8427_v53, %v2345_v2  ;;  %v2358_v34 = vshrl.u32 %v8429_v57, %v2346_v38  ;;  %v2350_v35 = vor.u32 %v2349_v39, %v2348_v14 }
 0x425   :  { %7370 = vst.msk [vmem:[%s14271_s3 + $0x170] sm:$0xff] %vm7323_vm14, %v5554_v12  ;;  %v2519_v46 = vxor.u32 2147483648, %v2518_v61  ;;  %v5825_v62 = vshrl.u32 %v5824_v5, 30  ;;  %v2357_v3 = vshll.u32 %v8428_v55, %v2345_v2  ;;  %vm5765_vm0 = vcmp.lt.s32.totalorder %v11592_v23, 0 }
 0x426   :  { %v2353_v10 = vor.u32 %v2352_v9, %v2351_v36  ;;  %v2356_v45 = vor.u32 %v2355_v18, %v2354_v40  ;;  %v2360_v37 = vshll.u32 %v8429_v57, %v2345_v2  ;;  %v2361_v44 = vshrl.u32 %v8430_v0, %v2346_v38 }
 0x427   :  { %v2520_v16 = vsel %vm2437_vm13, %v2519_v46, %v2518_v61  ;;  %v11745_v11 = vand.u32 3, %v2528_v8  ;;  %v5826_v7 = vshll.u32 %v5825_v62, 30  ;;  %v2359_v1 = vor.u32 %v2358_v34, %v2357_v3 }
 0x428   :  { %v2523_v30 = vsel %vm11674_vm15, %v11371_v24, %v2520_v16  ;;  %v2347_v22 = vshrl.u32 %v8425_v47, %v2346_v38  ;;  %v2362_v31 = vor.u32 %v2361_v44, %v2360_v37  ;;  %v11751_v60 = vshll.u32 %v2339_v49, 8 }
 0x429   :  { %8287 = vcosq.f32 %v2523_v30  ;;  %v11753_v2 = vsub.s32 %v5823_v28, %v5826_v7  ;;  %vm2363_vm12 = vcmp.lt.s32.totalorder %v2344_v50, 1  ;;  %vm2366_vm1 = vcmp.lt.s32.totalorder %v2344_v50, 4 }
 0x42a   :  { %8289 = vsinq.f32 %v2523_v30  ;;  %vm2364_vm13 = vcmp.lt.s32.totalorder %v2344_v50, 2  ;;  %v2368_v13 = vsel %vm2366_vm1, %v2356_v45, 2102212464  ;;  %v2371_v29 = vsel %vm2363_vm12, %v2350_v35, %v2353_v10 }
 0x42b   :  { %v5829_v56 = vsub.s32 0, %v11753_v2  ;;  %v5849_v17 = vsub.s32 4, %v5825_v62  ;;  %vm2365_vm4 = vcmp.lt.s32.totalorder %v2344_v50, 3  ;;  %v2372_v58 = vsel %vm2366_vm1, %v2359_v1, 920167782  ;;  %v11783_v50 = vpop.f32.mrb[20].mxu1 }
 0x42c   :  { %v2367_v63 = vsel %vm2363_vm12, %v2347_v22, %v2350_v35  ;;  %v2373_v6 = vsel %vm2365_vm4, %v2356_v45, %v2372_v58  ;;  %v2375_v38 = vsel %vm2363_vm12, %v2353_v10, %v2356_v45  ;;  %v2376_v8 = vsel %vm2366_vm1, %v2362_v31, 1326507024 }
 0x42d   :  { %v7654_v4 = vmin.u32 %v5829_v56, %v11753_v2  ;;  %v2369_v49 = vsel %vm2365_vm4, %v2353_v10, %v2368_v13  ;;  %v2374_v42 = vsel %vm2364_vm13, %v2371_v29, %v2373_v6  ;;  %v2377_v33 = vsel %vm2365_vm4, %v2359_v1, %v2376_v8 }
 0x42e   :  { %v2378_v25 = vsel %vm2364_vm13, %v2375_v38, %v2377_v33  ;;  %v11760_v28 = vmul.u32.u64.low %v11751_v60, %v2374_v42  ;;  %v11761_v20 = vmul.u32.u64.high %v11751_v60, %v2374_v42, %v11760_v28  ;;  %v5662_v14 = vand.u32 2139095040, %v11644_v41 }
 0x42f   :  { %v5831_v39 = vclz %v7654_v4  ;;  %v5850_v9 = vsel %vm5765_vm0, %v5849_v17, %v5825_v62  ;;  %v5659_v12 = vand.u32 2147483647, %v11644_v41  ;;  %v2370_v61 = vsel %vm2364_vm13, %v2367_v63, %v2369_v49 }
 0x430   :  { %v11769_v5 = vmul.u32.u64.low %v11751_v60, %v2378_v25  ;;  %v11770_v18 = vmul.u32.u64.high %v11751_v60, %v2378_v25, %v11769_v5  ;;  %v5663_v36 = vshrl.u32 %v5662_v14, 23  ;;  %vm2530_vm15 = vcmp.lt.s32.totalorder %v11745_v11, 2 }
 0x431   :  { %vm11775_vm7 = vcmp.le.f32.partialorder %v5763_v59, 0.7853982  ;;  %v7655_v34 = vadd.s32 4294967294, %v5831_v39  ;;  %v11781_v46 = vadd.f32 %v11362_v52, %v11354_v27  ;;  %vm2531_vm2 = vcmp.eq.s32.totalorder %v11745_v11, 0 }
 0x432   :  { %vm2534_vm5 = vcmp.eq.s32.totalorder %v11745_v11, 2  ;;  %v2389_v62 = vadd.s32 1, %v11761_v20  ;;  %v7649_v35 = vadd.s32 4294967169, %v5663_v36  ;;  %v5819_v59 = vadd.s32 %v11702_v48, %v11699_v32 }
 0x433   :  { %v8288_v3 = vpop.eup %8287  ;;  %vm7656_vm3 = vcmp.lt.s32.totalorder %v7655_v34, 0  ;;  %v5852_v10 = vsel %vm11775_vm7, 0, %v5850_v9  ;;  %v2386_v27 = vmul.u32 %v11751_v60, %v2370_v61  ;;  %vm2388_vm6 = vc.u32 %v11770_v18, %v11760_v28 }
 0x434   :  { %v8290_v52 = vpop.eup %8289  ;;  %v2535_v45 = vxor.u32 2147483648, %v8288_v3  ;;  %v5834_v37 = vsel %vm7656_vm3, 0, %v7655_v34  ;;  %v5666_v44 = vand.u32 8388607, %v5659_v12  ;;  %v2646_v30 = vand.u32 2139095040, %v11781_v46 }
 0x435   :  { %v2532_v16 = vxor.u32 2147483648, %v8290_v52  ;;  %v5835_v7 = vsub.s32 32, %v5834_v37  ;;  %v5839_v1 = vsub.s32 4294967266, %v5834_v37  ;;  %v5836_v48 = vshll.u32 %v11753_v2, %v5834_v37 }
 0x436   :  { %v2536_v32 = vsel %vm2534_vm5, %v2535_v45, %v8290_v52  ;;  %v2390_v22 = vsel %vm2388_vm6, %v2389_v62, %v11761_v20  ;;  %v5669_v31 = vadd.s32 1, %v7649_v35  ;;  %vm2527_vm10 = vweird.f32 %v11371_v24 }
 0x437   :  { %v2533_v60 = vsel %vm2531_vm2, %v8288_v3, %v2532_v16  ;;  %v5837_v13 = vshrl.u32 %v5819_v59, %v5835_v7  ;;  %v5840_v29 = vadd.s32 127, %v5839_v1  ;;  %v2391_v56 = vadd.s32 %v2390_v22, %v2386_v27 }
 0x438   :  { %v2537_v17 = vsel %vm2530_vm15, %v2533_v60, %v2536_v32  ;;  %v5856_v58 = vadd.s32 3, %v5852_v10  ;;  %vm5670_vm8 = vcmp.gt.s32.totalorder %v5669_v31, 0  ;;  %v5667_v8 = vor.u32 8388608, %v5666_v44 }
 0x439   :  { %v2538_v63 = vsel %vm2527_vm10, nan, %v2537_v17  ;;  %v5838_v6 = vor.u32 %v5837_v13, %v5836_v48  ;;  %v5841_v38 = vshll.u32 %v5840_v29, 23  ;;  %v2392_v2 = vadd.s32 536870912, %v2391_v56 }
 0x43a   :  { %7341 = vst.msk [vmem:[%s14271_s3 + $0x88] sm:$0xff] %vm7323_vm14, %v2538_v63  ;;  %v5671_v4 = vsel %vm5670_vm8, %v5669_v31, 0  ;;  %v2647_v33 = vshrl.u32 %v2646_v30, 23  ;;  %v11810_v20 = vand.u32 3, %v5856_v58  ;;  %vm2333_vm9 = vcmp.lt.s32.totalorder %v11609_v54, 0 }
 0x43b   :  { %v5842_v49 = vor.u32 4788187, %v5841_v38  ;;  %v2393_v42 = vshrl.u32 %v2392_v2, 30  ;;  %v5673_v24 = vand.u32 31, %v5671_v4  ;;  %v5845_v11 = vcvt.s32.f32 %v5838_v6 }
 0x43c   :  { %v11814_v39 = vadd.s32 %v11760_v28, %v11770_v18  ;;  %v11816_v61 = vshll.u32 %v5667_v8, 8  ;;  %v2643_v5 = vand.u32 2147483647, %v11781_v46  ;;  %v11821_v62 = vshrl.u32 %v5671_v4, 5 }
 0x43d   :  { %v5843_v25 = vand.u32 2147483647, %v5842_v49  ;;  %v2394_v14 = vshll.u32 %v2393_v42, 30  ;;  %v5674_v9 = vsub.s32 32, %v5673_v24  ;;  %v7533_v35 = vadd.s32 4294967169, %v2647_v33 }
 0x43e   :  { %v2417_v3 = vsub.s32 4, %v2393_v42  ;;  %v5676_v59 = vshll.u32 %v8425_v47, %v5673_v24  ;;  %vm11828_vm11 = vcmp.le.f32.partialorder %v2331_v15, 0.7853982  ;;  %v5679_v45 = vshll.u32 %v8426_v51, %v5673_v24 }
 0x43f   :  { %v5846_v36 = vmul.f32 %v5845_v11, %v5843_v25  ;;  %v11819_v34 = vsub.s32 %v2391_v56, %v2394_v14  ;;  %v5677_v10 = vshrl.u32 %v8426_v51, %v5674_v9  ;;  %v5680_v27 = vshrl.u32 %v8427_v53, %v5674_v9  ;;  %v11868_v14 = vpop.f32.mrb[21].mxu0 }
 0x440   :  { %v5683_v37 = vshrl.u32 %v8428_v55, %v5674_v9  ;;  %v5682_v16 = vshll.u32 %v8427_v53, %v5673_v24  ;;  %v5685_v7 = vshll.u32 %v8428_v55, %v5673_v24  ;;  %v5686_v1 = vshrl.u32 %v8429_v57, %v5674_v9 }
 0x441   :  { %v5847_v28 = vxor.u32 2147483648, %v5846_v36  ;;  %v2397_v52 = vsub.s32 0, %v11819_v34  ;;  %v5678_v44 = vor.u32 %v5677_v10, %v5676_v59  ;;  %v5681_v32 = vor.u32 %v5680_v27, %v5679_v45 }
 0x442   :  { %v5688_v48 = vshll.u32 %v8429_v57, %v5673_v24  ;;  %v5684_v31 = vor.u32 %v5683_v37, %v5682_v16  ;;  %v5687_v60 = vor.u32 %v5686_v1, %v5685_v7  ;;  %v5689_v13 = vshrl.u32 %v8430_v0, %v5674_v9 }
 0x443   :  { %v5848_v30 = vsel %vm5765_vm0, %v5847_v28, %v5846_v36  ;;  %v7522_v15 = vmin.u32 %v2397_v52, %v11819_v34  ;;  %vm5691_vm12 = vcmp.lt.s32.totalorder %v11821_v62, 1  ;;  %v2653_v56 = vadd.s32 1, %v7533_v35 }
 0x444   :  { %v5851_v22 = vsel %vm11775_vm7, %v11592_v23, %v5848_v30  ;;  %v2418_v17 = vsel %vm2333_vm9, %v2417_v3, %v2393_v42  ;;  %v5675_v58 = vshrl.u32 %v8425_v47, %v5674_v9  ;;  %v5690_v63 = vor.u32 %v5689_v13, %v5688_v48 }
 0x445   :  { %8291 = vcosq.f32 %v5851_v22  ;;  %v2399_v29 = vclz %v7522_v15  ;;  %vm5693_vm0 = vcmp.lt.s32.totalorder %v11821_v62, 3  ;;  %vm5694_vm1 = vcmp.lt.s32.totalorder %v11821_v62, 4 }
 0x446   :  { %8293 = vsinq.f32 %v5851_v22  ;;  %v5699_v40 = vsel %vm5691_vm12, %v5678_v44, %v5681_v32  ;;  %v5696_v38 = vsel %vm5694_vm1, %v5684_v31, 2102212464  ;;  %v5700_v2 = vsel %vm5694_vm1, %v5687_v60, 920167782 }
 0x447   :  { %v7523_v6 = vadd.s32 4294967294, %v2399_v29  ;;  %v5703_v8 = vsel %vm5691_vm12, %v5681_v32, %v5684_v31  ;;  %v5704_v4 = vsel %vm5694_vm1, %v5690_v63, 1326507024  ;;  %vm5692_vm4 = vcmp.lt.s32.totalorder %v11821_v62, 2  ;;  %v11898_v62 = vld [vmem:[%s14270_s2] ss:$0 sm:$0xff] }
 0x448   :  { %v5701_v49 = vsel %vm5693_vm0, %v5684_v31, %v5700_v2  ;;  %v5705_v42 = vsel %vm5693_vm0, %v5687_v60, %v5704_v4  ;;  %vm5859_vm15 = vcmp.eq.s32.totalorder %v11810_v20, 0  ;;  %v2420_v24 = vsel %vm11828_vm11, 0, %v2418_v17 }
 0x449   :  { %vm7524_vm13 = vcmp.lt.s32.totalorder %v7523_v6, 0  ;;  %v5702_v25 = vsel %vm5692_vm4, %v5699_v40, %v5701_v49  ;;  %v5706_v11 = vsel %vm5692_vm4, %v5703_v8, %v5705_v42  ;;  %vm5858_vm7 = vcmp.lt.s32.totalorder %v11810_v20, 2 }
 0x44a   :  { %v2402_v33 = vsel %vm7524_vm13, 0, %v7523_v6  ;;  %v5695_v35 = vsel %vm5691_vm12, %v5675_v58, %v5678_v44  ;;  %v5697_v3 = vsel %vm5693_vm0, %v5681_v32, %v5696_v38  ;;  %vm5855_vm2 = vweird.f32 %v11592_v23 }
 0x44b   :  { %v2403_v9 = vsub.s32 32, %v2402_v33  ;;  %v2407_v36 = vsub.s32 4294967266, %v2402_v33  ;;  %v11877_v59 = vmul.u32.u64.low %v11816_v61, %v5706_v11  ;;  %v11878_v10 = vmul.u32.u64.high %v11816_v61, %v5706_v11, %v11877_v59 }
 0x44c   :  { %v11881_v27 = vmul.u32.u64.low %v11816_v61, %v5702_v25  ;;  %v11882_v28 = vmul.u32.u64.high %v11816_v61, %v5702_v25, %v11881_v27  ;;  %v2404_v52 = vshll.u32 %v11819_v34, %v2402_v33  ;;  %vm2654_vm5 = vcmp.gt.s32.totalorder %v2653_v56, 0 }
 0x44d   :  { %v2405_v45 = vshrl.u32 %v11814_v39, %v2403_v9  ;;  %v2408_v37 = vadd.s32 127, %v2407_v36  ;;  %v2424_v44 = vadd.s32 3, %v2420_v24  ;;  %v5698_v16 = vsel %vm5692_vm4, %v5695_v35, %v5697_v3 }
 0x44e   :  { %v2650_v7 = vand.u32 8388607, %v2643_v5  ;;  %v2655_v1 = vsel %vm2654_vm5, %v2653_v56, 0  ;;  %vm5862_vm3 = vcmp.eq.s32.totalorder %v11810_v20, 2  ;;  %vm5716_vm6 = vc.u32 %v11878_v10, %v11881_v27 }
 0x44f   :  { %v8292_v30 = vpop.eup %8291  ;;  %v2406_v15 = vor.u32 %v2405_v45, %v2404_v52  ;;  %v2409_v32 = vshll.u32 %v2408_v37, 23  ;;  %v2657_v48 = vand.u32 31, %v2655_v1  ;;  %v5717_v39 = vadd.s32 1, %v11882_v28 }
 0x450   :  { %v8294_v22 = vpop.eup %8293  ;;  %v5863_v34 = vxor.u32 2147483648, %v8292_v30  ;;  %v11902_v31 = vadd.f32 %v11898_v62, %v11412_v26  ;;  %v5714_v29 = vmul.u32 %v11816_v61, %v5698_v16  ;;  %v11905_v58 = vand.u32 3, %v2424_v44 }
 0x451   :  { %v5860_v60 = vxor.u32 2147483648, %v8294_v22  ;;  %v2410_v13 = vor.u32 4788187, %v2409_v32  ;;  %v2658_v56 = vsub.s32 32, %v2657_v48  ;;  %v5718_v63 = vsel %vm5716_vm6, %v5717_v39, %v11882_v28 }
 0x452   :  { %v5864_v17 = vsel %vm5862_vm3, %v5863_v34, %v8294_v22  ;;  %v2651_v6 = vor.u32 8388608, %v2650_v7  ;;  %v2413_v2 = vcvt.s32.f32 %v2406_v15  ;;  %v5719_v8 = vadd.s32 %v5718_v63, %v5714_v29 }
 0x453   :  { %v5861_v40 = vsel %vm5859_vm15, %v8292_v30, %v5860_v60  ;;  %v2411_v38 = vand.u32 2147483647, %v2410_v13  ;;  %v2660_v4 = vshll.u32 %v8425_v47, %v2657_v48  ;;  %v2661_v61 = vshrl.u32 %v8426_v51, %v2658_v56 }
 0x454   :  { %v5865_v26 = vsel %vm5858_vm7, %v5861_v40, %v5864_v17  ;;  %v2664_v49 = vshrl.u32 %v8427_v53, %v2658_v56  ;;  %v5720_v24 = vadd.s32 536870912, %v5719_v8  ;;  %v2667_v25 = vshrl.u32 %v8428_v55, %v2658_v56 }
 0x455   :  { %v5866_v42 = vsel %vm5855_vm2, nan, %v5865_v26  ;;  %v2414_v33 = vmul.f32 %v2413_v2, %v2411_v38  ;;  %v2656_v20 = vshrl.u32 %v2655_v1, 5  ;;  %v2663_v11 = vshll.u32 %v8426_v51, %v2657_v48 }
 0x456   :  { %7373 = vst.msk [vmem:[%s14271_s3 + $0x188] sm:$0xff] %vm7323_vm14, %v5866_v42  ;;  %v2666_v9 = vshll.u32 %v8427_v53, %v2657_v48  ;;  %v2670_v36 = vshrl.u32 %v8429_v57, %v2658_v56  ;;  %v5721_v3 = vshrl.u32 %v5720_v24, 30  ;;  %v2662_v23 = vor.u32 %v2661_v61, %v2660_v4 }
 0x457   :  { %v2415_v35 = vxor.u32 2147483648, %v2414_v33  ;;  %v2669_v59 = vshll.u32 %v8428_v55, %v2657_v48  ;;  %v2665_v28 = vor.u32 %v2664_v49, %v2663_v11  ;;  %v2672_v45 = vshll.u32 %v8429_v57, %v2657_v48  ;;  %v11947_v49 = vpop.f32.mrb[21].mxu1 }
 0x458   :  { %v2668_v52 = vor.u32 %v2667_v25, %v2666_v9  ;;  %v2673_v37 = vshrl.u32 %v8430_v0, %v2658_v56  ;;  %v5722_v16 = vshll.u32 %v5721_v3, 30  ;;  %v11930_v1 = vshll.u32 %v2651_v6, 8 }
 0x459   :  { %v2416_v44 = vsel %vm2333_vm9, %v2415_v35, %v2414_v33  ;;  %v2671_v7 = vor.u32 %v2670_v36, %v2669_v59  ;;  %v2659_v15 = vshrl.u32 %v8425_v47, %v2658_v56  ;;  %v5974_v22 = vand.u32 2139095040, %v11902_v31 }
 0x45a   :  { %v2419_v30 = vsel %vm11828_vm11, %v11609_v54, %v2416_v44  ;;  %v2674_v32 = vor.u32 %v2673_v37, %v2672_v45  ;;  %v11937_v48 = vsub.s32 %v5719_v8, %v5722_v16  ;;  %vm2675_vm10 = vcmp.lt.s32.totalorder %v2656_v20, 1 }
 0x45b   :  { %8295 = vcosq.f32 %v2419_v30  ;;  %vm2678_vm8 = vcmp.lt.s32.totalorder %v2656_v20, 4  ;;  %vm2676_vm9 = vcmp.lt.s32.totalorder %v2656_v20, 2  ;;  %v2683_v39 = vsel %vm2675_vm10, %v2662_v23, %v2665_v28 }
 0x45c   :  { %8297 = vsinq.f32 %v2419_v30  ;;  %v2680_v34 = vsel %vm2678_vm8, %v2668_v52, 2102212464  ;;  %v5725_v60 = vsub.s32 0, %v11937_v48  ;;  %v5745_v13 = vsub.s32 4, %v5721_v3 }
 0x45d   :  { %vm2677_vm12 = vcmp.lt.s32.totalorder %v2656_v20, 3  ;;  %v2684_v18 = vsel %vm2678_vm8, %v2671_v7, 920167782  ;;  %v2679_v29 = vsel %vm2675_vm10, %v2659_v15, %v2662_v23  ;;  %v2687_v56 = vsel %vm2675_vm10, %v2665_v28, %v2668_v52 }
 0x45e   :  { %v2685_v17 = vsel %vm2677_vm12, %v2668_v52, %v2684_v18  ;;  %v2688_v63 = vsel %vm2678_vm8, %v2674_v32, 1326507024  ;;  %v7650_v6 = vmin.u32 %v5725_v60, %v11937_v48  ;;  %v2681_v40 = vsel %vm2677_vm12, %v2665_v28, %v2680_v34 }
 0x45f   :  { %v2686_v38 = vsel %vm2676_vm9, %v2683_v39, %v2685_v17  ;;  %v2689_v2 = vsel %vm2677_vm12, %v2671_v7, %v2688_v63  ;;  %v5975_v61 = vshrl.u32 %v5974_v22, 23  ;;  %vm11951_vm11 = vcmp.le.f32.partialorder %v5659_v12, 0.7853982 }
 0x460   :  { %v2690_v8 = vsel %vm2676_vm9, %v2687_v56, %v2689_v2  ;;  %v11944_v26 = vmul.u32.u64.low %v11930_v1, %v2686_v38  ;;  %v11945_v4 = vmul.u32.u64.high %v11930_v1, %v2686_v38, %v11944_v26  ;;  %vm5661_vm0 = vcmp.lt.s32.totalorder %v11644_v41, 0 }
 0x461   :  { %v5727_v33 = vclz %v7650_v6  ;;  %vm2423_vm1 = vweird.f32 %v11609_v54  ;;  %v5746_v24 = vsel %vm5661_vm0, %v5745_v13, %v5721_v3  ;;  %v7661_v9 = vadd.s32 4294967169, %v5975_v61 }
 0x462   :  { %v11960_v25 = vmul.u32.u64.low %v11930_v1, %v2690_v8  ;;  %v11961_v11 = vmul.u32.u64.high %v11930_v1, %v2690_v8, %v11960_v25  ;;  %v2682_v35 = vsel %vm2676_vm9, %v2679_v29, %v2681_v40  ;;  %v5971_v12 = vand.u32 2147483647, %v11902_v31 }
 0x463   :  { %v7651_v36 = vadd.s32 4294967294, %v5727_v33  ;;  %v11967_v23 = vadd.f32 %v11898_v62, %v11508_v21  ;;  %vm2426_vm13 = vcmp.lt.s32.totalorder %v11905_v58, 2  ;;  %vm2427_vm4 = vcmp.eq.s32.totalorder %v11905_v58, 0 }
 0x464   :  { %v2701_v3 = vadd.s32 1, %v11945_v4  ;;  %v5981_v59 = vadd.s32 1, %v7661_v9  ;;  %vm2430_vm15 = vcmp.eq.s32.totalorder %v11905_v58, 2  ;;  %v5715_v20 = vadd.s32 %v11881_v27, %v11878_v10 }
 0x465   :  { %v8296_v28 = vpop.eup %8295  ;;  %vm7652_vm7 = vcmp.lt.s32.totalorder %v7651_v36, 0  ;;  %v5748_v52 = vsel %vm11951_vm11, 0, %v5746_v24  ;;  %v2698_v44 = vmul.u32 %v11930_v1, %v2682_v35  ;;  %vm2700_vm2 = vc.u32 %v11961_v11, %v11944_v26 }
 0x466   :  { %v8298_v45 = vpop.eup %8297  ;;  %v2431_v21 = vxor.u32 2147483648, %v8296_v28  ;;  %v5730_v37 = vsel %vm7652_vm7, 0, %v7651_v36  ;;  %v5978_v15 = vand.u32 8388607, %v5971_v12  ;;  %v2702_v27 = vsel %vm2700_vm2, %v2701_v3, %v11945_v4 }
 0x467   :  { %v2428_v16 = vxor.u32 2147483648, %v8298_v45  ;;  %v5731_v7 = vsub.s32 32, %v5730_v37  ;;  %v5735_v30 = vsub.s32 4294967266, %v5730_v37  ;;  %v5732_v10 = vshll.u32 %v11937_v48, %v5730_v37 }
 0x468   :  { %v2432_v32 = vsel %vm2430_vm15, %v2431_v21, %v8298_v45  ;;  %vm5982_vm5 = vcmp.gt.s32.totalorder %v5981_v59, 0  ;;  %v2703_v1 = vadd.s32 %v2702_v27, %v2698_v44  ;;  %v5752_v13 = vadd.s32 3, %v5748_v52 }
 0x469   :  { %v2429_v22 = vsel %vm2427_vm4, %v8296_v28, %v2428_v16  ;;  %v5733_v34 = vshrl.u32 %v5715_v20, %v5731_v7  ;;  %v5736_v39 = vadd.s32 127, %v5735_v30  ;;  %v5983_v18 = vsel %vm5982_vm5, %v5981_v59, 0 }
 0x46a   :  { %v2433_v60 = vsel %vm2426_vm13, %v2429_v22, %v2432_v32  ;;  %v2539_v29 = vand.u32 2147483647, %v11967_v23  ;;  %v2704_v63 = vadd.s32 536870912, %v2703_v1  ;;  %v5979_v6 = vor.u32 8388608, %v5978_v15 }
 0x46b   :  { %v2434_v17 = vsel %vm2423_vm1, nan, %v2433_v60  ;;  %v5734_v48 = vor.u32 %v5733_v34, %v5732_v10  ;;  %v5737_v56 = vshll.u32 %v5736_v39, 23  ;;  %v5985_v40 = vand.u32 31, %v5983_v18 }
 0x46c   :  { %7340 = vst.msk [vmem:[%s14271_s3 + $0x80] sm:$0xff] %vm7323_vm14, %v2434_v17  ;;  %v11994_v58 = vshrl.u32 %v2704_v63, 30  ;;  %v11996_v2 = vand.u32 3, %v5752_v13  ;;  %v2542_v4 = vand.u32 2139095040, %v11967_v23  ;;  %v12001_v54 = vand.u32 8388607, %v2539_v29 }
 0x46d   :  { %v5738_v38 = vor.u32 4788187, %v5737_v56  ;;  %v5986_v8 = vsub.s32 32, %v5985_v40  ;;  %v5741_v33 = vcvt.s32.f32 %v5734_v48  ;;  %v12004_v24 = vadd.s32 %v11944_v26, %v11961_v11 }
 0x46e   :  { %v2706_v25 = vshll.u32 %v11994_v58, 30  ;;  %v12010_v3 = vshll.u32 %v5979_v6, 8  ;;  %v5988_v20 = vshll.u32 %v8425_v47, %v5985_v40  ;;  %v5984_v45 = vshrl.u32 %v5983_v18, 5 }
 0x46f   :  { %v5739_v61 = vand.u32 2147483647, %v5738_v38  ;;  %v5989_v9 = vshrl.u32 %v8426_v51, %v5986_v8  ;;  %v5992_v36 = vshrl.u32 %v8427_v53, %v5986_v8  ;;  %v5995_v35 = vshrl.u32 %v8428_v55, %v5986_v8 }
 0x470   :  { %v12012_v28 = vsub.s32 %v2703_v1, %v2706_v25  ;;  %v5998_v52 = vshrl.u32 %v8429_v57, %v5986_v8  ;;  %v5991_v26 = vshll.u32 %v8426_v51, %v5985_v40  ;;  %v5994_v11 = vshll.u32 %v8427_v53, %v5985_v40 }
 0x471   :  { %v5742_v59 = vmul.f32 %v5741_v33, %v5739_v61  ;;  %v2543_v21 = vshrl.u32 %v2542_v4, 23  ;;  %v5990_v16 = vor.u32 %v5989_v9, %v5988_v20  ;;  %v5997_v7 = vshll.u32 %v8428_v55, %v5985_v40 }
 0x472   :  { %v2709_v44 = vsub.s32 0, %v12012_v28  ;;  %v5993_v30 = vor.u32 %v5992_v36, %v5991_v26  ;;  %v5996_v15 = vor.u32 %v5995_v35, %v5994_v11  ;;  %v6000_v32 = vshll.u32 %v8429_v57, %v5985_v40 }
 0x473   :  { %v5743_v37 = vxor.u32 2147483648, %v5742_v59  ;;  %v6001_v10 = vshrl.u32 %v8430_v0, %v5986_v8  ;;  %v5999_v34 = vor.u32 %v5998_v52, %v5997_v7  ;;  %v2547_v39 = vor.u32 8388608, %v12001_v54 }
 0x474   :  { %v7534_v22 = vmin.u32 %v2709_v44, %v12012_v28  ;;  %v5987_v60 = vshrl.u32 %v8425_v47, %v5986_v8  ;;  %v7529_v18 = vadd.s32 4294967169, %v2543_v21  ;;  %vm6003_vm3 = vcmp.lt.s32.totalorder %v5984_v45, 1  ;;  %v12045_v44 = vpop.f32.mrb[22].mxu0 }
 0x475   :  { %v5744_v27 = vsel %vm5661_vm0, %v5743_v37, %v5742_v59  ;;  %v6002_v13 = vor.u32 %v6001_v10, %v6000_v32  ;;  %vm6006_vm6 = vcmp.lt.s32.totalorder %v5984_v45, 4  ;;  %vm2645_vm10 = vcmp.lt.s32.totalorder %v11781_v46, 0 }
 0x476   :  { %v5747_v1 = vsel %vm11951_vm11, %v11644_v41, %v5744_v27  ;;  %v2711_v17 = vclz %v7534_v22  ;;  %vm6004_vm8 = vcmp.lt.s32.totalorder %v5984_v45, 2  ;;  %v6008_v48 = vsel %vm6006_vm6, %v5996_v15, 2102212464 }
 0x477   :  { %8299 = vcosq.f32 %v5747_v1  ;;  %v6011_v56 = vsel %vm6003_vm3, %v5990_v16, %v5993_v30  ;;  %vm6005_vm9 = vcmp.lt.s32.totalorder %v5984_v45, 3  ;;  %v6012_v6 = vsel %vm6006_vm6, %v5999_v34, 920167782 }
 0x478   :  { %8301 = vsinq.f32 %v5747_v1  ;;  %v7535_v63 = vadd.s32 4294967294, %v2711_v17  ;;  %v6015_v40 = vsel %vm6003_vm3, %v5993_v30, %v5996_v15  ;;  %v6007_v42 = vsel %vm6003_vm3, %v5987_v60, %v5990_v16 }
 0x479   :  { %v6013_v38 = vsel %vm6005_vm9, %v5996_v15, %v6012_v6  ;;  %v6016_v4 = vsel %vm6006_vm6, %v6002_v13, 1326507024  ;;  %v2549_v8 = vadd.s32 1, %v7529_v18  ;;  %v6009_v54 = vsel %vm6005_vm9, %v5993_v30, %v6008_v48 }
 0x47a   :  { %vm7536_vm12 = vcmp.lt.s32.totalorder %v7535_v63, 0  ;;  %v6014_v61 = vsel %vm6004_vm8, %v6011_v56, %v6013_v38  ;;  %v6017_v33 = vsel %vm6005_vm9, %v5999_v34, %v6016_v4  ;;  %v2729_v52 = vsub.s32 4, %v11994_v58 }
 0x47b   :  { %v2714_v25 = vsel %vm7536_vm12, 0, %v7535_v63  ;;  %v6018_v9 = vsel %vm6004_vm8, %v6015_v40, %v6017_v33  ;;  %v12034_v36 = vmul.u32.u64.low %v12010_v3, %v6014_v61  ;;  %v12035_v35 = vmul.u32.u64.high %v12010_v3, %v6014_v61, %v12034_v36 }
 0x47c   :  { %v2715_v59 = vsub.s32 32, %v2714_v25  ;;  %v2719_v20 = vsub.s32 4294967266, %v2714_v25  ;;  %vm2550_vm11 = vcmp.gt.s32.totalorder %v2549_v8, 0  ;;  %vm5751_vm0 = vweird.f32 %v11644_v41 }
 0x47d   :  { %v6010_v26 = vsel %vm6004_vm8, %v6007_v42, %v6009_v54  ;;  %v12042_v11 = vmul.u32.u64.low %v12010_v3, %v6018_v9  ;;  %v12043_v21 = vmul.u32.u64.high %v12010_v3, %v6018_v9, %v12042_v11  ;;  %v2551_v37 = vsel %vm2550_vm11, %v2549_v8, 0 }
 0x47e   :  { %v2716_v16 = vshll.u32 %v12012_v28, %v2714_v25  ;;  %v2717_v7 = vshrl.u32 %v12004_v24, %v2715_v59  ;;  %v2720_v30 = vadd.s32 127, %v2719_v20  ;;  %v2553_v15 = vand.u32 31, %v2551_v37 }
 0x47f   :  { %vm5754_vm1 = vcmp.lt.s32.totalorder %v11996_v2, 2  ;;  %vm5755_vm13 = vcmp.eq.s32.totalorder %v11996_v2, 0  ;;  %vm12053_vm4 = vcmp.le.f32.partialorder %v2643_v5, 0.7853982  ;;  %v6029_v32 = vadd.s32 1, %v12035_v35 }
 0x480   :  { %vm5758_vm15 = vcmp.eq.s32.totalorder %v11996_v2, 2  ;;  %v2718_v28 = vor.u32 %v2717_v7, %v2716_v16  ;;  %v2721_v27 = vshll.u32 %v2720_v30, 23  ;;  %v2730_v24 = vsel %vm2645_vm10, %v2729_v52, %v11994_v58 }
 0x481   :  { %v8300_v10 = vpop.eup %8299  ;;  %v6026_v1 = vmul.u32 %v12010_v3, %v6010_v26  ;;  %vm6028_vm7 = vc.u32 %v12043_v21, %v12034_v36  ;;  %v2554_v5 = vsub.s32 32, %v2553_v15  ;;  %v12066_v17 = vshll.u32 %v2547_v39, 8 }
 0x482   :  { %v8302_v22 = vpop.eup %8301  ;;  %v5759_v34 = vxor.u32 2147483648, %v8300_v10  ;;  %v2722_v13 = vor.u32 4788187, %v2721_v27  ;;  %v6030_v18 = vsel %vm6028_vm7, %v6029_v32, %v12035_v35  ;;  %v2732_v56 = vsel %vm12053_vm4, 0, %v2730_v24 }
 0x483   :  { %v5756_v60 = vxor.u32 2147483648, %v8302_v22  ;;  %v6031_v63 = vadd.s32 %v6030_v18, %v6026_v1  ;;  %v12072_v58 = vadd.f32 %v11898_v62, %v11594_v43  ;;  %v2725_v40 = vcvt.s32.f32 %v2718_v28 }
 0x484   :  { %v5760_v48 = vsel %vm5758_vm15, %v5759_v34, %v8302_v22  ;;  %v2723_v6 = vand.u32 2147483647, %v2722_v13  ;;  %v12076_v42 = vshrl.u32 %v2551_v37, 5  ;;  %v2557_v4 = vshrl.u32 %v8426_v51, %v2554_v5 }
 0x485   :  { %v5757_v3 = vsel %vm5755_vm13, %v8300_v10, %v5756_v60  ;;  %v6032_v38 = vadd.s32 536870912, %v6031_v63  ;;  %v2560_v8 = vshrl.u32 %v8427_v53, %v2554_v5  ;;  %v2556_v61 = vshll.u32 %v8425_v47, %v2553_v15 }
 0x486   :  { %v5761_v39 = vsel %vm5754_vm1, %v5757_v3, %v5760_v48  ;;  %v2726_v43 = vmul.f32 %v2725_v40, %v2723_v6  ;;  %v2563_v33 = vshrl.u32 %v8428_v55, %v2554_v5  ;;  %v2559_v25 = vshll.u32 %v8426_v51, %v2553_v15 }
 0x487   :  { %v5762_v54 = vsel %vm5751_vm0, nan, %v5761_v39  ;;  %v6033_v2 = vshrl.u32 %v6032_v38, 30  ;;  %v2562_v9 = vshll.u32 %v8427_v53, %v2553_v15  ;;  %v2566_v35 = vshrl.u32 %v8429_v57, %v2554_v5 }
 0x488   :  { %7372 = vst.msk [vmem:[%s14271_s3 + $0x180] sm:$0xff] %vm7323_vm14, %v5762_v54  ;;  %v2727_v59 = vxor.u32 2147483648, %v2726_v43  ;;  %v2565_v41 = vshll.u32 %v8428_v55, %v2553_v15  ;;  %v2568_v20 = vshll.u32 %v8429_v57, %v2553_v15  ;;  %v2569_v52 = vshrl.u32 %v8430_v0, %v2554_v5 }
 0x489   :  { %v2736_v26 = vadd.s32 3, %v2732_v56  ;;  %v6034_v11 = vshll.u32 %v6033_v2, 30  ;;  %v2558_v37 = vor.u32 %v2557_v4, %v2556_v61  ;;  %v2561_v16 = vor.u32 %v2560_v8, %v2559_v25 }
 0x48a   :  { %v2728_v7 = vsel %vm2645_vm10, %v2727_v59, %v2726_v43  ;;  %v2564_v30 = vor.u32 %v2563_v33, %v2562_v9  ;;  %v2567_v32 = vor.u32 %v2566_v35, %v2565_v41  ;;  %v2570_v10 = vor.u32 %v2569_v52, %v2568_v20 }
 0x48b   :  { %v2731_v28 = vsel %vm12053_vm4, %v11781_v46, %v2728_v7  ;;  %v12101_v27 = vsub.s32 %v6031_v63, %v6034_v11  ;;  %v2555_v15 = vshrl.u32 %v8425_v47, %v2554_v5  ;;  %v5870_v24 = vand.u32 2139095040, %v12072_v58 }
 0x48c   :  { %8303 = vcosq.f32 %v2731_v28  ;;  %vm2571_vm2 = vcmp.lt.s32.totalorder %v12076_v42, 1  ;;  %vm2572_vm5 = vcmp.lt.s32.totalorder %v12076_v42, 2  ;;  %vm2573_vm3 = vcmp.lt.s32.totalorder %v12076_v42, 3 }
 0x48d   :  { %8305 = vsinq.f32 %v2731_v28  ;;  %v6037_v22 = vsub.s32 0, %v12101_v27  ;;  %vm2574_vm6 = vcmp.lt.s32.totalorder %v12076_v42, 4  ;;  %v2579_v45 = vsel %vm2571_vm2, %v2558_v37, %v2561_v16 }
 0x48e   :  { %v2576_v34 = vsel %vm2574_vm6, %v2564_v30, 2102212464  ;;  %v2580_v1 = vsel %vm2574_vm6, %v2567_v32, 920167782  ;;  %v2583_v5 = vsel %vm2571_vm2, %v2561_v16, %v2564_v30  ;;  %v2584_v60 = vsel %vm2574_vm6, %v2570_v10, 1326507024 }
 0x48f   :  { %v7662_v13 = vmin.u32 %v6037_v22, %v12101_v27  ;;  %v6057_v18 = vsub.s32 4, %v6033_v2  ;;  %v2581_v48 = vsel %vm2573_vm3, %v2564_v30, %v2580_v1  ;;  %v2585_v56 = vsel %vm2573_vm3, %v2567_v32, %v2584_v60 }
 0x490   :  { %v2737_v63 = vand.u32 3, %v2736_v26  ;;  %v2582_v3 = vsel %vm2572_vm5, %v2579_v45, %v2581_v48  ;;  %v2586_v6 = vsel %vm2572_vm5, %v2583_v5, %v2585_v56  ;;  %v5871_v40 = vshrl.u32 %v5870_v24, 23 }
 0x491   :  { %vm5973_vm10 = vcmp.lt.s32.totalorder %v11902_v31, 0  ;;  %v6039_v39 = vclz %v7662_v13  ;;  %v2575_v38 = vsel %vm2571_vm2, %v2555_v15, %v2558_v37  ;;  %v2577_v4 = vsel %vm2573_vm3, %v2561_v16, %v2576_v34 }
 0x492   :  { %v12129_v8 = vmul.u32.u64.low %v12066_v17, %v2586_v6  ;;  %v12130_v54 = vmul.u32.u64.high %v12066_v17, %v2586_v6, %v12129_v8  ;;  %v12133_v43 = vmul.u32.u64.low %v12066_v17, %v2582_v3  ;;  %v12134_v61 = vmul.u32.u64.high %v12066_v17, %v2582_v3, %v12133_v43 }
 0x493   :  { %vm2735_vm8 = vweird.f32 %v11781_v46  ;;  %vm12140_vm9 = vcmp.le.f32.partialorder %v5971_v12, 0.7853982  ;;  %v7663_v25 = vadd.s32 4294967294, %v6039_v39  ;;  %v6058_v9 = vsel %vm5973_vm10, %v6057_v18, %v6033_v2 }
 0x494   :  { %v7657_v35 = vadd.s32 4294967169, %v5871_v40  ;;  %vm2738_vm12 = vcmp.lt.s32.totalorder %v2737_v63, 2  ;;  %vm2739_vm11 = vcmp.eq.s32.totalorder %v2737_v63, 0  ;;  %vm2742_vm0 = vcmp.eq.s32.totalorder %v2737_v63, 2 }
 0x495   :  { %v2578_v59 = vsel %vm2572_vm5, %v2575_v38, %v2577_v4  ;;  %v6027_v41 = vadd.s32 %v12034_v36, %v12043_v21  ;;  %vm7664_vm1 = vcmp.lt.s32.totalorder %v7663_v25, 0  ;;  %v5867_v12 = vand.u32 2147483647, %v12072_v58 }
 0x496   :  { %v5877_v20 = vadd.s32 1, %v7657_v35  ;;  %v8304_v52 = vpop.eup %8303  ;;  %v6042_v26 = vsel %vm7664_vm1, 0, %v7663_v25  ;;  %v6060_v11 = vsel %vm12140_vm9, 0, %v6058_v9  ;;  %vm2596_vm13 = vc.u32 %v12130_v54, %v12133_v43  ;;  %v12182_v25 = vpop.f32.mrb[22].mxu1 }
 0x497   :  { %v2597_v2 = vadd.s32 1, %v12134_v61  ;;  %v8306_v37 = vpop.eup %8305  ;;  %v2743_v42 = vxor.u32 2147483648, %v8304_v52  ;;  %v6043_v16 = vsub.s32 32, %v6042_v26  ;;  %v6047_v7 = vsub.s32 4294967266, %v6042_v26 }
 0x498   :  { %v2594_v36 = vmul.u32 %v12066_v17, %v2578_v59  ;;  %v2740_v21 = vxor.u32 2147483648, %v8306_v37  ;;  %v6044_v30 = vshll.u32 %v12101_v27, %v6042_v26  ;;  %vm5878_vm4 = vcmp.gt.s32.totalorder %v5877_v20, 0 }
 0x499   :  { %v2598_v32 = vsel %vm2596_vm13, %v2597_v2, %v12134_v61  ;;  %v2744_v10 = vsel %vm2742_vm0, %v2743_v42, %v8306_v37  ;;  %v6045_v28 = vshrl.u32 %v6027_v41, %v6043_v16  ;;  %v6048_v15 = vadd.s32 127, %v6047_v7 }
 0x49a   :  { %v2599_v24 = vadd.s32 %v2598_v32, %v2594_v36  ;;  %v2741_v22 = vsel %vm2739_vm11, %v8304_v52, %v2740_v21  ;;  %v6064_v45 = vadd.s32 3, %v6060_v11  ;;  %v5874_v34 = vand.u32 8388607, %v5867_v12 }
 0x49b   :  { %v5879_v1 = vsel %vm5878_vm4, %v5877_v20, 0  ;;  %v2745_v17 = vsel %vm2738_vm12, %v2741_v22, %v2744_v10  ;;  %v6046_v5 = vor.u32 %v6045_v28, %v6044_v30  ;;  %v6049_v60 = vshll.u32 %v6048_v15, 23 }
 0x49c   :  { %v2600_v27 = vadd.s32 536870912, %v2599_v24  ;;  %v2746_v13 = vsel %vm2735_vm8, nan, %v2745_v17  ;;  %v5881_v18 = vand.u32 31, %v5879_v1  ;;  %v5875_v3 = vor.u32 8388608, %v5874_v34 }
 0x49d   :  { %7343 = vst.msk [vmem:[%s14271_s3 + $0x98] sm:$0xff] %vm7323_vm14, %v2746_v13  ;;  %v6050_v48 = vor.u32 4788187, %v6049_v60  ;;  %v6053_v63 = vcvt.s32.f32 %v6046_v5  ;;  %v12172_v39 = vand.u32 3, %v6064_v45  ;;  %v12180_v61 = vadd.f32 %v11898_v62, %v11707_v19 }
 0x49e   :  { %v12170_v56 = vshrl.u32 %v2600_v27, 30  ;;  %v5882_v6 = vsub.s32 32, %v5881_v18  ;;  %v5884_v59 = vshll.u32 %v8425_v47, %v5881_v18  ;;  %v5880_v20 = vshrl.u32 %v5879_v1, 5 }
 0x49f   :  { %v6051_v40 = vand.u32 2147483647, %v6050_v48  ;;  %v5887_v52 = vshll.u32 %v8426_v51, %v5881_v18  ;;  %v5890_v26 = vshll.u32 %v8427_v53, %v5881_v18  ;;  %v12190_v11 = vshll.u32 %v5875_v3, 8 }
 0x4a0   :  { %v2602_v38 = vshll.u32 %v12170_v56, 30  ;;  %v5885_v46 = vshrl.u32 %v8426_v51, %v5882_v6  ;;  %v5888_v4 = vshrl.u32 %v8427_v53, %v5882_v6  ;;  %v5891_v8 = vshrl.u32 %v8428_v55, %v5882_v6 }
 0x4a1   :  { %v6054_v9 = vmul.f32 %v6053_v63, %v6051_v40  ;;  %v5894_v41 = vshrl.u32 %v8429_v57, %v5882_v6  ;;  %v5893_v42 = vshll.u32 %v8428_v55, %v5881_v18  ;;  %v5896_v36 = vshll.u32 %v8429_v57, %v5881_v18 }
 0x4a2   :  { %v12184_v35 = vsub.s32 %v2599_v24, %v2602_v38  ;;  %v5886_v37 = vor.u32 %v5885_v46, %v5884_v59  ;;  %v5889_v16 = vor.u32 %v5888_v4, %v5887_v52  ;;  %v5892_v7 = vor.u32 %v5891_v8, %v5890_v26 }
 0x4a3   :  { %v6055_v2 = vxor.u32 2147483648, %v6054_v9  ;;  %v5897_v21 = vshrl.u32 %v8430_v0, %v5882_v6  ;;  %vm2541_vm15 = vcmp.lt.s32.totalorder %v11967_v23, 0  ;;  %v5895_v10 = vor.u32 %v5894_v41, %v5893_v42 }
 0x4a4   :  { %v2605_v19 = vsub.s32 0, %v12184_v35  ;;  %v2854_v28 = vand.u32 2139095040, %v12180_v61  ;;  %v2625_v24 = vsub.s32 4, %v12170_v56  ;;  %v5883_v22 = vshrl.u32 %v8425_v47, %v5882_v6 }
 0x4a5   :  { %v6056_v30 = vsel %vm5973_vm10, %v6055_v2, %v6054_v9  ;;  %v5898_v45 = vor.u32 %v5897_v21, %v5896_v36  ;;  %vm5899_vm7 = vcmp.lt.s32.totalorder %v5880_v20, 1  ;;  %vm5902_vm2 = vcmp.lt.s32.totalorder %v5880_v20, 4 }
 0x4a6   :  { %v7530_v32 = vmin.u32 %v2605_v19, %v12184_v35  ;;  %v6059_v15 = vsel %vm12140_vm9, %v11902_v31, %v6056_v30  ;;  %vm12208_vm5 = vcmp.le.f32.partialorder %v2539_v29, 0.7853982  ;;  %vm5900_vm3 = vcmp.lt.s32.totalorder %v5880_v20, 2 }
 0x4a7   :  { %8307 = vcosq.f32 %v6059_v15  ;;  %v5904_v17 = vsel %vm5902_vm2, %v5892_v7, 2102212464  ;;  %v5907_v33 = vsel %vm5899_vm7, %v5886_v37, %v5889_v16  ;;  %vm5901_vm6 = vcmp.lt.s32.totalorder %v5880_v20, 3 }
 0x4a8   :  { %v2607_v34 = vclz %v7530_v32  ;;  %8309 = vsinq.f32 %v6059_v15  ;;  %v5908_v60 = vsel %vm5902_vm2, %v5895_v10, 920167782  ;;  %v5911_v27 = vsel %vm5899_vm7, %v5889_v16, %v5892_v7 }
 0x4a9   :  { %v5903_v13 = vsel %vm5899_vm7, %v5883_v22, %v5886_v37  ;;  %v5909_v18 = vsel %vm5901_vm6, %v5892_v7, %v5908_v60  ;;  %v5912_v48 = vsel %vm5902_vm2, %v5898_v45, 1326507024  ;;  %v2855_v3 = vshrl.u32 %v2854_v28, 23 }
 0x4aa   :  { %v7531_v5 = vadd.s32 4294967294, %v2607_v34  ;;  %v5905_v6 = vsel %vm5901_vm6, %v5889_v16, %v5904_v17  ;;  %v5910_v40 = vsel %vm5900_vm3, %v5907_v33, %v5909_v18  ;;  %v5913_v63 = vsel %vm5901_vm6, %v5895_v10, %v5912_v48 }
 0x4ab   :  { %vm6067_vm8 = vcmp.eq.s32.totalorder %v12172_v39, 0  ;;  %v5914_v38 = vsel %vm5900_vm3, %v5911_v27, %v5913_v63  ;;  %v12216_v46 = vmul.u32.u64.low %v12190_v11, %v5910_v40  ;;  %v12217_v4 = vmul.u32.u64.high %v12190_v11, %v5910_v40, %v12216_v46 }
 0x4ac   :  { %vm7532_vm10 = vcmp.lt.s32.totalorder %v7531_v5, 0  ;;  %vm6066_vm9 = vcmp.lt.s32.totalorder %v12172_v39, 2  ;;  %v2595_v8 = vadd.s32 %v12133_v43, %v12130_v54  ;;  %v7541_v41 = vadd.s32 4294967169, %v2855_v3  ;;  %v12233_v43 = vpop.f32.mrb[23].mxu0 }
 0x4ad   :  { %v2610_v29 = vsel %vm7532_vm10, 0, %v7531_v5  ;;  %vm6063_vm12 = vweird.f32 %v11902_v31  ;;  %v2626_v52 = vsel %vm2541_vm15, %v2625_v24, %v12170_v56  ;;  %v5906_v26 = vsel %vm5900_vm3, %v5903_v13, %v5905_v6 }
 0x4ae   :  { %v2611_v9 = vsub.s32 32, %v2610_v29  ;;  %v2615_v59 = vsub.s32 4294967266, %v2610_v29  ;;  %v12229_v2 = vmul.u32.u64.low %v12190_v11, %v5914_v38  ;;  %v12230_v19 = vmul.u32.u64.high %v12190_v11, %v5914_v38, %v12229_v2 }
 0x4af   :  { %v2612_v37 = vshll.u32 %v12184_v35, %v2610_v29  ;;  %v2861_v54 = vadd.s32 1, %v7541_v41  ;;  %vm6070_vm11 = vcmp.eq.s32.totalorder %v12172_v39, 2  ;;  %v5925_v7 = vadd.s32 1, %v12217_v4 }
 0x4b0   :  { %v2613_v42 = vshrl.u32 %v2595_v8, %v2611_v9  ;;  %v2616_v16 = vadd.s32 127, %v2615_v59  ;;  %v2851_v36 = vand.u32 2147483647, %v12180_v61  ;;  %v12240_v56 = vadd.f32 %v11898_v62, %v11783_v50 }
 0x4b1   :  { %v8308_v20 = vpop.eup %8307  ;;  %v2628_v35 = vsel %vm12208_vm5, 0, %v2626_v52  ;;  %vm2862_vm0 = vcmp.gt.s32.totalorder %v2861_v54, 0  ;;  %v5922_v28 = vmul.u32 %v12190_v11, %v5906_v26  ;;  %vm5924_vm1 = vc.u32 %v12230_v19, %v12216_v46 }
 0x4b2   :  { %v2614_v21 = vor.u32 %v2613_v42, %v2612_v37  ;;  %v2617_v30 = vshll.u32 %v2616_v16, 23  ;;  %v8310_v32 = vpop.eup %8309  ;;  %v6071_v10 = vxor.u32 2147483648, %v8308_v20  ;;  %v2863_v15 = vsel %vm2862_vm0, %v2861_v54, 0 }
 0x4b3   :  { %v6068_v24 = vxor.u32 2147483648, %v8310_v32  ;;  %v5926_v50 = vsel %vm5924_vm1, %v5925_v7, %v12217_v4  ;;  %v12250_v45 = vadd.f32 %v11898_v62, %v11868_v14  ;;  %v2858_v33 = vand.u32 8388607, %v2851_v36 }
 0x4b4   :  { %v2618_v22 = vor.u32 4788187, %v2617_v30  ;;  %v6072_v34 = vsel %vm6070_vm11, %v6071_v10, %v8310_v32  ;;  %v5927_v17 = vadd.s32 %v5926_v50, %v5922_v28  ;;  %v2865_v11 = vand.u32 31, %v2863_v15 }
 0x4b5   :  { %v6069_v5 = vsel %vm6067_vm8, %v8308_v20, %v6068_v24  ;;  %v2621_v27 = vcvt.s32.f32 %v2614_v21  ;;  %v2632_v13 = vadd.s32 3, %v2628_v35  ;;  %v6182_v62 = vand.u32 2139095040, %v12240_v56 }
 0x4b6   :  { %v2619_v60 = vand.u32 2147483647, %v2618_v22  ;;  %v6073_v18 = vsel %vm6066_vm9, %v6069_v5, %v6072_v34  ;;  %v5928_v48 = vadd.s32 536870912, %v5927_v17  ;;  %v2866_v14 = vsub.s32 32, %v2865_v11 }
 0x4b7   :  { %v6074_v3 = vsel %vm6063_vm12, nan, %v6073_v18  ;;  %v2868_v40 = vshll.u32 %v8425_v47, %v2865_v11  ;;  %v2871_v63 = vshll.u32 %v8426_v51, %v2865_v11  ;;  %v2874_v4 = vshll.u32 %v8427_v53, %v2865_v11 }
 0x4b8   :  { %v2622_v6 = vmul.f32 %v2621_v27, %v2619_v60  ;;  %7375 = vst.msk [vmem:[%s14271_s3 + $0x198] sm:$0xff] %vm7323_vm14, %v6074_v3  ;;  %v5929_v29 = vshrl.u32 %v5928_v48, 30  ;;  %v2869_v39 = vshrl.u32 %v8426_v51, %v2866_v14  ;;  %v2872_v38 = vshrl.u32 %v8427_v53, %v2866_v14  ;;  %v12298_v27 = vpop.f32.mrb[23].mxu1 }
 0x4b9   :  { %v2875_v31 = vshrl.u32 %v8428_v55, %v2866_v14  ;;  %v2877_v9 = vshll.u32 %v8428_v55, %v2865_v11  ;;  %v2878_v59 = vshrl.u32 %v8429_v57, %v2866_v14  ;;  %v12275_v41 = vand.u32 3, %v2632_v13 }
 0x4ba   :  { %v2623_v8 = vxor.u32 2147483648, %v2622_v6  ;;  %vm5869_vm13 = vcmp.lt.s32.totalorder %v12072_v58, 0  ;;  %v5930_v52 = vshll.u32 %v5929_v29, 30  ;;  %v2864_v26 = vshrl.u32 %v2863_v15, 5 }
 0x4bb   :  { %v2870_v2 = vor.u32 %v2869_v39, %v2868_v40  ;;  %v2873_v42 = vor.u32 %v2872_v38, %v2871_v63  ;;  %v2876_v16 = vor.u32 %v2875_v31, %v2874_v4  ;;  %v2879_v54 = vor.u32 %v2878_v59, %v2877_v9 }
 0x4bc   :  { %v2624_v37 = vsel %vm2541_vm15, %v2623_v8, %v2622_v6  ;;  %v12283_v20 = vsub.s32 %v5927_v17, %v5930_v52  ;;  %v2880_v21 = vshll.u32 %v8429_v57, %v2865_v11  ;;  %v2881_v30 = vshrl.u32 %v8430_v0, %v2866_v14 }
 0x4bd   :  { %v2627_v7 = vsel %vm12208_vm5, %v11967_v23, %v2624_v37  ;;  %v2859_v35 = vor.u32 8388608, %v2858_v33  ;;  %v6179_v32 = vand.u32 2147483647, %v12240_v56  ;;  %v6183_v10 = vshrl.u32 %v6182_v62, 23 }
 0x4be   :  { %8311 = vcosq.f32 %v2627_v7  ;;  %vm12290_vm4 = vcmp.le.f32.partialorder %v5867_v12, 0.7853982  ;;  %v5933_v1 = vsub.s32 0, %v12283_v20  ;;  %v2867_v15 = vshrl.u32 %v8425_v47, %v2866_v14 }
 0x4bf   :  { %8313 = vsinq.f32 %v2627_v7  ;;  %v2882_v24 = vor.u32 %v2881_v30, %v2880_v21  ;;  %v5953_v22 = vsub.s32 4, %v5929_v29  ;;  %vm2883_vm15 = vcmp.lt.s32.totalorder %v2864_v26, 1 }
 0x4c0   :  { %vm2885_vm7 = vcmp.lt.s32.totalorder %v2864_v26, 3  ;;  %vm2886_vm2 = vcmp.lt.s32.totalorder %v2864_v26, 4  ;;  %v7658_v50 = vmin.u32 %v5933_v1, %v12283_v20  ;;  %v2891_v17 = vsel %vm2883_vm15, %v2870_v2, %v2873_v42 }
 0x4c1   :  { %v2888_v34 = vsel %vm2886_vm2, %v2876_v16, 2102212464  ;;  %v2892_v33 = vsel %vm2886_vm2, %v2879_v54, 920167782  ;;  %v2895_v12 = vsel %vm2883_vm15, %v2873_v42, %v2876_v16  ;;  %v2896_v5 = vsel %vm2886_vm2, %v2882_v24, 1326507024 }
 0x4c2   :  { %v2893_v11 = vsel %vm2885_vm7, %v2876_v16, %v2892_v33  ;;  %v2899_v60 = vshll.u32 %v2859_v35, 8  ;;  %v5935_v13 = vclz %v7658_v50  ;;  %vm2884_vm5 = vcmp.lt.s32.totalorder %v2864_v26, 2 }
 0x4c3   :  { %v2887_v18 = vsel %vm2883_vm15, %v2867_v15, %v2870_v2  ;;  %v2889_v48 = vsel %vm2885_vm7, %v2873_v42, %v2888_v34  ;;  %v5954_v14 = vsel %vm5869_vm13, %v5953_v22, %v5929_v29  ;;  %v2894_v62 = vsel %vm2884_vm5, %v2891_v17, %v2893_v11 }
 0x4c4   :  { %v2897_v3 = vsel %vm2885_vm7, %v2879_v54, %v2896_v5  ;;  %v7669_v6 = vadd.s32 4294967169, %v6183_v10  ;;  %vm2631_vm3 = vweird.f32 %v11967_v23  ;;  %v7659_v40 = vadd.s32 4294967294, %v5935_v13 }
 0x4c5   :  { %v2898_v63 = vsel %vm2884_vm5, %v2895_v12, %v2897_v3  ;;  %v12305_v39 = vmul.u32.u64.low %v2899_v60, %v2894_v62  ;;  %v12306_v38 = vmul.u32.u64.high %v2899_v60, %v2894_v62, %v12305_v39  ;;  %vm2634_vm6 = vcmp.lt.s32.totalorder %v12275_v41, 2 }
 0x4c6   :  { %v2890_v4 = vsel %vm2884_vm5, %v2887_v18, %v2889_v48  ;;  %v12310_v8 = vmul.u32.u64.low %v2899_v60, %v2898_v63  ;;  %v12311_v31 = vmul.u32.u64.high %v2899_v60, %v2898_v63, %v12310_v8  ;;  %vm2635_vm10 = vcmp.eq.s32.totalorder %v12275_v41, 0 }
 0x4c7   :  { %vm2638_vm8 = vcmp.eq.s32.totalorder %v12275_v41, 2  ;;  %vm7660_vm9 = vcmp.lt.s32.totalorder %v7659_v40, 0  ;;  %v6189_v29 = vadd.s32 1, %v7669_v6  ;;  %v5923_v59 = vadd.s32 %v12216_v46, %v12230_v19 }
 0x4c8   :  { %v8312_v9 = vpop.eup %8311  ;;  %v5938_v52 = vsel %vm7660_vm9, 0, %v7659_v40  ;;  %v5956_v26 = vsel %vm12290_vm4, 0, %v5954_v14  ;;  %v6186_v2 = vand.u32 8388607, %v6179_v32  ;;  %v2906_v7 = vmul.u32 %v2899_v60, %v2890_v4 }
 0x4c9   :  { %v8314_v37 = vpop.eup %8313  ;;  %v2639_v42 = vxor.u32 2147483648, %v8312_v9  ;;  %v5939_v16 = vsub.s32 32, %v5938_v52  ;;  %v5943_v54 = vsub.s32 4294967266, %v5938_v52  ;;  %v5940_v30 = vshll.u32 %v12283_v20, %v5938_v52 }
 0x4ca   :  { %v2636_v21 = vxor.u32 2147483648, %v8314_v37  ;;  %vm2908_vm12 = vc.u32 %v12311_v31, %v12305_v39  ;;  %v2909_v46 = vadd.s32 1, %v12306_v38  ;;  %vm6190_vm11 = vcmp.gt.s32.totalorder %v6189_v29, 0 }
 0x4cb   :  { %v2640_v19 = vsel %vm2638_vm8, %v2639_v42, %v8314_v37  ;;  %v5941_v35 = vshrl.u32 %v5923_v59, %v5939_v16  ;;  %v5944_v10 = vadd.s32 127, %v5943_v54  ;;  %v5960_v15 = vadd.s32 3, %v5956_v26 }
 0x4cc   :  { %v2637_v1 = vsel %vm2635_vm10, %v8312_v9, %v2636_v21  ;;  %v2910_v24 = vsel %vm2908_vm12, %v2909_v46, %v12306_v38  ;;  %v6191_v22 = vsel %vm6190_vm11, %v6189_v29, 0  ;;  %v6187_v13 = vor.u32 8388608, %v6186_v2 }
 0x4cd   :  { %v2641_v20 = vsel %vm2634_vm6, %v2637_v1, %v2640_v19  ;;  %v5942_v50 = vor.u32 %v5941_v35, %v5940_v30  ;;  %v5945_v34 = vshll.u32 %v5944_v10, 23  ;;  %v2911_v17 = vadd.s32 %v2910_v24, %v2906_v7 }
 0x4ce   :  { %v2642_v33 = vsel %vm2631_vm3, nan, %v2641_v20  ;;  %v6193_v11 = vand.u32 31, %v6191_v22  ;;  %v12338_v60 = vand.u32 3, %v5960_v15  ;;  %v2750_v62 = vand.u32 2139095040, %v12250_v45 }
 0x4cf   :  { %7342 = vst.msk [vmem:[%s14271_s3 + $0x90] sm:$0xff] %vm7323_vm14, %v2642_v33  ;;  %v5946_v12 = vor.u32 4788187, %v5945_v34  ;;  %v2912_v5 = vadd.s32 536870912, %v2911_v17  ;;  %v5949_v48 = vcvt.s32.f32 %v5942_v50  ;;  %v6192_v23 = vshrl.u32 %v6191_v22, 5 }
 0x4d0   :  { %v6194_v18 = vsub.s32 32, %v6193_v11  ;;  %v6202_v4 = vshll.u32 %v8427_v53, %v6193_v11  ;;  %v6196_v29 = vshll.u32 %v8425_v47, %v6193_v11  ;;  %v6199_v9 = vshll.u32 %v8426_v51, %v6193_v11 }
 0x4d1   :  { %v5947_v41 = vand.u32 2147483647, %v5946_v12  ;;  %v12340_v14 = vshrl.u32 %v2912_v5, 30  ;;  %v6205_v59 = vshll.u32 %v8428_v55, %v6193_v11  ;;  %v2747_v42 = vand.u32 2147483647, %v12250_v45 }
 0x4d2   :  { %v6197_v3 = vshrl.u32 %v8426_v51, %v6194_v18  ;;  %v6200_v6 = vshrl.u32 %v8427_v53, %v6194_v18  ;;  %v6203_v40 = vshrl.u32 %v8428_v55, %v6194_v18  ;;  %v6206_v8 = vshrl.u32 %v8429_v57, %v6194_v18 }
 0x4d3   :  { %v5950_v63 = vmul.f32 %v5949_v48, %v5947_v41  ;;  %v2914_v38 = vshll.u32 %v12340_v14, 30  ;;  %v6209_v52 = vshrl.u32 %v8430_v0, %v6194_v18  ;;  %v6208_v21 = vshll.u32 %v8429_v57, %v6193_v11 }
 0x4d4   :  { %v6204_v37 = vor.u32 %v6203_v40, %v6202_v4  ;;  %v6198_v16 = vor.u32 %v6197_v3, %v6196_v29  ;;  %v6201_v54 = vor.u32 %v6200_v6, %v6199_v9  ;;  %v6207_v7 = vor.u32 %v6206_v8, %v6205_v59 }
 0x4d5   :  { %v5951_v26 = vxor.u32 2147483648, %v5950_v63  ;;  %v12353_v2 = vsub.s32 %v2911_v17, %v2914_v38  ;;  %v12360_v19 = vshll.u32 %v6187_v13, 8  ;;  %v2751_v35 = vshrl.u32 %v2750_v62, 23 }
 0x4d6   :  { %v6195_v1 = vshrl.u32 %v8425_v47, %v6194_v18  ;;  %v6210_v15 = vor.u32 %v6209_v52, %v6208_v21  ;;  %vm6214_vm0 = vcmp.lt.s32.totalorder %v6192_v23, 4  ;;  %vm6211_vm1 = vcmp.lt.s32.totalorder %v6192_v23, 1 }
 0x4d7   :  { %v5952_v30 = vsel %vm5869_vm13, %v5951_v26, %v5950_v63  ;;  %v2917_v46 = vsub.s32 0, %v12353_v2  ;;  %v6216_v22 = vsel %vm6214_vm0, %v6204_v37, 2102212464  ;;  %vm6213_vm13 = vcmp.lt.s32.totalorder %v6192_v23, 3 }
 0x4d8   :  { %v5955_v10 = vsel %vm12290_vm4, %v12072_v58, %v5952_v30  ;;  %v6219_v20 = vsel %vm6211_vm1, %v6198_v16, %v6201_v54  ;;  %v6220_v50 = vsel %vm6214_vm0, %v6207_v7, 920167782  ;;  %vm12371_vm15 = vcmp.le.f32.partialorder %v2851_v36, 0.7853982 }
 0x4d9   :  { %8315 = vcosq.f32 %v5955_v10  ;;  %v7542_v24 = vmin.u32 %v2917_v46, %v12353_v2  ;;  %v6215_v17 = vsel %vm6211_vm1, %v6195_v1, %v6198_v16  ;;  %v6217_v33 = vsel %vm6213_vm13, %v6201_v54, %v6216_v22 }
 0x4da   :  { %8317 = vsinq.f32 %v5955_v10  ;;  %v6223_v11 = vsel %vm6211_vm1, %v6201_v54, %v6204_v37  ;;  %vm6212_vm4 = vcmp.lt.s32.totalorder %v6192_v23, 2  ;;  %v6221_v12 = vsel %vm6213_vm13, %v6204_v37, %v6220_v50 }
 0x4db   :  { %v2919_v34 = vclz %v7542_v24  ;;  %v6224_v5 = vsel %vm6214_vm0, %v6210_v15, 1326507024  ;;  %v7537_v13 = vadd.s32 4294967169, %v2751_v35  ;;  %v2937_v41 = vsub.s32 4, %v12340_v14  ;;  %v12404_v35 = vpop.f32.mrb[24].mxu0 }
 0x4dc   :  { %v6222_v48 = vsel %vm6212_vm4, %v6219_v20, %v6221_v12  ;;  %v6225_v62 = vsel %vm6213_vm13, %v6207_v7, %v6224_v5  ;;  %v6218_v3 = vsel %vm6212_vm4, %v6215_v17, %v6217_v33  ;;  %vm5959_vm2 = vweird.f32 %v12072_v58  ;;  %v12412_v20 = vld [vmem:[%s14270_s2] ss:$0 sm:$0xff] }
 0x4dd   :  { %v7543_v18 = vadd.s32 4294967294, %v2919_v34  ;;  %v6226_v6 = vsel %vm6212_vm4, %v6223_v11, %v6225_v62  ;;  %v12378_v36 = vmul.u32.u64.low %v12360_v19, %v6222_v48  ;;  %v12379_v40 = vmul.u32.u64.high %v12360_v19, %v6222_v48, %v12378_v36 }
 0x4de   :  { %v12383_v63 = vmul.u32.u64.low %v12360_v19, %v6226_v6  ;;  %v12384_v38 = vmul.u32.u64.high %v12360_v19, %v6226_v6, %v12383_v63  ;;  %v2757_v23 = vadd.s32 1, %v7537_v13  ;;  %vm5966_vm5 = vcmp.eq.s32.totalorder %v12338_v60, 2 }
 0x4df   :  { %vm7544_vm7 = vcmp.lt.s32.totalorder %v7543_v18, 0  ;;  %vm2853_vm3 = vcmp.lt.s32.totalorder %v12180_v61, 0  ;;  %v2907_v4 = vadd.s32 %v12305_v39, %v12311_v31  ;;  %v6234_v52 = vmul.u32 %v12360_v19, %v6218_v3 }
 0x4e0   :  { %v2922_v8 = vsel %vm7544_vm7, 0, %v7543_v18  ;;  %v2938_v59 = vsel %vm2853_vm3, %v2937_v41, %v12340_v14  ;;  %vm2758_vm6 = vcmp.gt.s32.totalorder %v2757_v23, 0  ;;  %v6237_v26 = vadd.s32 1, %v12379_v40 }
 0x4e1   :  { %v2923_v29 = vsub.s32 32, %v2922_v8  ;;  %v2927_v9 = vsub.s32 4294967266, %v2922_v8  ;;  %v2754_v37 = vand.u32 8388607, %v2747_v42  ;;  %v2759_v16 = vsel %vm2758_vm6, %v2757_v23, 0 }
 0x4e2   :  { %v2924_v7 = vshll.u32 %v12353_v2, %v2922_v8  ;;  %vm6236_vm10 = vc.u32 %v12384_v38, %v12378_v36  ;;  %v2940_v14 = vsel %vm12371_vm15, 0, %v2938_v59  ;;  %v2761_v19 = vand.u32 31, %v2759_v16 }
 0x4e3   :  { %v8316_v54 = vpop.eup %8315  ;;  %v2925_v39 = vshrl.u32 %v2907_v4, %v2923_v29  ;;  %v2928_v31 = vadd.s32 127, %v2927_v9  ;;  %v6238_v46 = vsel %vm6236_vm10, %v6237_v26, %v12379_v40  ;;  %vm5963_vm8 = vcmp.eq.s32.totalorder %v12338_v60, 0 }
 0x4e4   :  { %v8318_v21 = vpop.eup %8317  ;;  %v5967_v30 = vxor.u32 2147483648, %v8316_v54  ;;  %v6239_v24 = vadd.s32 %v6238_v46, %v6234_v52  ;;  %v2762_v22 = vsub.s32 32, %v2761_v19  ;;  %v12416_v50 = vadd.f32 %v12412_v20, %v11947_v49 }
 0x4e5   :  { %v5964_v10 = vxor.u32 2147483648, %v8318_v21  ;;  %v2926_v1 = vor.u32 %v2925_v39, %v2924_v7  ;;  %v2929_v15 = vshll.u32 %v2928_v31, 23  ;;  %vm5962_vm9 = vcmp.lt.s32.totalorder %v12338_v60, 2 }
 0x4e6   :  { %v5968_v2 = vsel %vm5966_vm5, %v5967_v30, %v8318_v21  ;;  %v6240_v33 = vadd.s32 536870912, %v6239_v24  ;;  %v2944_v12 = vadd.s32 3, %v2940_v14  ;;  %v2755_v5 = vor.u32 8388608, %v2754_v37 }
 0x4e7   :  { %v5965_v34 = vsel %vm5963_vm8, %v8316_v54, %v5964_v10  ;;  %v2930_v17 = vor.u32 4788187, %v2929_v15  ;;  %v12421_v13 = vadd.f32 %v12412_v20, %v12045_v44  ;;  %v2933_v48 = vcvt.s32.f32 %v2926_v1 }
 0x4e8   :  { %v5969_v11 = vsel %vm5962_vm9, %v5965_v34, %v5968_v2  ;;  %v6241_v62 = vshrl.u32 %v6240_v33, 30  ;;  %v2760_v49 = vshrl.u32 %v2759_v16, 5  ;;  %v2765_v60 = vshrl.u32 %v8426_v51, %v2762_v22 }
 0x4e9   :  { %v5970_v18 = vsel %vm5959_vm2, nan, %v5969_v11  ;;  %v2931_v41 = vand.u32 2147483647, %v2930_v17  ;;  %v2768_v3 = vshrl.u32 %v8427_v53, %v2762_v22  ;;  %v2771_v6 = vshrl.u32 %v8428_v55, %v2762_v22 }
 0x4ea   :  { %7374 = vst.msk [vmem:[%s14271_s3 + $0x190] sm:$0xff] %vm7323_vm14, %v5970_v18  ;;  %v6242_v40 = vshll.u32 %v6241_v62, 30  ;;  %v2770_v58 = vshll.u32 %v8427_v53, %v2761_v19  ;;  %v2774_v63 = vshrl.u32 %v8429_v57, %v2762_v22  ;;  %vm6181_vm12 = vcmp.lt.s32.totalorder %v12240_v56, 0 }
 0x4eb   :  { %v2934_v44 = vmul.f32 %v2933_v48, %v2931_v41  ;;  %v2764_v23 = vshll.u32 %v8425_v47, %v2761_v19  ;;  %v2767_v4 = vshll.u32 %v8426_v51, %v2761_v19  ;;  %v2773_v8 = vshll.u32 %v8428_v55, %v2761_v19 }
 0x4ec   :  { %v2777_v29 = vshrl.u32 %v8430_v0, %v2762_v22  ;;  %v12439_v59 = vand.u32 3, %v2944_v12  ;;  %v12441_v52 = vsub.s32 %v6239_v24, %v6242_v40  ;;  %v2772_v26 = vor.u32 %v2771_v6, %v2770_v58  ;;  %v12462_v12 = vpop.f32.mrb[24].mxu1 }
 0x4ed   :  { %v2935_v9 = vxor.u32 2147483648, %v2934_v44  ;;  %v2766_v37 = vor.u32 %v2765_v60, %v2764_v23  ;;  %v2769_v16 = vor.u32 %v2768_v3, %v2767_v4  ;;  %v2775_v54 = vor.u32 %v2774_v63, %v2773_v8 }
 0x4ee   :  { %v2776_v7 = vshll.u32 %v8429_v57, %v2761_v19  ;;  %v6245_v31 = vsub.s32 0, %v12441_v52  ;;  %v2763_v21 = vshrl.u32 %v8425_v47, %v2762_v22  ;;  %v2795_v30 = vshll.u32 %v2755_v5, 8 }
 0x4ef   :  { %v2936_v39 = vsel %vm2853_vm3, %v2935_v9, %v2934_v44  ;;  %v6265_v46 = vsub.s32 4, %v6241_v62  ;;  %vm2782_vm11 = vcmp.lt.s32.totalorder %v2760_v49, 4  ;;  %vm12453_vm0 = vcmp.le.f32.partialorder %v6179_v32, 0.7853982 }
 0x4f0   :  { %v2939_v14 = vsel %vm12371_vm15, %v12180_v61, %v2936_v39  ;;  %v2778_v10 = vor.u32 %v2777_v29, %v2776_v7  ;;  %v7670_v1 = vmin.u32 %v6245_v31, %v12441_v52  ;;  %vm2779_vm1 = vcmp.lt.s32.totalorder %v2760_v49, 1 }
 0x4f1   :  { %8319 = vcosq.f32 %v2939_v14  ;;  %v2784_v15 = vsel %vm2782_vm11, %v2772_v26, 2102212464  ;;  %vm2780_vm13 = vcmp.lt.s32.totalorder %v2760_v49, 2  ;;  %v2787_v24 = vsel %vm2779_vm1, %v2766_v37, %v2769_v16 }
 0x4f2   :  { %8321 = vsinq.f32 %v2939_v14  ;;  %v2788_v28 = vsel %vm2782_vm11, %v2775_v54, 920167782  ;;  %v6247_v2 = vclz %v7670_v1  ;;  %vm2781_vm15 = vcmp.lt.s32.totalorder %v2760_v49, 3 }
 0x4f3   :  { %v2783_v22 = vsel %vm2779_vm1, %v2763_v21, %v2766_v37  ;;  %v2791_v34 = vsel %vm2779_vm1, %v2769_v16, %v2772_v26  ;;  %v2785_v17 = vsel %vm2781_vm15, %v2769_v16, %v2784_v15  ;;  %v2789_v33 = vsel %vm2781_vm15, %v2772_v26, %v2788_v28 }
 0x4f4   :  { %v2792_v32 = vsel %vm2782_vm11, %v2778_v10, 1326507024  ;;  %v6078_v11 = vand.u32 2139095040, %v12416_v50  ;;  %v7671_v5 = vadd.s32 4294967294, %v6247_v2  ;;  %v6266_v18 = vsel %vm6181_vm12, %v6265_v46, %v6241_v62 }
 0x4f5   :  { %v2790_v41 = vsel %vm2780_vm13, %v2787_v24, %v2789_v33  ;;  %v2793_v48 = vsel %vm2781_vm15, %v2775_v54, %v2792_v32  ;;  %v2786_v40 = vsel %vm2780_vm13, %v2783_v22, %v2785_v17  ;;  %vm2946_vm7 = vcmp.lt.s32.totalorder %v12439_v59, 2 }
 0x4f6   :  { %v2794_v60 = vsel %vm2780_vm13, %v2791_v34, %v2793_v48  ;;  %v12468_v3 = vmul.u32.u64.low %v2795_v30, %v2790_v41  ;;  %v12469_v6 = vmul.u32.u64.high %v2795_v30, %v2790_v41, %v12468_v3  ;;  %v6079_v44 = vshrl.u32 %v6078_v11, 23 }
 0x4f7   :  { %vm7672_vm4 = vcmp.lt.s32.totalorder %v7671_v5, 0  ;;  %v12473_v58 = vmul.u32.u64.low %v2795_v30, %v2794_v60  ;;  %v12474_v63 = vmul.u32.u64.high %v2795_v30, %v2794_v60, %v12473_v58  ;;  %vm2947_vm2 = vcmp.eq.s32.totalorder %v12439_v59, 0 }
 0x4f8   :  { %v6250_v62 = vsel %vm7672_vm4, 0, %v7671_v5  ;;  %v7665_v23 = vadd.s32 4294967169, %v6079_v44  ;;  %v6235_v4 = vadd.s32 %v12378_v36, %v12384_v38  ;;  %v6075_v9 = vand.u32 2147483647, %v12416_v50 }
 0x4f9   :  { %v6251_v8 = vsub.s32 32, %v6250_v62  ;;  %v6255_v29 = vsub.s32 4294967266, %v6250_v62  ;;  %v6268_v49 = vsel %vm12453_vm0, 0, %v6266_v18  ;;  %v2802_v26 = vmul.u32 %v2795_v30, %v2786_v40 }
 0x4fa   :  { %v2805_v37 = vadd.s32 1, %v12469_v6  ;;  %v6085_v16 = vadd.s32 1, %v7665_v23  ;;  %v6252_v7 = vshll.u32 %v12441_v52, %v6250_v62  ;;  %vm2804_vm5 = vc.u32 %v12474_v63, %v12468_v3 }
 0x4fb   :  { %v8320_v54 = vpop.eup %8319  ;;  %v6253_v39 = vshrl.u32 %v6235_v4, %v6251_v8  ;;  %v6256_v31 = vadd.s32 127, %v6255_v29  ;;  %vm2950_vm3 = vcmp.eq.s32.totalorder %v12439_v59, 2  ;;  %v6272_v15 = vadd.s32 3, %v6268_v49 }
 0x4fc   :  { %v8322_v36 = vpop.eup %8321  ;;  %v2951_v38 = vxor.u32 2147483648, %v8320_v54  ;;  %v2806_v21 = vsel %vm2804_vm5, %v2805_v37, %v12469_v6  ;;  %vm6086_vm6 = vcmp.gt.s32.totalorder %v6085_v16, 0  ;;  %v6082_v52 = vand.u32 8388607, %v6075_v9 }
 0x4fd   :  { %v2948_v14 = vxor.u32 2147483648, %v8322_v36  ;;  %v6254_v30 = vor.u32 %v6253_v39, %v6252_v7  ;;  %v6257_v46 = vshll.u32 %v6256_v31, 23  ;;  %v2807_v10 = vadd.s32 %v2806_v21, %v2802_v26 }
 0x4fe   :  { %v2952_v1 = vsel %vm2950_vm3, %v2951_v38, %v8322_v36  ;;  %v6087_v24 = vsel %vm6086_vm6, %v6085_v16, 0  ;;  %v3062_v34 = vand.u32 2139095040, %v12421_v13  ;;  %vm2943_vm10 = vweird.f32 %v12180_v61 }
 0x4ff   :  { %v2949_v28 = vsel %vm2947_vm2, %v8320_v54, %v2948_v14  ;;  %v6258_v2 = vor.u32 4788187, %v6257_v46  ;;  %v2808_v22 = vadd.s32 536870912, %v2807_v10  ;;  %v6089_v33 = vand.u32 31, %v6087_v24 }
 0x500   :  { %v2953_v17 = vsel %vm2946_vm7, %v2949_v28, %v2952_v1  ;;  %v6261_v5 = vcvt.s32.f32 %v6254_v30  ;;  %v12503_v41 = vand.u32 3, %v6272_v15  ;;  %v6083_v48 = vor.u32 8388608, %v6082_v52 }
 0x501   :  { %v2954_v32 = vsel %vm2943_vm10, nan, %v2953_v17  ;;  %v6259_v11 = vand.u32 2147483647, %v6258_v2  ;;  %v12497_v18 = vshrl.u32 %v2808_v22, 30  ;;  %v6090_v60 = vsub.s32 32, %v6089_v33 }
 0x502   :  { %7345 = vst.msk [vmem:[%s14271_s3 + $0xa8] sm:$0xff] %vm7323_vm14, %v2954_v32  ;;  %v3059_v61 = vand.u32 2147483647, %v12421_v13  ;;  %v6092_v44 = vshll.u32 %v8425_v47, %v6089_v33  ;;  %v3063_v40 = vshrl.u32 %v3062_v34, 23  ;;  %v6095_v62 = vshll.u32 %v8426_v51, %v6089_v33 }
 0x503   :  { %v6262_v6 = vmul.f32 %v6261_v5, %v6259_v11  ;;  %v2810_v59 = vshll.u32 %v12497_v18, 30  ;;  %v6093_v58 = vshrl.u32 %v8426_v51, %v6090_v60  ;;  %v6096_v23 = vshrl.u32 %v8427_v53, %v6090_v60 }
 0x504   :  { %v6099_v4 = vshrl.u32 %v8428_v55, %v6090_v60  ;;  %v6098_v49 = vshll.u32 %v8427_v53, %v6089_v33  ;;  %v6102_v26 = vshrl.u32 %v8429_v57, %v6090_v60  ;;  %v6088_v37 = vshrl.u32 %v6087_v24, 5 }
 0x505   :  { %v6263_v8 = vxor.u32 2147483648, %v6262_v6  ;;  %v12512_v29 = vsub.s32 %v2807_v10, %v2810_v59  ;;  %v6094_v16 = vor.u32 %v6093_v58, %v6092_v44  ;;  %v6101_v54 = vshll.u32 %v8428_v55, %v6089_v33 }
 0x506   :  { %v12517_v7 = vshll.u32 %v6083_v48, 8  ;;  %v6097_v36 = vor.u32 %v6096_v23, %v6095_v62  ;;  %v6100_v38 = vor.u32 %v6099_v4, %v6098_v49  ;;  %vm2749_vm8 = vcmp.lt.s32.totalorder %v12250_v45, 0  ;;  %v12558_v49 = vpop.f32.mrb[25].mxu0 }
 0x507   :  { %v6264_v39 = vsel %vm6181_vm12, %v6263_v8, %v6262_v6  ;;  %v2813_v31 = vsub.s32 0, %v12512_v29  ;;  %v6103_v14 = vor.u32 %v6102_v26, %v6101_v54  ;;  %v6104_v30 = vshll.u32 %v8429_v57, %v6089_v33 }
 0x508   :  { %v6267_v21 = vsel %vm12453_vm0, %v12240_v56, %v6264_v39  ;;  %v6105_v46 = vshrl.u32 %v8430_v0, %v6090_v60  ;;  %v2803_v10 = vadd.s32 %v12468_v3, %v12474_v63  ;;  %v7549_v15 = vadd.s32 4294967169, %v3063_v40 }
 0x509   :  { %8323 = vcosq.f32 %v6267_v21  ;;  %v7538_v1 = vmin.u32 %v2813_v31, %v12512_v29  ;;  %v2833_v52 = vsub.s32 4, %v12497_v18  ;;  %v6091_v19 = vshrl.u32 %v8425_v47, %v6090_v60 }
 0x50a   :  { %8325 = vsinq.f32 %v6267_v21  ;;  %v6106_v24 = vor.u32 %v6105_v46, %v6104_v30  ;;  %vm12535_vm9 = vcmp.le.f32.partialorder %v2747_v42, 0.7853982  ;;  %vm6107_vm12 = vcmp.lt.s32.totalorder %v6088_v37, 1 }
 0x50b   :  { %v2815_v2 = vclz %v7538_v1  ;;  %vm6108_vm11 = vcmp.lt.s32.totalorder %v6088_v37, 2  ;;  %vm6110_vm0 = vcmp.lt.s32.totalorder %v6088_v37, 4  ;;  %vm6109_vm1 = vcmp.lt.s32.totalorder %v6088_v37, 3 }
 0x50c   :  { %v6112_v3 = vsel %vm6110_vm0, %v6100_v38, 2102212464  ;;  %v6115_v63 = vsel %vm6107_vm12, %v6094_v16, %v6097_v36  ;;  %v6116_v22 = vsel %vm6110_vm0, %v6103_v14, 920167782  ;;  %vm6278_vm13 = vcmp.eq.s32.totalorder %v12503_v41, 2 }
 0x50d   :  { %v7539_v34 = vadd.s32 4294967294, %v2815_v2  ;;  %v6111_v17 = vsel %vm6107_vm12, %v6091_v19, %v6094_v16  ;;  %v6117_v33 = vsel %vm6109_vm1, %v6100_v38, %v6116_v22  ;;  %v6119_v32 = vsel %vm6107_vm12, %v6097_v36, %v6100_v38 }
 0x50e   :  { %vm6275_vm15 = vcmp.eq.s32.totalorder %v12503_v41, 0  ;;  %v6113_v42 = vsel %vm6109_vm1, %v6097_v36, %v6112_v3  ;;  %v6118_v11 = vsel %vm6108_vm11, %v6115_v63, %v6117_v33  ;;  %v6120_v5 = vsel %vm6110_vm0, %v6106_v24, 1326507024 }
 0x50f   :  { %v3069_v48 = vadd.s32 1, %v7549_v15  ;;  %vm6274_vm4 = vcmp.lt.s32.totalorder %v12503_v41, 2  ;;  %vm7540_vm7 = vcmp.lt.s32.totalorder %v7539_v34, 0  ;;  %v6121_v60 = vsel %vm6109_vm1, %v6103_v14, %v6120_v5 }
 0x510   :  { %v12547_v6 = vmul.u32.u64.low %v12517_v7, %v6118_v11  ;;  %v12548_v59 = vmul.u32.u64.high %v12517_v7, %v6118_v11, %v12547_v6  ;;  %vm6271_vm2 = vweird.f32 %v12240_v56  ;;  %v2818_v44 = vsel %vm7540_vm7, 0, %v7539_v34 }
 0x511   :  { %v6122_v40 = vsel %vm6108_vm11, %v6119_v32, %v6121_v60  ;;  %v3066_v58 = vand.u32 8388607, %v3059_v61  ;;  %vm3070_vm5 = vcmp.gt.s32.totalorder %v3069_v48, 0  ;;  %v2819_v62 = vsub.s32 32, %v2818_v44 }
 0x512   :  { %v2823_v23 = vsub.s32 4294967266, %v2818_v44  ;;  %v2834_v4 = vsel %vm2749_vm8, %v2833_v52, %v12497_v18  ;;  %v3071_v8 = vsel %vm3070_vm5, %v3069_v48, 0  ;;  %v6114_v26 = vsel %vm6108_vm11, %v6111_v17, %v6113_v42 }
 0x513   :  { %v12562_v16 = vmul.u32.u64.low %v12517_v7, %v6122_v40  ;;  %v12563_v54 = vmul.u32.u64.high %v12517_v7, %v6122_v40, %v12562_v16  ;;  %v3073_v39 = vand.u32 31, %v3071_v8  ;;  %v8324_v31 = vpop.eup %8323  ;;  %v2820_v36 = vshll.u32 %v12512_v29, %v2818_v44 }
 0x514   :  { %v2821_v38 = vshrl.u32 %v2803_v10, %v2819_v62  ;;  %v2824_v21 = vadd.s32 127, %v2823_v23  ;;  %v6133_v14 = vadd.s32 1, %v12548_v59  ;;  %v8326_v30 = vpop.eup %8325  ;;  %v6279_v46 = vxor.u32 2147483648, %v8324_v31 }
 0x515   :  { %v2836_v18 = vsel %vm12535_vm9, 0, %v2834_v4  ;;  %v3067_v1 = vor.u32 8388608, %v3066_v58  ;;  %v3074_v37 = vsub.s32 32, %v3073_v39  ;;  %v6276_v15 = vxor.u32 2147483648, %v8326_v30 }
 0x516   :  { %v2822_v52 = vor.u32 %v2821_v38, %v2820_v36  ;;  %v2825_v19 = vshll.u32 %v2824_v21, 23  ;;  %v6130_v24 = vmul.u32 %v12517_v7, %v6114_v26  ;;  %v6280_v2 = vsel %vm6278_vm13, %v6279_v46, %v8326_v30 }
 0x517   :  { %vm6132_vm3 = vc.u32 %v12563_v54, %v12547_v6  ;;  %v12574_v29 = vshrl.u32 %v3071_v8, 5  ;;  %v3076_v10 = vshll.u32 %v8425_v47, %v3073_v39  ;;  %v6277_v3 = vsel %vm6275_vm15, %v8324_v31, %v6276_v15 }
 0x518   :  { %v2826_v63 = vor.u32 4788187, %v2825_v19  ;;  %v6134_v22 = vsel %vm6132_vm3, %v6133_v14, %v12548_v59  ;;  %v3079_v34 = vshll.u32 %v8426_v51, %v3073_v39  ;;  %v6281_v7 = vsel %vm6274_vm4, %v6277_v3, %v6280_v2 }
 0x519   :  { %v6135_v17 = vadd.s32 %v6134_v22, %v6130_v24  ;;  %v3077_v33 = vshrl.u32 %v8426_v51, %v3074_v37  ;;  %v3080_v32 = vshrl.u32 %v8427_v53, %v3074_v37  ;;  %v6282_v42 = vsel %vm6271_vm2, nan, %v6281_v7 }
 0x51a   :  { %v2827_v11 = vand.u32 2147483647, %v2826_v63  ;;  %v2829_v5 = vcvt.s32.f32 %v2822_v52  ;;  %v3083_v48 = vshrl.u32 %v8428_v55, %v3074_v37  ;;  %7377 = vst.msk [vmem:[%s14271_s3 + $0x1a8] sm:$0xff] %vm7323_vm14, %v6282_v42  ;;  %v3082_v41 = vshll.u32 %v8427_v53, %v3073_v39  ;;  %v12644_v42 = vpop.f32.mrb[25].mxu1 }
 0x51b   :  { %v6136_v60 = vadd.s32 536870912, %v6135_v17  ;;  %v3085_v59 = vshll.u32 %v8428_v55, %v3073_v39  ;;  %v3086_v44 = vshrl.u32 %v8429_v57, %v3074_v37  ;;  %v3078_v58 = vor.u32 %v3077_v33, %v3076_v10 }
 0x51c   :  { %v2830_v40 = vmul.f32 %v2829_v5, %v2827_v11  ;;  %v3081_v56 = vor.u32 %v3080_v32, %v3079_v34  ;;  %v3089_v62 = vshrl.u32 %v8430_v0, %v3074_v37  ;;  %v2840_v26 = vadd.s32 3, %v2836_v18 }
 0x51d   :  { %v6137_v23 = vshrl.u32 %v6136_v60, 30  ;;  %v3087_v4 = vor.u32 %v3086_v44, %v3085_v59  ;;  %v3084_v16 = vor.u32 %v3083_v48, %v3082_v41  ;;  %v3088_v31 = vshll.u32 %v8429_v57, %v3073_v39 }
 0x51e   :  { %v2831_v8 = vxor.u32 2147483648, %v2830_v40  ;;  %vm3091_vm6 = vcmp.lt.s32.totalorder %v12574_v29, 1  ;;  %vm3094_vm10 = vcmp.lt.s32.totalorder %v12574_v29, 4  ;;  %v12599_v38 = vshll.u32 %v3067_v1, 8 }
 0x51f   :  { %v6138_v36 = vshll.u32 %v6137_v23, 30  ;;  %v3090_v14 = vor.u32 %v3089_v62, %v3088_v31  ;;  %v3099_v30 = vsel %vm3091_vm6, %v3078_v58, %v3081_v56  ;;  %v3100_v46 = vsel %vm3094_vm10, %v3087_v4, 920167782 }
 0x520   :  { %v2832_v21 = vsel %vm2749_vm8, %v2831_v8, %v2830_v40  ;;  %v3075_v15 = vshrl.u32 %v8425_v47, %v3074_v37  ;;  %vm3093_vm12 = vcmp.lt.s32.totalorder %v12574_v29, 3  ;;  %vm3092_vm8 = vcmp.lt.s32.totalorder %v12574_v29, 2 }
 0x521   :  { %v2835_v39 = vsel %vm12535_vm9, %v12250_v45, %v2832_v21  ;;  %v12610_v18 = vsub.s32 %v6135_v17, %v6138_v36  ;;  %v3096_v1 = vsel %vm3094_vm10, %v3084_v16, 2102212464  ;;  %v3101_v52 = vsel %vm3093_vm12, %v3084_v16, %v3100_v46 }
 0x522   :  { %8327 = vcosq.f32 %v2835_v39  ;;  %v3102_v28 = vsel %vm3092_vm8, %v3099_v30, %v3101_v52  ;;  %v3103_v37 = vsel %vm3091_vm6, %v3081_v56, %v3084_v16  ;;  %v6161_v24 = vsub.s32 4, %v6137_v23 }
 0x523   :  { %8329 = vsinq.f32 %v2835_v39  ;;  %v6141_v19 = vsub.s32 0, %v12610_v18  ;;  %v3104_v2 = vsel %vm3094_vm10, %v3090_v14, 1326507024  ;;  %v2841_v63 = vand.u32 3, %v2840_v26 }
 0x524   :  { %v12627_v10 = vmul.u32.u64.low %v12599_v38, %v3102_v28  ;;  %v12628_v3 = vmul.u32.u64.high %v12599_v38, %v3102_v28, %v12627_v10  ;;  %v3105_v34 = vsel %vm3093_vm12, %v3087_v4, %v3104_v2  ;;  %v3095_v7 = vsel %vm3091_vm6, %v3075_v15, %v3078_v58 }
 0x525   :  { %v7666_v22 = vmin.u32 %v6141_v19, %v12610_v18  ;;  %v3097_v17 = vsel %vm3093_vm12, %v3081_v56, %v3096_v1  ;;  %v3106_v33 = vsel %vm3092_vm8, %v3103_v37, %v3105_v34  ;;  %v12642_v32 = vadd.f32 %v12412_v20, %v12182_v25 }
 0x526   :  { %vm6077_vm9 = vcmp.lt.s32.totalorder %v12416_v50, 0  ;;  %v12650_v48 = vmul.u32.u64.low %v12599_v38, %v3106_v33  ;;  %v12651_v60 = vmul.u32.u64.high %v12599_v38, %v3106_v33, %v12650_v48  ;;  %vm2839_vm11 = vweird.f32 %v12250_v45 }
 0x527   :  { %v6143_v11 = vclz %v7666_v22  ;;  %v6162_v5 = vsel %vm6077_vm9, %v6161_v24, %v6137_v23  ;;  %v3098_v59 = vsel %vm3092_vm8, %v3095_v7, %v3097_v17  ;;  %v6390_v25 = vand.u32 2139095040, %v12642_v32 }
 0x528   :  { %v12659_v44 = vadd.f32 %v12412_v20, %v12233_v43  ;;  %vm2843_vm0 = vcmp.eq.s32.totalorder %v2841_v63, 0  ;;  %vm2846_vm1 = vcmp.eq.s32.totalorder %v2841_v63, 2  ;;  %vm12663_vm13 = vcmp.le.f32.partialorder %v6075_v9, 0.7853982 }
 0x529   :  { %v7667_v41 = vadd.s32 4294967294, %v6143_v11  ;;  %v3117_v58 = vadd.s32 1, %v12628_v3  ;;  %v6131_v29 = vadd.s32 %v12547_v6, %v12563_v54  ;;  %v6164_v56 = vsel %vm12663_vm13, 0, %v6162_v5 }
 0x52a   :  { %v6391_v62 = vshrl.u32 %v6390_v25, 23  ;;  %v3114_v4 = vmul.u32 %v12599_v38, %v3098_v59  ;;  %vm3116_vm4 = vc.u32 %v12651_v60, %v12627_v10  ;;  %v6387_v9 = vand.u32 2147483647, %v12642_v32 }
 0x52b   :  { %vm7668_vm15 = vcmp.lt.s32.totalorder %v7667_v41, 0  ;;  %v2958_v6 = vand.u32 2139095040, %v12659_v44  ;;  %v3118_v21 = vsel %vm3116_vm4, %v3117_v58, %v12628_v3  ;;  %vm2842_vm7 = vcmp.lt.s32.totalorder %v2841_v63, 2 }
 0x52c   :  { %v8328_v43 = vpop.eup %8327  ;;  %v6146_v23 = vsel %vm7668_vm15, 0, %v7667_v41  ;;  %v7677_v14 = vadd.s32 4294967169, %v6391_v62  ;;  %v3119_v39 = vadd.s32 %v3118_v21, %v3114_v4  ;;  %v6168_v1 = vadd.s32 3, %v6164_v56 }
 0x52d   :  { %v8330_v8 = vpop.eup %8329  ;;  %v2847_v26 = vxor.u32 2147483648, %v8328_v43  ;;  %v6147_v16 = vsub.s32 32, %v6146_v23  ;;  %v6151_v31 = vsub.s32 4294967266, %v6146_v23  ;;  %v6148_v36 = vshll.u32 %v12610_v18, %v6146_v23 }
 0x52e   :  { %v2844_v54 = vxor.u32 2147483648, %v8330_v8  ;;  %v6397_v52 = vadd.s32 1, %v7677_v14  ;;  %v3120_v24 = vadd.s32 536870912, %v3119_v39  ;;  %v6394_v2 = vand.u32 8388607, %v6387_v9 }
 0x52f   :  { %v2848_v30 = vsel %vm2846_vm1, %v2847_v26, %v8330_v8  ;;  %v6149_v38 = vshrl.u32 %v6131_v29, %v6147_v16  ;;  %v6152_v46 = vadd.s32 127, %v6151_v31  ;;  %v2959_v34 = vshrl.u32 %v2958_v6, 23 }
 0x530   :  { %v2845_v15 = vsel %vm2843_vm0, %v8328_v43, %v2844_v54  ;;  %vm6398_vm2 = vcmp.gt.s32.totalorder %v6397_v52, 0  ;;  %v3121_v63 = vshrl.u32 %v3120_v24, 30  ;;  %v12689_v7 = vand.u32 3, %v6168_v1 }
 0x531   :  { %v2849_v19 = vsel %vm2842_vm7, %v2845_v15, %v2848_v30  ;;  %v6150_v28 = vor.u32 %v6149_v38, %v6148_v36  ;;  %v6153_v37 = vshll.u32 %v6152_v46, 23  ;;  %v6399_v22 = vsel %vm6398_vm2, %v6397_v52, 0 }
 0x532   :  { %v2850_v18 = vsel %vm2839_vm11, nan, %v2849_v19  ;;  %v6401_v17 = vand.u32 31, %v6399_v22  ;;  %vm3061_vm5 = vcmp.lt.s32.totalorder %v12421_v13, 0  ;;  %v3122_v45 = vshll.u32 %v3121_v63, 30 }
 0x533   :  { %7344 = vst.msk [vmem:[%s14271_s3 + $0xa0] sm:$0xff] %vm7323_vm14, %v2850_v18  ;;  %v6154_v3 = vor.u32 4788187, %v6153_v37  ;;  %v6157_v11 = vcvt.s32.f32 %v6150_v28  ;;  %v12694_v5 = vadd.f32 %v12412_v20, %v12298_v27  ;;  %v3115_v48 = vadd.s32 %v12627_v10, %v12651_v60 }
 0x534   :  { %v6395_v41 = vor.u32 8388608, %v6394_v2  ;;  %v6402_v59 = vsub.s32 32, %v6401_v17  ;;  %v2955_v25 = vand.u32 2147483647, %v12659_v44  ;;  %v12699_v29 = vsub.s32 %v3119_v39, %v3122_v45 }
 0x535   :  { %v6155_v33 = vand.u32 2147483647, %v6154_v3  ;;  %v12701_v56 = vshrl.u32 %v6399_v22, 5  ;;  %v7545_v62 = vadd.s32 4294967169, %v2959_v34  ;;  %v3145_v43 = vsub.s32 4, %v3121_v63 }
 0x536   :  { %v6404_v23 = vshll.u32 %v8425_v47, %v6401_v17  ;;  %v6405_v4 = vshrl.u32 %v8426_v51, %v6402_v59  ;;  %v6408_v27 = vshrl.u32 %v8427_v53, %v6402_v59  ;;  %v3125_v10 = vsub.s32 0, %v12699_v29 }
 0x537   :  { %v6158_v58 = vmul.f32 %v6157_v11, %v6155_v33  ;;  %v6407_v60 = vshll.u32 %v8426_v51, %v6401_v17  ;;  %v6411_v26 = vshrl.u32 %v8428_v55, %v6402_v59  ;;  %v6410_v31 = vshll.u32 %v8427_v53, %v6401_v17 }
 0x538   :  { %v6406_v16 = vor.u32 %v6405_v4, %v6404_v23  ;;  %v6413_v6 = vshll.u32 %v8428_v55, %v6401_v17  ;;  %v6414_v54 = vshrl.u32 %v8429_v57, %v6402_v59  ;;  %v7550_v21 = vmin.u32 %v3125_v10, %v12699_v29 }
 0x539   :  { %v6159_v8 = vxor.u32 2147483648, %v6158_v58  ;;  %v6409_v14 = vor.u32 %v6408_v27, %v6407_v60  ;;  %v6416_v30 = vshll.u32 %v8429_v57, %v6401_v17  ;;  %v6412_v46 = vor.u32 %v6411_v26, %v6410_v31  ;;  %v12757_v26 = vpop.f32.mrb[26].mxu0 }
 0x53a   :  { %v6415_v39 = vor.u32 %v6414_v54, %v6413_v6  ;;  %v6417_v15 = vshrl.u32 %v8430_v0, %v6402_v59  ;;  %v3127_v1 = vclz %v7550_v21  ;;  %v12720_v52 = vshll.u32 %v6395_v41, 8 }
 0x53b   :  { %v6160_v36 = vsel %vm6077_vm9, %v6159_v8, %v6158_v58  ;;  %v2965_v19 = vadd.s32 1, %v7545_v62  ;;  %vm12724_vm3 = vcmp.le.f32.partialorder %v3059_v61, 0.7853982  ;;  %v3146_v40 = vsel %vm3061_vm5, %v3145_v43, %v3121_v63 }
 0x53c   :  { %v6163_v38 = vsel %vm12663_vm13, %v12416_v50, %v6160_v36  ;;  %v6403_v37 = vshrl.u32 %v8425_v47, %v6402_v59  ;;  %v6418_v24 = vor.u32 %v6417_v15, %v6416_v30  ;;  %v7551_v18 = vadd.s32 4294967294, %v3127_v1 }
 0x53d   :  { %8331 = vcosq.f32 %v6163_v38  ;;  %vm6419_vm6 = vcmp.lt.s32.totalorder %v12701_v56, 1  ;;  %vm6421_vm10 = vcmp.lt.s32.totalorder %v12701_v56, 3  ;;  %vm6422_vm12 = vcmp.lt.s32.totalorder %v12701_v56, 4 }
 0x53e   :  { %8333 = vsinq.f32 %v6163_v38  ;;  %v6424_v2 = vsel %vm6422_vm12, %v6412_v46, 2102212464  ;;  %v6427_v3 = vsel %vm6419_vm6, %v6406_v16, %v6409_v14  ;;  %v6428_v22 = vsel %vm6422_vm12, %v6415_v39, 920167782 }
 0x53f   :  { %v6431_v61 = vsel %vm6419_vm6, %v6409_v14, %v6412_v46  ;;  %vm7552_vm8 = vcmp.lt.s32.totalorder %v7551_v18, 0  ;;  %vm6420_vm9 = vcmp.lt.s32.totalorder %v12701_v56, 2  ;;  %v6429_v63 = vsel %vm6421_vm10, %v6412_v46, %v6428_v22 }
 0x540   :  { %v6432_v34 = vsel %vm6422_vm12, %v6418_v24, 1326507024  ;;  %v3130_v17 = vsel %vm7552_vm8, 0, %v7551_v18  ;;  %v6423_v33 = vsel %vm6419_vm6, %v6403_v37, %v6406_v16  ;;  %v6430_v11 = vsel %vm6420_vm9, %v6427_v3, %v6429_v63 }
 0x541   :  { %v6433_v45 = vsel %vm6421_vm10, %v6415_v39, %v6432_v34  ;;  %vm6170_vm11 = vcmp.lt.s32.totalorder %v12689_v7, 2  ;;  %v3131_v41 = vsub.s32 32, %v3130_v17  ;;  %v3135_v59 = vsub.s32 4294967266, %v3130_v17 }
 0x542   :  { %v6425_v58 = vsel %vm6421_vm10, %v6409_v14, %v6424_v2  ;;  %v6434_v62 = vsel %vm6420_vm9, %v6431_v61, %v6433_v45  ;;  %vm6167_vm0 = vweird.f32 %v12416_v50  ;;  %v3132_v8 = vshll.u32 %v12699_v29, %v3130_v17 }
 0x543   :  { %v12748_v43 = vmul.u32.u64.low %v12720_v52, %v6434_v62  ;;  %v12749_v23 = vmul.u32.u64.high %v12720_v52, %v6434_v62, %v12748_v43  ;;  %v12752_v4 = vmul.u32.u64.low %v12720_v52, %v6430_v11  ;;  %v12753_v27 = vmul.u32.u64.high %v12720_v52, %v6430_v11, %v12752_v4 }
 0x544   :  { %v3133_v10 = vshrl.u32 %v3115_v48, %v3131_v41  ;;  %v3136_v60 = vadd.s32 127, %v3135_v59  ;;  %vm2966_vm1 = vcmp.gt.s32.totalorder %v2965_v19, 0  ;;  %vm6171_vm13 = vcmp.eq.s32.totalorder %v12689_v7, 0 }
 0x545   :  { %v6426_v16 = vsel %vm6420_vm9, %v6423_v33, %v6425_v58  ;;  %v2962_v31 = vand.u32 8388607, %v2955_v25  ;;  %v2967_v6 = vsel %vm2966_vm1, %v2965_v19, 0  ;;  %v3148_v29 = vsel %vm12724_vm3, 0, %v3146_v40 }
 0x546   :  { %v3134_v36 = vor.u32 %v3133_v10, %v3132_v8  ;;  %v3137_v21 = vshll.u32 %v3136_v60, 23  ;;  %v2969_v48 = vand.u32 31, %v2967_v6  ;;  %vm6174_vm15 = vcmp.eq.s32.totalorder %v12689_v7, 2 }
 0x547   :  { %v8332_v54 = vpop.eup %8331  ;;  %vm6444_vm4 = vc.u32 %v12749_v23, %v12752_v4  ;;  %v6445_v56 = vadd.s32 1, %v12753_v27  ;;  %v6442_v39 = vmul.u32 %v12720_v52, %v6426_v16  ;;  %v3152_v19 = vadd.s32 3, %v3148_v29 }
 0x548   :  { %v8334_v14 = vpop.eup %8333  ;;  %v6175_v30 = vxor.u32 2147483648, %v8332_v54  ;;  %v3138_v46 = vor.u32 4788187, %v3137_v21  ;;  %v2970_v15 = vsub.s32 32, %v2969_v48  ;;  %v2963_v40 = vor.u32 8388608, %v2962_v31 }
 0x549   :  { %v6172_v38 = vxor.u32 2147483648, %v8334_v14  ;;  %v6446_v37 = vsel %vm6444_vm4, %v6445_v56, %v12753_v27  ;;  %v3141_v2 = vcvt.s32.f32 %v3134_v36  ;;  %v2972_v61 = vshll.u32 %v8425_v47, %v2969_v48 }
 0x54a   :  { %v6176_v1 = vsel %vm6174_vm15, %v6175_v30, %v8334_v14  ;;  %v3139_v18 = vand.u32 2147483647, %v3138_v46  ;;  %v6447_v3 = vadd.s32 %v6446_v37, %v6442_v39  ;;  %v2973_v63 = vshrl.u32 %v8426_v51, %v2970_v15 }
 0x54b   :  { %v6173_v24 = vsel %vm6171_vm13, %v8332_v54, %v6172_v38  ;;  %v2976_v52 = vshrl.u32 %v8427_v53, %v2970_v15  ;;  %v2979_v11 = vshrl.u32 %v8428_v55, %v2970_v15  ;;  %v2968_v7 = vshrl.u32 %v2967_v6, 5 }
 0x54c   :  { %v6177_v22 = vsel %vm6170_vm11, %v6173_v24, %v6176_v1  ;;  %v3142_v17 = vmul.f32 %v3141_v2, %v3139_v18  ;;  %v6448_v33 = vadd.s32 536870912, %v6447_v3  ;;  %v2975_v45 = vshll.u32 %v8426_v51, %v2969_v48 }
 0x54d   :  { %v6178_v34 = vsel %vm6167_vm0, nan, %v6177_v22  ;;  %v2978_v41 = vshll.u32 %v8427_v53, %v2969_v48  ;;  %v2982_v59 = vshrl.u32 %v8429_v57, %v2970_v15  ;;  %v2974_v50 = vor.u32 %v2973_v63, %v2972_v61 }
 0x54e   :  { %7376 = vst.msk [vmem:[%s14271_s3 + $0x1a0] sm:$0xff] %vm7323_vm14, %v6178_v34  ;;  %v3143_v58 = vxor.u32 2147483648, %v3142_v17  ;;  %v6449_v62 = vshrl.u32 %v6448_v33, 30  ;;  %v2981_v43 = vshll.u32 %v8428_v55, %v2969_v48  ;;  %vm6389_vm7 = vcmp.lt.s32.totalorder %v12642_v32, 0 }
 0x54f   :  { %v2977_v27 = vor.u32 %v2976_v52, %v2975_v45  ;;  %v2980_v8 = vor.u32 %v2979_v11, %v2978_v41  ;;  %v2984_v10 = vshll.u32 %v8429_v57, %v2969_v48  ;;  %v2985_v60 = vshrl.u32 %v8430_v0, %v2970_v15 }
 0x550   :  { %v3144_v16 = vsel %vm3061_vm5, %v3143_v58, %v3142_v17  ;;  %v12795_v31 = vand.u32 3, %v3152_v19  ;;  %v6450_v6 = vshll.u32 %v6449_v62, 30  ;;  %v2983_v54 = vor.u32 %v2982_v59, %v2981_v43 }
 0x551   :  { %v3147_v36 = vsel %vm12724_vm3, %v12421_v13, %v3144_v16  ;;  %v2971_v21 = vshrl.u32 %v8425_v47, %v2970_v15  ;;  %v2986_v29 = vor.u32 %v2985_v60, %v2984_v10  ;;  %v12801_v14 = vshll.u32 %v2963_v40, 8 }
 0x552   :  { %8335 = vcosq.f32 %v3147_v36  ;;  %v12803_v48 = vsub.s32 %v6447_v3, %v6450_v6  ;;  %vm2987_vm2 = vcmp.lt.s32.totalorder %v2968_v7, 1  ;;  %vm2990_vm6 = vcmp.lt.s32.totalorder %v2968_v7, 4 }
 0x553   :  { %8337 = vsinq.f32 %v3147_v36  ;;  %vm2988_vm5 = vcmp.lt.s32.totalorder %v2968_v7, 2  ;;  %v2992_v30 = vsel %vm2990_vm6, %v2980_v8, 2102212464  ;;  %v2995_v56 = vsel %vm2987_vm2, %v2974_v50, %v2977_v27 }
 0x554   :  { %v6453_v38 = vsub.s32 0, %v12803_v48  ;;  %v6473_v46 = vsub.s32 4, %v6449_v62  ;;  %vm2989_vm10 = vcmp.lt.s32.totalorder %v2968_v7, 3  ;;  %v2996_v28 = vsel %vm2990_vm6, %v2983_v54, 920167782  ;;  %v12833_v7 = vpop.f32.mrb[26].mxu1 }
 0x555   :  { %v2991_v39 = vsel %vm2987_vm2, %v2971_v21, %v2974_v50  ;;  %v2997_v1 = vsel %vm2989_vm10, %v2980_v8, %v2996_v28  ;;  %v2999_v15 = vsel %vm2987_vm2, %v2977_v27, %v2980_v8  ;;  %v3000_v19 = vsel %vm2990_vm6, %v2986_v29, 1326507024 }
 0x556   :  { %v7678_v37 = vmin.u32 %v6453_v38, %v12803_v48  ;;  %v2993_v40 = vsel %vm2989_vm10, %v2977_v27, %v2992_v30  ;;  %v2998_v24 = vsel %vm2988_vm5, %v2995_v56, %v2997_v1  ;;  %v3001_v18 = vsel %vm2989_vm10, %v2983_v54, %v3000_v19 }
 0x557   :  { %v3002_v2 = vsel %vm2988_vm5, %v2999_v15, %v3001_v18  ;;  %v12810_v3 = vmul.u32.u64.low %v12801_v14, %v2998_v24  ;;  %v12811_v22 = vmul.u32.u64.high %v12801_v14, %v2998_v24, %v12810_v3  ;;  %v6286_v61 = vand.u32 2139095040, %v12694_v5 }
 0x558   :  { %v6455_v63 = vclz %v7678_v37  ;;  %v6474_v52 = vsel %vm6389_vm7, %v6473_v46, %v6449_v62  ;;  %v6283_v34 = vand.u32 2147483647, %v12694_v5  ;;  %v2994_v17 = vsel %vm2988_vm5, %v2991_v39, %v2993_v40 }
 0x559   :  { %v12819_v33 = vmul.u32.u64.low %v12801_v14, %v3002_v2  ;;  %v12820_v11 = vmul.u32.u64.high %v12801_v14, %v3002_v2, %v12819_v33  ;;  %v6287_v45 = vshrl.u32 %v6286_v61, 23  ;;  %vm3154_vm3 = vcmp.lt.s32.totalorder %v12795_v31, 2 }
 0x55a   :  { %vm12825_vm12 = vcmp.le.f32.partialorder %v6387_v9, 0.7853982  ;;  %v7679_v59 = vadd.s32 4294967294, %v6455_v63  ;;  %v12831_v58 = vadd.f32 %v12412_v20, %v12404_v35  ;;  %vm3155_vm8 = vcmp.eq.s32.totalorder %v12795_v31, 0 }
 0x55b   :  { %vm3158_vm9 = vcmp.eq.s32.totalorder %v12795_v31, 2  ;;  %v3013_v62 = vadd.s32 1, %v12811_v22  ;;  %v7673_v50 = vadd.s32 4294967169, %v6287_v45  ;;  %v6443_v9 = vadd.s32 %v12752_v4, %v12749_v23 }
 0x55c   :  { %v8336_v43 = vpop.eup %8335  ;;  %vm7680_vm11 = vcmp.lt.s32.totalorder %v7679_v59, 0  ;;  %v6476_v27 = vsel %vm12825_vm12, 0, %v6474_v52  ;;  %v3010_v35 = vmul.u32 %v12801_v14, %v2994_v17  ;;  %vm3012_vm0 = vc.u32 %v12820_v11, %v12810_v3 }
 0x55d   :  { %v8338_v20 = vpop.eup %8337  ;;  %v3159_v8 = vxor.u32 2147483648, %v8336_v43  ;;  %v6458_v10 = vsel %vm7680_vm11, 0, %v7679_v59  ;;  %v6290_v60 = vand.u32 8388607, %v6283_v34  ;;  %v3270_v36 = vand.u32 2139095040, %v12831_v58 }
 0x55e   :  { %v3156_v16 = vxor.u32 2147483648, %v8338_v20  ;;  %v6459_v6 = vsub.s32 32, %v6458_v10  ;;  %v6463_v54 = vsub.s32 4294967266, %v6458_v10  ;;  %v6460_v4 = vshll.u32 %v12803_v48, %v6458_v10 }
 0x55f   :  { %v3160_v23 = vsel %vm3158_vm9, %v3159_v8, %v8338_v20  ;;  %v3014_v21 = vsel %vm3012_vm0, %v3013_v62, %v12811_v22  ;;  %v6293_v29 = vadd.s32 1, %v7673_v50  ;;  %vm3151_vm1 = vweird.f32 %v12421_v13 }
 0x560   :  { %v3157_v14 = vsel %vm3155_vm8, %v8336_v43, %v3156_v16  ;;  %v6461_v30 = vshrl.u32 %v6443_v9, %v6459_v6  ;;  %v6464_v56 = vadd.s32 127, %v6463_v54  ;;  %v3015_v38 = vadd.s32 %v3014_v21, %v3010_v35 }
 0x561   :  { %v3161_v46 = vsel %vm3154_vm3, %v3157_v14, %v3160_v23  ;;  %v6480_v28 = vadd.s32 3, %v6476_v27  ;;  %vm6294_vm13 = vcmp.gt.s32.totalorder %v6293_v29, 0  ;;  %v6291_v19 = vor.u32 8388608, %v6290_v60 }
 0x562   :  { %v3162_v39 = vsel %vm3151_vm1, nan, %v3161_v46  ;;  %v6462_v1 = vor.u32 %v6461_v30, %v6460_v4  ;;  %v6465_v15 = vshll.u32 %v6464_v56, 23  ;;  %v3016_v48 = vadd.s32 536870912, %v3015_v38 }
 0x563   :  { %7347 = vst.msk [vmem:[%s14271_s3 + $0xb8] sm:$0xff] %vm7323_vm14, %v3162_v39  ;;  %v6295_v37 = vsel %vm6294_vm13, %v6293_v29, 0  ;;  %v3271_v18 = vshrl.u32 %v3270_v36, 23  ;;  %v12860_v22 = vand.u32 3, %v6480_v28  ;;  %vm2957_vm15 = vcmp.lt.s32.totalorder %v12659_v44, 0 }
 0x564   :  { %v6466_v40 = vor.u32 4788187, %v6465_v15  ;;  %v3017_v24 = vshrl.u32 %v3016_v48, 30  ;;  %v6297_v13 = vand.u32 31, %v6295_v37  ;;  %v6469_v31 = vcvt.s32.f32 %v6462_v1 }
 0x565   :  { %v12864_v63 = vadd.s32 %v12810_v3, %v12820_v11  ;;  %v12866_v17 = vshll.u32 %v6291_v19, 8  ;;  %v3267_v33 = vand.u32 2147483647, %v12831_v58  ;;  %v12871_v62 = vshrl.u32 %v6295_v37, 5 }
 0x566   :  { %v6467_v2 = vand.u32 2147483647, %v6466_v40  ;;  %v3018_v61 = vshll.u32 %v3017_v24, 30  ;;  %v6298_v52 = vsub.s32 32, %v6297_v13  ;;  %v7557_v50 = vadd.s32 4294967169, %v3271_v18 }
 0x567   :  { %v3041_v43 = vsub.s32 4, %v3017_v24  ;;  %v6300_v9 = vshll.u32 %v8425_v47, %v6297_v13  ;;  %vm12878_vm4 = vcmp.le.f32.partialorder %v2955_v25, 0.7853982  ;;  %v6303_v8 = vshll.u32 %v8426_v51, %v6297_v13 }
 0x568   :  { %v6470_v45 = vmul.f32 %v6469_v31, %v6467_v2  ;;  %v12869_v59 = vsub.s32 %v3015_v38, %v3018_v61  ;;  %v6301_v27 = vshrl.u32 %v8426_v51, %v6298_v52  ;;  %v6304_v35 = vshrl.u32 %v8427_v53, %v6298_v52  ;;  %v12918_v61 = vpop.f32.mrb[27].mxu0 }
 0x569   :  { %v6307_v10 = vshrl.u32 %v8428_v55, %v6298_v52  ;;  %v6306_v16 = vshll.u32 %v8427_v53, %v6297_v13  ;;  %v6309_v6 = vshll.u32 %v8428_v55, %v6297_v13  ;;  %v6310_v54 = vshrl.u32 %v8429_v57, %v6298_v52 }
 0x56a   :  { %v6471_v3 = vxor.u32 2147483648, %v6470_v45  ;;  %v3021_v20 = vsub.s32 0, %v12869_v59  ;;  %v6302_v60 = vor.u32 %v6301_v27, %v6300_v9  ;;  %v6305_v23 = vor.u32 %v6304_v35, %v6303_v8 }
 0x56b   :  { %v6312_v4 = vshll.u32 %v8429_v57, %v6297_v13  ;;  %v6308_v29 = vor.u32 %v6307_v10, %v6306_v16  ;;  %v6311_v14 = vor.u32 %v6310_v54, %v6309_v6  ;;  %v6313_v30 = vshrl.u32 %v8430_v0, %v6298_v52 }
 0x56c   :  { %v6472_v36 = vsel %vm6389_vm7, %v6471_v3, %v6470_v45  ;;  %v7546_v25 = vmin.u32 %v3021_v20, %v12869_v59  ;;  %vm6315_vm2 = vcmp.lt.s32.totalorder %v12871_v62, 1  ;;  %v3277_v38 = vadd.s32 1, %v7557_v50 }
 0x56d   :  { %v6475_v21 = vsel %vm12825_vm12, %v12642_v32, %v6472_v36  ;;  %v3042_v46 = vsel %vm2957_vm15, %v3041_v43, %v3017_v24  ;;  %v6299_v28 = vshrl.u32 %v8425_v47, %v6298_v52  ;;  %v6314_v39 = vor.u32 %v6313_v30, %v6312_v4 }
 0x56e   :  { %8339 = vcosq.f32 %v6475_v21  ;;  %v3023_v56 = vclz %v7546_v25  ;;  %vm6317_vm7 = vcmp.lt.s32.totalorder %v12871_v62, 3  ;;  %vm6318_vm6 = vcmp.lt.s32.totalorder %v12871_v62, 4 }
 0x56f   :  { %8341 = vsinq.f32 %v6475_v21  ;;  %v6323_v41 = vsel %vm6315_vm2, %v6302_v60, %v6305_v23  ;;  %v6320_v15 = vsel %vm6318_vm6, %v6308_v29, 2102212464  ;;  %v6324_v48 = vsel %vm6318_vm6, %v6311_v14, 920167782 }
 0x570   :  { %v7547_v1 = vadd.s32 4294967294, %v3023_v56  ;;  %v6327_v19 = vsel %vm6315_vm2, %v6305_v23, %v6308_v29  ;;  %v6328_v37 = vsel %vm6318_vm6, %v6314_v39, 1326507024  ;;  %vm6316_vm10 = vcmp.lt.s32.totalorder %v12871_v62, 2  ;;  %v12948_v62 = vld [vmem:[%s14270_s2] ss:$0 sm:$0xff] }
 0x571   :  { %v6325_v40 = vsel %vm6317_vm7, %v6308_v29, %v6324_v48  ;;  %v6329_v24 = vsel %vm6317_vm7, %v6311_v14, %v6328_v37  ;;  %vm6483_vm3 = vcmp.eq.s32.totalorder %v12860_v22, 0  ;;  %v3044_v13 = vsel %vm12878_vm4, 0, %v3042_v46 }
 0x572   :  { %vm7548_vm5 = vcmp.lt.s32.totalorder %v7547_v1, 0  ;;  %v6326_v2 = vsel %vm6316_vm10, %v6323_v41, %v6325_v40  ;;  %v6330_v31 = vsel %vm6316_vm10, %v6327_v19, %v6329_v24  ;;  %vm6482_vm12 = vcmp.lt.s32.totalorder %v12860_v22, 2 }
 0x573   :  { %v3026_v18 = vsel %vm7548_vm5, 0, %v7547_v1  ;;  %v6319_v50 = vsel %vm6315_vm2, %v6299_v28, %v6302_v60  ;;  %v6321_v43 = vsel %vm6317_vm7, %v6305_v23, %v6320_v15  ;;  %vm6479_vm8 = vweird.f32 %v12642_v32 }
 0x574   :  { %v3027_v52 = vsub.s32 32, %v3026_v18  ;;  %v3031_v45 = vsub.s32 4294967266, %v3026_v18  ;;  %v12927_v9 = vmul.u32.u64.low %v12866_v17, %v6330_v31  ;;  %v12928_v27 = vmul.u32.u64.high %v12866_v17, %v6330_v31, %v12927_v9 }
 0x575   :  { %v12931_v35 = vmul.u32.u64.low %v12866_v17, %v6326_v2  ;;  %v12932_v3 = vmul.u32.u64.high %v12866_v17, %v6326_v2, %v12931_v35  ;;  %v3028_v20 = vshll.u32 %v12869_v59, %v3026_v18  ;;  %vm3278_vm9 = vcmp.gt.s32.totalorder %v3277_v38, 0 }
 0x576   :  { %v3029_v8 = vshrl.u32 %v12864_v63, %v3027_v52  ;;  %v3032_v10 = vadd.s32 127, %v3031_v45  ;;  %v3048_v60 = vadd.s32 3, %v3044_v13  ;;  %v6322_v16 = vsel %vm6316_vm10, %v6319_v50, %v6321_v43 }
 0x577   :  { %v3274_v6 = vand.u32 8388607, %v3267_v33  ;;  %v3279_v54 = vsel %vm3278_vm9, %v3277_v38, 0  ;;  %vm6486_vm11 = vcmp.eq.s32.totalorder %v12860_v22, 2  ;;  %vm6340_vm0 = vc.u32 %v12928_v27, %v12931_v35 }
 0x578   :  { %v8340_v36 = vpop.eup %8339  ;;  %v3030_v25 = vor.u32 %v3029_v8, %v3028_v20  ;;  %v3033_v23 = vshll.u32 %v3032_v10, 23  ;;  %v3281_v4 = vand.u32 31, %v3279_v54  ;;  %v6341_v63 = vadd.s32 1, %v12932_v3 }
 0x579   :  { %v8342_v21 = vpop.eup %8341  ;;  %v6487_v59 = vxor.u32 2147483648, %v8340_v36  ;;  %v12952_v29 = vadd.f32 %v12948_v62, %v12462_v12  ;;  %v6338_v56 = vmul.u32 %v12866_v17, %v6322_v16  ;;  %v12955_v28 = vand.u32 3, %v3048_v60 }
 0x57a   :  { %v6484_v14 = vxor.u32 2147483648, %v8342_v21  ;;  %v3034_v30 = vor.u32 4788187, %v3033_v23  ;;  %v3282_v38 = vsub.s32 32, %v3281_v4  ;;  %v6342_v39 = vsel %vm6340_vm0, %v6341_v63, %v12932_v3 }
 0x57b   :  { %v6488_v46 = vsel %vm6486_vm11, %v6487_v59, %v8342_v21  ;;  %v3275_v1 = vor.u32 8388608, %v3274_v6  ;;  %v3037_v48 = vcvt.s32.f32 %v3030_v25  ;;  %v6343_v19 = vadd.s32 %v6342_v39, %v6338_v56 }
 0x57c   :  { %v6485_v41 = vsel %vm6483_vm3, %v8340_v36, %v6484_v14  ;;  %v3035_v15 = vand.u32 2147483647, %v3034_v30  ;;  %v3284_v37 = vshll.u32 %v8425_v47, %v3281_v4  ;;  %v3285_v17 = vshrl.u32 %v8426_v51, %v3282_v38 }
 0x57d   :  { %v6489_v12 = vsel %vm6482_vm12, %v6485_v41, %v6488_v46  ;;  %v3288_v40 = vshrl.u32 %v8427_v53, %v3282_v38  ;;  %v6344_v13 = vadd.s32 536870912, %v6343_v19  ;;  %v3291_v2 = vshrl.u32 %v8428_v55, %v3282_v38 }
 0x57e   :  { %v6490_v24 = vsel %vm6479_vm8, nan, %v6489_v12  ;;  %v3038_v18 = vmul.f32 %v3037_v48, %v3035_v15  ;;  %v3280_v22 = vshrl.u32 %v3279_v54, 5  ;;  %v3287_v31 = vshll.u32 %v8426_v51, %v3281_v4 }
 0x57f   :  { %7379 = vst.msk [vmem:[%s14271_s3 + $0x1b8] sm:$0xff] %vm7323_vm14, %v6490_v24  ;;  %v3290_v52 = vshll.u32 %v8427_v53, %v3281_v4  ;;  %v3294_v45 = vshrl.u32 %v8429_v57, %v3282_v38  ;;  %v6345_v43 = vshrl.u32 %v6344_v13, 30  ;;  %v3286_v32 = vor.u32 %v3285_v17, %v3284_v37 }
 0x580   :  { %v3039_v50 = vxor.u32 2147483648, %v3038_v18  ;;  %v3293_v9 = vshll.u32 %v8428_v55, %v3281_v4  ;;  %v3289_v3 = vor.u32 %v3288_v40, %v3287_v31  ;;  %v3296_v8 = vshll.u32 %v8429_v57, %v3281_v4  ;;  %v12997_v40 = vpop.f32.mrb[27].mxu1 }
 0x581   :  { %v3292_v20 = vor.u32 %v3291_v2, %v3290_v52  ;;  %v3297_v10 = vshrl.u32 %v8430_v0, %v3282_v38  ;;  %v6346_v16 = vshll.u32 %v6345_v43, 30  ;;  %v12980_v54 = vshll.u32 %v3275_v1, 8 }
 0x582   :  { %v3040_v60 = vsel %vm2957_vm15, %v3039_v50, %v3038_v18  ;;  %v3295_v6 = vor.u32 %v3294_v45, %v3293_v9  ;;  %v3283_v25 = vshrl.u32 %v8425_v47, %v3282_v38  ;;  %v6598_v21 = vand.u32 2139095040, %v12952_v29 }
 0x583   :  { %v3043_v36 = vsel %vm12878_vm4, %v12659_v44, %v3040_v60  ;;  %v3298_v23 = vor.u32 %v3297_v10, %v3296_v8  ;;  %v12987_v4 = vsub.s32 %v6343_v19, %v6346_v16  ;;  %vm3299_vm1 = vcmp.lt.s32.totalorder %v3280_v22, 1 }
 0x584   :  { %8343 = vcosq.f32 %v3043_v36  ;;  %vm3302_vm13 = vcmp.lt.s32.totalorder %v3280_v22, 4  ;;  %vm3300_vm15 = vcmp.lt.s32.totalorder %v3280_v22, 2  ;;  %v3307_v63 = vsel %vm3299_vm1, %v3286_v32, %v3289_v3 }
 0x585   :  { %8345 = vsinq.f32 %v3043_v36  ;;  %v3304_v59 = vsel %vm3302_vm13, %v3292_v20, 2102212464  ;;  %v6349_v14 = vsub.s32 0, %v12987_v4  ;;  %v6369_v30 = vsub.s32 4, %v6345_v43 }
 0x586   :  { %vm3301_vm2 = vcmp.lt.s32.totalorder %v3280_v22, 3  ;;  %v3308_v11 = vsel %vm3302_vm13, %v3295_v6, 920167782  ;;  %v3303_v56 = vsel %vm3299_vm1, %v3283_v25, %v3286_v32  ;;  %v3311_v38 = vsel %vm3299_vm1, %v3289_v3, %v3292_v20 }
 0x587   :  { %v3309_v46 = vsel %vm3301_vm2, %v3292_v20, %v3308_v11  ;;  %v3312_v39 = vsel %vm3302_vm13, %v3298_v23, 1326507024  ;;  %v7674_v1 = vmin.u32 %v6349_v14, %v12987_v4  ;;  %v3305_v41 = vsel %vm3301_vm2, %v3289_v3, %v3304_v59 }
 0x588   :  { %v3310_v15 = vsel %vm3300_vm15, %v3307_v63, %v3309_v46  ;;  %v3313_v48 = vsel %vm3301_vm2, %v3295_v6, %v3312_v39  ;;  %v6599_v17 = vshrl.u32 %v6598_v21, 23  ;;  %vm13001_vm4 = vcmp.le.f32.partialorder %v6283_v34, 0.7853982 }
 0x589   :  { %v3314_v19 = vsel %vm3300_vm15, %v3311_v38, %v3313_v48  ;;  %v12994_v12 = vmul.u32.u64.low %v12980_v54, %v3310_v15  ;;  %v12995_v37 = vmul.u32.u64.high %v12980_v54, %v3310_v15, %v12994_v12  ;;  %vm6285_vm7 = vcmp.lt.s32.totalorder %v12694_v5, 0 }
 0x58a   :  { %v6351_v18 = vclz %v7674_v1  ;;  %vm3047_vm6 = vweird.f32 %v12659_v44  ;;  %v6370_v13 = vsel %vm6285_vm7, %v6369_v30, %v6345_v43  ;;  %v7685_v52 = vadd.s32 4294967169, %v6599_v17 }
 0x58b   :  { %v13010_v2 = vmul.u32.u64.low %v12980_v54, %v3314_v19  ;;  %v13011_v31 = vmul.u32.u64.high %v12980_v54, %v3314_v19, %v13010_v2  ;;  %v3306_v50 = vsel %vm3300_vm15, %v3303_v56, %v3305_v41  ;;  %v6595_v34 = vand.u32 2147483647, %v12952_v29 }
 0x58c   :  { %v7675_v45 = vadd.s32 4294967294, %v6351_v18  ;;  %v13017_v32 = vadd.f32 %v12948_v62, %v12558_v49  ;;  %vm3050_vm5 = vcmp.lt.s32.totalorder %v12955_v28, 2  ;;  %vm3051_vm10 = vcmp.eq.s32.totalorder %v12955_v28, 0 }
 0x58d   :  { %v3325_v43 = vadd.s32 1, %v12995_v37  ;;  %v6605_v9 = vadd.s32 1, %v7685_v52  ;;  %vm3054_vm3 = vcmp.eq.s32.totalorder %v12955_v28, 2  ;;  %v6339_v22 = vadd.s32 %v12931_v35, %v12928_v27 }
 0x58e   :  { %v8344_v3 = vpop.eup %8343  ;;  %vm7676_vm12 = vcmp.lt.s32.totalorder %v7675_v45, 0  ;;  %v6372_v20 = vsel %vm13001_vm4, 0, %v6370_v13  ;;  %v3322_v60 = vmul.u32 %v12980_v54, %v3306_v50  ;;  %vm3324_vm8 = vc.u32 %v13011_v31, %v12994_v12 }
 0x58f   :  { %v8346_v8 = vpop.eup %8345  ;;  %v3055_v49 = vxor.u32 2147483648, %v8344_v3  ;;  %v6354_v10 = vsel %vm7676_vm12, 0, %v7675_v45  ;;  %v6602_v25 = vand.u32 8388607, %v6595_v34  ;;  %v3326_v35 = vsel %vm3324_vm8, %v3325_v43, %v12995_v37 }
 0x590   :  { %v3052_v16 = vxor.u32 2147483648, %v8346_v8  ;;  %v6355_v6 = vsub.s32 32, %v6354_v10  ;;  %v6359_v36 = vsub.s32 4294967266, %v6354_v10  ;;  %v6356_v27 = vshll.u32 %v12987_v4, %v6354_v10 }
 0x591   :  { %v3056_v23 = vsel %vm3054_vm3, %v3055_v49, %v8346_v8  ;;  %vm6606_vm9 = vcmp.gt.s32.totalorder %v6605_v9, 0  ;;  %v3327_v54 = vadd.s32 %v3326_v35, %v3322_v60  ;;  %v6376_v30 = vadd.s32 3, %v6372_v20 }
 0x592   :  { %v3053_v21 = vsel %vm3051_vm10, %v8344_v3, %v3052_v16  ;;  %v6357_v59 = vshrl.u32 %v6339_v22, %v6355_v6  ;;  %v6360_v63 = vadd.s32 127, %v6359_v36  ;;  %v6607_v11 = vsel %vm6606_vm9, %v6605_v9, 0 }
 0x593   :  { %v3057_v14 = vsel %vm3050_vm5, %v3053_v21, %v3056_v23  ;;  %v3163_v56 = vand.u32 2147483647, %v13017_v32  ;;  %v3328_v39 = vadd.s32 536870912, %v3327_v54  ;;  %v6603_v1 = vor.u32 8388608, %v6602_v25 }
 0x594   :  { %v3058_v46 = vsel %vm3047_vm6, nan, %v3057_v14  ;;  %v6358_v4 = vor.u32 %v6357_v59, %v6356_v27  ;;  %v6361_v38 = vshll.u32 %v6360_v63, 23  ;;  %v6609_v41 = vand.u32 31, %v6607_v11 }
 0x595   :  { %7346 = vst.msk [vmem:[%s14271_s3 + $0xb0] sm:$0xff] %vm7323_vm14, %v3058_v46  ;;  %v13044_v28 = vshrl.u32 %v3328_v39, 30  ;;  %v13046_v48 = vand.u32 3, %v6376_v30  ;;  %v3166_v37 = vand.u32 2139095040, %v13017_v32  ;;  %v13051_v44 = vand.u32 8388607, %v3163_v56 }
 0x596   :  { %v6362_v15 = vor.u32 4788187, %v6361_v38  ;;  %v6610_v19 = vsub.s32 32, %v6609_v41  ;;  %v6365_v18 = vcvt.s32.f32 %v6358_v4  ;;  %v13054_v13 = vadd.s32 %v12994_v12, %v13011_v31 }
 0x597   :  { %v3330_v2 = vshll.u32 %v13044_v28, 30  ;;  %v13060_v43 = vshll.u32 %v6603_v1, 8  ;;  %v6612_v22 = vshll.u32 %v8425_v47, %v6609_v41  ;;  %v6608_v8 = vshrl.u32 %v6607_v11, 5 }
 0x598   :  { %v6363_v17 = vand.u32 2147483647, %v6362_v15  ;;  %v6613_v52 = vshrl.u32 %v8426_v51, %v6610_v19  ;;  %v6616_v45 = vshrl.u32 %v8427_v53, %v6610_v19  ;;  %v6619_v50 = vshrl.u32 %v8428_v55, %v6610_v19 }
 0x599   :  { %v13062_v3 = vsub.s32 %v3327_v54, %v3330_v2  ;;  %v6622_v20 = vshrl.u32 %v8429_v57, %v6610_v19  ;;  %v6615_v12 = vshll.u32 %v8426_v51, %v6609_v41  ;;  %v6618_v31 = vshll.u32 %v8427_v53, %v6609_v41 }
 0x59a   :  { %v6366_v9 = vmul.f32 %v6365_v18, %v6363_v17  ;;  %v3167_v49 = vshrl.u32 %v3166_v37, 23  ;;  %v6614_v16 = vor.u32 %v6613_v52, %v6612_v22  ;;  %v6621_v6 = vshll.u32 %v8428_v55, %v6609_v41 }
 0x59b   :  { %v3333_v60 = vsub.s32 0, %v13062_v3  ;;  %v6617_v36 = vor.u32 %v6616_v45, %v6615_v12  ;;  %v6620_v25 = vor.u32 %v6619_v50, %v6618_v31  ;;  %v6624_v23 = vshll.u32 %v8429_v57, %v6609_v41 }
 0x59c   :  { %v6367_v10 = vxor.u32 2147483648, %v6366_v9  ;;  %v6625_v27 = vshrl.u32 %v8430_v0, %v6610_v19  ;;  %v6623_v59 = vor.u32 %v6622_v20, %v6621_v6  ;;  %v3171_v63 = vor.u32 8388608, %v13051_v44 }
 0x59d   :  { %v7558_v21 = vmin.u32 %v3333_v60, %v13062_v3  ;;  %v6611_v14 = vshrl.u32 %v8425_v47, %v6610_v19  ;;  %v7553_v11 = vadd.s32 4294967169, %v3167_v49  ;;  %vm6627_vm11 = vcmp.lt.s32.totalorder %v6608_v8, 1  ;;  %v13095_v60 = vpop.f32.mrb[28].mxu0 }
 0x59e   :  { %v6368_v35 = vsel %vm6285_vm7, %v6367_v10, %v6366_v9  ;;  %v6626_v30 = vor.u32 %v6625_v27, %v6624_v23  ;;  %vm6630_vm0 = vcmp.lt.s32.totalorder %v6608_v8, 4  ;;  %vm3269_vm1 = vcmp.lt.s32.totalorder %v12831_v58, 0 }
 0x59f   :  { %v6371_v54 = vsel %vm13001_vm4, %v12694_v5, %v6368_v35  ;;  %v3335_v46 = vclz %v7558_v21  ;;  %vm6628_vm13 = vcmp.lt.s32.totalorder %v6608_v8, 2  ;;  %v6632_v4 = vsel %vm6630_vm0, %v6620_v25, 2102212464 }
 0x5a0   :  { %8347 = vcosq.f32 %v6371_v54  ;;  %v6635_v38 = vsel %vm6627_vm11, %v6614_v16, %v6617_v36  ;;  %vm6629_vm15 = vcmp.lt.s32.totalorder %v6608_v8, 3  ;;  %v6636_v1 = vsel %vm6630_vm0, %v6623_v59, 920167782 }
 0x5a1   :  { %8349 = vsinq.f32 %v6371_v54  ;;  %v7559_v39 = vadd.s32 4294967294, %v3335_v46  ;;  %v6639_v41 = vsel %vm6627_vm11, %v6617_v36, %v6620_v25  ;;  %v6631_v24 = vsel %vm6627_vm11, %v6611_v14, %v6614_v16 }
 0x5a2   :  { %v6637_v15 = vsel %vm6629_vm15, %v6620_v25, %v6636_v1  ;;  %v6640_v37 = vsel %vm6630_vm0, %v6626_v30, 1326507024  ;;  %v3173_v19 = vadd.s32 1, %v7553_v11  ;;  %v6633_v44 = vsel %vm6629_vm15, %v6617_v36, %v6632_v4 }
 0x5a3   :  { %vm7560_vm2 = vcmp.lt.s32.totalorder %v7559_v39, 0  ;;  %v6638_v17 = vsel %vm6628_vm13, %v6635_v38, %v6637_v15  ;;  %v6641_v18 = vsel %vm6629_vm15, %v6623_v59, %v6640_v37  ;;  %v3353_v20 = vsub.s32 4, %v13044_v28 }
 0x5a4   :  { %v3338_v2 = vsel %vm7560_vm2, 0, %v7559_v39  ;;  %v6642_v52 = vsel %vm6628_vm13, %v6639_v41, %v6641_v18  ;;  %v13084_v45 = vmul.u32.u64.low %v13060_v43, %v6638_v17  ;;  %v13085_v50 = vmul.u32.u64.high %v13060_v43, %v6638_v17, %v13084_v45 }
 0x5a5   :  { %v3339_v9 = vsub.s32 32, %v3338_v2  ;;  %v3343_v22 = vsub.s32 4294967266, %v3338_v2  ;;  %vm3174_vm4 = vcmp.gt.s32.totalorder %v3173_v19, 0  ;;  %vm6375_vm7 = vweird.f32 %v12694_v5 }
 0x5a6   :  { %v6634_v12 = vsel %vm6628_vm13, %v6631_v24, %v6633_v44  ;;  %v13092_v31 = vmul.u32.u64.low %v13060_v43, %v6642_v52  ;;  %v13093_v49 = vmul.u32.u64.high %v13060_v43, %v6642_v52, %v13092_v31  ;;  %v3175_v10 = vsel %vm3174_vm4, %v3173_v19, 0 }
 0x5a7   :  { %v3340_v16 = vshll.u32 %v13062_v3, %v3338_v2  ;;  %v3341_v6 = vshrl.u32 %v13054_v13, %v3339_v9  ;;  %v3344_v36 = vadd.s32 127, %v3343_v22  ;;  %v3177_v25 = vand.u32 31, %v3175_v10 }
 0x5a8   :  { %vm6378_vm6 = vcmp.lt.s32.totalorder %v13046_v48, 2  ;;  %vm6379_vm5 = vcmp.eq.s32.totalorder %v13046_v48, 0  ;;  %vm13103_vm10 = vcmp.le.f32.partialorder %v3267_v33, 0.7853982  ;;  %v6653_v23 = vadd.s32 1, %v13085_v50 }
 0x5a9   :  { %vm6382_vm3 = vcmp.eq.s32.totalorder %v13046_v48, 2  ;;  %v3342_v3 = vor.u32 %v3341_v6, %v3340_v16  ;;  %v3345_v35 = vshll.u32 %v3344_v36, 23  ;;  %v3354_v13 = vsel %vm3269_vm1, %v3353_v20, %v13044_v28 }
 0x5aa   :  { %v8348_v27 = vpop.eup %8347  ;;  %v6650_v54 = vmul.u32 %v13060_v43, %v6634_v12  ;;  %vm6652_vm12 = vc.u32 %v13093_v49, %v13084_v45  ;;  %v3178_v33 = vsub.s32 32, %v3177_v25  ;;  %v13116_v46 = vshll.u32 %v3171_v63, 8 }
 0x5ab   :  { %v8350_v21 = vpop.eup %8349  ;;  %v6383_v59 = vxor.u32 2147483648, %v8348_v27  ;;  %v3346_v30 = vor.u32 4788187, %v3345_v35  ;;  %v6654_v11 = vsel %vm6652_vm12, %v6653_v23, %v13085_v50  ;;  %v3356_v38 = vsel %vm13103_vm10, 0, %v3354_v13 }
 0x5ac   :  { %v6380_v14 = vxor.u32 2147483648, %v8350_v21  ;;  %v6655_v39 = vadd.s32 %v6654_v11, %v6650_v54  ;;  %v13122_v28 = vadd.f32 %v12948_v62, %v12644_v42  ;;  %v3349_v41 = vcvt.s32.f32 %v3342_v3 }
 0x5ad   :  { %v6384_v4 = vsel %vm6382_vm3, %v6383_v59, %v8350_v21  ;;  %v3347_v1 = vand.u32 2147483647, %v3346_v30  ;;  %v13126_v24 = vshrl.u32 %v3175_v10, 5  ;;  %v3181_v37 = vshrl.u32 %v8426_v51, %v3178_v33 }
 0x5ae   :  { %v6381_v43 = vsel %vm6379_vm5, %v8348_v27, %v6380_v14  ;;  %v6656_v15 = vadd.s32 536870912, %v6655_v39  ;;  %v3184_v19 = vshrl.u32 %v8427_v53, %v3178_v33  ;;  %v3180_v17 = vshll.u32 %v8425_v47, %v3177_v25 }
 0x5af   :  { %v6385_v63 = vsel %vm6378_vm6, %v6381_v43, %v6384_v4  ;;  %v3350_v42 = vmul.f32 %v3349_v41, %v3347_v1  ;;  %v3187_v18 = vshrl.u32 %v8428_v55, %v3178_v33  ;;  %v3183_v2 = vshll.u32 %v8426_v51, %v3177_v25 }
 0x5b0   :  { %v6386_v44 = vsel %vm6375_vm7, nan, %v6385_v63  ;;  %v6657_v48 = vshrl.u32 %v6656_v15, 30  ;;  %v3186_v52 = vshll.u32 %v8427_v53, %v3177_v25  ;;  %v3190_v50 = vshrl.u32 %v8429_v57, %v3178_v33 }
 0x5b1   :  { %7378 = vst.msk [vmem:[%s14271_s3 + $0x1b0] sm:$0xff] %vm7323_vm14, %v6386_v44  ;;  %v3351_v9 = vxor.u32 2147483648, %v3350_v42  ;;  %v3189_v5 = vshll.u32 %v8428_v55, %v3177_v25  ;;  %v3192_v22 = vshll.u32 %v8429_v57, %v3177_v25  ;;  %v3193_v20 = vshrl.u32 %v8430_v0, %v3178_v33 }
 0x5b2   :  { %v3360_v12 = vadd.s32 3, %v3356_v38  ;;  %v6658_v31 = vshll.u32 %v6657_v48, 30  ;;  %v3182_v10 = vor.u32 %v3181_v37, %v3180_v17  ;;  %v3185_v16 = vor.u32 %v3184_v19, %v3183_v2 }
 0x5b3   :  { %v3352_v6 = vsel %vm3269_vm1, %v3351_v9, %v3350_v42  ;;  %v3188_v36 = vor.u32 %v3187_v18, %v3186_v52  ;;  %v3191_v23 = vor.u32 %v3190_v50, %v3189_v5  ;;  %v3194_v27 = vor.u32 %v3193_v20, %v3192_v22 }
 0x5b4   :  { %v3355_v3 = vsel %vm13103_vm10, %v12831_v58, %v3352_v6  ;;  %v13151_v35 = vsub.s32 %v6655_v39, %v6658_v31  ;;  %v3179_v25 = vshrl.u32 %v8425_v47, %v3178_v33  ;;  %v6494_v13 = vand.u32 2139095040, %v13122_v28 }
 0x5b5   :  { %8351 = vcosq.f32 %v3355_v3  ;;  %vm3195_vm8 = vcmp.lt.s32.totalorder %v13126_v24, 1  ;;  %vm3196_vm9 = vcmp.lt.s32.totalorder %v13126_v24, 2  ;;  %vm3197_vm11 = vcmp.lt.s32.totalorder %v13126_v24, 3 }
 0x5b6   :  { %8353 = vsinq.f32 %v3355_v3  ;;  %v6661_v21 = vsub.s32 0, %v13151_v35  ;;  %vm3198_vm0 = vcmp.lt.s32.totalorder %v13126_v24, 4  ;;  %v3203_v8 = vsel %vm3195_vm8, %v3182_v10, %v3185_v16 }
 0x5b7   :  { %v3200_v59 = vsel %vm3198_vm0, %v3188_v36, 2102212464  ;;  %v3204_v54 = vsel %vm3198_vm0, %v3191_v23, 920167782  ;;  %v3207_v33 = vsel %vm3195_vm8, %v3185_v16, %v3188_v36  ;;  %v3208_v14 = vsel %vm3198_vm0, %v3194_v27, 1326507024 }
 0x5b8   :  { %v7686_v30 = vmin.u32 %v6661_v21, %v13151_v35  ;;  %v6681_v11 = vsub.s32 4, %v6657_v48  ;;  %v3205_v4 = vsel %vm3197_vm11, %v3188_v36, %v3204_v54  ;;  %v3209_v38 = vsel %vm3197_vm11, %v3191_v23, %v3208_v14 }
 0x5b9   :  { %v3361_v39 = vand.u32 3, %v3360_v12  ;;  %v3206_v43 = vsel %vm3196_vm9, %v3203_v8, %v3205_v4  ;;  %v3210_v1 = vsel %vm3196_vm9, %v3207_v33, %v3209_v38  ;;  %v6495_v41 = vshrl.u32 %v6494_v13, 23 }
 0x5ba   :  { %vm6597_vm1 = vcmp.lt.s32.totalorder %v12952_v29, 0  ;;  %v6663_v63 = vclz %v7686_v30  ;;  %v3199_v15 = vsel %vm3195_vm8, %v3179_v25, %v3182_v10  ;;  %v3201_v37 = vsel %vm3197_vm11, %v3185_v16, %v3200_v59 }
 0x5bb   :  { %v13179_v19 = vmul.u32.u64.low %v13116_v46, %v3210_v1  ;;  %v13180_v44 = vmul.u32.u64.high %v13116_v46, %v3210_v1, %v13179_v19  ;;  %v13183_v42 = vmul.u32.u64.low %v13116_v46, %v3206_v43  ;;  %v13184_v17 = vmul.u32.u64.high %v13116_v46, %v3206_v43, %v13183_v42 }
 0x5bc   :  { %vm3359_vm13 = vweird.f32 %v12831_v58  ;;  %vm13190_vm15 = vcmp.le.f32.partialorder %v6595_v34, 0.7853982  ;;  %v7687_v2 = vadd.s32 4294967294, %v6663_v63  ;;  %v6682_v52 = vsel %vm6597_vm1, %v6681_v11, %v6657_v48 }
 0x5bd   :  { %v7681_v50 = vadd.s32 4294967169, %v6495_v41  ;;  %vm3362_vm2 = vcmp.lt.s32.totalorder %v3361_v39, 2  ;;  %vm3363_vm4 = vcmp.eq.s32.totalorder %v3361_v39, 0  ;;  %vm3366_vm7 = vcmp.eq.s32.totalorder %v3361_v39, 2 }
 0x5be   :  { %v3202_v9 = vsel %vm3196_vm9, %v3199_v15, %v3201_v37  ;;  %v6651_v5 = vadd.s32 %v13084_v45, %v13093_v49  ;;  %vm7688_vm6 = vcmp.lt.s32.totalorder %v7687_v2, 0  ;;  %v6491_v34 = vand.u32 2147483647, %v13122_v28 }
 0x5bf   :  { %v6501_v22 = vadd.s32 1, %v7681_v50  ;;  %v8352_v20 = vpop.eup %8351  ;;  %v6666_v12 = vsel %vm7688_vm6, 0, %v7687_v2  ;;  %v6684_v31 = vsel %vm13190_vm15, 0, %v6682_v52  ;;  %vm3220_vm5 = vc.u32 %v13180_v44, %v13183_v42  ;;  %v13232_v2 = vpop.f32.mrb[28].mxu1 }
 0x5c0   :  { %v3221_v48 = vadd.s32 1, %v13184_v17  ;;  %v8354_v10 = vpop.eup %8353  ;;  %v3367_v24 = vxor.u32 2147483648, %v8352_v20  ;;  %v6667_v16 = vsub.s32 32, %v6666_v12  ;;  %v6671_v6 = vsub.s32 4294967266, %v6666_v12 }
 0x5c1   :  { %v3218_v45 = vmul.u32 %v13116_v46, %v3202_v9  ;;  %v3364_v49 = vxor.u32 2147483648, %v8354_v10  ;;  %v6668_v36 = vshll.u32 %v13151_v35, %v6666_v12  ;;  %vm6502_vm10 = vcmp.gt.s32.totalorder %v6501_v22, 0 }
 0x5c2   :  { %v3222_v23 = vsel %vm3220_vm5, %v3221_v48, %v13184_v17  ;;  %v3368_v27 = vsel %vm3366_vm7, %v3367_v24, %v8354_v10  ;;  %v6669_v3 = vshrl.u32 %v6651_v5, %v6667_v16  ;;  %v6672_v25 = vadd.s32 127, %v6671_v6 }
 0x5c3   :  { %v3223_v13 = vadd.s32 %v3222_v23, %v3218_v45  ;;  %v3365_v21 = vsel %vm3363_vm4, %v8352_v20, %v3364_v49  ;;  %v6688_v8 = vadd.s32 3, %v6684_v31  ;;  %v6498_v59 = vand.u32 8388607, %v6491_v34 }
 0x5c4   :  { %v6503_v54 = vsel %vm6502_vm10, %v6501_v22, 0  ;;  %v3369_v46 = vsel %vm3362_vm2, %v3365_v21, %v3368_v27  ;;  %v6670_v33 = vor.u32 %v6669_v3, %v6668_v36  ;;  %v6673_v14 = vshll.u32 %v6672_v25, 23 }
 0x5c5   :  { %v3224_v35 = vadd.s32 536870912, %v3223_v13  ;;  %v3370_v30 = vsel %vm3359_vm13, nan, %v3369_v46  ;;  %v6505_v11 = vand.u32 31, %v6503_v54  ;;  %v6499_v43 = vor.u32 8388608, %v6498_v59 }
 0x5c6   :  { %7349 = vst.msk [vmem:[%s14271_s3 + $0xc8] sm:$0xff] %vm7323_vm14, %v3370_v30  ;;  %v6674_v4 = vor.u32 4788187, %v6673_v14  ;;  %v6677_v39 = vcvt.s32.f32 %v6670_v33  ;;  %v13222_v63 = vand.u32 3, %v6688_v8  ;;  %v13230_v17 = vadd.f32 %v12948_v62, %v12757_v26 }
 0x5c7   :  { %v13220_v38 = vshrl.u32 %v3224_v35, 30  ;;  %v6506_v1 = vsub.s32 32, %v6505_v11  ;;  %v6508_v9 = vshll.u32 %v8425_v47, %v6505_v11  ;;  %v6504_v22 = vshrl.u32 %v6503_v54, 5 }
 0x5c8   :  { %v6675_v41 = vand.u32 2147483647, %v6674_v4  ;;  %v6511_v20 = vshll.u32 %v8426_v51, %v6505_v11  ;;  %v6514_v12 = vshll.u32 %v8427_v53, %v6505_v11  ;;  %v13240_v31 = vshll.u32 %v6499_v43, 8 }
 0x5c9   :  { %v3226_v15 = vshll.u32 %v13220_v38, 30  ;;  %v6509_v58 = vshrl.u32 %v8426_v51, %v6506_v1  ;;  %v6512_v37 = vshrl.u32 %v8427_v53, %v6506_v1  ;;  %v6515_v19 = vshrl.u32 %v8428_v55, %v6506_v1 }
 0x5ca   :  { %v6678_v52 = vmul.f32 %v6677_v39, %v6675_v41  ;;  %v6518_v5 = vshrl.u32 %v8429_v57, %v6506_v1  ;;  %v6517_v24 = vshll.u32 %v8428_v55, %v6505_v11  ;;  %v6520_v45 = vshll.u32 %v8429_v57, %v6505_v11 }
 0x5cb   :  { %v13234_v50 = vsub.s32 %v3223_v13, %v3226_v15  ;;  %v6510_v10 = vor.u32 %v6509_v58, %v6508_v9  ;;  %v6513_v16 = vor.u32 %v6512_v37, %v6511_v20  ;;  %v6516_v6 = vor.u32 %v6515_v19, %v6514_v12 }
 0x5cc   :  { %v6679_v48 = vxor.u32 2147483648, %v6678_v52  ;;  %v6521_v49 = vshrl.u32 %v8430_v0, %v6506_v1  ;;  %vm3165_vm3 = vcmp.lt.s32.totalorder %v13017_v32, 0  ;;  %v6519_v27 = vor.u32 %v6518_v5, %v6517_v24 }
 0x5cd   :  { %v3229_v26 = vsub.s32 0, %v13234_v50  ;;  %v3478_v3 = vand.u32 2139095040, %v13230_v17  ;;  %v3249_v13 = vsub.s32 4, %v13220_v38  ;;  %v6507_v21 = vshrl.u32 %v8425_v47, %v6506_v1 }
 0x5ce   :  { %v6680_v36 = vsel %vm6597_vm1, %v6679_v48, %v6678_v52  ;;  %v6522_v8 = vor.u32 %v6521_v49, %v6520_v45  ;;  %vm6523_vm12 = vcmp.lt.s32.totalorder %v6504_v22, 1  ;;  %vm6526_vm8 = vcmp.lt.s32.totalorder %v6504_v22, 4 }
 0x5cf   :  { %v7554_v23 = vmin.u32 %v3229_v26, %v13234_v50  ;;  %v6683_v25 = vsel %vm13190_vm15, %v12952_v29, %v6680_v36  ;;  %vm13258_vm9 = vcmp.le.f32.partialorder %v3163_v56, 0.7853982  ;;  %vm6524_vm11 = vcmp.lt.s32.totalorder %v6504_v22, 2 }
 0x5d0   :  { %8355 = vcosq.f32 %v6683_v25  ;;  %v6528_v46 = vsel %vm6526_vm8, %v6516_v6, 2102212464  ;;  %v6531_v18 = vsel %vm6523_vm12, %v6510_v10, %v6513_v16  ;;  %vm6525_vm0 = vcmp.lt.s32.totalorder %v6504_v22, 3 }
 0x5d1   :  { %v3231_v59 = vclz %v7554_v23  ;;  %8357 = vsinq.f32 %v6683_v25  ;;  %v6532_v14 = vsel %vm6526_vm8, %v6519_v27, 920167782  ;;  %v6535_v35 = vsel %vm6523_vm12, %v6513_v16, %v6516_v6 }
 0x5d2   :  { %v6527_v30 = vsel %vm6523_vm12, %v6507_v21, %v6510_v10  ;;  %v6533_v11 = vsel %vm6525_vm0, %v6516_v6, %v6532_v14  ;;  %v6536_v4 = vsel %vm6526_vm8, %v6522_v8, 1326507024  ;;  %v3479_v43 = vshrl.u32 %v3478_v3, 23 }
 0x5d3   :  { %v7555_v33 = vadd.s32 4294967294, %v3231_v59  ;;  %v6529_v1 = vsel %vm6525_vm0, %v6513_v16, %v6528_v46  ;;  %v6534_v41 = vsel %vm6524_vm11, %v6531_v18, %v6533_v11  ;;  %v6537_v39 = vsel %vm6525_vm0, %v6519_v27, %v6536_v4 }
 0x5d4   :  { %vm6691_vm13 = vcmp.eq.s32.totalorder %v13222_v63, 0  ;;  %v6538_v15 = vsel %vm6524_vm11, %v6535_v35, %v6537_v39  ;;  %v13266_v58 = vmul.u32.u64.low %v13240_v31, %v6534_v41  ;;  %v13267_v37 = vmul.u32.u64.high %v13240_v31, %v6534_v41, %v13266_v58 }
 0x5d5   :  { %vm7556_vm1 = vcmp.lt.s32.totalorder %v7555_v33, 0  ;;  %vm6690_vm15 = vcmp.lt.s32.totalorder %v13222_v63, 2  ;;  %v3219_v19 = vadd.s32 %v13183_v42, %v13180_v44  ;;  %v7565_v5 = vadd.s32 4294967169, %v3479_v43  ;;  %v13283_v42 = vpop.f32.mrb[29].mxu0 }
 0x5d6   :  { %v3234_v56 = vsel %vm7556_vm1, 0, %v7555_v33  ;;  %vm6687_vm2 = vweird.f32 %v12952_v29  ;;  %v3250_v20 = vsel %vm3165_vm3, %v3249_v13, %v13220_v38  ;;  %v6530_v12 = vsel %vm6524_vm11, %v6527_v30, %v6529_v1 }
 0x5d7   :  { %v3235_v52 = vsub.s32 32, %v3234_v56  ;;  %v3239_v9 = vsub.s32 4294967266, %v3234_v56  ;;  %v13279_v48 = vmul.u32.u64.low %v13240_v31, %v6538_v15  ;;  %v13280_v26 = vmul.u32.u64.high %v13240_v31, %v6538_v15, %v13279_v48 }
 0x5d8   :  { %v3236_v10 = vshll.u32 %v13234_v50, %v3234_v56  ;;  %v3485_v44 = vadd.s32 1, %v7565_v5  ;;  %vm6694_vm4 = vcmp.eq.s32.totalorder %v13222_v63, 2  ;;  %v6549_v6 = vadd.s32 1, %v13267_v37 }
 0x5d9   :  { %v3237_v24 = vshrl.u32 %v3219_v19, %v3235_v52  ;;  %v3240_v16 = vadd.s32 127, %v3239_v9  ;;  %v3475_v45 = vand.u32 2147483647, %v13230_v17  ;;  %v13290_v38 = vadd.f32 %v12948_v62, %v12833_v7 }
 0x5da   :  { %v8356_v22 = vpop.eup %8355  ;;  %v3252_v50 = vsel %vm13258_vm9, 0, %v3250_v20  ;;  %vm3486_vm7 = vcmp.gt.s32.totalorder %v3485_v44, 0  ;;  %v6546_v3 = vmul.u32 %v13240_v31, %v6530_v12  ;;  %vm6548_vm6 = vc.u32 %v13280_v26, %v13266_v58 }
 0x5db   :  { %v3238_v49 = vor.u32 %v3237_v24, %v3236_v10  ;;  %v3241_v36 = vshll.u32 %v3240_v16, 23  ;;  %v8358_v23 = vpop.eup %8357  ;;  %v6695_v27 = vxor.u32 2147483648, %v8356_v22  ;;  %v3487_v25 = vsel %vm3486_vm7, %v3485_v44, 0 }
 0x5dc   :  { %v6692_v13 = vxor.u32 2147483648, %v8358_v23  ;;  %v6550_v7 = vsel %vm6548_vm6, %v6549_v6, %v13267_v37  ;;  %v13300_v8 = vadd.f32 %v12948_v62, %v12918_v61  ;;  %v3482_v18 = vand.u32 8388607, %v3475_v45 }
 0x5dd   :  { %v3242_v21 = vor.u32 4788187, %v3241_v36  ;;  %v6696_v59 = vsel %vm6694_vm4, %v6695_v27, %v8358_v23  ;;  %v6551_v46 = vadd.s32 %v6550_v7, %v6546_v3  ;;  %v3489_v31 = vand.u32 31, %v3487_v25 }
 0x5de   :  { %v6693_v33 = vsel %vm6691_vm13, %v8356_v22, %v6692_v13  ;;  %v3245_v35 = vcvt.s32.f32 %v3238_v49  ;;  %v3256_v30 = vadd.s32 3, %v3252_v50  ;;  %v6806_v62 = vand.u32 2139095040, %v13290_v38 }
 0x5df   :  { %v3243_v14 = vand.u32 2147483647, %v3242_v21  ;;  %v6697_v11 = vsel %vm6690_vm15, %v6693_v33, %v6696_v59  ;;  %v6552_v4 = vadd.s32 536870912, %v6551_v46  ;;  %v3490_v61 = vsub.s32 32, %v3489_v31 }
 0x5e0   :  { %v6698_v43 = vsel %vm6687_vm2, nan, %v6697_v11  ;;  %v3492_v41 = vshll.u32 %v8425_v47, %v3489_v31  ;;  %v3495_v39 = vshll.u32 %v8426_v51, %v3489_v31  ;;  %v3498_v37 = vshll.u32 %v8427_v53, %v3489_v31 }
 0x5e1   :  { %v3246_v1 = vmul.f32 %v3245_v35, %v3243_v14  ;;  %7381 = vst.msk [vmem:[%s14271_s3 + $0x1c8] sm:$0xff] %vm7323_vm14, %v6698_v43  ;;  %v6553_v56 = vshrl.u32 %v6552_v4, 30  ;;  %v3493_v63 = vshrl.u32 %v8426_v51, %v3490_v61  ;;  %v3496_v15 = vshrl.u32 %v8427_v53, %v3490_v61  ;;  %v13348_v35 = vpop.f32.mrb[29].mxu1 }
 0x5e2   :  { %v3499_v29 = vshrl.u32 %v8428_v55, %v3490_v61  ;;  %v3501_v52 = vshll.u32 %v8428_v55, %v3489_v31  ;;  %v3502_v9 = vshrl.u32 %v8429_v57, %v3490_v61  ;;  %v13325_v5 = vand.u32 3, %v3256_v30 }
 0x5e3   :  { %v3247_v19 = vxor.u32 2147483648, %v3246_v1  ;;  %vm6493_vm5 = vcmp.lt.s32.totalorder %v13122_v28, 0  ;;  %v6554_v20 = vshll.u32 %v6553_v56, 30  ;;  %v3488_v12 = vshrl.u32 %v3487_v25, 5 }
 0x5e4   :  { %v3494_v48 = vor.u32 %v3493_v63, %v3492_v41  ;;  %v3497_v24 = vor.u32 %v3496_v15, %v3495_v39  ;;  %v3500_v16 = vor.u32 %v3499_v29, %v3498_v37  ;;  %v3503_v44 = vor.u32 %v3502_v9, %v3501_v52 }
 0x5e5   :  { %v3248_v10 = vsel %vm3165_vm3, %v3247_v19, %v3246_v1  ;;  %v13333_v22 = vsub.s32 %v6551_v46, %v6554_v20  ;;  %v3504_v49 = vshll.u32 %v8429_v57, %v3489_v31  ;;  %v3505_v36 = vshrl.u32 %v8430_v0, %v3490_v61 }
 0x5e6   :  { %v3251_v6 = vsel %vm13258_vm9, %v13017_v32, %v3248_v10  ;;  %v3483_v50 = vor.u32 8388608, %v3482_v18  ;;  %v6803_v23 = vand.u32 2147483647, %v13290_v38  ;;  %v6807_v27 = vshrl.u32 %v6806_v62, 23 }
 0x5e7   :  { %8359 = vcosq.f32 %v3251_v6  ;;  %vm13340_vm10 = vcmp.le.f32.partialorder %v6491_v34, 0.7853982  ;;  %v6557_v54 = vsub.s32 0, %v13333_v22  ;;  %v3491_v25 = vshrl.u32 %v8425_v47, %v3490_v61 }
 0x5e8   :  { %8361 = vsinq.f32 %v3251_v6  ;;  %v3506_v13 = vor.u32 %v3505_v36, %v3504_v49  ;;  %v6577_v21 = vsub.s32 4, %v6553_v56  ;;  %vm3507_vm3 = vcmp.lt.s32.totalorder %v3488_v12, 1 }
 0x5e9   :  { %vm3509_vm12 = vcmp.lt.s32.totalorder %v3488_v12, 3  ;;  %vm3510_vm8 = vcmp.lt.s32.totalorder %v3488_v12, 4  ;;  %v7682_v7 = vmin.u32 %v6557_v54, %v13333_v22  ;;  %v3515_v46 = vsel %vm3507_vm3, %v3494_v48, %v3497_v24 }
 0x5ea   :  { %v3512_v59 = vsel %vm3510_vm8, %v3500_v16, 2102212464  ;;  %v3516_v18 = vsel %vm3510_vm8, %v3503_v44, 920167782  ;;  %v3519_v34 = vsel %vm3507_vm3, %v3497_v24, %v3500_v16  ;;  %v3520_v33 = vsel %vm3510_vm8, %v3506_v13, 1326507024 }
 0x5eb   :  { %v3517_v31 = vsel %vm3509_vm12, %v3500_v16, %v3516_v18  ;;  %v3523_v14 = vshll.u32 %v3483_v50, 8  ;;  %v6559_v30 = vclz %v7682_v7  ;;  %vm3508_vm9 = vcmp.lt.s32.totalorder %v3488_v12, 2 }
 0x5ec   :  { %v3511_v11 = vsel %vm3507_vm3, %v3491_v25, %v3494_v48  ;;  %v3513_v4 = vsel %vm3509_vm12, %v3497_v24, %v3512_v59  ;;  %v6578_v61 = vsel %vm6493_vm5, %v6577_v21, %v6553_v56  ;;  %v3518_v62 = vsel %vm3508_vm9, %v3515_v46, %v3517_v31 }
 0x5ed   :  { %v3521_v43 = vsel %vm3509_vm12, %v3503_v44, %v3520_v33  ;;  %v7693_v1 = vadd.s32 4294967169, %v6807_v27  ;;  %vm3255_vm11 = vweird.f32 %v13017_v32  ;;  %v7683_v41 = vadd.s32 4294967294, %v6559_v30 }
 0x5ee   :  { %v3522_v39 = vsel %vm3508_vm9, %v3519_v34, %v3521_v43  ;;  %v13355_v63 = vmul.u32.u64.low %v3523_v14, %v3518_v62  ;;  %v13356_v15 = vmul.u32.u64.high %v3523_v14, %v3518_v62, %v13355_v63  ;;  %vm3258_vm0 = vcmp.lt.s32.totalorder %v13325_v5, 2 }
 0x5ef   :  { %v3514_v37 = vsel %vm3508_vm9, %v3511_v11, %v3513_v4  ;;  %v13360_v19 = vmul.u32.u64.low %v3523_v14, %v3522_v39  ;;  %v13361_v29 = vmul.u32.u64.high %v3523_v14, %v3522_v39, %v13360_v19  ;;  %vm3259_vm1 = vcmp.eq.s32.totalorder %v13325_v5, 0 }
 0x5f0   :  { %vm3262_vm13 = vcmp.eq.s32.totalorder %v13325_v5, 2  ;;  %vm7684_vm15 = vcmp.lt.s32.totalorder %v7683_v41, 0  ;;  %v6813_v56 = vadd.s32 1, %v7693_v1  ;;  %v6547_v9 = vadd.s32 %v13266_v58, %v13280_v26 }
 0x5f1   :  { %v8360_v52 = vpop.eup %8359  ;;  %v6562_v20 = vsel %vm7684_vm15, 0, %v7683_v41  ;;  %v6580_v12 = vsel %vm13340_vm10, 0, %v6578_v61  ;;  %v6810_v48 = vand.u32 8388607, %v6803_v23  ;;  %v3530_v6 = vmul.u32 %v3523_v14, %v3514_v37 }
 0x5f2   :  { %v8362_v10 = vpop.eup %8361  ;;  %v3263_v24 = vxor.u32 2147483648, %v8360_v52  ;;  %v6563_v16 = vsub.s32 32, %v6562_v20  ;;  %v6567_v44 = vsub.s32 4294967266, %v6562_v20  ;;  %v6564_v36 = vshll.u32 %v13333_v22, %v6562_v20 }
 0x5f3   :  { %v3260_v49 = vxor.u32 2147483648, %v8362_v10  ;;  %vm3532_vm2 = vc.u32 %v13361_v29, %v13355_v63  ;;  %v3533_v58 = vadd.s32 1, %v13356_v15  ;;  %vm6814_vm4 = vcmp.gt.s32.totalorder %v6813_v56, 0 }
 0x5f4   :  { %v3264_v26 = vsel %vm3262_vm13, %v3263_v24, %v8362_v10  ;;  %v6565_v50 = vshrl.u32 %v6547_v9, %v6563_v16  ;;  %v6568_v27 = vadd.s32 127, %v6567_v44  ;;  %v6584_v25 = vadd.s32 3, %v6580_v12 }
 0x5f5   :  { %v3261_v54 = vsel %vm3259_vm1, %v8360_v52, %v3260_v49  ;;  %v3534_v13 = vsel %vm3532_vm2, %v3533_v58, %v13356_v15  ;;  %v6815_v21 = vsel %vm6814_vm4, %v6813_v56, 0  ;;  %v6811_v30 = vor.u32 8388608, %v6810_v48 }
 0x5f6   :  { %v3265_v22 = vsel %vm3258_vm0, %v3261_v54, %v3264_v26  ;;  %v6566_v7 = vor.u32 %v6565_v50, %v6564_v36  ;;  %v6569_v59 = vshll.u32 %v6568_v27, 23  ;;  %v3535_v46 = vadd.s32 %v3534_v13, %v3530_v6 }
 0x5f7   :  { %v3266_v18 = vsel %vm3255_vm11, nan, %v3265_v22  ;;  %v6817_v31 = vand.u32 31, %v6815_v21  ;;  %v13388_v14 = vand.u32 3, %v6584_v25  ;;  %v3374_v62 = vand.u32 2139095040, %v13300_v8 }
 0x5f8   :  { %7348 = vst.msk [vmem:[%s14271_s3 + $0xc0] sm:$0xff] %vm7323_vm14, %v3266_v18  ;;  %v6570_v34 = vor.u32 4788187, %v6569_v59  ;;  %v3536_v33 = vadd.s32 536870912, %v3535_v46  ;;  %v6573_v4 = vcvt.s32.f32 %v6566_v7  ;;  %v6816_v32 = vshrl.u32 %v6815_v21, 5 }
 0x5f9   :  { %v6818_v11 = vsub.s32 32, %v6817_v31  ;;  %v6826_v37 = vshll.u32 %v8427_v53, %v6817_v31  ;;  %v6820_v56 = vshll.u32 %v8425_v47, %v6817_v31  ;;  %v6823_v52 = vshll.u32 %v8426_v51, %v6817_v31 }
 0x5fa   :  { %v6571_v5 = vand.u32 2147483647, %v6570_v34  ;;  %v13390_v61 = vshrl.u32 %v3536_v33, 30  ;;  %v6829_v9 = vshll.u32 %v8428_v55, %v6817_v31  ;;  %v3371_v24 = vand.u32 2147483647, %v13300_v8 }
 0x5fb   :  { %v6821_v43 = vshrl.u32 %v8426_v51, %v6818_v11  ;;  %v6824_v1 = vshrl.u32 %v8427_v53, %v6818_v11  ;;  %v6827_v41 = vshrl.u32 %v8428_v55, %v6818_v11  ;;  %v6830_v19 = vshrl.u32 %v8429_v57, %v6818_v11 }
 0x5fc   :  { %v6574_v39 = vmul.f32 %v6573_v4, %v6571_v5  ;;  %v3538_v15 = vshll.u32 %v13390_v61, 30  ;;  %v6833_v20 = vshrl.u32 %v8430_v0, %v6818_v11  ;;  %v6832_v49 = vshll.u32 %v8429_v57, %v6817_v31 }
 0x5fd   :  { %v6828_v10 = vor.u32 %v6827_v41, %v6826_v37  ;;  %v6822_v16 = vor.u32 %v6821_v43, %v6820_v56  ;;  %v6825_v44 = vor.u32 %v6824_v1, %v6823_v52  ;;  %v6831_v6 = vor.u32 %v6830_v19, %v6829_v9 }
 0x5fe   :  { %v6575_v12 = vxor.u32 2147483648, %v6574_v39  ;;  %v13403_v48 = vsub.s32 %v3535_v46, %v3538_v15  ;;  %v13410_v26 = vshll.u32 %v6811_v30, 8  ;;  %v3375_v50 = vshrl.u32 %v3374_v62, 23 }
 0x5ff   :  { %v6819_v54 = vshrl.u32 %v8425_v47, %v6818_v11  ;;  %v6834_v25 = vor.u32 %v6833_v20, %v6832_v49  ;;  %vm6838_vm7 = vcmp.lt.s32.totalorder %v6816_v32, 4  ;;  %vm6835_vm6 = vcmp.lt.s32.totalorder %v6816_v32, 1 }
 0x600   :  { %v6576_v36 = vsel %vm6493_vm5, %v6575_v12, %v6574_v39  ;;  %v3541_v58 = vsub.s32 0, %v13403_v48  ;;  %v6840_v21 = vsel %vm6838_vm7, %v6828_v10, 2102212464  ;;  %vm6837_vm5 = vcmp.lt.s32.totalorder %v6816_v32, 3 }
 0x601   :  { %v6579_v27 = vsel %vm13340_vm10, %v13122_v28, %v6576_v36  ;;  %v6843_v22 = vsel %vm6835_vm6, %v6822_v16, %v6825_v44  ;;  %v6844_v7 = vsel %vm6838_vm7, %v6831_v6, 920167782  ;;  %vm13421_vm3 = vcmp.le.f32.partialorder %v3475_v45, 0.7853982 }
 0x602   :  { %8363 = vcosq.f32 %v6579_v27  ;;  %v7566_v13 = vmin.u32 %v3541_v58, %v13403_v48  ;;  %v6839_v46 = vsel %vm6835_vm6, %v6819_v54, %v6822_v16  ;;  %v6841_v18 = vsel %vm6837_vm5, %v6825_v44, %v6840_v21 }
 0x603   :  { %8365 = vsinq.f32 %v6579_v27  ;;  %v6847_v31 = vsel %vm6835_vm6, %v6825_v44, %v6828_v10  ;;  %vm6836_vm10 = vcmp.lt.s32.totalorder %v6816_v32, 2  ;;  %v6845_v34 = vsel %vm6837_vm5, %v6828_v10, %v6844_v7 }
 0x604   :  { %v3543_v59 = vclz %v7566_v13  ;;  %v6848_v33 = vsel %vm6838_vm7, %v6834_v25, 1326507024  ;;  %v7561_v30 = vadd.s32 4294967169, %v3375_v50  ;;  %v3561_v5 = vsub.s32 4, %v13390_v61  ;;  %v13454_v50 = vpop.f32.mrb[30].mxu0 }
 0x605   :  { %v6846_v4 = vsel %vm6836_vm10, %v6843_v22, %v6845_v34  ;;  %v6849_v62 = vsel %vm6837_vm5, %v6831_v6, %v6848_v33  ;;  %v6842_v43 = vsel %vm6836_vm10, %v6839_v46, %v6841_v18  ;;  %vm6583_vm8 = vweird.f32 %v13122_v28  ;;  %v13462_v22 = vld [vmem:[%s14270_s2] ss:$0 sm:$0xff] }
 0x606   :  { %v7567_v11 = vadd.s32 4294967294, %v3543_v59  ;;  %v6850_v1 = vsel %vm6836_vm10, %v6847_v31, %v6849_v62  ;;  %v13428_v45 = vmul.u32.u64.low %v13410_v26, %v6846_v4  ;;  %v13429_v41 = vmul.u32.u64.high %v13410_v26, %v6846_v4, %v13428_v45 }
 0x607   :  { %v13433_v39 = vmul.u32.u64.low %v13410_v26, %v6850_v1  ;;  %v13434_v15 = vmul.u32.u64.high %v13410_v26, %v6850_v1, %v13433_v39  ;;  %v3381_v32 = vadd.s32 1, %v7561_v30  ;;  %vm6590_vm9 = vcmp.eq.s32.totalorder %v13388_v14, 2 }
 0x608   :  { %vm7568_vm12 = vcmp.lt.s32.totalorder %v7567_v11, 0  ;;  %vm3477_vm11 = vcmp.lt.s32.totalorder %v13230_v17, 0  ;;  %v3531_v37 = vadd.s32 %v13355_v63, %v13361_v29  ;;  %v6858_v20 = vmul.u32 %v13410_v26, %v6842_v43 }
 0x609   :  { %v3546_v19 = vsel %vm7568_vm12, 0, %v7567_v11  ;;  %v3562_v9 = vsel %vm3477_vm11, %v3561_v5, %v13390_v61  ;;  %vm3382_vm0 = vcmp.gt.s32.totalorder %v3381_v32, 0  ;;  %v6861_v12 = vadd.s32 1, %v13429_v41 }
 0x60a   :  { %v3547_v56 = vsub.s32 32, %v3546_v19  ;;  %v3551_v52 = vsub.s32 4294967266, %v3546_v19  ;;  %v3378_v10 = vand.u32 8388607, %v3371_v24  ;;  %v3383_v16 = vsel %vm3382_vm0, %v3381_v32, 0 }
 0x60b   :  { %v3548_v6 = vshll.u32 %v13403_v48, %v3546_v19  ;;  %vm6860_vm1 = vc.u32 %v13434_v15, %v13428_v45  ;;  %v3564_v61 = vsel %vm13421_vm3, 0, %v3562_v9  ;;  %v3385_v26 = vand.u32 31, %v3383_v16 }
 0x60c   :  { %v8364_v44 = vpop.eup %8363  ;;  %v3549_v63 = vshrl.u32 %v3531_v37, %v3547_v56  ;;  %v3552_v29 = vadd.s32 127, %v3551_v52  ;;  %v6862_v58 = vsel %vm6860_vm1, %v6861_v12, %v13429_v41  ;;  %vm6587_vm13 = vcmp.eq.s32.totalorder %v13388_v14, 0 }
 0x60d   :  { %v8366_v49 = vpop.eup %8365  ;;  %v6591_v36 = vxor.u32 2147483648, %v8364_v44  ;;  %v6863_v13 = vadd.s32 %v6862_v58, %v6858_v20  ;;  %v3386_v21 = vsub.s32 32, %v3385_v26  ;;  %v13466_v7 = vadd.f32 %v13462_v22, %v12997_v40 }
 0x60e   :  { %v6588_v27 = vxor.u32 2147483648, %v8366_v49  ;;  %v3550_v54 = vor.u32 %v3549_v63, %v3548_v6  ;;  %v3553_v25 = vshll.u32 %v3552_v29, 23  ;;  %vm6586_vm15 = vcmp.lt.s32.totalorder %v13388_v14, 2 }
 0x60f   :  { %v6592_v48 = vsel %vm6590_vm9, %v6591_v36, %v8366_v49  ;;  %v6864_v18 = vadd.s32 536870912, %v6863_v13  ;;  %v3568_v34 = vadd.s32 3, %v3564_v61  ;;  %v3379_v33 = vor.u32 8388608, %v3378_v10 }
 0x610   :  { %v6589_v59 = vsel %vm6587_vm13, %v8364_v44, %v6588_v27  ;;  %v3554_v46 = vor.u32 4788187, %v3553_v25  ;;  %v13471_v30 = vadd.f32 %v13462_v22, %v13095_v60  ;;  %v3557_v4 = vcvt.s32.f32 %v3550_v54 }
 0x611   :  { %v6593_v31 = vsel %vm6586_vm15, %v6589_v59, %v6592_v48  ;;  %v6865_v62 = vshrl.u32 %v6864_v18, 30  ;;  %v3384_v40 = vshrl.u32 %v3383_v16, 5  ;;  %v3389_v14 = vshrl.u32 %v8426_v51, %v3386_v21 }
 0x612   :  { %v6594_v11 = vsel %vm6583_vm8, nan, %v6593_v31  ;;  %v3555_v5 = vand.u32 2147483647, %v3554_v46  ;;  %v3392_v43 = vshrl.u32 %v8427_v53, %v3386_v21  ;;  %v3395_v1 = vshrl.u32 %v8428_v55, %v3386_v21 }
 0x613   :  { %7380 = vst.msk [vmem:[%s14271_s3 + $0x1c0] sm:$0xff] %vm7323_vm14, %v6594_v11  ;;  %v6866_v41 = vshll.u32 %v6865_v62, 30  ;;  %v3394_v28 = vshll.u32 %v8427_v53, %v3385_v26  ;;  %v3398_v39 = vshrl.u32 %v8429_v57, %v3386_v21  ;;  %vm6805_vm2 = vcmp.lt.s32.totalorder %v13290_v38, 0 }
 0x614   :  { %v3558_v60 = vmul.f32 %v3557_v4, %v3555_v5  ;;  %v3388_v32 = vshll.u32 %v8425_v47, %v3385_v26  ;;  %v3391_v37 = vshll.u32 %v8426_v51, %v3385_v26  ;;  %v3397_v19 = vshll.u32 %v8428_v55, %v3385_v26 }
 0x615   :  { %v3401_v56 = vshrl.u32 %v8430_v0, %v3386_v21  ;;  %v13489_v9 = vand.u32 3, %v3568_v34  ;;  %v13491_v20 = vsub.s32 %v6863_v13, %v6866_v41  ;;  %v3396_v12 = vor.u32 %v3395_v1, %v3394_v28  ;;  %v13512_v34 = vpop.f32.mrb[30].mxu1 }
 0x616   :  { %v3559_v52 = vxor.u32 2147483648, %v3558_v60  ;;  %v3390_v10 = vor.u32 %v3389_v14, %v3388_v32  ;;  %v3393_v16 = vor.u32 %v3392_v43, %v3391_v37  ;;  %v3399_v44 = vor.u32 %v3398_v39, %v3397_v19 }
 0x617   :  { %v3400_v6 = vshll.u32 %v8429_v57, %v3385_v26  ;;  %v6869_v29 = vsub.s32 0, %v13491_v20  ;;  %v3387_v49 = vshrl.u32 %v8425_v47, %v3386_v21  ;;  %v3419_v36 = vshll.u32 %v3379_v33, 8 }
 0x618   :  { %v3560_v63 = vsel %vm3477_vm11, %v3559_v52, %v3558_v60  ;;  %v6889_v58 = vsub.s32 4, %v6865_v62  ;;  %vm3406_vm4 = vcmp.lt.s32.totalorder %v3384_v40, 4  ;;  %vm13503_vm7 = vcmp.le.f32.partialorder %v6803_v23, 0.7853982 }
 0x619   :  { %v3563_v61 = vsel %vm13421_vm3, %v13230_v17, %v3560_v63  ;;  %v3402_v27 = vor.u32 %v3401_v56, %v3400_v6  ;;  %v7694_v54 = vmin.u32 %v6869_v29, %v13491_v20  ;;  %vm3403_vm6 = vcmp.lt.s32.totalorder %v3384_v40, 1 }
 0x61a   :  { %8367 = vcosq.f32 %v3563_v61  ;;  %v3408_v25 = vsel %vm3406_vm4, %v3396_v12, 2102212464  ;;  %vm3404_vm5 = vcmp.lt.s32.totalorder %v3384_v40, 2  ;;  %v3411_v13 = vsel %vm3403_vm6, %v3390_v10, %v3393_v16 }
 0x61b   :  { %8369 = vsinq.f32 %v3563_v61  ;;  %v3412_v3 = vsel %vm3406_vm4, %v3399_v44, 920167782  ;;  %v6871_v48 = vclz %v7694_v54  ;;  %vm3405_vm3 = vcmp.lt.s32.totalorder %v3384_v40, 3 }
 0x61c   :  { %v3407_v21 = vsel %vm3403_vm6, %v3387_v49, %v3390_v10  ;;  %v3415_v59 = vsel %vm3403_vm6, %v3393_v16, %v3396_v12  ;;  %v3409_v46 = vsel %vm3405_vm3, %v3393_v16, %v3408_v25  ;;  %v3413_v18 = vsel %vm3405_vm3, %v3396_v12, %v3412_v3 }
 0x61d   :  { %v3416_v23 = vsel %vm3406_vm4, %v3402_v27, 1326507024  ;;  %v6702_v31 = vand.u32 2139095040, %v13466_v7  ;;  %v7695_v33 = vadd.s32 4294967294, %v6871_v48  ;;  %v6890_v11 = vsel %vm6805_vm2, %v6889_v58, %v6865_v62 }
 0x61e   :  { %v3414_v5 = vsel %vm3404_vm5, %v3411_v13, %v3413_v18  ;;  %v3417_v4 = vsel %vm3405_vm3, %v3399_v44, %v3416_v23  ;;  %v3410_v41 = vsel %vm3404_vm5, %v3407_v21, %v3409_v46  ;;  %vm3570_vm12 = vcmp.lt.s32.totalorder %v13489_v9, 2 }
 0x61f   :  { %v3418_v14 = vsel %vm3404_vm5, %v3415_v59, %v3417_v4  ;;  %v13518_v43 = vmul.u32.u64.low %v3419_v36, %v3414_v5  ;;  %v13519_v1 = vmul.u32.u64.high %v3419_v36, %v3414_v5, %v13518_v43  ;;  %v6703_v60 = vshrl.u32 %v6702_v31, 23 }
 0x620   :  { %vm7696_vm10 = vcmp.lt.s32.totalorder %v7695_v33, 0  ;;  %v13523_v28 = vmul.u32.u64.low %v3419_v36, %v3418_v14  ;;  %v13524_v39 = vmul.u32.u64.high %v3419_v36, %v3418_v14, %v13523_v28  ;;  %vm3571_vm8 = vcmp.eq.s32.totalorder %v13489_v9, 0 }
 0x621   :  { %v6874_v62 = vsel %vm7696_vm10, 0, %v7695_v33  ;;  %v7689_v32 = vadd.s32 4294967169, %v6703_v60  ;;  %v6859_v37 = vadd.s32 %v13428_v45, %v13434_v15  ;;  %v6699_v52 = vand.u32 2147483647, %v13466_v7 }
 0x622   :  { %v6875_v19 = vsub.s32 32, %v6874_v62  ;;  %v6879_v56 = vsub.s32 4294967266, %v6874_v62  ;;  %v6892_v40 = vsel %vm13503_vm7, 0, %v6890_v11  ;;  %v3426_v12 = vmul.u32 %v3419_v36, %v3410_v41 }
 0x623   :  { %v3429_v10 = vadd.s32 1, %v13519_v1  ;;  %v6709_v16 = vadd.s32 1, %v7689_v32  ;;  %v6876_v6 = vshll.u32 %v13491_v20, %v6874_v62  ;;  %vm3428_vm9 = vc.u32 %v13524_v39, %v13518_v43 }
 0x624   :  { %v8368_v44 = vpop.eup %8367  ;;  %v6877_v63 = vshrl.u32 %v6859_v37, %v6875_v19  ;;  %v6880_v29 = vadd.s32 127, %v6879_v56  ;;  %vm3574_vm11 = vcmp.eq.s32.totalorder %v13489_v9, 2  ;;  %v6896_v25 = vadd.s32 3, %v6892_v40 }
 0x625   :  { %v8370_v45 = vpop.eup %8369  ;;  %v3575_v15 = vxor.u32 2147483648, %v8368_v44  ;;  %v3430_v49 = vsel %vm3428_vm9, %v3429_v10, %v13519_v1  ;;  %vm6710_vm0 = vcmp.gt.s32.totalorder %v6709_v16, 0  ;;  %v6706_v20 = vand.u32 8388607, %v6699_v52 }
 0x626   :  { %v3572_v61 = vxor.u32 2147483648, %v8370_v45  ;;  %v6878_v36 = vor.u32 %v6877_v63, %v6876_v6  ;;  %v6881_v58 = vshll.u32 %v6880_v29, 23  ;;  %v3431_v27 = vadd.s32 %v3430_v49, %v3426_v12 }
 0x627   :  { %v3576_v54 = vsel %vm3574_vm11, %v3575_v15, %v8370_v45  ;;  %v6711_v13 = vsel %vm6710_vm0, %v6709_v16, 0  ;;  %v3686_v59 = vand.u32 2139095040, %v13471_v30  ;;  %vm3567_vm1 = vweird.f32 %v13230_v17 }
 0x628   :  { %v3573_v3 = vsel %vm3571_vm8, %v8368_v44, %v3572_v61  ;;  %v6882_v48 = vor.u32 4788187, %v6881_v58  ;;  %v3432_v21 = vadd.s32 536870912, %v3431_v27  ;;  %v6713_v18 = vand.u32 31, %v6711_v13 }
 0x629   :  { %v3577_v46 = vsel %vm3570_vm12, %v3573_v3, %v3576_v54  ;;  %v6885_v33 = vcvt.s32.f32 %v6878_v36  ;;  %v13553_v5 = vand.u32 3, %v6896_v25  ;;  %v6707_v4 = vor.u32 8388608, %v6706_v20 }
 0x62a   :  { %v3578_v23 = vsel %vm3567_vm1, nan, %v3577_v46  ;;  %v6883_v31 = vand.u32 2147483647, %v6882_v48  ;;  %v13547_v11 = vshrl.u32 %v3432_v21, 30  ;;  %v6714_v14 = vsub.s32 32, %v6713_v18 }
 0x62b   :  { %7351 = vst.msk [vmem:[%s14271_s3 + $0xd8] sm:$0xff] %vm7323_vm14, %v3578_v23  ;;  %v3683_v17 = vand.u32 2147483647, %v13471_v30  ;;  %v6716_v60 = vshll.u32 %v8425_v47, %v6713_v18  ;;  %v3687_v41 = vshrl.u32 %v3686_v59, 23  ;;  %v6719_v62 = vshll.u32 %v8426_v51, %v6713_v18 }
 0x62c   :  { %v6886_v1 = vmul.f32 %v6885_v33, %v6883_v31  ;;  %v3434_v9 = vshll.u32 %v13547_v11, 30  ;;  %v6717_v28 = vshrl.u32 %v8426_v51, %v6714_v14  ;;  %v6720_v32 = vshrl.u32 %v8427_v53, %v6714_v14 }
 0x62d   :  { %v6723_v37 = vshrl.u32 %v8428_v55, %v6714_v14  ;;  %v6722_v40 = vshll.u32 %v8427_v53, %v6713_v18  ;;  %v6726_v12 = vshrl.u32 %v8429_v57, %v6714_v14  ;;  %v6712_v10 = vshrl.u32 %v6711_v13, 5 }
 0x62e   :  { %v6887_v19 = vxor.u32 2147483648, %v6886_v1  ;;  %v13562_v56 = vsub.s32 %v3431_v27, %v3434_v9  ;;  %v6718_v16 = vor.u32 %v6717_v28, %v6716_v60  ;;  %v6725_v44 = vshll.u32 %v8428_v55, %v6713_v18 }
 0x62f   :  { %v13567_v6 = vshll.u32 %v6707_v4, 8  ;;  %v6721_v45 = vor.u32 %v6720_v32, %v6719_v62  ;;  %v6724_v15 = vor.u32 %v6723_v37, %v6722_v40  ;;  %vm3373_vm13 = vcmp.lt.s32.totalorder %v13300_v8, 0  ;;  %v13608_v40 = vpop.f32.mrb[31].mxu0 }
 0x630   :  { %v6888_v63 = vsel %vm6805_vm2, %v6887_v19, %v6886_v1  ;;  %v3437_v29 = vsub.s32 0, %v13562_v56  ;;  %v6727_v61 = vor.u32 %v6726_v12, %v6725_v44  ;;  %v6728_v36 = vshll.u32 %v8429_v57, %v6713_v18 }
 0x631   :  { %v6891_v49 = vsel %vm13503_vm7, %v13290_v38, %v6888_v63  ;;  %v6729_v58 = vshrl.u32 %v8430_v0, %v6714_v14  ;;  %v3427_v27 = vadd.s32 %v13518_v43, %v13524_v39  ;;  %v7573_v25 = vadd.s32 4294967169, %v3687_v41 }
 0x632   :  { %8371 = vcosq.f32 %v6891_v49  ;;  %v7562_v54 = vmin.u32 %v3437_v29, %v13562_v56  ;;  %v3457_v20 = vsub.s32 4, %v13547_v11  ;;  %v6715_v26 = vshrl.u32 %v8425_v47, %v6714_v14 }
 0x633   :  { %8373 = vsinq.f32 %v6891_v49  ;;  %v6730_v13 = vor.u32 %v6729_v58, %v6728_v36  ;;  %vm13585_vm15 = vcmp.le.f32.partialorder %v3371_v24, 0.7853982  ;;  %vm6731_vm2 = vcmp.lt.s32.totalorder %v6712_v10, 1 }
 0x634   :  { %v3439_v48 = vclz %v7562_v54  ;;  %vm6732_vm4 = vcmp.lt.s32.totalorder %v6712_v10, 2  ;;  %vm6734_vm7 = vcmp.lt.s32.totalorder %v6712_v10, 4  ;;  %vm6733_vm6 = vcmp.lt.s32.totalorder %v6712_v10, 3 }
 0x635   :  { %v6736_v43 = vsel %vm6734_vm7, %v6724_v15, 2102212464  ;;  %v6739_v39 = vsel %vm6731_vm2, %v6718_v16, %v6721_v45  ;;  %v6740_v21 = vsel %vm6734_vm7, %v6727_v61, 920167782  ;;  %vm6902_vm5 = vcmp.eq.s32.totalorder %v13553_v5, 2 }
 0x636   :  { %v7563_v59 = vadd.s32 4294967294, %v3439_v48  ;;  %v6735_v46 = vsel %vm6731_vm2, %v6715_v26, %v6718_v16  ;;  %v6741_v18 = vsel %vm6733_vm6, %v6724_v15, %v6740_v21  ;;  %v6743_v23 = vsel %vm6731_vm2, %v6721_v45, %v6724_v15 }
 0x637   :  { %vm6899_vm3 = vcmp.eq.s32.totalorder %v13553_v5, 0  ;;  %v6737_v24 = vsel %vm6733_vm6, %v6721_v45, %v6736_v43  ;;  %v6742_v31 = vsel %vm6732_vm4, %v6739_v39, %v6741_v18  ;;  %v6744_v33 = vsel %vm6734_vm7, %v6730_v13, 1326507024 }
 0x638   :  { %v3693_v4 = vadd.s32 1, %v7573_v25  ;;  %vm6898_vm10 = vcmp.lt.s32.totalorder %v13553_v5, 2  ;;  %vm7564_vm12 = vcmp.lt.s32.totalorder %v7563_v59, 0  ;;  %v6745_v14 = vsel %vm6733_vm6, %v6727_v61, %v6744_v33 }
 0x639   :  { %v13597_v1 = vmul.u32.u64.low %v13567_v6, %v6742_v31  ;;  %v13598_v9 = vmul.u32.u64.high %v13567_v6, %v6742_v31, %v13597_v1  ;;  %vm6895_vm8 = vweird.f32 %v13290_v38  ;;  %v3442_v60 = vsel %vm7564_vm12, 0, %v7563_v59 }
 0x63a   :  { %v6746_v41 = vsel %vm6732_vm4, %v6743_v23, %v6745_v14  ;;  %v3690_v28 = vand.u32 8388607, %v3683_v17  ;;  %vm3694_vm9 = vcmp.gt.s32.totalorder %v3693_v4, 0  ;;  %v3443_v62 = vsub.s32 32, %v3442_v60 }
 0x63b   :  { %v3447_v32 = vsub.s32 4294967266, %v3442_v60  ;;  %v3458_v37 = vsel %vm3373_vm13, %v3457_v20, %v13547_v11  ;;  %v3695_v19 = vsel %vm3694_vm9, %v3693_v4, 0  ;;  %v6738_v12 = vsel %vm6732_vm4, %v6735_v46, %v6737_v24 }
 0x63c   :  { %v13612_v16 = vmul.u32.u64.low %v13567_v6, %v6746_v41  ;;  %v13613_v44 = vmul.u32.u64.high %v13567_v6, %v6746_v41, %v13612_v16  ;;  %v3697_v63 = vand.u32 31, %v3695_v19  ;;  %v8372_v29 = vpop.eup %8371  ;;  %v3444_v45 = vshll.u32 %v13562_v56, %v3442_v60 }
 0x63d   :  { %v3445_v15 = vshrl.u32 %v3427_v27, %v3443_v62  ;;  %v3448_v49 = vadd.s32 127, %v3447_v32  ;;  %v6757_v61 = vadd.s32 1, %v13598_v9  ;;  %v8374_v36 = vpop.eup %8373  ;;  %v6903_v58 = vxor.u32 2147483648, %v8372_v29 }
 0x63e   :  { %v3460_v11 = vsel %vm13585_vm15, 0, %v3458_v37  ;;  %v3691_v54 = vor.u32 8388608, %v3690_v28  ;;  %v3698_v10 = vsub.s32 32, %v3697_v63  ;;  %v6900_v25 = vxor.u32 2147483648, %v8374_v36 }
 0x63f   :  { %v3446_v20 = vor.u32 %v3445_v15, %v3444_v45  ;;  %v3449_v26 = vshll.u32 %v3448_v49, 23  ;;  %v6754_v13 = vmul.u32 %v13567_v6, %v6738_v12  ;;  %v6904_v48 = vsel %vm6902_vm5, %v6903_v58, %v8374_v36 }
 0x640   :  { %vm6756_vm11 = vc.u32 %v13613_v44, %v13597_v1  ;;  %v13624_v56 = vshrl.u32 %v3695_v19, 5  ;;  %v3700_v27 = vshll.u32 %v8425_v47, %v3697_v63  ;;  %v6901_v43 = vsel %vm6899_vm3, %v8372_v29, %v6900_v25 }
 0x641   :  { %v3450_v39 = vor.u32 4788187, %v3449_v26  ;;  %v6758_v21 = vsel %vm6756_vm11, %v6757_v61, %v13598_v9  ;;  %v3703_v59 = vshll.u32 %v8426_v51, %v3697_v63  ;;  %v6905_v6 = vsel %vm6898_vm10, %v6901_v43, %v6904_v48 }
 0x642   :  { %v6759_v46 = vadd.s32 %v6758_v21, %v6754_v13  ;;  %v3701_v18 = vshrl.u32 %v8426_v51, %v3698_v10  ;;  %v3704_v23 = vshrl.u32 %v8427_v53, %v3698_v10  ;;  %v6906_v24 = vsel %vm6895_vm8, nan, %v6905_v6 }
 0x643   :  { %v3451_v31 = vand.u32 2147483647, %v3450_v39  ;;  %v3453_v33 = vcvt.s32.f32 %v3446_v20  ;;  %v3707_v4 = vshrl.u32 %v8428_v55, %v3698_v10  ;;  %7383 = vst.msk [vmem:[%s14271_s3 + $0x1d8] sm:$0xff] %vm7323_vm14, %v6906_v24  ;;  %v3706_v5 = vshll.u32 %v8427_v53, %v3697_v63  ;;  %v13694_v24 = vpop.f32.mrb[31].mxu1 }
 0x644   :  { %v6760_v14 = vadd.s32 536870912, %v6759_v46  ;;  %v3709_v9 = vshll.u32 %v8428_v55, %v3697_v63  ;;  %v3710_v60 = vshrl.u32 %v8429_v57, %v3698_v10  ;;  %v3702_v28 = vor.u32 %v3701_v18, %v3700_v27 }
 0x645   :  { %v3454_v41 = vmul.f32 %v3453_v33, %v3451_v31  ;;  %v3705_v38 = vor.u32 %v3704_v23, %v3703_v59  ;;  %v3713_v62 = vshrl.u32 %v8430_v0, %v3698_v10  ;;  %v3464_v12 = vadd.s32 3, %v3460_v11 }
 0x646   :  { %v6761_v32 = vshrl.u32 %v6760_v14, 30  ;;  %v3711_v37 = vor.u32 %v3710_v60, %v3709_v9  ;;  %v3708_v16 = vor.u32 %v3707_v4, %v3706_v5  ;;  %v3712_v29 = vshll.u32 %v8429_v57, %v3697_v63 }
 0x647   :  { %v3455_v19 = vxor.u32 2147483648, %v3454_v41  ;;  %vm3715_vm0 = vcmp.lt.s32.totalorder %v13624_v56, 1  ;;  %vm3718_vm1 = vcmp.lt.s32.totalorder %v13624_v56, 4  ;;  %v13649_v15 = vshll.u32 %v3691_v54, 8 }
 0x648   :  { %v6762_v45 = vshll.u32 %v6761_v32, 30  ;;  %v3714_v61 = vor.u32 %v3713_v62, %v3712_v29  ;;  %v3723_v36 = vsel %vm3715_vm0, %v3702_v28, %v3705_v38  ;;  %v3724_v58 = vsel %vm3718_vm1, %v3711_v37, 920167782 }
 0x649   :  { %v3456_v49 = vsel %vm3373_vm13, %v3455_v19, %v3454_v41  ;;  %v3699_v25 = vshrl.u32 %v8425_v47, %v3698_v10  ;;  %vm3717_vm2 = vcmp.lt.s32.totalorder %v13624_v56, 3  ;;  %vm3716_vm13 = vcmp.lt.s32.totalorder %v13624_v56, 2 }
 0x64a   :  { %v3459_v63 = vsel %vm13585_vm15, %v13300_v8, %v3456_v49  ;;  %v13660_v11 = vsub.s32 %v6759_v46, %v6762_v45  ;;  %v3720_v54 = vsel %vm3718_vm1, %v3708_v16, 2102212464  ;;  %v3725_v20 = vsel %vm3717_vm2, %v3708_v16, %v3724_v58 }
 0x64b   :  { %8375 = vcosq.f32 %v3459_v63  ;;  %v3726_v3 = vsel %vm3716_vm13, %v3723_v36, %v3725_v20  ;;  %v3727_v10 = vsel %vm3715_vm0, %v3705_v38, %v3708_v16  ;;  %v6785_v13 = vsub.s32 4, %v6761_v32 }
 0x64c   :  { %8377 = vsinq.f32 %v3459_v63  ;;  %v6765_v26 = vsub.s32 0, %v13660_v11  ;;  %v3728_v48 = vsel %vm3718_vm1, %v3714_v61, 1326507024  ;;  %v3465_v39 = vand.u32 3, %v3464_v12 }
 0x64d   :  { %v13677_v27 = vmul.u32.u64.low %v13649_v15, %v3726_v3  ;;  %v13678_v43 = vmul.u32.u64.high %v13649_v15, %v3726_v3, %v13677_v27  ;;  %v3729_v59 = vsel %vm3717_vm2, %v3711_v37, %v3728_v48  ;;  %v3719_v6 = vsel %vm3715_vm0, %v3699_v25, %v3702_v28 }
 0x64e   :  { %v7690_v21 = vmin.u32 %v6765_v26, %v13660_v11  ;;  %v3721_v46 = vsel %vm3717_vm2, %v3705_v38, %v3720_v54  ;;  %v3730_v18 = vsel %vm3716_vm13, %v3727_v10, %v3729_v59  ;;  %v13692_v23 = vadd.f32 %v13462_v22, %v13232_v2 }
 0x64f   :  { %vm6701_vm15 = vcmp.lt.s32.totalorder %v13466_v7, 0  ;;  %v13700_v4 = vmul.u32.u64.low %v13649_v15, %v3730_v18  ;;  %v13701_v14 = vmul.u32.u64.high %v13649_v15, %v3730_v18, %v13700_v4  ;;  %vm3463_vm4 = vweird.f32 %v13300_v8 }
 0x650   :  { %v6767_v31 = vclz %v7690_v21  ;;  %v6786_v33 = vsel %vm6701_vm15, %v6785_v13, %v6761_v32  ;;  %v3722_v9 = vsel %vm3716_vm13, %v3719_v6, %v3721_v46  ;;  %v7014_v2 = vand.u32 2139095040, %v13692_v23 }
 0x651   :  { %v13709_v60 = vadd.f32 %v13462_v22, %v13283_v42  ;;  %vm3467_vm7 = vcmp.eq.s32.totalorder %v3465_v39, 0  ;;  %vm3470_vm6 = vcmp.eq.s32.totalorder %v3465_v39, 2  ;;  %vm13713_vm5 = vcmp.le.f32.partialorder %v6699_v52, 0.7853982 }
 0x652   :  { %v7691_v5 = vadd.s32 4294967294, %v6767_v31  ;;  %v3741_v28 = vadd.s32 1, %v13678_v43  ;;  %v6755_v56 = vadd.s32 %v13597_v1, %v13613_v44  ;;  %v6788_v38 = vsel %vm13713_vm5, 0, %v6786_v33 }
 0x653   :  { %v7015_v62 = vshrl.u32 %v7014_v2, 23  ;;  %v3738_v37 = vmul.u32 %v13649_v15, %v3722_v9  ;;  %vm3740_vm10 = vc.u32 %v13701_v14, %v13677_v27  ;;  %v7011_v52 = vand.u32 2147483647, %v13692_v23 }
 0x654   :  { %vm7692_vm3 = vcmp.lt.s32.totalorder %v7691_v5, 0  ;;  %v3582_v1 = vand.u32 2139095040, %v13709_v60  ;;  %v3742_v49 = vsel %vm3740_vm10, %v3741_v28, %v13678_v43  ;;  %vm3466_vm12 = vcmp.lt.s32.totalorder %v3465_v39, 2 }
 0x655   :  { %v8376_v42 = vpop.eup %8375  ;;  %v6770_v32 = vsel %vm7692_vm3, 0, %v7691_v5  ;;  %v7701_v61 = vadd.s32 4294967169, %v7015_v62  ;;  %v3743_v63 = vadd.s32 %v3742_v49, %v3738_v37  ;;  %v6792_v54 = vadd.s32 3, %v6788_v38 }
 0x656   :  { %v8378_v19 = vpop.eup %8377  ;;  %v3471_v12 = vxor.u32 2147483648, %v8376_v42  ;;  %v6771_v16 = vsub.s32 32, %v6770_v32  ;;  %v6775_v29 = vsub.s32 4294967266, %v6770_v32  ;;  %v6772_v45 = vshll.u32 %v13660_v11, %v6770_v32 }
 0x657   :  { %v3468_v44 = vxor.u32 2147483648, %v8378_v19  ;;  %v7021_v20 = vadd.s32 1, %v7701_v61  ;;  %v3744_v13 = vadd.s32 536870912, %v3743_v63  ;;  %v7018_v48 = vand.u32 8388607, %v7011_v52 }
 0x658   :  { %v3472_v36 = vsel %vm3470_vm6, %v3471_v12, %v8378_v19  ;;  %v6773_v15 = vshrl.u32 %v6755_v56, %v6771_v16  ;;  %v6776_v58 = vadd.s32 127, %v6775_v29  ;;  %v3583_v59 = vshrl.u32 %v3582_v1, 23 }
 0x659   :  { %v3469_v25 = vsel %vm3467_vm7, %v8376_v42, %v3468_v44  ;;  %vm7022_vm8 = vcmp.gt.s32.totalorder %v7021_v20, 0  ;;  %v3745_v39 = vshrl.u32 %v3744_v13, 30  ;;  %v13739_v6 = vand.u32 3, %v6792_v54 }
 0x65a   :  { %v3473_v26 = vsel %vm3466_vm12, %v3469_v25, %v3472_v36  ;;  %v6774_v3 = vor.u32 %v6773_v15, %v6772_v45  ;;  %v6777_v10 = vshll.u32 %v6776_v58, 23  ;;  %v7023_v21 = vsel %vm7022_vm8, %v7021_v20, 0 }
 0x65b   :  { %v3474_v11 = vsel %vm3463_vm4, nan, %v3473_v26  ;;  %v7025_v46 = vand.u32 31, %v7023_v21  ;;  %vm3685_vm9 = vcmp.lt.s32.totalorder %v13471_v30, 0  ;;  %v3746_v8 = vshll.u32 %v3745_v39, 30 }
 0x65c   :  { %7350 = vst.msk [vmem:[%s14271_s3 + $0xd0] sm:$0xff] %vm7323_vm14, %v3474_v11  ;;  %v6778_v43 = vor.u32 4788187, %v6777_v10  ;;  %v6781_v31 = vcvt.s32.f32 %v6774_v3  ;;  %v13744_v33 = vadd.f32 %v13462_v22, %v13348_v35  ;;  %v3739_v4 = vadd.s32 %v13677_v27, %v13701_v14 }
 0x65d   :  { %v7019_v5 = vor.u32 8388608, %v7018_v48  ;;  %v7026_v9 = vsub.s32 32, %v7025_v46  ;;  %v3579_v2 = vand.u32 2147483647, %v13709_v60  ;;  %v13749_v56 = vsub.s32 %v3743_v63, %v3746_v8 }
 0x65e   :  { %v6779_v18 = vand.u32 2147483647, %v6778_v43  ;;  %v7024_v38 = vshrl.u32 %v7023_v21, 5  ;;  %v7569_v62 = vadd.s32 4294967169, %v3583_v59  ;;  %v3769_v42 = vsub.s32 4, %v3745_v39 }
 0x65f   :  { %v7028_v32 = vshll.u32 %v8425_v47, %v7025_v46  ;;  %v7029_v37 = vshrl.u32 %v8426_v51, %v7026_v9  ;;  %v7032_v35 = vshrl.u32 %v8427_v53, %v7026_v9  ;;  %v3749_v12 = vsub.s32 0, %v13749_v56 }
 0x660   :  { %v6782_v28 = vmul.f32 %v6781_v31, %v6779_v18  ;;  %v7031_v27 = vshll.u32 %v8426_v51, %v7025_v46  ;;  %v7035_v14 = vshrl.u32 %v8428_v55, %v7026_v9  ;;  %v7034_v29 = vshll.u32 %v8427_v53, %v7025_v46 }
 0x661   :  { %v7030_v16 = vor.u32 %v7029_v37, %v7028_v32  ;;  %v7037_v1 = vshll.u32 %v8428_v55, %v7025_v46  ;;  %v7038_v44 = vshrl.u32 %v8429_v57, %v7026_v9  ;;  %v7574_v49 = vmin.u32 %v3749_v12, %v13749_v56 }
 0x662   :  { %v6783_v19 = vxor.u32 2147483648, %v6782_v28  ;;  %v7033_v61 = vor.u32 %v7032_v35, %v7031_v27  ;;  %v7040_v36 = vshll.u32 %v8429_v57, %v7025_v46  ;;  %v7036_v58 = vor.u32 %v7035_v14, %v7034_v29 }
 0x663   :  { %v7039_v63 = vor.u32 %v7038_v44, %v7037_v1  ;;  %v7041_v25 = vshrl.u32 %v8430_v0, %v7026_v9  ;;  %v3751_v54 = vclz %v7574_v49  ;;  %v13768_v20 = vshll.u32 %v7019_v5, 8 }
 0x664   :  { %v6784_v45 = vsel %vm6701_vm15, %v6783_v19, %v6782_v28  ;;  %v3589_v26 = vadd.s32 1, %v7569_v62  ;;  %vm13772_vm11 = vcmp.le.f32.partialorder %v3683_v17, 0.7853982  ;;  %v3770_v41 = vsel %vm3685_vm9, %v3769_v42, %v3745_v39 }
 0x665   :  { %v6787_v15 = vsel %vm13713_vm5, %v13466_v7, %v6784_v45  ;;  %v7027_v10 = vshrl.u32 %v8425_v47, %v7026_v9  ;;  %v7042_v13 = vor.u32 %v7041_v25, %v7040_v36  ;;  %v7575_v11 = vadd.s32 4294967294, %v3751_v54 }
 0x666   :  { %8379 = vcosq.f32 %v6787_v15  ;;  %vm7043_vm0 = vcmp.lt.s32.totalorder %v7024_v38, 1  ;;  %vm7045_vm1 = vcmp.lt.s32.totalorder %v7024_v38, 3  ;;  %vm7046_vm2 = vcmp.lt.s32.totalorder %v7024_v38, 4 }
 0x667   :  { %8381 = vsinq.f32 %v6787_v15  ;;  %v7048_v48 = vsel %vm7046_vm2, %v7036_v58, 2102212464  ;;  %v7051_v43 = vsel %vm7043_vm0, %v7030_v16, %v7033_v61  ;;  %v7052_v21 = vsel %vm7046_vm2, %v7039_v63, 920167782 }
 0x668   :  { %v7055_v59 = vsel %vm7043_vm0, %v7033_v61, %v7036_v58  ;;  %vm7576_vm13 = vcmp.lt.s32.totalorder %v7575_v11, 0  ;;  %vm7044_vm15 = vcmp.lt.s32.totalorder %v7024_v38, 2  ;;  %v7053_v17 = vsel %vm7045_vm1, %v7036_v58, %v7052_v21 }
 0x669   :  { %v7056_v46 = vsel %vm7046_vm2, %v7042_v13, 1326507024  ;;  %v3754_v18 = vsel %vm7576_vm13, 0, %v7575_v11  ;;  %v7047_v31 = vsel %vm7043_vm0, %v7027_v10, %v7030_v16  ;;  %v7054_v39 = vsel %vm7044_vm15, %v7051_v43, %v7053_v17 }
 0x66a   :  { %v7057_v8 = vsel %vm7045_vm1, %v7039_v63, %v7056_v46  ;;  %vm6794_vm4 = vcmp.lt.s32.totalorder %v13739_v6, 2  ;;  %v3755_v5 = vsub.s32 32, %v3754_v18  ;;  %v3759_v9 = vsub.s32 4294967266, %v3754_v18 }
 0x66b   :  { %v7049_v28 = vsel %vm7045_vm1, %v7033_v61, %v7048_v48  ;;  %v7058_v62 = vsel %vm7044_vm15, %v7055_v59, %v7057_v8  ;;  %vm6791_vm7 = vweird.f32 %v13466_v7  ;;  %v3756_v19 = vshll.u32 %v13749_v56, %v3754_v18 }
 0x66c   :  { %v13787_v42 = vmul.u32.u64.low %v13768_v20, %v7058_v62  ;;  %v13788_v32 = vmul.u32.u64.high %v13768_v20, %v7058_v62, %v13787_v42  ;;  %v13791_v37 = vmul.u32.u64.low %v13768_v20, %v7054_v39  ;;  %v13792_v35 = vmul.u32.u64.high %v13768_v20, %v7054_v39, %v13791_v37 }
 0x66d   :  { %v3757_v12 = vshrl.u32 %v3739_v4, %v3755_v5  ;;  %v3760_v27 = vadd.s32 127, %v3759_v9  ;;  %vm3590_vm6 = vcmp.gt.s32.totalorder %v3589_v26, 0  ;;  %vm6795_vm5 = vcmp.eq.s32.totalorder %v13739_v6, 0 }
 0x66e   :  { %v7050_v14 = vsel %vm7044_vm15, %v7047_v31, %v7049_v28  ;;  %v3586_v16 = vand.u32 8388607, %v3579_v2  ;;  %v3591_v29 = vsel %vm3590_vm6, %v3589_v26, 0  ;;  %v3772_v49 = vsel %vm13772_vm11, 0, %v3770_v41 }
 0x66f   :  { %v3758_v44 = vor.u32 %v3757_v12, %v3756_v19  ;;  %v3761_v45 = vshll.u32 %v3760_v27, 23  ;;  %v3593_v61 = vand.u32 31, %v3591_v29  ;;  %vm6798_vm3 = vcmp.eq.s32.totalorder %v13739_v6, 2 }
 0x670   :  { %v8380_v1 = vpop.eup %8379  ;;  %vm7068_vm10 = vc.u32 %v13788_v32, %v13791_v37  ;;  %v7069_v56 = vadd.s32 1, %v13792_v35  ;;  %v7066_v58 = vmul.u32 %v13768_v20, %v7050_v14  ;;  %v3776_v54 = vadd.s32 3, %v3772_v49 }
 0x671   :  { %v8382_v36 = vpop.eup %8381  ;;  %v6799_v4 = vxor.u32 2147483648, %v8380_v1  ;;  %v3762_v15 = vor.u32 4788187, %v3761_v45  ;;  %v3594_v63 = vsub.s32 32, %v3593_v61  ;;  %v3587_v41 = vor.u32 8388608, %v3586_v16 }
 0x672   :  { %v6796_v38 = vxor.u32 2147483648, %v8382_v36  ;;  %v7070_v26 = vsel %vm7068_vm10, %v7069_v56, %v13792_v35  ;;  %v3765_v11 = vcvt.s32.f32 %v3758_v44  ;;  %v3596_v21 = vshll.u32 %v8425_v47, %v3593_v61 }
 0x673   :  { %v6800_v25 = vsel %vm6798_vm3, %v6799_v4, %v8382_v36  ;;  %v3763_v13 = vand.u32 2147483647, %v3762_v15  ;;  %v7071_v48 = vadd.s32 %v7070_v26, %v7066_v58  ;;  %v3597_v59 = vshrl.u32 %v8426_v51, %v3594_v63 }
 0x674   :  { %v6797_v10 = vsel %vm6795_vm5, %v8380_v1, %v6796_v38  ;;  %v3600_v20 = vshrl.u32 %v8427_v53, %v3594_v63  ;;  %v3603_v31 = vshrl.u32 %v8428_v55, %v3594_v63  ;;  %v3592_v6 = vshrl.u32 %v3591_v29, 5 }
 0x675   :  { %v6801_v43 = vsel %vm6794_vm4, %v6797_v10, %v6800_v25  ;;  %v3766_v46 = vmul.f32 %v3765_v11, %v3763_v13  ;;  %v7072_v18 = vadd.s32 536870912, %v7071_v48  ;;  %v3599_v39 = vshll.u32 %v8426_v51, %v3593_v61 }
 0x676   :  { %v6802_v17 = vsel %vm6791_vm7, nan, %v6801_v43  ;;  %v3602_v8 = vshll.u32 %v8427_v53, %v3593_v61  ;;  %v3606_v5 = vshrl.u32 %v8429_v57, %v3594_v63  ;;  %v3598_v7 = vor.u32 %v3597_v59, %v3596_v21 }
 0x677   :  { %7382 = vst.msk [vmem:[%s14271_s3 + $0x1d0] sm:$0xff] %vm7323_vm14, %v6802_v17  ;;  %v3767_v9 = vxor.u32 2147483648, %v3766_v46  ;;  %v7073_v28 = vshrl.u32 %v7072_v18, 30  ;;  %v3605_v62 = vshll.u32 %v8428_v55, %v3593_v61  ;;  %vm7013_vm12 = vcmp.lt.s32.totalorder %v13692_v23, 0 }
 0x678   :  { %v3601_v42 = vor.u32 %v3600_v20, %v3599_v39  ;;  %v3604_v35 = vor.u32 %v3603_v31, %v3602_v8  ;;  %v3608_v19 = vshll.u32 %v8429_v57, %v3593_v61  ;;  %v3609_v12 = vshrl.u32 %v8430_v0, %v3594_v63 }
 0x679   :  { %v3768_v27 = vsel %vm3685_vm9, %v3767_v9, %v3766_v46  ;;  %v13831_v14 = vand.u32 3, %v3776_v54  ;;  %v7074_v16 = vshll.u32 %v7073_v28, 30  ;;  %v3607_v29 = vor.u32 %v3606_v5, %v3605_v62 }
 0x67a   :  { %v3771_v1 = vsel %vm13772_vm11, %v13471_v30, %v3768_v27  ;;  %v3595_v44 = vshrl.u32 %v8425_v47, %v3594_v63  ;;  %v3610_v45 = vor.u32 %v3609_v12, %v3608_v19  ;;  %v3627_v49 = vshll.u32 %v3587_v41, 8 }
 0x67b   :  { %8383 = vcosq.f32 %v3771_v1  ;;  %v13837_v36 = vsub.s32 %v7071_v48, %v7074_v16  ;;  %vm3611_vm8 = vcmp.lt.s32.totalorder %v3592_v6, 1  ;;  %vm3614_vm0 = vcmp.lt.s32.totalorder %v3592_v6, 4 }
 0x67c   :  { %8385 = vsinq.f32 %v3771_v1  ;;  %vm3612_vm1 = vcmp.lt.s32.totalorder %v3592_v6, 2  ;;  %v3616_v61 = vsel %vm3614_vm0, %v3604_v35, 2102212464  ;;  %v3619_v4 = vsel %vm3611_vm8, %v3598_v7, %v3601_v42 }
 0x67d   :  { %v7077_v56 = vsub.s32 0, %v13837_v36  ;;  %v7097_v38 = vsub.s32 4, %v7073_v28  ;;  %vm3613_vm9 = vcmp.lt.s32.totalorder %v3592_v6, 3  ;;  %v3620_v15 = vsel %vm3614_vm0, %v3607_v29, 920167782 }
 0x67e   :  { %v3615_v3 = vsel %vm3611_vm8, %v3595_v44, %v3598_v7  ;;  %v3621_v58 = vsel %vm3613_vm9, %v3604_v35, %v3620_v15  ;;  %v3623_v25 = vsel %vm3611_vm8, %v3601_v42, %v3604_v35  ;;  %v3624_v63 = vsel %vm3614_vm0, %v3610_v45, 1326507024 }
 0x67f   :  { %v7702_v54 = vmin.u32 %v7077_v56, %v13837_v36  ;;  %v3617_v26 = vsel %vm3613_vm9, %v3601_v42, %v3616_v61  ;;  %v3622_v41 = vsel %vm3612_vm1, %v3619_v4, %v3621_v58  ;;  %v3625_v10 = vsel %vm3613_vm9, %v3607_v29, %v3624_v63 }
 0x680   :  { %v3626_v13 = vsel %vm3612_vm1, %v3623_v25, %v3625_v10  ;;  %v13843_v11 = vmul.u32.u64.low %v3627_v49, %v3622_v41  ;;  %v13844_v48 = vmul.u32.u64.high %v3627_v49, %v3622_v41, %v13843_v11  ;;  %v6910_v43 = vand.u32 2139095040, %v13744_v33 }
 0x681   :  { %v7079_v21 = vclz %v7702_v54  ;;  %v7098_v59 = vsel %vm7013_vm12, %v7097_v38, %v7073_v28  ;;  %v6907_v20 = vand.u32 2147483647, %v13744_v33  ;;  %v3618_v17 = vsel %vm3612_vm1, %v3615_v3, %v3617_v26 }
 0x682   :  { %v13851_v46 = vmul.u32.u64.low %v3627_v49, %v3626_v13  ;;  %v13852_v18 = vmul.u32.u64.high %v3627_v49, %v3626_v13, %v13851_v46  ;;  %v6911_v31 = vshrl.u32 %v6910_v43, 23  ;;  %vm3778_vm11 = vcmp.lt.s32.totalorder %v13831_v14, 2 }
 0x683   :  { %vm13857_vm2 = vcmp.le.f32.partialorder %v7011_v52, 0.7853982  ;;  %v7703_v8 = vadd.s32 4294967294, %v7079_v21  ;;  %v13863_v5 = vadd.f32 %v13462_v22, %v13454_v50  ;;  %vm3779_vm13 = vcmp.eq.s32.totalorder %v13831_v14, 0 }
 0x684   :  { %vm3782_vm15 = vcmp.eq.s32.totalorder %v13831_v14, 2  ;;  %v3637_v6 = vadd.s32 1, %v13844_v48  ;;  %v7697_v9 = vadd.s32 4294967169, %v6911_v31  ;;  %v7067_v7 = vadd.s32 %v13791_v37, %v13788_v32 }
 0x685   :  { %v8384_v28 = vpop.eup %8383  ;;  %vm7704_vm4 = vcmp.lt.s32.totalorder %v7703_v8, 0  ;;  %v7100_v52 = vsel %vm13857_vm2, 0, %v7098_v59  ;;  %v3634_v62 = vmul.u32 %v3627_v49, %v3618_v17  ;;  %vm3636_vm7 = vc.u32 %v13852_v18, %v13843_v11 }
 0x686   :  { %v8386_v42 = vpop.eup %8385  ;;  %v3783_v35 = vxor.u32 2147483648, %v8384_v28  ;;  %v7082_v50 = vsel %vm7704_vm4, 0, %v7703_v8  ;;  %v6914_v22 = vand.u32 8388607, %v6907_v20  ;;  %v3894_v16 = vand.u32 2139095040, %v13863_v5 }
 0x687   :  { %v3780_v19 = vxor.u32 2147483648, %v8386_v42  ;;  %v7083_v12 = vsub.s32 32, %v7082_v50  ;;  %v7087_v27 = vsub.s32 4294967266, %v7082_v50  ;;  %v7084_v37 = vshll.u32 %v13837_v36, %v7082_v50 }
 0x688   :  { %v3784_v32 = vsel %vm3782_vm15, %v3783_v35, %v8386_v42  ;;  %v3638_v29 = vsel %vm3636_vm7, %v3637_v6, %v13844_v48  ;;  %v6917_v1 = vadd.s32 1, %v7697_v9  ;;  %vm3775_vm6 = vweird.f32 %v13471_v30 }
 0x689   :  { %v3781_v44 = vsel %vm3779_vm13, %v8384_v28, %v3780_v19  ;;  %v7085_v45 = vshrl.u32 %v7067_v7, %v7083_v12  ;;  %v7088_v49 = vadd.s32 127, %v7087_v27  ;;  %v3639_v61 = vadd.s32 %v3638_v29, %v3634_v62 }
 0x68a   :  { %v3785_v4 = vsel %vm3778_vm11, %v3781_v44, %v3784_v32  ;;  %v7104_v56 = vadd.s32 3, %v7100_v52  ;;  %vm6918_vm5 = vcmp.gt.s32.totalorder %v6917_v1, 0  ;;  %v6915_v58 = vor.u32 8388608, %v6914_v22 }
 0x68b   :  { %v3786_v38 = vsel %vm3775_vm6, nan, %v3785_v4  ;;  %v7086_v15 = vor.u32 %v7085_v45, %v7084_v37  ;;  %v7089_v3 = vshll.u32 %v7088_v49, 23  ;;  %v3640_v36 = vadd.s32 536870912, %v3639_v61 }
 0x68c   :  { %7353 = vst.msk [vmem:[%s14271_s3 + $0xe8] sm:$0xff] %vm7323_vm14, %v3786_v38  ;;  %v6919_v25 = vsel %vm6918_vm5, %v6917_v1, 0  ;;  %v3895_v26 = vshrl.u32 %v3894_v16, 23  ;;  %v13889_v10 = vand.u32 3, %v7104_v56  ;;  %vm3581_vm3 = vcmp.lt.s32.totalorder %v13709_v60, 0 }
 0x68d   :  { %v7090_v63 = vor.u32 4788187, %v7089_v3  ;;  %v3641_v54 = vshrl.u32 %v3640_v36, 30  ;;  %v6921_v30 = vand.u32 31, %v6919_v25  ;;  %v7093_v14 = vcvt.s32.f32 %v7086_v15 }
 0x68e   :  { %v3635_v48 = vadd.s32 %v13843_v11, %v13852_v18  ;;  %v13893_v21 = vshll.u32 %v6915_v58, 8  ;;  %v3891_v59 = vand.u32 2147483647, %v13863_v5  ;;  %v6920_v31 = vshrl.u32 %v6919_v25, 5 }
 0x68f   :  { %v7091_v41 = vand.u32 2147483647, %v7090_v63  ;;  %v3642_v13 = vshll.u32 %v3641_v54, 30  ;;  %v6922_v43 = vsub.s32 32, %v6921_v30  ;;  %v7581_v8 = vadd.s32 4294967169, %v3895_v26 }
 0x690   :  { %v3665_v6 = vsub.s32 4, %v3641_v54  ;;  %v6924_v9 = vshll.u32 %v8425_v47, %v6921_v30  ;;  %vm13903_vm10 = vcmp.le.f32.partialorder %v3579_v2, 0.7853982  ;;  %v6927_v62 = vshll.u32 %v8426_v51, %v6921_v30 }
 0x691   :  { %v7094_v17 = vmul.f32 %v7093_v14, %v7091_v41  ;;  %v13896_v46 = vsub.s32 %v3639_v61, %v3642_v13  ;;  %v6925_v28 = vshrl.u32 %v8426_v51, %v6922_v43  ;;  %v6928_v7 = vshrl.u32 %v8427_v53, %v6922_v43 }
 0x692   :  { %v6931_v42 = vshrl.u32 %v8428_v55, %v6922_v43  ;;  %v6930_v50 = vshll.u32 %v8427_v53, %v6921_v30  ;;  %v6933_v22 = vshll.u32 %v8428_v55, %v6921_v30  ;;  %v6934_v19 = vshrl.u32 %v8429_v57, %v6922_v43 }
 0x693   :  { %v7095_v52 = vxor.u32 2147483648, %v7094_v17  ;;  %v3645_v18 = vsub.s32 0, %v13896_v46  ;;  %v6926_v35 = vor.u32 %v6925_v28, %v6924_v9  ;;  %v6929_v27 = vor.u32 %v6928_v7, %v6927_v62 }
 0x694   :  { %v6936_v16 = vshll.u32 %v8429_v57, %v6921_v30  ;;  %v6932_v37 = vor.u32 %v6931_v42, %v6930_v50  ;;  %v6935_v29 = vor.u32 %v6934_v19, %v6933_v22  ;;  %v6937_v1 = vshrl.u32 %v8430_v0, %v6922_v43 }
 0x695   :  { %v7096_v12 = vsel %vm7013_vm12, %v7095_v52, %v7094_v17  ;;  %v7570_v2 = vmin.u32 %v3645_v18, %v13896_v46  ;;  %vm6939_vm8 = vcmp.lt.s32.totalorder %v6920_v31, 1  ;;  %v3901_v45 = vadd.s32 1, %v7581_v8 }
 0x696   :  { %v7099_v32 = vsel %vm13857_vm2, %v13692_v23, %v7096_v12  ;;  %v3666_v49 = vsel %vm3581_vm3, %v3665_v6, %v3641_v54  ;;  %v6923_v61 = vshrl.u32 %v8425_v47, %v6922_v43  ;;  %v6938_v4 = vor.u32 %v6937_v1, %v6936_v16 }
 0x697   :  { %8387 = vcosq.f32 %v7099_v32  ;;  %v3647_v44 = vclz %v7570_v2  ;;  %vm6941_vm12 = vcmp.lt.s32.totalorder %v6920_v31, 3  ;;  %vm6942_vm0 = vcmp.lt.s32.totalorder %v6920_v31, 4 }
 0x698   :  { %8389 = vsinq.f32 %v7099_v32  ;;  %v6947_v39 = vsel %vm6939_vm8, %v6926_v35, %v6929_v27  ;;  %v6944_v38 = vsel %vm6942_vm0, %v6932_v37, 2102212464  ;;  %v6948_v15 = vsel %vm6942_vm0, %v6935_v29, 920167782 }
 0x699   :  { %v7571_v56 = vadd.s32 4294967294, %v3647_v44  ;;  %v6951_v3 = vsel %vm6939_vm8, %v6929_v27, %v6932_v37  ;;  %v6952_v36 = vsel %vm6942_vm0, %v6938_v4, 1326507024  ;;  %vm6940_vm9 = vcmp.lt.s32.totalorder %v6920_v31, 2  ;;  %v13959_v44 = vld [vmem:[%s14270_s2] ss:$0 sm:$0xff] }
 0x69a   :  { %v6949_v58 = vsel %vm6941_vm12, %v6932_v37, %v6948_v15  ;;  %v6953_v25 = vsel %vm6941_vm12, %v6935_v29, %v6952_v36  ;;  %v3668_v54 = vsel %vm13903_vm10, 0, %v3666_v49  ;;  %vm7106_vm11 = vcmp.lt.s32.totalorder %v13889_v10, 2 }
 0x69b   :  { %vm7572_vm1 = vcmp.lt.s32.totalorder %v7571_v56, 0  ;;  %v6950_v26 = vsel %vm6940_vm9, %v6947_v39, %v6949_v58  ;;  %v6954_v30 = vsel %vm6940_vm9, %v6951_v3, %v6953_v25  ;;  %v6943_v13 = vsel %vm6939_vm8, %v6923_v61, %v6926_v35 }
 0x69c   :  { %v3650_v63 = vsel %vm7572_vm1, 0, %v7571_v56  ;;  %v6945_v43 = vsel %vm6941_vm12, %v6929_v27, %v6944_v38  ;;  %vm7103_vm2 = vweird.f32 %v13692_v23  ;;  %vm3902_vm13 = vcmp.gt.s32.totalorder %v3901_v45, 0 }
 0x69d   :  { %v3651_v41 = vsub.s32 32, %v3650_v63  ;;  %v3655_v14 = vsub.s32 4294967266, %v3650_v63  ;;  %v13937_v17 = vmul.u32.u64.low %v13893_v21, %v6954_v30  ;;  %v13938_v8 = vmul.u32.u64.high %v13893_v21, %v6954_v30, %v13937_v17 }
 0x69e   :  { %v13941_v6 = vmul.u32.u64.low %v13893_v21, %v6950_v26  ;;  %v13942_v9 = vmul.u32.u64.high %v13893_v21, %v6950_v26, %v13941_v6  ;;  %v3652_v28 = vshll.u32 %v13896_v46, %v3650_v63  ;;  %vm7107_vm15 = vcmp.eq.s32.totalorder %v13889_v10, 0 }
 0x69f   :  { %v3653_v7 = vshrl.u32 %v3635_v48, %v3651_v41  ;;  %v3656_v52 = vadd.s32 127, %v3655_v14  ;;  %v6946_v18 = vsel %vm6940_vm9, %v6943_v13, %v6945_v43  ;;  %v3898_v62 = vand.u32 8388607, %v3891_v59 }
 0x6a0   :  { %v3903_v42 = vsel %vm3902_vm13, %v3901_v45, 0  ;;  %vm7110_vm4 = vcmp.eq.s32.totalorder %v13889_v10, 2  ;;  %v3672_v46 = vadd.s32 3, %v3668_v54  ;;  %vm6964_vm7 = vc.u32 %v13938_v8, %v13941_v6 }
 0x6a1   :  { %v8388_v35 = vpop.eup %8387  ;;  %v3654_v50 = vor.u32 %v3653_v7, %v3652_v28  ;;  %v3657_v22 = vshll.u32 %v3656_v52, 23  ;;  %v3905_v19 = vand.u32 31, %v3903_v42  ;;  %v6965_v48 = vadd.s32 1, %v13942_v9 }
 0x6a2   :  { %v8390_v12 = vpop.eup %8389  ;;  %v7111_v2 = vxor.u32 2147483648, %v8388_v35  ;;  %v6962_v16 = vmul.u32 %v13893_v21, %v6946_v18  ;;  %v3899_v1 = vor.u32 8388608, %v3898_v62  ;;  %v13963_v45 = vadd.f32 %v13959_v44, %v13512_v34 }
 0x6a3   :  { %v7108_v31 = vxor.u32 2147483648, %v8390_v12  ;;  %v3658_v27 = vor.u32 4788187, %v3657_v22  ;;  %v3906_v32 = vsub.s32 32, %v3905_v19  ;;  %v6966_v29 = vsel %vm6964_vm7, %v6965_v48, %v13942_v9 }
 0x6a4   :  { %v7112_v37 = vsel %vm7110_vm4, %v7111_v2, %v8390_v12  ;;  %v3661_v4 = vcvt.s32.f32 %v3654_v50  ;;  %v6967_v21 = vadd.s32 %v6966_v29, %v6962_v16  ;;  %v13969_v39 = vand.u32 3, %v3672_v46 }
 0x6a5   :  { %v7109_v49 = vsel %vm7107_vm15, %v8388_v35, %v7108_v31  ;;  %v3659_v61 = vand.u32 2147483647, %v3658_v27  ;;  %v3909_v38 = vshrl.u32 %v8426_v51, %v3906_v32  ;;  %v3912_v15 = vshrl.u32 %v8427_v53, %v3906_v32 }
 0x6a6   :  { %v7113_v56 = vsel %vm7106_vm11, %v7109_v49, %v7112_v37  ;;  %v6968_v36 = vadd.s32 536870912, %v6967_v21  ;;  %v3904_v58 = vshrl.u32 %v3903_v42, 5  ;;  %vm6909_vm6 = vcmp.lt.s32.totalorder %v13744_v33, 0 }
 0x6a7   :  { %v7114_v3 = vsel %vm7103_vm2, nan, %v7113_v56  ;;  %v3662_v34 = vmul.f32 %v3661_v4, %v3659_v61  ;;  %v3908_v10 = vshll.u32 %v8425_v47, %v3905_v19  ;;  %v3911_v25 = vshll.u32 %v8426_v51, %v3905_v19 }
 0x6a8   :  { %7385 = vst.msk [vmem:[%s14271_s3 + $0x1e8] sm:$0xff] %vm7323_vm14, %v7114_v3  ;;  %v3915_v63 = vshrl.u32 %v8428_v55, %v3906_v32  ;;  %v3918_v54 = vshrl.u32 %v8429_v57, %v3906_v32  ;;  %v6969_v26 = vshrl.u32 %v6968_v36, 30  ;;  %v3914_v30 = vshll.u32 %v8427_v53, %v3905_v19 }
 0x6a9   :  { %v3663_v23 = vxor.u32 2147483648, %v3662_v34  ;;  %v3917_v41 = vshll.u32 %v8428_v55, %v3905_v19  ;;  %v3910_v14 = vor.u32 %v3909_v38, %v3908_v10  ;;  %v3913_v13 = vor.u32 %v3912_v15, %v3911_v25 }
 0x6aa   :  { %v3920_v43 = vshll.u32 %v8429_v57, %v3905_v19  ;;  %v3921_v17 = vshrl.u32 %v8430_v0, %v3906_v32  ;;  %v6970_v28 = vshll.u32 %v6969_v26, 30  ;;  %v13990_v52 = vshll.u32 %v3899_v1, 8 }
 0x6ab   :  { %v3664_v9 = vsel %vm3581_vm3, %v3663_v23, %v3662_v34  ;;  %v3919_v7 = vor.u32 %v3918_v54, %v3917_v41  ;;  %v3916_v62 = vor.u32 %v3915_v63, %v3914_v30  ;;  %v7222_v35 = vand.u32 2139095040, %v13963_v45 }
 0x6ac   :  { %v3667_v18 = vsel %vm13903_vm10, %v13709_v60, %v3664_v9  ;;  %v3922_v42 = vor.u32 %v3921_v17, %v3920_v43  ;;  %v13996_v50 = vsub.s32 %v6967_v21, %v6970_v28  ;;  %v6993_v22 = vsub.s32 4, %v6969_v26 }
 0x6ad   :  { %8391 = vcosq.f32 %v3667_v18  ;;  %vm3923_vm5 = vcmp.lt.s32.totalorder %v3904_v58, 1  ;;  %v3907_v19 = vshrl.u32 %v8425_v47, %v3906_v32  ;;  %vm3926_vm3 = vcmp.lt.s32.totalorder %v3904_v58, 4 }
 0x6ae   :  { %8393 = vsinq.f32 %v3667_v18  ;;  %v3931_v12 = vsel %vm3923_vm5, %v3910_v14, %v3913_v13  ;;  %v6973_v2 = vsub.s32 0, %v13996_v50  ;;  %vm3924_vm8 = vcmp.lt.s32.totalorder %v3904_v58, 2 }
 0x6af   :  { %vm3925_vm12 = vcmp.lt.s32.totalorder %v3904_v58, 3  ;;  %v3932_v11 = vsel %vm3926_vm3, %v3919_v7, 920167782  ;;  %v3928_v46 = vsel %vm3926_vm3, %v3916_v62, 2102212464  ;;  %v3935_v31 = vsel %vm3923_vm5, %v3913_v13, %v3916_v62 }
 0x6b0   :  { %v3933_v48 = vsel %vm3925_vm12, %v3916_v62, %v3932_v11  ;;  %v3936_v27 = vsel %vm3926_vm3, %v3922_v42, 1326507024  ;;  %v7698_v16 = vmin.u32 %v6973_v2, %v13996_v50  ;;  %v6994_v37 = vsel %vm6909_vm6, %v6993_v22, %v6969_v26 }
 0x6b1   :  { %v3934_v32 = vsel %vm3924_vm8, %v3931_v12, %v3933_v48  ;;  %v3937_v29 = vsel %vm3925_vm12, %v3919_v7, %v3936_v27  ;;  %v7223_v4 = vshrl.u32 %v7222_v35, 23  ;;  %v3927_v56 = vsel %vm3923_vm5, %v3907_v19, %v3910_v14 }
 0x6b2   :  { %v3938_v1 = vsel %vm3924_vm8, %v3935_v31, %v3937_v29  ;;  %v14008_v49 = vmul.u32.u64.low %v13990_v52, %v3934_v32  ;;  %v14009_v61 = vmul.u32.u64.high %v13990_v52, %v3934_v32, %v14008_v49  ;;  %v6975_v21 = vclz %v7698_v16 }
 0x6b3   :  { %v3929_v38 = vsel %vm3925_vm12, %v3913_v13, %v3928_v46  ;;  %vm3671_vm10 = vweird.f32 %v13709_v60  ;;  %vm14015_vm0 = vcmp.le.f32.partialorder %v6907_v20, 0.7853982  ;;  %v7709_v36 = vadd.s32 4294967169, %v7223_v4 }
 0x6b4   :  { %v14020_v3 = vmul.u32.u64.low %v13990_v52, %v3938_v1  ;;  %v14021_v34 = vmul.u32.u64.high %v13990_v52, %v3938_v1, %v14020_v3  ;;  %v7699_v10 = vadd.s32 4294967294, %v6975_v21  ;;  %v6996_v25 = vsel %vm14015_vm0, 0, %v6994_v37 }
 0x6b5   :  { %v7219_v63 = vand.u32 2147483647, %v13963_v45  ;;  %v14028_v54 = vadd.f32 %v13959_v44, %v13608_v40  ;;  %vm3674_vm1 = vcmp.lt.s32.totalorder %v13969_v39, 2  ;;  %v3930_v20 = vsel %vm3924_vm8, %v3927_v56, %v3929_v38 }
 0x6b6   :  { %v3949_v23 = vadd.s32 1, %v14009_v61  ;;  %v7229_v26 = vadd.s32 1, %v7709_v36  ;;  %vm3675_vm9 = vcmp.eq.s32.totalorder %v13969_v39, 0  ;;  %vm3678_vm11 = vcmp.eq.s32.totalorder %v13969_v39, 2 }
 0x6b7   :  { %v8392_v30 = vpop.eup %8391  ;;  %v6963_v41 = vadd.s32 %v13941_v6, %v13938_v8  ;;  %vm7700_vm2 = vcmp.lt.s32.totalorder %v7699_v10, 0  ;;  %v7000_v43 = vadd.s32 3, %v6996_v25  ;;  %vm3948_vm13 = vc.u32 %v14021_v34, %v14008_v49 }
 0x6b8   :  { %v8394_v14 = vpop.eup %8393  ;;  %v3679_v13 = vxor.u32 2147483648, %v8392_v30  ;;  %v6978_v40 = vsel %vm7700_vm2, 0, %v7699_v10  ;;  %v3946_v28 = vmul.u32 %v13990_v52, %v3930_v20  ;;  %v3950_v62 = vsel %vm3948_vm13, %v3949_v23, %v14009_v61 }
 0x6b9   :  { %v3676_v58 = vxor.u32 2147483648, %v8394_v14  ;;  %v6979_v17 = vsub.s32 32, %v6978_v40  ;;  %v6983_v9 = vsub.s32 4294967266, %v6978_v40  ;;  %v6980_v18 = vshll.u32 %v13996_v50, %v6978_v40 }
 0x6ba   :  { %v3680_v7 = vsel %vm3678_vm11, %v3679_v13, %v8394_v14  ;;  %vm7230_vm15 = vcmp.gt.s32.totalorder %v7229_v26, 0  ;;  %v3951_v35 = vadd.s32 %v3950_v62, %v3946_v28  ;;  %v7226_v19 = vand.u32 8388607, %v7219_v63 }
 0x6bb   :  { %v3677_v8 = vsel %vm3675_vm9, %v8392_v30, %v3676_v58  ;;  %v6981_v6 = vshrl.u32 %v6963_v41, %v6979_v17  ;;  %v6984_v42 = vadd.s32 127, %v6983_v9  ;;  %v7231_v12 = vsel %vm7230_vm15, %v7229_v26, 0 }
 0x6bc   :  { %v3681_v22 = vsel %vm3674_vm1, %v3677_v8, %v3680_v7  ;;  %v3787_v52 = vand.u32 2147483647, %v14028_v54  ;;  %v3952_v46 = vadd.s32 536870912, %v3951_v35  ;;  %v7233_v48 = vand.u32 31, %v7231_v12 }
 0x6bd   :  { %v3682_v50 = vsel %vm3671_vm10, nan, %v3681_v22  ;;  %v6982_v2 = vor.u32 %v6981_v6, %v6980_v18  ;;  %v6985_v11 = vshll.u32 %v6984_v42, 23  ;;  %v14056_v27 = vand.u32 3, %v7000_v43 }
 0x6be   :  { %7352 = vst.msk [vmem:[%s14271_s3 + $0xe0] sm:$0xff] %vm7323_vm14, %v3682_v50  ;;  %v14054_v31 = vshrl.u32 %v3952_v46, 30  ;;  %v7227_v16 = vor.u32 8388608, %v7226_v19  ;;  %v7234_v37 = vsub.s32 32, %v7233_v48  ;;  %v3790_v32 = vand.u32 2139095040, %v14028_v54 }
 0x6bf   :  { %v6986_v39 = vor.u32 4788187, %v6985_v11  ;;  %v6989_v29 = vcvt.s32.f32 %v6982_v2  ;;  %v14062_v61 = vand.u32 8388607, %v3787_v52  ;;  %v3947_v4 = vadd.s32 %v14008_v49, %v14021_v34 }
 0x6c0   :  { %v3954_v1 = vshll.u32 %v14054_v31, 30  ;;  %v7237_v21 = vshrl.u32 %v8426_v51, %v7234_v37  ;;  %v7240_v56 = vshrl.u32 %v8427_v53, %v7234_v37  ;;  %v7243_v38 = vshrl.u32 %v8428_v55, %v7234_v37 }
 0x6c1   :  { %v6987_v60 = vand.u32 2147483647, %v6986_v39  ;;  %v7236_v10 = vshll.u32 %v8425_v47, %v7233_v48  ;;  %v7246_v25 = vshrl.u32 %v8429_v57, %v7234_v37  ;;  %v7232_v20 = vshrl.u32 %v7231_v12, 5 }
 0x6c2   :  { %v14068_v36 = vsub.s32 %v3951_v35, %v3954_v1  ;;  %v7239_v23 = vshll.u32 %v8426_v51, %v7233_v48  ;;  %v7242_v26 = vshll.u32 %v8427_v53, %v7233_v48  ;;  %v3791_v30 = vshrl.u32 %v3790_v32, 23 }
 0x6c3   :  { %v6990_v3 = vmul.f32 %v6989_v29, %v6987_v60  ;;  %v7238_v41 = vor.u32 %v7237_v21, %v7236_v10  ;;  %v7245_v14 = vshll.u32 %v8428_v55, %v7233_v48  ;;  %v7248_v43 = vshll.u32 %v8429_v57, %v7233_v48 }
 0x6c4   :  { %v3957_v34 = vsub.s32 0, %v14068_v36  ;;  %v7241_v13 = vor.u32 %v7240_v56, %v7239_v23  ;;  %v7244_v40 = vor.u32 %v7243_v38, %v7242_v26  ;;  %v7249_v58 = vshrl.u32 %v8430_v0, %v7234_v37 }
 0x6c5   :  { %v6991_v49 = vxor.u32 2147483648, %v6990_v3  ;;  %v7247_v28 = vor.u32 %v7246_v25, %v7245_v14  ;;  %v14081_v7 = vshll.u32 %v7227_v16, 8  ;;  %v7235_v62 = vshrl.u32 %v8425_v47, %v7234_v37 }
 0x6c6   :  { %v7582_v9 = vmin.u32 %v3957_v34, %v14068_v36  ;;  %v7250_v8 = vor.u32 %v7249_v58, %v7248_v43  ;;  %v7577_v6 = vadd.s32 4294967169, %v3791_v30  ;;  %vm7251_vm4 = vcmp.lt.s32.totalorder %v7232_v20, 1 }
 0x6c7   :  { %v6992_v17 = vsel %vm6909_vm6, %v6991_v49, %v6990_v3  ;;  %vm7254_vm7 = vcmp.lt.s32.totalorder %v7232_v20, 4  ;;  %vm3893_vm6 = vcmp.lt.s32.totalorder %v13863_v5, 0  ;;  %vm7252_vm5 = vcmp.lt.s32.totalorder %v7232_v20, 2 }
 0x6c8   :  { %v6995_v18 = vsel %vm14015_vm0, %v13744_v33, %v6992_v17  ;;  %v3959_v42 = vclz %v7582_v9  ;;  %v7256_v35 = vsel %vm7254_vm7, %v7244_v40, 2102212464  ;;  %v7259_v22 = vsel %vm7251_vm4, %v7238_v41, %v7241_v13 }
 0x6c9   :  { %8395 = vcosq.f32 %v6995_v18  ;;  %vm7253_vm3 = vcmp.lt.s32.totalorder %v7232_v20, 3  ;;  %v7260_v12 = vsel %vm7254_vm7, %v7247_v28, 920167782  ;;  %v7263_v50 = vsel %vm7251_vm4, %v7241_v13, %v7244_v40 }
 0x6ca   :  { %8397 = vsinq.f32 %v6995_v18  ;;  %v7583_v19 = vadd.s32 4294967294, %v3959_v42  ;;  %v7255_v15 = vsel %vm7251_vm4, %v7235_v62, %v7238_v41  ;;  %v7261_v2 = vsel %vm7253_vm3, %v7244_v40, %v7260_v12 }
 0x6cb   :  { %v7264_v11 = vsel %vm7254_vm7, %v7250_v8, 1326507024  ;;  %v3797_v46 = vadd.s32 1, %v7577_v6  ;;  %v7257_v48 = vsel %vm7253_vm3, %v7241_v13, %v7256_v35  ;;  %v7262_v39 = vsel %vm7252_vm5, %v7259_v22, %v7261_v2 }
 0x6cc   :  { %vm7584_vm8 = vcmp.lt.s32.totalorder %v7583_v19, 0  ;;  %v7265_v16 = vsel %vm7253_vm3, %v7247_v28, %v7264_v11  ;;  %v14091_v60 = vmul.u32.u64.low %v14081_v7, %v7262_v39  ;;  %v14092_v29 = vmul.u32.u64.high %v14081_v7, %v7262_v39, %v14091_v60 }
 0x6cd   :  { %v3962_v37 = vsel %vm7584_vm8, 0, %v7583_v19  ;;  %v7266_v32 = vsel %vm7252_vm5, %v7263_v50, %v7265_v16  ;;  %v3977_v56 = vsub.s32 4, %v14054_v31  ;;  %vm3798_vm12 = vcmp.gt.s32.totalorder %v3797_v46, 0 }
 0x6ce   :  { %v3963_v1 = vsub.s32 32, %v3962_v37  ;;  %v3967_v21 = vsub.s32 4294967266, %v3962_v37  ;;  %vm6999_vm10 = vweird.f32 %v13744_v33  ;;  %v7258_v38 = vsel %vm7252_vm5, %v7255_v15, %v7257_v48 }
 0x6cf   :  { %v14099_v3 = vmul.u32.u64.low %v14081_v7, %v7266_v32  ;;  %v14100_v10 = vmul.u32.u64.high %v14081_v7, %v7266_v32, %v14099_v3  ;;  %v3799_v25 = vsel %vm3798_vm12, %v3797_v46, 0  ;;  %v3964_v23 = vshll.u32 %v14068_v36, %v3962_v37 }
 0x6d0   :  { %v3965_v26 = vshrl.u32 %v3947_v4, %v3963_v1  ;;  %v3968_v30 = vadd.s32 127, %v3967_v21  ;;  %v3801_v49 = vand.u32 31, %v3799_v25  ;;  %vm7002_vm0 = vcmp.lt.s32.totalorder %v14056_v27, 2 }
 0x6d1   :  { %vm7003_vm1 = vcmp.eq.s32.totalorder %v14056_v27, 0  ;;  %vm14107_vm9 = vcmp.le.f32.partialorder %v3891_v59, 0.7853982  ;;  %v7277_v20 = vadd.s32 1, %v14092_v29  ;;  %vm7006_vm11 = vcmp.eq.s32.totalorder %v14056_v27, 2 }
 0x6d2   :  { %v3966_v14 = vor.u32 %v3965_v26, %v3964_v23  ;;  %v3969_v36 = vshll.u32 %v3968_v30, 23  ;;  %v3978_v4 = vsel %vm3893_vm6, %v3977_v56, %v14054_v31  ;;  %v7274_v43 = vmul.u32 %v14081_v7, %v7258_v38 }
 0x6d3   :  { %v8396_v41 = vpop.eup %8395  ;;  %vm7276_vm2 = vc.u32 %v14100_v10, %v14091_v60  ;;  %v3802_v59 = vsub.s32 32, %v3801_v49  ;;  %v3795_v28 = vor.u32 8388608, %v14062_v61  ;;  %v3980_v62 = vsel %vm14107_vm9, 0, %v3978_v4 }
 0x6d4   :  { %v8398_v13 = vpop.eup %8397  ;;  %v7007_v40 = vxor.u32 2147483648, %v8396_v41  ;;  %v3970_v17 = vor.u32 4788187, %v3969_v36  ;;  %v7278_v9 = vsel %vm7276_vm2, %v7277_v20, %v14092_v29  ;;  %v14125_v31 = vadd.f32 %v13959_v44, %v13694_v24 }
 0x6d5   :  { %v7004_v58 = vxor.u32 2147483648, %v8398_v13  ;;  %v7279_v8 = vadd.s32 %v7278_v9, %v7274_v43  ;;  %v3973_v42 = vcvt.s32.f32 %v3966_v14  ;;  %v3800_v35 = vshrl.u32 %v3799_v25, 5 }
 0x6d6   :  { %v7008_v18 = vsel %vm7006_vm11, %v7007_v40, %v8398_v13  ;;  %v3971_v6 = vand.u32 2147483647, %v3970_v17  ;;  %v3805_v61 = vshrl.u32 %v8426_v51, %v3802_v59  ;;  %v3808_v12 = vshrl.u32 %v8427_v53, %v3802_v59 }
 0x6d7   :  { %v7005_v7 = vsel %vm7003_vm1, %v8396_v41, %v7004_v58  ;;  %v7280_v19 = vadd.s32 536870912, %v7279_v8  ;;  %v3804_v24 = vshll.u32 %v8425_v47, %v3801_v49  ;;  %v3811_v44 = vshrl.u32 %v8428_v55, %v3802_v59 }
 0x6d8   :  { %v7009_v22 = vsel %vm7002_vm0, %v7005_v7, %v7008_v18  ;;  %v3974_v15 = vmul.f32 %v3973_v42, %v3971_v6  ;;  %v3807_v2 = vshll.u32 %v8426_v51, %v3801_v49  ;;  %v3810_v11 = vshll.u32 %v8427_v53, %v3801_v49 }
 0x6d9   :  { %v7010_v50 = vsel %vm6999_vm10, nan, %v7009_v22  ;;  %v14141_v27 = vshrl.u32 %v7280_v19, 30  ;;  %v3814_v46 = vshrl.u32 %v8429_v57, %v3802_v59  ;;  %v3813_v48 = vshll.u32 %v8428_v55, %v3801_v49 }
 0x6da   :  { %7384 = vst.msk [vmem:[%s14271_s3 + $0x1e0] sm:$0xff] %vm7323_vm14, %v7010_v50  ;;  %v3975_v33 = vxor.u32 2147483648, %v3974_v15  ;;  %v3816_v39 = vshll.u32 %v8429_v57, %v3801_v49  ;;  %v3817_v16 = vshrl.u32 %v8430_v0, %v3802_v59  ;;  %v3806_v32 = vor.u32 %v3805_v61, %v3804_v24 }
 0x6db   :  { %v7282_v37 = vshll.u32 %v14141_v27, 30  ;;  %v3809_v29 = vor.u32 %v3808_v12, %v3807_v2  ;;  %v14150_v1 = vshll.u32 %v3795_v28, 8  ;;  %v3812_v56 = vor.u32 %v3811_v44, %v3810_v11 }
 0x6dc   :  { %v3976_v21 = vsel %vm3893_vm6, %v3975_v33, %v3974_v15  ;;  %v3815_v38 = vor.u32 %v3814_v46, %v3813_v48  ;;  %v3818_v3 = vor.u32 %v3817_v16, %v3816_v39  ;;  %v3984_v23 = vadd.s32 3, %v3980_v62 }
 0x6dd   :  { %v3979_v25 = vsel %vm14107_vm9, %v13863_v5, %v3976_v21  ;;  %v7283_v26 = vsub.s32 %v7279_v8, %v7282_v37  ;;  %v7118_v30 = vand.u32 2139095040, %v14125_v31  ;;  %v3803_v49 = vshrl.u32 %v8425_v47, %v3802_v59 }
 0x6de   :  { %8399 = vcosq.f32 %v3979_v25  ;;  %vm3819_vm13 = vcmp.lt.s32.totalorder %v3800_v35, 1  ;;  %vm3821_vm15 = vcmp.lt.s32.totalorder %v3800_v35, 3  ;;  %vm3822_vm4 = vcmp.lt.s32.totalorder %v3800_v35, 4 }
 0x6df   :  { %8401 = vsinq.f32 %v3979_v25  ;;  %v7285_v20 = vsub.s32 0, %v7283_v26  ;;  %v3827_v41 = vsel %vm3819_vm13, %v3806_v32, %v3809_v29  ;;  %v3824_v14 = vsel %vm3822_vm4, %v3812_v56, 2102212464 }
 0x6e0   :  { %v3828_v36 = vsel %vm3822_vm4, %v3815_v38, 920167782  ;;  %v3831_v4 = vsel %vm3819_vm13, %v3809_v29, %v3812_v56  ;;  %v3832_v34 = vsel %vm3822_vm4, %v3818_v3, 1326507024  ;;  %vm3820_vm7 = vcmp.lt.s32.totalorder %v3800_v35, 2 }
 0x6e1   :  { %v7710_v13 = vmin.u32 %v7285_v20, %v7283_v26  ;;  %v3829_v40 = vsel %vm3821_vm15, %v3812_v56, %v3828_v36  ;;  %v3833_v43 = vsel %vm3821_vm15, %v3815_v38, %v3832_v34  ;;  %v3985_v58 = vand.u32 3, %v3984_v23 }
 0x6e2   :  { %v3830_v59 = vsel %vm3820_vm7, %v3827_v41, %v3829_v40  ;;  %v3834_v17 = vsel %vm3820_vm7, %v3831_v4, %v3833_v43  ;;  %v7119_v9 = vshrl.u32 %v7118_v30, 23  ;;  %v3823_v18 = vsel %vm3819_vm13, %v3803_v49, %v3806_v32 }
 0x6e3   :  { %v7287_v28 = vclz %v7710_v13  ;;  %v3825_v62 = vsel %vm3821_vm15, %v3809_v29, %v3824_v14  ;;  %v14168_v8 = vmul.u32.u64.low %v14150_v1, %v3834_v17  ;;  %v14169_v7 = vmul.u32.u64.high %v14150_v1, %v3834_v17, %v14168_v8 }
 0x6e4   :  { %v14172_v6 = vmul.u32.u64.low %v14150_v1, %v3830_v59  ;;  %v14173_v42 = vmul.u32.u64.high %v14150_v1, %v3830_v59, %v14172_v6  ;;  %v7705_v19 = vadd.s32 4294967169, %v7119_v9  ;;  %vm3983_vm6 = vweird.f32 %v13863_v5 }
 0x6e5   :  { %v7711_v22 = vadd.s32 4294967294, %v7287_v28  ;;  %vm3987_vm5 = vcmp.eq.s32.totalorder %v3985_v58, 0  ;;  %v3826_v61 = vsel %vm3820_vm7, %v3823_v18, %v3825_v62  ;;  %vm3990_vm3 = vcmp.eq.s32.totalorder %v3985_v58, 2 }
 0x6e6   :  { %v7275_v12 = vadd.s32 %v14091_v60, %v14100_v10  ;;  %v7125_v50 = vadd.s32 1, %v7705_v19  ;;  %v7305_v44 = vsub.s32 4, %v14141_v27  ;;  %vm3844_vm12 = vc.u32 %v14169_v7, %v14172_v6 }
 0x6e7   :  { %vm7712_vm8 = vcmp.lt.s32.totalorder %v7711_v22, 0  ;;  %v3845_v2 = vadd.s32 1, %v14173_v42  ;;  %v3842_v48 = vmul.u32 %v14150_v1, %v3826_v61  ;;  %vm3986_vm0 = vcmp.lt.s32.totalorder %v3985_v58, 2 }
 0x6e8   :  { %v8400_v15 = vpop.eup %8399  ;;  %v7290_v24 = vsel %vm7712_vm8, 0, %v7711_v22  ;;  %vm7126_vm10 = vcmp.gt.s32.totalorder %v7125_v50, 0  ;;  %v7115_v56 = vand.u32 2147483647, %v14125_v31  ;;  %vm7221_vm1 = vcmp.lt.s32.totalorder %v13963_v45, 0 }
 0x6e9   :  { %v8402_v11 = vpop.eup %8401  ;;  %v3991_v46 = vxor.u32 2147483648, %v8400_v15  ;;  %v7291_v33 = vsub.s32 32, %v7290_v24  ;;  %v7295_v35 = vsub.s32 4294967266, %v7290_v24  ;;  %v7292_v16 = vshll.u32 %v7283_v26, %v7290_v24 }
 0x6ea   :  { %v3988_v39 = vxor.u32 2147483648, %v8402_v11  ;;  %v3846_v60 = vsel %vm3844_vm12, %v3845_v2, %v14173_v42  ;;  %v7127_v38 = vsel %vm7126_vm10, %v7125_v50, 0  ;;  %v7306_v20 = vsel %vm7221_vm1, %v7305_v44, %v14141_v27 }
 0x6eb   :  { %v3992_v10 = vsel %vm3990_vm3, %v3991_v46, %v8402_v11  ;;  %v7293_v37 = vshrl.u32 %v7275_v12, %v7291_v33  ;;  %v7296_v32 = vadd.s32 127, %v7295_v35  ;;  %v3847_v29 = vadd.s32 %v3846_v60, %v3842_v48 }
 0x6ec   :  { %v3989_v21 = vsel %vm3987_vm5, %v8400_v15, %v3988_v39  ;;  %v7129_v30 = vand.u32 31, %v7127_v38  ;;  %v7122_v14 = vand.u32 8388607, %v7115_v56  ;;  %vm14205_vm9 = vcmp.le.f32.partialorder %v7219_v63, 0.7853982 }
 0x6ed   :  { %v3993_v3 = vsel %vm3986_vm0, %v3989_v21, %v3992_v10  ;;  %v7294_v25 = vor.u32 %v7293_v37, %v7292_v16  ;;  %v7297_v23 = vshll.u32 %v7296_v32, 23  ;;  %v3848_v1 = vadd.s32 536870912, %v3847_v29 }
 0x6ee   :  { %v3994_v26 = vsel %vm3983_vm6, nan, %v3993_v3  ;;  %v7130_v5 = vsub.s32 32, %v7129_v30  ;;  %v7308_v40 = vsel %vm14205_vm9, 0, %v7306_v20  ;;  %v7132_v63 = vshll.u32 %v8425_v47, %v7129_v30 }
 0x6ef   :  { %7355 = vst.msk [vmem:[%s14271_s3 + $0xf8] sm:$0xff] %vm7323_vm14, %v3994_v26  ;;  %v7298_v49 = vor.u32 4788187, %v7297_v23  ;;  %v14199_v41 = vshrl.u32 %v3848_v1, 30  ;;  %v7301_v34 = vcvt.s32.f32 %v7294_v25  ;;  %v7123_v28 = vor.u32 8388608, %v7122_v14 }
 0x6f0   :  { %v7133_v27 = vshrl.u32 %v8426_v51, %v7130_v5  ;;  %v7136_v43 = vshrl.u32 %v8427_v53, %v7130_v5  ;;  %v7139_v58 = vshrl.u32 %v8428_v55, %v7130_v5  ;;  %v7142_v9 = vshrl.u32 %v8429_v57, %v7130_v5 }
 0x6f1   :  { %v7299_v4 = vand.u32 2147483647, %v7298_v49  ;;  %v3850_v13 = vshll.u32 %v14199_v41, 30  ;;  %v7128_v18 = vshrl.u32 %v7127_v38, 5  ;;  %v7135_v62 = vshll.u32 %v8426_v51, %v7129_v30 }
 0x6f2   :  { %v7138_v8 = vshll.u32 %v8427_v53, %v7129_v30  ;;  %v7134_v19 = vor.u32 %v7133_v27, %v7132_v63  ;;  %v7141_v61 = vshll.u32 %v8428_v55, %v7129_v30  ;;  %v7144_v15 = vshll.u32 %v8429_v57, %v7129_v30 }
 0x6f3   :  { %v7302_v59 = vmul.f32 %v7301_v34, %v7299_v4  ;;  %v3851_v17 = vsub.s32 %v3847_v29, %v3850_v13  ;;  %v7137_v12 = vor.u32 %v7136_v43, %v7135_v62  ;;  %v7145_v24 = vshrl.u32 %v8430_v0, %v7130_v5 }
 0x6f4   :  { %v7140_v50 = vor.u32 %v7139_v58, %v7138_v8  ;;  %v7143_v11 = vor.u32 %v7142_v9, %v7141_v61  ;;  %v7312_v53 = vadd.s32 3, %v7308_v40  ;;  %v7163_v33 = vshll.u32 %v7123_v28, 8 }
 0x6f5   :  { %v7303_v42 = vxor.u32 2147483648, %v7302_v59  ;;  %v3853_v22 = vsub.s32 0, %v3851_v17  ;;  %v7146_v46 = vor.u32 %v7145_v24, %v7144_v15  ;;  %vm7147_vm11 = vcmp.lt.s32.totalorder %v7128_v18, 1 }
 0x6f6   :  { %vm7150_vm2 = vcmp.lt.s32.totalorder %v7128_v18, 4  ;;  %v7131_v57 = vshrl.u32 %v8425_v47, %v7130_v5  ;;  %v7155_v35 = vsel %vm7147_vm11, %v7134_v19, %v7137_v12  ;;  %vm7149_vm13 = vcmp.lt.s32.totalorder %v7128_v18, 3 }
 0x6f7   :  { %v7304_v44 = vsel %vm7221_vm1, %v7303_v42, %v7302_v59  ;;  %v7578_v2 = vmin.u32 %v3853_v22, %v3851_v17  ;;  %v7152_v0 = vsel %vm7150_vm2, %v7140_v50, 2102212464  ;;  %v7156_v39 = vsel %vm7150_vm2, %v7143_v11, 920167782 }
 0x6f8   :  { %v7307_v51 = vsel %vm14205_vm9, %v13963_v45, %v7304_v44  ;;  %v7159_v16 = vsel %vm7147_vm11, %v7137_v12, %v7140_v50  ;;  %vm7148_vm15 = vcmp.lt.s32.totalorder %v7128_v18, 2  ;;  %v7151_v60 = vsel %vm7147_vm11, %v7131_v57, %v7134_v19 }
 0x6f9   :  { %8403 = vcosq.f32 %v7307_v51  ;;  %v3855_v55 = vclz %v7578_v2  ;;  %v7157_v10 = vsel %vm7149_vm13, %v7140_v50, %v7156_v39  ;;  %v7160_v37 = vsel %vm7150_vm2, %v7146_v46, 1326507024 }
 0x6fa   :  { %8405 = vsinq.f32 %v7307_v51  ;;  %v7153_v32 = vsel %vm7149_vm13, %v7137_v12, %v7152_v0  ;;  %v7158_v29 = vsel %vm7148_vm15, %v7155_v35, %v7157_v10  ;;  %v7161_v21 = vsel %vm7149_vm13, %v7143_v11, %v7160_v37 }
 0x6fb   :  { %v7579_v48 = vadd.s32 4294967294, %v3855_v55  ;;  %v7162_v3 = vsel %vm7148_vm15, %v7159_v16, %v7161_v21  ;;  %v14230_v25 = vmul.u32.u64.low %v7163_v33, %v7158_v29  ;;  %v14231_v47 = vmul.u32.u64.high %v7163_v33, %v7158_v29, %v14230_v25 }
 0x6fc   :  { %v3843_v23 = vadd.s32 %v14172_v6, %v14169_v7  ;;  %v7313_v30 = vand.u32 3, %v7312_v53  ;;  %v14235_v49 = vmul.u32.u64.low %v7163_v33, %v7162_v3  ;;  %v14236_v20 = vmul.u32.u64.high %v7163_v33, %v7162_v3, %v14235_v49 }
 0x6fd   :  { %vm7580_vm4 = vcmp.lt.s32.totalorder %v7579_v48, 0  ;;  %v7154_v4 = vsel %vm7148_vm15, %v7151_v60, %v7153_v32  ;;  %v7173_v34 = vadd.s32 1, %v14231_v47  ;;  %vm7311_vm8 = vweird.f32 %v13963_v45 }
 0x6fe   :  { %v3858_v38 = vsel %vm7580_vm4, 0, %v7579_v48  ;;  %v7170_v59 = vmul.u32 %v7163_v33, %v7154_v4  ;;  %vm7172_vm7 = vc.u32 %v14236_v20, %v14230_v25  ;;  %vm7318_vm6 = vcmp.eq.s32.totalorder %v7313_v30, 2 }
 0x6ff   :  { %v3859_v1 = vsub.s32 32, %v3858_v38  ;;  %v3863_v26 = vsub.s32 4294967266, %v3858_v38  ;;  %v3860_v14 = vshll.u32 %v3851_v17, %v3858_v38  ;;  %v7174_v63 = vsel %vm7172_vm7, %v7173_v34, %v14231_v47 }
 0x700   :  { %vm7315_vm5 = vcmp.eq.s32.totalorder %v7313_v30, 0  ;;  %v7175_v9 = vadd.s32 %v7174_v63, %v7170_v59  ;;  %vm7314_vm3 = vcmp.lt.s32.totalorder %v7313_v30, 2  ;;  %v3873_v61 = vsub.s32 4, %v14199_v41 }
 0x701   :  { %v3861_v5 = vshrl.u32 %v3843_v23, %v3859_v1  ;;  %v3864_v36 = vadd.s32 127, %v3863_v26  ;;  %vm3789_vm12 = vcmp.lt.s32.totalorder %v14028_v54, 0  ;;  %vm3788_vm10 = vcmp.le.f32.partialorder %v3787_v52, 0.7853982 }
 0x702   :  { %v7176_v42 = vadd.s32 536870912, %v7175_v9  ;;  %v3874_v24 = vsel %vm3789_vm12, %v3873_v61, %v14199_v41  ;;  %v7171_v39 = vadd.s32 %v14230_v25, %v14236_v20  ;;  %vm3879_vm2 = vweird.f32 %v14028_v54 }
 0x703   :  { %v8404_v13 = vpop.eup %8403  ;;  %v3862_v40 = vor.u32 %v3861_v5, %v3860_v14  ;;  %v3865_v27 = vshll.u32 %v3864_v36, 23  ;;  %v3876_v11 = vsel %vm3788_vm10, 0, %v3874_v24  ;;  %vm7117_vm13 = vcmp.lt.s32.totalorder %v14125_v31, 0 }
 0x704   :  { %v8406_v43 = vpop.eup %8405  ;;  %v7319_v58 = vxor.u32 2147483648, %v8404_v13  ;;  %v7177_v12 = vshrl.u32 %v7176_v42, 30  ;;  %v3880_v46 = vadd.s32 3, %v3876_v11  ;;  %vm7116_vm15 = vcmp.le.f32.partialorder %v7115_v56, 0.7853982 }
 0x705   :  { %v7316_v7 = vxor.u32 2147483648, %v8406_v43  ;;  %v3866_v6 = vor.u32 4788187, %v3865_v27  ;;  %v3869_v62 = vcvt.s32.f32 %v3862_v40 }
 0x706   :  { %v7320_v17 = vsel %vm7318_vm6, %v7319_v58, %v8406_v43  ;;  %v7178_v15 = vshll.u32 %v7177_v12, 30  ;;  %v3881_v57 = vand.u32 3, %v3880_v46  ;;  %v7201_v49 = vsub.s32 4, %v7177_v12 }
 0x707   :  { %v7317_v28 = vsel %vm7315_vm5, %v8404_v13, %v7316_v7  ;;  %v3867_v18 = vand.u32 2147483647, %v3866_v6  ;;  %vm7207_vm5 = vweird.f32 %v14125_v31 }
 0x708   :  { %v7321_v8 = vsel %vm7314_vm3, %v7317_v28, %v7320_v17  ;;  %v7179_v2 = vsub.s32 %v7175_v9, %v7178_v15  ;;  %vm3883_vm1 = vcmp.eq.s32.totalorder %v3881_v57, 0  ;;  %vm3886_vm9 = vcmp.eq.s32.totalorder %v3881_v57, 2 }
 0x709   :  { %v7322_v22 = vsel %vm7311_vm8, nan, %v7321_v8  ;;  %v3870_v19 = vmul.f32 %v3869_v62, %v3867_v18  ;;  %vm3882_vm11 = vcmp.lt.s32.totalorder %v3881_v57, 2  ;;  %v7202_v14 = vsel %vm7117_vm13, %v7201_v49, %v7177_v12 }
 0x70a   :  { %7387 = vst.msk [vmem:[%s14271_s3 + $0x1f8] sm:$0xff] %vm7323_vm14, %v7322_v22  ;;  %v7181_v51 = vsub.s32 0, %v7179_v2  ;;  %v7204_v36 = vsel %vm7116_vm15, 0, %v7202_v14 }
 0x70b   :  { %v3871_v50 = vxor.u32 2147483648, %v3870_v19  ;;  %v7208_v4 = vadd.s32 3, %v7204_v36 }
 0x70c   :  { %v7706_v53 = vmin.u32 %v7181_v51, %v7179_v2 }
 0x70d   :  { %v3872_v45 = vsel %vm3789_vm12, %v3871_v50, %v3870_v19  ;;  %v7209_v34 = vand.u32 3, %v7208_v4 }
 0x70e   :  { %v3875_v44 = vsel %vm3788_vm10, %v14028_v54, %v3872_v45  ;;  %v7183_v33 = vclz %v7706_v53 }
 0x70f   :  { %8407 = vcosq.f32 %v3875_v44  ;;  %vm7214_vm4 = vcmp.eq.s32.totalorder %v7209_v34, 2  ;;  %vm7211_vm7 = vcmp.eq.s32.totalorder %v7209_v34, 0  ;;  %vm7210_vm6 = vcmp.lt.s32.totalorder %v7209_v34, 2 }
 0x710   :  { %8409 = vsinq.f32 %v3875_v44  ;;  %v7707_v55 = vadd.s32 4294967294, %v7183_v33 }
 0x712   :  { %vm7708_vm0 = vcmp.lt.s32.totalorder %v7707_v55, 0 }
 0x713   :  { %v7186_v35 = vsel %vm7708_vm0, 0, %v7707_v55 }
 0x714   :  { %v7187_v41 = vsub.s32 32, %v7186_v35  ;;  %v7191_v16 = vsub.s32 4294967266, %v7186_v35  ;;  %v7188_v37 = vshll.u32 %v7179_v2, %v7186_v35 }
 0x716   :  { %v7189_v32 = vshrl.u32 %v7171_v39, %v7187_v41  ;;  %v7192_v29 = vadd.s32 127, %v7191_v16 }
 0x718   :  { %v7190_v3 = vor.u32 %v7189_v32, %v7188_v37  ;;  %v7193_v47 = vshll.u32 %v7192_v29, 23 }
 0x719   :  { %v8408_v0 = vpop.eup %8407 }
 0x71a   :  { %v8410_v48 = vpop.eup %8409  ;;  %v3887_v52 = vxor.u32 2147483648, %v8408_v0  ;;  %v7194_v25 = vor.u32 4788187, %v7193_v47  ;;  %v7197_v26 = vcvt.s32.f32 %v7190_v3 }
 0x71b   :  { %v3884_v60 = vxor.u32 2147483648, %v8410_v48 }
 0x71c   :  { %v3888_v10 = vsel %vm3886_vm9, %v3887_v52, %v8410_v48  ;;  %v7195_v1 = vand.u32 2147483647, %v7194_v25 }
 0x71d   :  { %v3885_v21 = vsel %vm3883_vm1, %v8408_v0, %v3884_v60 }
 0x71e   :  { %v3889_v38 = vsel %vm3882_vm11, %v3885_v21, %v3888_v10  ;;  %v7198_v30 = vmul.f32 %v7197_v26, %v7195_v1 }
 0x71f   :  { %v3890_v23 = vsel %vm3879_vm2, nan, %v3889_v38 }
 0x720   :  { %7354 = vst.msk [vmem:[%s14271_s3 + $0xf0] sm:$0xff] %vm7323_vm14, %v3890_v23  ;;  %v7199_v20 = vxor.u32 2147483648, %v7198_v30 }
 0x722   :  { %v7200_v54 = vsel %vm7117_vm13, %v7199_v20, %v7198_v30 }
 0x723   :  { %v7203_v5 = vsel %vm7116_vm15, %v14125_v31, %v7200_v54 }
 0x724   :  { %8411 = vcosq.f32 %v7203_v5 }
 0x725   :  { %8413 = vsinq.f32 %v7203_v5 }
 0x72e   :  { %v8412_v13 = vpop.eup %8411 }
 0x72f   :  { %v8414_v40 = vpop.eup %8413  ;;  %v7215_v27 = vxor.u32 2147483648, %v8412_v13 }
 0x730   :  { %v7212_v43 = vxor.u32 2147483648, %v8414_v40 }
 0x731   :  { %v7216_v58 = vsel %vm7214_vm4, %v7215_v27, %v8414_v40 }
 0x732   :  { %v7213_v59 = vsel %vm7211_vm7, %v8412_v13, %v7212_v43 }
 0x733   :  { %v7217_v56 = vsel %vm7210_vm6, %v7213_v59, %v7216_v58 }
 0x734   :  { %v7218_v7 = vsel %vm7207_vm5, nan, %v7217_v56 }
 0x735   :  { %7386 = vst.msk [vmem:[%s14271_s3 + $0x1f0] sm:$0xff] %vm7323_vm14, %v7218_v7 }

</bundles_post_ra>
